<compile_context>
chip_gen: v5e
topology: v5e:2x2
jax: 0.10.0
libtpu: 0.0.40
codegen_flags: <defaults>
</compile_context>

<pallas_src>
import jax
import jax.numpy as jnp
from jax.experimental import pallas as pl
from jax.experimental.pallas import tpu as pltpu

LANE = 128


def _round_up(v, m):
    return (v + m - 1) // m * m


# ----------------------------------------------------------------------------
# Fused Pallas kernel: one image per grid step
# ----------------------------------------------------------------------------
def _basic_block_kernel(x_ref, w1_ref, w2_ref, s1_ref, b1_ref, s2_ref, b2_ref,
                        out_ref, xpad_ref, mid_ref):
    """conv1+bn1+relu -> conv2+bn2+residual+relu, fully fused in VMEM.

    x_ref    : (1, H, W, Cp)   bf16  (channels zero-padded to Cp = k*128)
    w*_ref   : (9, Cp, Cp)     bf16  3x3 taps stacked as (dy*3+dx, Cin, Cout)
    s*/b*_ref: (1, Cp)         f32   folded BatchNorm scale / bias
    out_ref  : (1, H, W, Cp)   f32
    xpad/mid : (H+2, W+2, Cp)  bf16  VMEM scratch with 1-pixel zero halo
    """
    _, H, W, Cp = out_ref.shape

    # Build spatial halo in VMEM (no padded HBM copy of the activation).
    xpad_ref[...] = jnp.zeros_like(xpad_ref)
    xpad_ref[pl.ds(1, H), pl.ds(1, W), :] = x_ref[0]

    # ---- conv1 (3x3, stride 1) as 9 lane-dense (H*W,Cp)x(Cp,Cp) matmuls ----
    acc = jnp.zeros((H * W, Cp), jnp.float32)
    for dy in range(3):
        for dx in range(3):
            patch = xpad_ref[dy:dy + H, dx:dx + W, :].reshape(H * W, Cp)
            acc = acc + jnp.dot(patch, w1_ref[dy * 3 + dx],
                                preferred_element_type=jnp.float32)
    y = jnp.maximum(acc * s1_ref[...] + b1_ref[...], 0.0)

    # Intermediate activation stays resident in VMEM (padded for conv2 halo).
    mid_ref[...] = jnp.zeros_like(mid_ref)
    mid_ref[pl.ds(1, H), pl.ds(1, W), :] = (
        y.reshape(H, W, Cp).astype(jnp.bfloat16))

    # ---- conv2 + bn2 + residual add + relu --------------------------------
    acc2 = jnp.zeros((H * W, Cp), jnp.float32)
    for dy in range(3):
        for dx in range(3):
            patch = mid_ref[dy:dy + H, dx:dx + W, :].reshape(H * W, Cp)
            acc2 = acc2 + jnp.dot(patch, w2_ref[dy * 3 + dx],
                                  preferred_element_type=jnp.float32)
    y2 = acc2 * s2_ref[...] + b2_ref[...]
    y2 = y2 + x_ref[0].reshape(H * W, Cp).astype(jnp.float32)
    y2 = jnp.maximum(y2, 0.0)
    out_ref[...] = y2.reshape(1, H, W, Cp)


# ----------------------------------------------------------------------------
# Wrapper: layout / padding / BN folding glue
# ----------------------------------------------------------------------------
def _prep_weight(w_hwio, cp):
    """(3,3,Cin,Cout) f32 -> (9, Cp, Cp) bf16, channel-padded, tap-stacked."""
    kh, kw, cin, cout = w_hwio.shape
    w = jnp.zeros((kh, kw, cp, cp), jnp.float32)
    w = w.at[:, :, :cin, :cout].set(w_hwio.astype(jnp.float32))
    return w.reshape(kh * kw, cp, cp).astype(jnp.bfloat16)


def _fold_bn(gamma, beta, mean, var, eps=1e-5):
    scale = gamma / jnp.sqrt(var + eps)
    bias = beta - mean * scale
    return scale, bias


def _pad_vec(v, cp):
    out = jnp.zeros((cp,), jnp.float32).at[:v.shape[0]].set(v)
    return out.reshape(1, cp)


def basic_block_forward(x_nchw, params):
    """BasicBlock forward (stride=1, downsample=None); input NCHW like PyTorch."""
    # TODO(synk): stride>1 / downsample branch of BasicBlock is not implemented
    #             (the module defaults used here are stride=1, downsample=None).
    x = jnp.transpose(x_nchw, (0, 2, 3, 1)).astype(jnp.float32)   # -> NHWC
    N, H, W, C = x.shape
    cp = _round_up(C, LANE)

    # Lane-dense, bf16 operands (f32 accumulation happens inside the kernel).
    xb = jnp.pad(x, ((0, 0), (0, 0), (0, 0), (0, cp - C))).astype(jnp.bfloat16)
    w1 = _prep_weight(params["w1"], cp)
    w2 = _prep_weight(params["w2"], cp)
    s1, b1 = _fold_bn(*params["bn1"])
    s2, b2 = _fold_bn(*params["bn2"])
    s1 = _pad_vec(s1, cp)
    b1 = _pad_vec(b1, cp)
    s2 = _pad_vec(s2, cp)
    b2 = _pad_vec(b2, cp)

    out = pl.pallas_call(
        _basic_block_kernel,
        out_shape=jax.ShapeDtypeStruct((N, H, W, cp), jnp.float32),
        grid=(N,),
        in_specs=[
            pl.BlockSpec((1, H, W, cp), lambda n: (n, 0, 0, 0)),
            pl.BlockSpec((9, cp, cp), lambda n: (0, 0, 0)),
            pl.BlockSpec((9, cp, cp), lambda n: (0, 0, 0)),
            pl.BlockSpec((1, cp), lambda n: (0, 0)),
            pl.BlockSpec((1, cp), lambda n: (0, 0)),
            pl.BlockSpec((1, cp), lambda n: (0, 0)),
            pl.BlockSpec((1, cp), lambda n: (0, 0)),
        ],
        out_specs=pl.BlockSpec((1, H, W, cp), lambda n: (n, 0, 0, 0)),
        scratch_shapes=[
            pltpu.VMEM((H + 2, W + 2, cp), jnp.bfloat16),   # padded input
            pltpu.VMEM((H + 2, W + 2, cp), jnp.bfloat16),   # padded intermediate
        ],
        compiler_params=pltpu.CompilerParams(
            dimension_semantics=("parallel",)),
        # TODO(synk): for real ResNet spatial sizes (e.g. 224x224), row-tile H
        #             with a 1-row halo so blocks fit v7x's smaller VMEM.
    )(xb, w1, w2, s1, b1, s2, b2)

    out = out[..., :C]
    return jnp.transpose(out, (0, 3, 1, 2))                      # -> NCHW


# ----------------------------------------------------------------------------
# Pure-JAX reference (mirrors the kernel's bf16 input / bf16 intermediate casts)
# ----------------------------------------------------------------------------
def _ref_forward(x_nchw, params):
    x = jnp.transpose(x_nchw, (0, 2, 3, 1)).astype(jnp.float32)
    xb = x.astype(jnp.bfloat16).astype(jnp.float32)
    dn = ("NHWC", "HWIO", "NHWC")

    def conv(inp, w):
        wb = w.astype(jnp.bfloat16).astype(jnp.float32)
        return jax.lax.conv_general_dilated(
            inp, wb, (1, 1), "SAME", dimension_numbers=dn,
            precision=jax.lax.Precision.HIGHEST)

    s1, b1 = _fold_bn(*params["bn1"])
    s2, b2 = _fold_bn(*params["bn2"])
    mid = jnp.maximum(conv(xb, params["w1"]) * s1 + b1, 0.0)
    mid = mid.astype(jnp.bfloat16).astype(jnp.float32)
    out = jnp.maximum(conv(mid, params["w2"]) * s2 + b2 + xb, 0.0)
    return jnp.transpose(out, (0, 3, 1, 2))


# ----------------------------------------------------------------------------
if __name__ == "__main__":
    key = jax.random.PRNGKey(0)
    N, C, H, W = 2, 4, 16, 16          # inplanes = planes = 4, stride = 1
    ks = jax.random.split(key, 12)

    x = jax.random.normal(ks[0], (N, C, H, W), jnp.float32)

    params = {
        # conv weights stored HWIO (kh, kw, Cin, Cout)
        "w1": 0.2 * jax.random.normal(ks[1], (3, 3, C, C), jnp.float32),
        "w2": 0.2 * jax.random.normal(ks[2], (3, 3, C, C), jnp.float32),
        # BN (inference mode): gamma, beta, running_mean, running_var
        "bn1": (1.0 + 0.1 * jax.random.normal(ks[3], (C,), jnp.float32),
                0.1 * jax.random.normal(ks[4], (C,), jnp.float32),
                0.1 * jax.random.normal(ks[5], (C,), jnp.float32),
                1.0 + 0.1 * jax.random.uniform(ks[6], (C,), jnp.float32)),
        "bn2": (1.0 + 0.1 * jax.random.normal(ks[7], (C,), jnp.float32),
                0.1 * jax.random.normal(ks[8], (C,), jnp.float32),
                0.1 * jax.random.normal(ks[9], (C,), jnp.float32),
                1.0 + 0.1 * jax.random.uniform(ks[10], (C,), jnp.float32)),
    }

    out = basic_block_forward(x, params)
    out = jax.block_until_ready(out)

    ref = _ref_forward(x, params)
    assert out.shape == (N, C, H, W)
    assert jnp.allclose(out, ref, atol=2e-2, rtol=2e-2), "mismatch vs reference"

    print("KERNEL_OK")
</pallas_src>

<mosaic_0001>
module attributes {stable_mosaic.version = 11 : i64} {
  func.func @_basic_block_kernel(%arg0: i32, %arg1: memref<1x16x16x128xbf16, #tpu.memory_space<vmem>>, %arg2: memref<9x128x128xbf16, #tpu.memory_space<vmem>>, %arg3: memref<9x128x128xbf16, #tpu.memory_space<vmem>>, %arg4: memref<1x128xf32, #tpu.memory_space<vmem>>, %arg5: memref<1x128xf32, #tpu.memory_space<vmem>>, %arg6: memref<1x128xf32, #tpu.memory_space<vmem>>, %arg7: memref<1x128xf32, #tpu.memory_space<vmem>>, %arg8: memref<1x16x16x128xf32, #tpu.memory_space<vmem>>, %arg9: memref<18x18x128xbf16, #tpu.memory_space<vmem>>, %arg10: memref<18x18x128xbf16, #tpu.memory_space<vmem>>) attributes {dimension_semantics = [#tpu.dimension_semantics<parallel>], iteration_bounds = array<i64: 2>, scalar_prefetch = 0 : i64, scratch_operands = 2 : i64, tpu.core_type = #tpu.core_type<tc>, window_params = [{transform_indices = @transform_0, window_bounds = array<i64: 1, 16, 16, 128>}, {pipeline_mode = #tpu.pipeline_mode<synchronous>, transform_indices = @transform_1, window_bounds = array<i64: 9, 128, 128>}, {pipeline_mode = #tpu.pipeline_mode<synchronous>, transform_indices = @transform_2, window_bounds = array<i64: 9, 128, 128>}, {pipeline_mode = #tpu.pipeline_mode<synchronous>, transform_indices = @transform_3, window_bounds = array<i64: 1, 128>}, {pipeline_mode = #tpu.pipeline_mode<synchronous>, transform_indices = @transform_4, window_bounds = array<i64: 1, 128>}, {pipeline_mode = #tpu.pipeline_mode<synchronous>, transform_indices = @transform_5, window_bounds = array<i64: 1, 128>}, {pipeline_mode = #tpu.pipeline_mode<synchronous>, transform_indices = @transform_6, window_bounds = array<i64: 1, 128>}, {transform_indices = @transform_7, window_bounds = array<i64: 1, 16, 16, 128>}]} {
    %cst = arith.constant 0.000000e+00 : bf16
    %0 = vector.broadcast %cst : bf16 to vector<18x18x128xbf16>
    %c0 = arith.constant 0 : index
    %c0_0 = arith.constant 0 : index
    %c0_1 = arith.constant 0 : index
    %1 = vector.load %arg9[%c0, %c0_0, %c0_1] : memref<18x18x128xbf16, #tpu.memory_space<vmem>>, vector<18x18x128xbf16>
    tpu.vector_store %arg9[%c0, %c0_0, %c0_1], %0 {strides = array<i32>} : memref<18x18x128xbf16, #tpu.memory_space<vmem>>, vector<18x18x128xbf16>,
    %c0_2 = arith.constant 0 : index
    %c0_3 = arith.constant 0 : index
    %c0_4 = arith.constant 0 : index
    %c0_5 = arith.constant 0 : index
    %2 = vector.load %arg1[%c0_2, %c0_3, %c0_4, %c0_5] : memref<1x16x16x128xbf16, #tpu.memory_space<vmem>>, vector<1x16x16x128xbf16>
    %3 = vector.shape_cast %2 : vector<1x16x16x128xbf16> to vector<16x16x128xbf16>
    %c1 = arith.constant 1 : index
    %c1_6 = arith.constant 1 : index
    %c0_7 = arith.constant 0 : index
    %4 = vector.load %arg9[%c1, %c1_6, %c0_7] : memref<18x18x128xbf16, #tpu.memory_space<vmem>>, vector<16x16x128xbf16>
    tpu.vector_store %arg9[%c1, %c1_6, %c0_7], %3 {strides = array<i32>} : memref<18x18x128xbf16, #tpu.memory_space<vmem>>, vector<16x16x128xbf16>,
    %cst_8 = arith.constant 0.000000e+00 : f32
    %5 = vector.broadcast %cst_8 : f32 to vector<256x128xf32>
    %c0_9 = arith.constant 0 : index
    %c0_10 = arith.constant 0 : index
    %c0_11 = arith.constant 0 : index
    %6 = vector.load %arg9[%c0_9, %c0_10, %c0_11] : memref<18x18x128xbf16, #tpu.memory_space<vmem>>, vector<16x16x128xbf16>
    %7 = vector.shape_cast %6 : vector<16x16x128xbf16> to vector<256x128xbf16>
    %c0_12 = arith.constant 0 : index
    %c0_13 = arith.constant 0 : index
    %c0_14 = arith.constant 0 : index
    %8 = vector.load %arg2[%c0_12, %c0_13, %c0_14] : memref<9x128x128xbf16, #tpu.memory_space<vmem>>, vector<1x128x128xbf16>
    %9 = vector.shape_cast %8 : vector<1x128x128xbf16> to vector<128x128xbf16>
    %cst_15 = arith.constant dense<0.000000e+00> : vector<256x128xf32>
    %10 = tpu.matmul %7, %9, %cst_15 {dimension_numbers = #tpu.dot_dimension_numbers<[1], [0], [0], [1], [0, 0, 1, 1], [], []>} : vector<256x128xbf16>, vector<128x128xbf16>, vector<256x128xf32> -> vector<256x128xf32>
    %11 = arith.addf %5, %10 : vector<256x128xf32>
    %c0_16 = arith.constant 0 : index
    %c1_17 = arith.constant 1 : index
    %c0_18 = arith.constant 0 : index
    %12 = vector.load %arg9[%c0_16, %c1_17, %c0_18] : memref<18x18x128xbf16, #tpu.memory_space<vmem>>, vector<16x16x128xbf16>
    %13 = vector.shape_cast %12 : vector<16x16x128xbf16> to vector<256x128xbf16>
    %c1_19 = arith.constant 1 : index
    %c0_20 = arith.constant 0 : index
    %c0_21 = arith.constant 0 : index
    %14 = vector.load %arg2[%c1_19, %c0_20, %c0_21] : memref<9x128x128xbf16, #tpu.memory_space<vmem>>, vector<1x128x128xbf16>
    %15 = vector.shape_cast %14 : vector<1x128x128xbf16> to vector<128x128xbf16>
    %cst_22 = arith.constant dense<0.000000e+00> : vector<256x128xf32>
    %16 = tpu.matmul %13, %15, %cst_22 {dimension_numbers = #tpu.dot_dimension_numbers<[1], [0], [0], [1], [0, 0, 1, 1], [], []>} : vector<256x128xbf16>, vector<128x128xbf16>, vector<256x128xf32> -> vector<256x128xf32>
    %17 = arith.addf %11, %16 : vector<256x128xf32>
    %c0_23 = arith.constant 0 : index
    %c2 = arith.constant 2 : index
    %c0_24 = arith.constant 0 : index
    %18 = vector.load %arg9[%c0_23, %c2, %c0_24] : memref<18x18x128xbf16, #tpu.memory_space<vmem>>, vector<16x16x128xbf16>
    %19 = vector.shape_cast %18 : vector<16x16x128xbf16> to vector<256x128xbf16>
    %c2_25 = arith.constant 2 : index
    %c0_26 = arith.constant 0 : index
    %c0_27 = arith.constant 0 : index
    %20 = vector.load %arg2[%c2_25, %c0_26, %c0_27] : memref<9x128x128xbf16, #tpu.memory_space<vmem>>, vector<1x128x128xbf16>
    %21 = vector.shape_cast %20 : vector<1x128x128xbf16> to vector<128x128xbf16>
    %cst_28 = arith.constant dense<0.000000e+00> : vector<256x128xf32>
    %22 = tpu.matmul %19, %21, %cst_28 {dimension_numbers = #tpu.dot_dimension_numbers<[1], [0], [0], [1], [0, 0, 1, 1], [], []>} : vector<256x128xbf16>, vector<128x128xbf16>, vector<256x128xf32> -> vector<256x128xf32>
    %23 = arith.addf %17, %22 : vector<256x128xf32>
    %c1_29 = arith.constant 1 : index
    %c0_30 = arith.constant 0 : index
    %c0_31 = arith.constant 0 : index
    %24 = vector.load %arg9[%c1_29, %c0_30, %c0_31] : memref<18x18x128xbf16, #tpu.memory_space<vmem>>, vector<16x16x128xbf16>
    %25 = vector.shape_cast %24 : vector<16x16x128xbf16> to vector<256x128xbf16>
    %c3 = arith.constant 3 : index
    %c0_32 = arith.constant 0 : index
    %c0_33 = arith.constant 0 : index
    %26 = vector.load %arg2[%c3, %c0_32, %c0_33] : memref<9x128x128xbf16, #tpu.memory_space<vmem>>, vector<1x128x128xbf16>
    %27 = vector.shape_cast %26 : vector<1x128x128xbf16> to vector<128x128xbf16>
    %cst_34 = arith.constant dense<0.000000e+00> : vector<256x128xf32>
    %28 = tpu.matmul %25, %27, %cst_34 {dimension_numbers = #tpu.dot_dimension_numbers<[1], [0], [0], [1], [0, 0, 1, 1], [], []>} : vector<256x128xbf16>, vector<128x128xbf16>, vector<256x128xf32> -> vector<256x128xf32>
    %29 = arith.addf %23, %28 : vector<256x128xf32>
    %c1_35 = arith.constant 1 : index
    %c1_36 = arith.constant 1 : index
    %c0_37 = arith.constant 0 : index
    %30 = vector.load %arg9[%c1_35, %c1_36, %c0_37] : memref<18x18x128xbf16, #tpu.memory_space<vmem>>, vector<16x16x128xbf16>
    %31 = vector.shape_cast %30 : vector<16x16x128xbf16> to vector<256x128xbf16>
    %c4 = arith.constant 4 : index
    %c0_38 = arith.constant 0 : index
    %c0_39 = arith.constant 0 : index
    %32 = vector.load %arg2[%c4, %c0_38, %c0_39] : memref<9x128x128xbf16, #tpu.memory_space<vmem>>, vector<1x128x128xbf16>
    %33 = vector.shape_cast %32 : vector<1x128x128xbf16> to vector<128x128xbf16>
    %cst_40 = arith.constant dense<0.000000e+00> : vector<256x128xf32>
    %34 = tpu.matmul %31, %33, %cst_40 {dimension_numbers = #tpu.dot_dimension_numbers<[1], [0], [0], [1], [0, 0, 1, 1], [], []>} : vector<256x128xbf16>, vector<128x128xbf16>, vector<256x128xf32> -> vector<256x128xf32>
    %35 = arith.addf %29, %34 : vector<256x128xf32>
    %c1_41 = arith.constant 1 : index
    %c2_42 = arith.constant 2 : index
    %c0_43 = arith.constant 0 : index
    %36 = vector.load %arg9[%c1_41, %c2_42, %c0_43] : memref<18x18x128xbf16, #tpu.memory_space<vmem>>, vector<16x16x128xbf16>
    %37 = vector.shape_cast %36 : vector<16x16x128xbf16> to vector<256x128xbf16>
    %c5 = arith.constant 5 : index
    %c0_44 = arith.constant 0 : index
    %c0_45 = arith.constant 0 : index
    %38 = vector.load %arg2[%c5, %c0_44, %c0_45] : memref<9x128x128xbf16, #tpu.memory_space<vmem>>, vector<1x128x128xbf16>
    %39 = vector.shape_cast %38 : vector<1x128x128xbf16> to vector<128x128xbf16>
    %cst_46 = arith.constant dense<0.000000e+00> : vector<256x128xf32>
    %40 = tpu.matmul %37, %39, %cst_46 {dimension_numbers = #tpu.dot_dimension_numbers<[1], [0], [0], [1], [0, 0, 1, 1], [], []>} : vector<256x128xbf16>, vector<128x128xbf16>, vector<256x128xf32> -> vector<256x128xf32>
    %41 = arith.addf %35, %40 : vector<256x128xf32>
    %c2_47 = arith.constant 2 : index
    %c0_48 = arith.constant 0 : index
    %c0_49 = arith.constant 0 : index
    %42 = vector.load %arg9[%c2_47, %c0_48, %c0_49] : memref<18x18x128xbf16, #tpu.memory_space<vmem>>, vector<16x16x128xbf16>
    %43 = vector.shape_cast %42 : vector<16x16x128xbf16> to vector<256x128xbf16>
    %c6 = arith.constant 6 : index
    %c0_50 = arith.constant 0 : index
    %c0_51 = arith.constant 0 : index
    %44 = vector.load %arg2[%c6, %c0_50, %c0_51] : memref<9x128x128xbf16, #tpu.memory_space<vmem>>, vector<1x128x128xbf16>
    %45 = vector.shape_cast %44 : vector<1x128x128xbf16> to vector<128x128xbf16>
    %cst_52 = arith.constant dense<0.000000e+00> : vector<256x128xf32>
    %46 = tpu.matmul %43, %45, %cst_52 {dimension_numbers = #tpu.dot_dimension_numbers<[1], [0], [0], [1], [0, 0, 1, 1], [], []>} : vector<256x128xbf16>, vector<128x128xbf16>, vector<256x128xf32> -> vector<256x128xf32>
    %47 = arith.addf %41, %46 : vector<256x128xf32>
    %c2_53 = arith.constant 2 : index
    %c1_54 = arith.constant 1 : index
    %c0_55 = arith.constant 0 : index
    %48 = vector.load %arg9[%c2_53, %c1_54, %c0_55] : memref<18x18x128xbf16, #tpu.memory_space<vmem>>, vector<16x16x128xbf16>
    %49 = vector.shape_cast %48 : vector<16x16x128xbf16> to vector<256x128xbf16>
    %c7 = arith.constant 7 : index
    %c0_56 = arith.constant 0 : index
    %c0_57 = arith.constant 0 : index
    %50 = vector.load %arg2[%c7, %c0_56, %c0_57] : memref<9x128x128xbf16, #tpu.memory_space<vmem>>, vector<1x128x128xbf16>
    %51 = vector.shape_cast %50 : vector<1x128x128xbf16> to vector<128x128xbf16>
    %cst_58 = arith.constant dense<0.000000e+00> : vector<256x128xf32>
    %52 = tpu.matmul %49, %51, %cst_58 {dimension_numbers = #tpu.dot_dimension_numbers<[1], [0], [0], [1], [0, 0, 1, 1], [], []>} : vector<256x128xbf16>, vector<128x128xbf16>, vector<256x128xf32> -> vector<256x128xf32>
    %53 = arith.addf %47, %52 : vector<256x128xf32>
    %c2_59 = arith.constant 2 : index
    %c2_60 = arith.constant 2 : index
    %c0_61 = arith.constant 0 : index
    %54 = vector.load %arg9[%c2_59, %c2_60, %c0_61] : memref<18x18x128xbf16, #tpu.memory_space<vmem>>, vector<16x16x128xbf16>
    %55 = vector.shape_cast %54 : vector<16x16x128xbf16> to vector<256x128xbf16>
    %c8 = arith.constant 8 : index
    %c0_62 = arith.constant 0 : index
    %c0_63 = arith.constant 0 : index
    %56 = vector.load %arg2[%c8, %c0_62, %c0_63] : memref<9x128x128xbf16, #tpu.memory_space<vmem>>, vector<1x128x128xbf16>
    %57 = vector.shape_cast %56 : vector<1x128x128xbf16> to vector<128x128xbf16>
    %cst_64 = arith.constant dense<0.000000e+00> : vector<256x128xf32>
    %58 = tpu.matmul %55, %57, %cst_64 {dimension_numbers = #tpu.dot_dimension_numbers<[1], [0], [0], [1], [0, 0, 1, 1], [], []>} : vector<256x128xbf16>, vector<128x128xbf16>, vector<256x128xf32> -> vector<256x128xf32>
    %59 = arith.addf %53, %58 : vector<256x128xf32>
    %c0_65 = arith.constant 0 : index
    %c0_66 = arith.constant 0 : index
    %60 = vector.load %arg4[%c0_65, %c0_66] : memref<1x128xf32, #tpu.memory_space<vmem>>, vector<1x128xf32>
    %61 = vector.broadcast %60 : vector<1x128xf32> to vector<256x128xf32>
    %62 = arith.mulf %59, %61 : vector<256x128xf32>
    %c0_67 = arith.constant 0 : index
    %c0_68 = arith.constant 0 : index
    %63 = vector.load %arg5[%c0_67, %c0_68] : memref<1x128xf32, #tpu.memory_space<vmem>>, vector<1x128xf32>
    %64 = vector.broadcast %63 : vector<1x128xf32> to vector<256x128xf32>
    %65 = arith.addf %62, %64 : vector<256x128xf32>
    %cst_69 = arith.constant 0.000000e+00 : f32
    %66 = vector.broadcast %cst_69 : f32 to vector<256x128xf32>
    %67 = arith.maximumf %65, %66 : vector<256x128xf32>
    %cst_70 = arith.constant 0.000000e+00 : bf16
    %68 = vector.broadcast %cst_70 : bf16 to vector<18x18x128xbf16>
    %c0_71 = arith.constant 0 : index
    %c0_72 = arith.constant 0 : index
    %c0_73 = arith.constant 0 : index
    %69 = vector.load %arg10[%c0_71, %c0_72, %c0_73] : memref<18x18x128xbf16, #tpu.memory_space<vmem>>, vector<18x18x128xbf16>
    tpu.vector_store %arg10[%c0_71, %c0_72, %c0_73], %68 {strides = array<i32>} : memref<18x18x128xbf16, #tpu.memory_space<vmem>>, vector<18x18x128xbf16>,
    %70 = vector.shape_cast %67 : vector<256x128xf32> to vector<16x16x128xf32>
    %71 = arith.truncf %70 : vector<16x16x128xf32> to vector<16x16x128xbf16>
    %c1_74 = arith.constant 1 : index
    %c1_75 = arith.constant 1 : index
    %c0_76 = arith.constant 0 : index
    %72 = vector.load %arg10[%c1_74, %c1_75, %c0_76] : memref<18x18x128xbf16, #tpu.memory_space<vmem>>, vector<16x16x128xbf16>
    tpu.vector_store %arg10[%c1_74, %c1_75, %c0_76], %71 {strides = array<i32>} : memref<18x18x128xbf16, #tpu.memory_space<vmem>>, vector<16x16x128xbf16>,
    %cst_77 = arith.constant 0.000000e+00 : f32
    %73 = vector.broadcast %cst_77 : f32 to vector<256x128xf32>
    %c0_78 = arith.constant 0 : index
    %c0_79 = arith.constant 0 : index
    %c0_80 = arith.constant 0 : index
    %74 = vector.load %arg10[%c0_78, %c0_79, %c0_80] : memref<18x18x128xbf16, #tpu.memory_space<vmem>>, vector<16x16x128xbf16>
    %75 = vector.shape_cast %74 : vector<16x16x128xbf16> to vector<256x128xbf16>
    %c0_81 = arith.constant 0 : index
    %c0_82 = arith.constant 0 : index
    %c0_83 = arith.constant 0 : index
    %76 = vector.load %arg3[%c0_81, %c0_82, %c0_83] : memref<9x128x128xbf16, #tpu.memory_space<vmem>>, vector<1x128x128xbf16>
    %77 = vector.shape_cast %76 : vector<1x128x128xbf16> to vector<128x128xbf16>
    %cst_84 = arith.constant dense<0.000000e+00> : vector<256x128xf32>
    %78 = tpu.matmul %75, %77, %cst_84 {dimension_numbers = #tpu.dot_dimension_numbers<[1], [0], [0], [1], [0, 0, 1, 1], [], []>} : vector<256x128xbf16>, vector<128x128xbf16>, vector<256x128xf32> -> vector<256x128xf32>
    %79 = arith.addf %73, %78 : vector<256x128xf32>
    %c0_85 = arith.constant 0 : index
    %c1_86 = arith.constant 1 : index
    %c0_87 = arith.constant 0 : index
    %80 = vector.load %arg10[%c0_85, %c1_86, %c0_87] : memref<18x18x128xbf16, #tpu.memory_space<vmem>>, vector<16x16x128xbf16>
    %81 = vector.shape_cast %80 : vector<16x16x128xbf16> to vector<256x128xbf16>
    %c1_88 = arith.constant 1 : index
    %c0_89 = arith.constant 0 : index
    %c0_90 = arith.constant 0 : index
    %82 = vector.load %arg3[%c1_88, %c0_89, %c0_90] : memref<9x128x128xbf16, #tpu.memory_space<vmem>>, vector<1x128x128xbf16>
    %83 = vector.shape_cast %82 : vector<1x128x128xbf16> to vector<128x128xbf16>
    %cst_91 = arith.constant dense<0.000000e+00> : vector<256x128xf32>
    %84 = tpu.matmul %81, %83, %cst_91 {dimension_numbers = #tpu.dot_dimension_numbers<[1], [0], [0], [1], [0, 0, 1, 1], [], []>} : vector<256x128xbf16>, vector<128x128xbf16>, vector<256x128xf32> -> vector<256x128xf32>
    %85 = arith.addf %79, %84 : vector<256x128xf32>
    %c0_92 = arith.constant 0 : index
    %c2_93 = arith.constant 2 : index
    %c0_94 = arith.constant 0 : index
    %86 = vector.load %arg10[%c0_92, %c2_93, %c0_94] : memref<18x18x128xbf16, #tpu.memory_space<vmem>>, vector<16x16x128xbf16>
    %87 = vector.shape_cast %86 : vector<16x16x128xbf16> to vector<256x128xbf16>
    %c2_95 = arith.constant 2 : index
    %c0_96 = arith.constant 0 : index
    %c0_97 = arith.constant 0 : index
    %88 = vector.load %arg3[%c2_95, %c0_96, %c0_97] : memref<9x128x128xbf16, #tpu.memory_space<vmem>>, vector<1x128x128xbf16>
    %89 = vector.shape_cast %88 : vector<1x128x128xbf16> to vector<128x128xbf16>
    %cst_98 = arith.constant dense<0.000000e+00> : vector<256x128xf32>
    %90 = tpu.matmul %87, %89, %cst_98 {dimension_numbers = #tpu.dot_dimension_numbers<[1], [0], [0], [1], [0, 0, 1, 1], [], []>} : vector<256x128xbf16>, vector<128x128xbf16>, vector<256x128xf32> -> vector<256x128xf32>
    %91 = arith.addf %85, %90 : vector<256x128xf32>
    %c1_99 = arith.constant 1 : index
    %c0_100 = arith.constant 0 : index
    %c0_101 = arith.constant 0 : index
    %92 = vector.load %arg10[%c1_99, %c0_100, %c0_101] : memref<18x18x128xbf16, #tpu.memory_space<vmem>>, vector<16x16x128xbf16>
    %93 = vector.shape_cast %92 : vector<16x16x128xbf16> to vector<256x128xbf16>
    %c3_102 = arith.constant 3 : index
    %c0_103 = arith.constant 0 : index
    %c0_104 = arith.constant 0 : index
    %94 = vector.load %arg3[%c3_102, %c0_103, %c0_104] : memref<9x128x128xbf16, #tpu.memory_space<vmem>>, vector<1x128x128xbf16>
    %95 = vector.shape_cast %94 : vector<1x128x128xbf16> to vector<128x128xbf16>
    %cst_105 = arith.constant dense<0.000000e+00> : vector<256x128xf32>
    %96 = tpu.matmul %93, %95, %cst_105 {dimension_numbers = #tpu.dot_dimension_numbers<[1], [0], [0], [1], [0, 0, 1, 1], [], []>} : vector<256x128xbf16>, vector<128x128xbf16>, vector<256x128xf32> -> vector<256x128xf32>
    %97 = arith.addf %91, %96 : vector<256x128xf32>
    %c1_106 = arith.constant 1 : index
    %c1_107 = arith.constant 1 : index
    %c0_108 = arith.constant 0 : index
    %98 = vector.load %arg10[%c1_106, %c1_107, %c0_108] : memref<18x18x128xbf16, #tpu.memory_space<vmem>>, vector<16x16x128xbf16>
    %99 = vector.shape_cast %98 : vector<16x16x128xbf16> to vector<256x128xbf16>
    %c4_109 = arith.constant 4 : index
    %c0_110 = arith.constant 0 : index
    %c0_111 = arith.constant 0 : index
    %100 = vector.load %arg3[%c4_109, %c0_110, %c0_111] : memref<9x128x128xbf16, #tpu.memory_space<vmem>>, vector<1x128x128xbf16>
    %101 = vector.shape_cast %100 : vector<1x128x128xbf16> to vector<128x128xbf16>
    %cst_112 = arith.constant dense<0.000000e+00> : vector<256x128xf32>
    %102 = tpu.matmul %99, %101, %cst_112 {dimension_numbers = #tpu.dot_dimension_numbers<[1], [0], [0], [1], [0, 0, 1, 1], [], []>} : vector<256x128xbf16>, vector<128x128xbf16>, vector<256x128xf32> -> vector<256x128xf32>
    %103 = arith.addf %97, %102 : vector<256x128xf32>
    %c1_113 = arith.constant 1 : index
    %c2_114 = arith.constant 2 : index
    %c0_115 = arith.constant 0 : index
    %104 = vector.load %arg10[%c1_113, %c2_114, %c0_115] : memref<18x18x128xbf16, #tpu.memory_space<vmem>>, vector<16x16x128xbf16>
    %105 = vector.shape_cast %104 : vector<16x16x128xbf16> to vector<256x128xbf16>
    %c5_116 = arith.constant 5 : index
    %c0_117 = arith.constant 0 : index
    %c0_118 = arith.constant 0 : index
    %106 = vector.load %arg3[%c5_116, %c0_117, %c0_118] : memref<9x128x128xbf16, #tpu.memory_space<vmem>>, vector<1x128x128xbf16>
    %107 = vector.shape_cast %106 : vector<1x128x128xbf16> to vector<128x128xbf16>
    %cst_119 = arith.constant dense<0.000000e+00> : vector<256x128xf32>
    %108 = tpu.matmul %105, %107, %cst_119 {dimension_numbers = #tpu.dot_dimension_numbers<[1], [0], [0], [1], [0, 0, 1, 1], [], []>} : vector<256x128xbf16>, vector<128x128xbf16>, vector<256x128xf32> -> vector<256x128xf32>
    %109 = arith.addf %103, %108 : vector<256x128xf32>
    %c2_120 = arith.constant 2 : index
    %c0_121 = arith.constant 0 : index
    %c0_122 = arith.constant 0 : index
    %110 = vector.load %arg10[%c2_120, %c0_121, %c0_122] : memref<18x18x128xbf16, #tpu.memory_space<vmem>>, vector<16x16x128xbf16>
    %111 = vector.shape_cast %110 : vector<16x16x128xbf16> to vector<256x128xbf16>
    %c6_123 = arith.constant 6 : index
    %c0_124 = arith.constant 0 : index
    %c0_125 = arith.constant 0 : index
    %112 = vector.load %arg3[%c6_123, %c0_124, %c0_125] : memref<9x128x128xbf16, #tpu.memory_space<vmem>>, vector<1x128x128xbf16>
    %113 = vector.shape_cast %112 : vector<1x128x128xbf16> to vector<128x128xbf16>
    %cst_126 = arith.constant dense<0.000000e+00> : vector<256x128xf32>
    %114 = tpu.matmul %111, %113, %cst_126 {dimension_numbers = #tpu.dot_dimension_numbers<[1], [0], [0], [1], [0, 0, 1, 1], [], []>} : vector<256x128xbf16>, vector<128x128xbf16>, vector<256x128xf32> -> vector<256x128xf32>
    %115 = arith.addf %109, %114 : vector<256x128xf32>
    %c2_127 = arith.constant 2 : index
    %c1_128 = arith.constant 1 : index
    %c0_129 = arith.constant 0 : index
    %116 = vector.load %arg10[%c2_127, %c1_128, %c0_129] : memref<18x18x128xbf16, #tpu.memory_space<vmem>>, vector<16x16x128xbf16>
    %117 = vector.shape_cast %116 : vector<16x16x128xbf16> to vector<256x128xbf16>
    %c7_130 = arith.constant 7 : index
    %c0_131 = arith.constant 0 : index
    %c0_132 = arith.constant 0 : index
    %118 = vector.load %arg3[%c7_130, %c0_131, %c0_132] : memref<9x128x128xbf16, #tpu.memory_space<vmem>>, vector<1x128x128xbf16>
    %119 = vector.shape_cast %118 : vector<1x128x128xbf16> to vector<128x128xbf16>
    %cst_133 = arith.constant dense<0.000000e+00> : vector<256x128xf32>
    %120 = tpu.matmul %117, %119, %cst_133 {dimension_numbers = #tpu.dot_dimension_numbers<[1], [0], [0], [1], [0, 0, 1, 1], [], []>} : vector<256x128xbf16>, vector<128x128xbf16>, vector<256x128xf32> -> vector<256x128xf32>
    %121 = arith.addf %115, %120 : vector<256x128xf32>
    %c2_134 = arith.constant 2 : index
    %c2_135 = arith.constant 2 : index
    %c0_136 = arith.constant 0 : index
    %122 = vector.load %arg10[%c2_134, %c2_135, %c0_136] : memref<18x18x128xbf16, #tpu.memory_space<vmem>>, vector<16x16x128xbf16>
    %123 = vector.shape_cast %122 : vector<16x16x128xbf16> to vector<256x128xbf16>
    %c8_137 = arith.constant 8 : index
    %c0_138 = arith.constant 0 : index
    %c0_139 = arith.constant 0 : index
    %124 = vector.load %arg3[%c8_137, %c0_138, %c0_139] : memref<9x128x128xbf16, #tpu.memory_space<vmem>>, vector<1x128x128xbf16>
    %125 = vector.shape_cast %124 : vector<1x128x128xbf16> to vector<128x128xbf16>
    %cst_140 = arith.constant dense<0.000000e+00> : vector<256x128xf32>
    %126 = tpu.matmul %123, %125, %cst_140 {dimension_numbers = #tpu.dot_dimension_numbers<[1], [0], [0], [1], [0, 0, 1, 1], [], []>} : vector<256x128xbf16>, vector<128x128xbf16>, vector<256x128xf32> -> vector<256x128xf32>
    %127 = arith.addf %121, %126 : vector<256x128xf32>
    %c0_141 = arith.constant 0 : index
    %c0_142 = arith.constant 0 : index
    %128 = vector.load %arg6[%c0_141, %c0_142] : memref<1x128xf32, #tpu.memory_space<vmem>>, vector<1x128xf32>
    %129 = vector.broadcast %128 : vector<1x128xf32> to vector<256x128xf32>
    %130 = arith.mulf %127, %129 : vector<256x128xf32>
    %c0_143 = arith.constant 0 : index
    %c0_144 = arith.constant 0 : index
    %131 = vector.load %arg7[%c0_143, %c0_144] : memref<1x128xf32, #tpu.memory_space<vmem>>, vector<1x128xf32>
    %132 = vector.broadcast %131 : vector<1x128xf32> to vector<256x128xf32>
    %133 = arith.addf %130, %132 : vector<256x128xf32>
    %c0_145 = arith.constant 0 : index
    %c0_146 = arith.constant 0 : index
    %c0_147 = arith.constant 0 : index
    %c0_148 = arith.constant 0 : index
    %134 = vector.load %arg1[%c0_145, %c0_146, %c0_147, %c0_148] : memref<1x16x16x128xbf16, #tpu.memory_space<vmem>>, vector<1x16x16x128xbf16>
    %135 = vector.shape_cast %134 : vector<1x16x16x128xbf16> to vector<16x16x128xbf16>
    %136 = vector.shape_cast %135 : vector<16x16x128xbf16> to vector<256x128xbf16>
    %137 = arith.extf %136 : vector<256x128xbf16> to vector<256x128xf32>
    %138 = arith.addf %133, %137 : vector<256x128xf32>
    %cst_149 = arith.constant 0.000000e+00 : f32
    %139 = vector.broadcast %cst_149 : f32 to vector<256x128xf32>
    %140 = arith.maximumf %138, %139 : vector<256x128xf32>
    %141 = vector.shape_cast %140 : vector<256x128xf32> to vector<1x16x16x128xf32>
    %c0_150 = arith.constant 0 : index
    %c0_151 = arith.constant 0 : index
    %c0_152 = arith.constant 0 : index
    %c0_153 = arith.constant 0 : index
    %142 = vector.load %arg8[%c0_150, %c0_151, %c0_152, %c0_153] : memref<1x16x16x128xf32, #tpu.memory_space<vmem>>, vector<1x16x16x128xf32>
    tpu.vector_store %arg8[%c0_150, %c0_151, %c0_152, %c0_153], %141 {strides = array<i32>} : memref<1x16x16x128xf32, #tpu.memory_space<vmem>>, vector<1x16x16x128xf32>,
    return
  }
  func.func @transform_0(%arg0: i32) -> (i32, i32, i32, i32) {
    %c0_i32 = arith.constant 0 : i32
    %c0_i32_0 = arith.constant 0 : i32
    %c0_i32_1 = arith.constant 0 : i32
    %c0_i32_2 = arith.constant 0 : i32
    return %arg0, %c0_i32, %c0_i32_0, %c0_i32_1 : i32, i32, i32, i32
  }
  func.func @transform_1(%arg0: i32) -> (i32, i32, i32) {
    %c0_i32 = arith.constant 0 : i32
    %c0_i32_0 = arith.constant 0 : i32
    %c0_i32_1 = arith.constant 0 : i32
    %c0_i32_2 = arith.constant 0 : i32
    return %c0_i32, %c0_i32_0, %c0_i32_1 : i32, i32, i32
  }
  func.func @transform_2(%arg0: i32) -> (i32, i32, i32) {
    %c0_i32 = arith.constant 0 : i32
    %c0_i32_0 = arith.constant 0 : i32
    %c0_i32_1 = arith.constant 0 : i32
    %c0_i32_2 = arith.constant 0 : i32
    return %c0_i32, %c0_i32_0, %c0_i32_1 : i32, i32, i32
  }
  func.func @transform_3(%arg0: i32) -> (i32, i32) {
    %c0_i32 = arith.constant 0 : i32
    %c0_i32_0 = arith.constant 0 : i32
    %c0_i32_1 = arith.constant 0 : i32
    return %c0_i32, %c0_i32_0 : i32, i32
  }
  func.func @transform_4(%arg0: i32) -> (i32, i32) {
    %c0_i32 = arith.constant 0 : i32
    %c0_i32_0 = arith.constant 0 : i32
    %c0_i32_1 = arith.constant 0 : i32
    return %c0_i32, %c0_i32_0 : i32, i32
  }
  func.func @transform_5(%arg0: i32) -> (i32, i32) {
    %c0_i32 = arith.constant 0 : i32
    %c0_i32_0 = arith.constant 0 : i32
    %c0_i32_1 = arith.constant 0 : i32
    return %c0_i32, %c0_i32_0 : i32, i32
  }
  func.func @transform_6(%arg0: i32) -> (i32, i32) {
    %c0_i32 = arith.constant 0 : i32
    %c0_i32_0 = arith.constant 0 : i32
    %c0_i32_1 = arith.constant 0 : i32
    return %c0_i32, %c0_i32_0 : i32, i32
  }
  func.func @transform_7(%arg0: i32) -> (i32, i32, i32, i32) {
    %c0_i32 = arith.constant 0 : i32
    %c0_i32_0 = arith.constant 0 : i32
    %c0_i32_1 = arith.constant 0 : i32
    %c0_i32_2 = arith.constant 0 : i32
    return %arg0, %c0_i32, %c0_i32_0, %c0_i32_1 : i32, i32, i32, i32
  }
}

</mosaic_0001>

<bundles_post_ra>
// kernel: tpu_custom_call.1
= control target key start
LH: loop header
LB: loop body
LE: loop exit
PB: predicated region body
PF: predicated region fallthrough
CT: control target
= control target key end

     0   :  { %s15511_s0 = inlined_call_operand.hbm [shape: bf16[2,16,16,128], index: 0, kind: input, shape index: {}]   ;;  %s15512_s1 = inlined_call_operand.hbm [shape: bf16[9,128,128], index: 1, kind: input, shape index: {}]   ;;  %s15513_s2 = inlined_call_operand.hbm [shape: bf16[9,128,128], index: 2, kind: input, shape index: {}]   ;;  %s15514_s3 = inlined_call_operand.vmem [shape: f32[1,128], index: 3, kind: input, shape index: {}]   ;;  %s15515_s4 = inlined_call_operand.vmem [shape: f32[1,128], index: 4, kind: input, shape index: {}]   ;;  %s15516_s5 = inlined_call_operand.vmem [shape: f32[1,128], index: 5, kind: input, shape index: {}]   ;;  %s15517_s6 = inlined_call_operand.vmem [shape: f32[1,128], index: 6, kind: input, shape index: {}]   ;;  %s15518_s7 = inlined_call_operand.hbm [shape: f32[2,16,16,128], index: 7, kind: output, shape index: {}]  }
   0x1   :  { %15524 = sst [smem:[#allocation60_spill]] %s15512_s1 }
   0x2   :  { %12 = vsyncpa [#allocation5], 0 }
   0x3   :  { %14 = vsyncpa [#allocation5 + $0x1], 0 }
   0x4   :  { %15 = vsyncpa [#allocation8], 0 }
   0x5   :  { %16 = vsyncpa [#allocation6], 0 }
   0x6   :  { %18 = vsyncpa [#allocation6 + $0x1], 0  ;;  %s11872_s24 = smov 0   ;;  %s11874_s25 = smov 0  }
   0x7   :  { %s11876_s26 = smov 0   ;;  %s11878_s27 = smov 0  }
   0x8 LB: > { %s11893_s28 = sadd.s32 4294967295, %s11823_s27   ;;  %s10137_s29 = sadd.s32 4294967294, %s11823_s27   ;;  %s11823_s27 = sphi %s11878_s27, %s15757_s27   ;;  %s11819_s26 = sphi %s11876_s26, %s15756_s26   ;;  %s11815_s25 = sphi %s11874_s25, %s15755_s25   ;;  %s11811_s24 = sphi %s11872_s24, %s15754_s24  }
   0x9   : > { %p44_p0 = scmp.ne.s32.totalorder %s11815_s25, %s11811_s24  ;;  %p45_p1 = scmp.eq.s32.totalorder %s11893_s28, 0 }
   0xa   : > { %p194_p2 = scmp.eq.s32.totalorder %s11893_s28, 1  ;;  %p200_p3 = scmp.eq.s32.totalorder %s10137_s29, 1 }
   0xb   : > { %p11902_p4 = por %p45_p1, %p44_p0  ;;  %p10138_p5 = scmp.ge.s32.totalorder %s11823_s27, 1 }
   0xc   : > { %p11907_p6 = por %p200_p3, %p44_p0  ;;  %p207_p7 = scmp.lt.s32.totalorder %s11823_s27, 3 }
   0xd   : > { %s15527_s1 = sld [smem:[#allocation60_spill]]  ;;  %s11825_s13 = smov [#allocation7]  }
   0xe   : > { %p11915_p8 = pnand %p10138_p5, %p207_p7  ;;  %s220_s14 = sshll.u32 %s11825_s13, 4  ;;  %s221_s14 = int_to_ptr.vmem [resolvable:$true] %s220_s14 }
   0xf   : > { %s232_s17 = sshll.u32 %s15513_s2, 4  ;;  %s15519_s18 = smov 64   ;;  %s233_s17 = int_to_ptr.hbm [resolvable:$true] %s232_s17 }
  0x10   : > { %p11560_p9 = pneg %p11915_p8  ;;  %s15520_s19 = smov 4  }
  0x11   : > { %s11828_s20 = smov [#allocation9]   ;;  %s11934_s22 = sadd.s32 1, %s11823_s27  }
  0x12   : > { %p11561_p10 = pnand %p11560_p9, %p45_p1  ;;  %s234_s21 = sshll.u32 %s11828_s20, 4  ;;  %s235_s21 = int_to_ptr.vmem [resolvable:$true] %s234_s21 }
  0x13   : > { %s218_s11 = sshll.u32 %s15527_s1, 4  ;;  %s31_s23 = sadd.s32 1, %s11819_s26  ;;  %s219_s11 = int_to_ptr.hbm [resolvable:$true] %s218_s11 }
  0x14   : > { %11563 = dma.hbm_to_vmem [thread:$0]  (!%p11561_p10), %s219_s11, 9216, %s221_s14, [#allocation8], %s15519_s18, %s15519_s18, %s15520_s19  }
  0x15   : > { %11566 = dma.hbm_to_vmem [thread:$0]  (!%p11561_p10), %s233_s17, 9216, %s235_s21, [#allocation8], %s15519_s18, %s15519_s18, %s15520_s19  }
  0x16   : > { %s28_s29 = ssub.s32 %s11823_s27, %s11934_s22  ;;  %p38_p12 = scmp.ne.s32.totalorder %s11819_s26, %s11815_s25 }
  0x17   : > { %p29_p13 = scmp.eq.s32.totalorder %s28_s29, 0  ;;  %p39_p0 = scmp.eq.s32.totalorder %s11823_s27, 0 }
  0x18   : > { %p11944_p3 = por %p194_p2, %p38_p12  ;;  %p11577_p5 = scmp.lt.s32.totalorder %s11823_s27, 2 }
  0x19   : > { %s11950_s10 = scalar_select %p29_p13, %s11819_s26, %s31_s23  }
  0x1a   : > { %p40_p7 = por %p39_p0, %p38_p12  ;;  %s260_s11 = sand.u32 1, %s11819_s26  }
  0x1b   : > { %s10142_s13 = sshll.u32 %s260_s11, 7  ;;  %s11211_s14 = sshll.u32 %s11823_s27, 7 }
  0x1c   : > { %s269_s17 = scalar_lea.hbm %s15511_s0, %s11211_s14  ;;  %s264_s20 = scalar_lea.vmem [#allocation4], %s10142_s13 }
  0x1d   : > { %s272_s21 = sshll.u32 %s264_s20, 4  ;;  %s270_s29 = sshll.u32 %s269_s17, 4  ;;  %s273_s21 = int_to_ptr.vmem [resolvable:$true] %s272_s21  ;;  %s271_s29 = int_to_ptr.hbm [resolvable:$true] %s270_s29 }
  0x1e   : > { %p11957_p2 = pnand %p11577_p5, %p40_p7  ;;  %s261_s23 = scalar_lea.sflag [#allocation5], %s260_s11 }
  0x1f   : > { %s11723_s19 = sshra.s32 %s271_s29, 4  ;;  %s11730_s15 = scalar_lea.hbm %s15511_s0, 256  ;;  %s11724_s19 = int_to_ptr.hbm [resolvable:$true] %s11723_s19 }
  0x20   : > { %s11725_s1 = scalar_lea.hbm %s11724_s19, 128  ;;  %p11727_p10 = pneg %p11957_p2 }
  0x21   : > { %p11726_p9 = scmp.ne.s32.totalorder %s11724_s19, %s11725_s1  ;;  %p11731_p0 = scmp.lt.s32.totalorder %s11724_s19, %s15511_s0 }
  0x22   : > { %p11732_p5 = scmp.lt.s32.totalorder %s11730_s15, %s11725_s1 }
  0x23   : > { %p11728_p12 = pnand %p11727_p10, %p11726_p9 }
  0x24   : > { %p11733_p7 = por %p11732_p5, %p11731_p0 }
  0x25   : > { %p11729_p13 = pneg %p11728_p12 }
  0x27   : > { %p11734_p11 = pnand %p11733_p7, %p11729_p13 }
  0x29   : > { %11737 = shalt.err (!%p11734_p11)
}
  0x2a   : > { %s15531_s11 = smov 4   ;;  %s15532_s20 = smov 64  }
  0x2b   : > { %11570 = dma.hbm_to_vmem [thread:$0]  (!%p11957_p2), %s271_s29, 2048, %s273_s21, %s261_s23, %s15532_s20, %s15532_s20, %s15531_s11  }
  0x2c   : > { %284 = sbr.rel (%p11915_p8) target bundleno = 1643 (0x66b), region = 48 }
  0x31   : > { %s11977_s14 = sand.u32 1, %s11815_s25  }
  0x32   : > { %s10146_s19 = sshll.u32 %s11977_s14, 7  ;;  %s287_s1 = scalar_lea.sflag [#allocation5], %s11977_s14 }
  0x33   : > { %s11981_s13 = scalar_lea.vmem [#allocation4], %s10146_s19 }
  0x34   : > { %11798 = dma.done.wait (%p11902_p4), %s287_s1, 2048  }
  0x35   : > { %11800 = vsyncadd (%p11902_p4), %s287_s1, 4294965248 }
  0x36   : > { %11802 = dma.done.wait (%p45_p1), [#allocation8], 18432  }
  0x37   : > { %11804 = vsyncadd (%p45_p1), [#allocation8], 4294948864  ;;  %v11829_v0 = vmov 0   ;;  %v11243_v1 = vld [vmem:[#allocation7 + $0x78] sm:$0xff]  ;;  %v11242_v3 = vld [vmem:[#allocation7 + $0x70] sm:$0xff]  ;;  %vm743_vm5 = vcmask 1043456  }
  0x38   : > { %333 = vst [vmem:[#allocation2] sm:$0xf] %v11829_v0  ;;  %v11235_v2 = vld [vmem:[#allocation7 + $0x38] sm:$0xff]  ;;  %1440 = vmatpush.bf16.msra.mxu0 %v11243_v1  ;;  %11532 = vmatpush.bf16.msra.mxu2 %v11243_v1  ;;  %v11234_v4 = vld [vmem:[#allocation7 + $0x30] sm:$0xff]  ;;  %v11241_v7 = vld [vmem:[#allocation7 + $0x68] sm:$0xff]  ;;  %vm750_vm7 = vcmask 1040384  }
  0x39   : > { %334 = vst [vmem:[#allocation2 + $0x4] sm:$0xf] %v11829_v0  ;;  %11540 = vmatpush.bf16.msra.mxu3 %v11235_v2  ;;  %1673 = vmatpush.bf16.msra.mxu1 %v11235_v2  ;;  %v11233_v12 = vld [vmem:[#allocation7 + $0x28] sm:$0xff]  ;;  %v11240_v13 = vld [vmem:[#allocation7 + $0x60] sm:$0xff]  ;;  %v11239_v20 = vld [vmem:[#allocation7 + $0x58] sm:$0xff]  ;;  %vm1810_vm11 = vcmask 1042432  }
  0x3a   : > { %335 = vst [vmem:[#allocation2 + $0x8] sm:$0x1] %v11829_v0  ;;  %v11232_v14 = vld [vmem:[#allocation7 + $0x20] sm:$0xff]  ;;  %v11231_v24 = vld [vmem:[#allocation7 + $0x18] sm:$0xff]  ;;  %vm924_vm0 = vsmask.f32 3328 }
  0x3b   : > { %336 = vst [vmem:[#allocation2 + $0xc] sm:$0xf] %v11829_v0  ;;  %vm925_vm1 = vsmask.f32 7440  ;;  %v11238_v25 = vld [vmem:[#allocation7 + $0x50] sm:$0xff]  ;;  %v11237_v31 = vld [vmem:[#allocation7 + $0x48] sm:$0xff] }
  0x3c   : > { %337 = vst [vmem:[#allocation2 + $0x10] sm:$0xf] %v11829_v0  ;;  %1441 = vmatpush.bf16.msra.mxu0 %v11242_v3  ;;  %11533 = vmatpush.bf16.msra.mxu2 %v11242_v3  ;;  %v11230_v29 = vld [vmem:[#allocation7 + $0x10] sm:$0xff]  ;;  %vm12014_vm2 = vmor %vm924_vm0, %vm925_vm1  ;;  %v11229_v34 = vld [vmem:[#allocation7 + $0x8] sm:$0xff]  ;;  %vm419_vm3 = vsmask.f32 256 }
  0x3d   : > { %338 = vst [vmem:[#allocation2 + $0x14] sm:$0x1] %v11829_v0  ;;  %11541 = vmatpush.bf16.msra.mxu3 %v11234_v4  ;;  %1674 = vmatpush.bf16.msra.mxu1 %v11234_v4  ;;  %v11236_v37 = vld [vmem:[#allocation7 + $0x40] sm:$0xff]  ;;  %v401_v40 = vld [vmem:[%s11981_s13 + $0x38] sm:$0xf]  ;;  %vm12144_vm10 = vmand %vm750_vm7, %vm419_vm3  ;;  %vm1811_vm12 = vcmask 1046532  }
  0x3e   : > { %339 = vst [vmem:[#allocation2 + $0x18] sm:$0xf] %v11829_v0  ;;  %v11228_v38 = vld [vmem:[#allocation7] sm:$0xff]  ;;  %v402_v41 = vld [vmem:[%s11981_s13 + $0x3c] sm:$0xf]  ;;  %v542_v42 = vshrl.u32 %v401_v40, 16  ;;  %vm12391_vm13 = vmor %vm1810_vm11, %vm1811_vm12 }
  0x3f   : > { %340 = vst [vmem:[#allocation2 + $0x1c] sm:$0xf] %v11829_v0  ;;  %v860_v5 = vld [vmem:[#allocation2] sm:$0xf]  ;;  %v550_v43 = vshrl.u32 %v402_v41, 16  ;;  %v553_v49 = vshll.u32 %v402_v41, 16 }
  0x40   : > { %341 = vst [vmem:[#allocation2 + $0x20] sm:$0x1] %v11829_v0  ;;  %v861_v6 = vld [vmem:[#allocation2 + $0x4] sm:$0xf]  ;;  %v928_v8 = vshrl.u32 %v860_v5, 16  ;;  %v931_v9 = vshll.u32 %v860_v5, 16  ;;  %1442 = vmatpush.bf16.msra.mxu0 %v11241_v7  ;;  %11534 = vmatpush.bf16.msra.mxu2 %v11241_v7 }
  0x41   : > { %342 = vst [vmem:[#allocation2 + $0x24] sm:$0xf] %v11829_v0  ;;  %v937_v10 = vshll.u32 %v861_v6, 16  ;;  %v941_v11 = vshrl.u32 %v861_v6, 16  ;;  %11542 = vmatpush.bf16.msra.mxu3 %v11233_v12  ;;  %1675 = vmatpush.bf16.msra.mxu1 %v11233_v12  ;;  %v908_v19 = vld [vmem:[#allocation2 + $0x8] sm:$0x1] }
  0x42   : > { %343 = vst [vmem:[#allocation2 + $0x28] sm:$0xf] %v11829_v0  ;;  %v930_v15 = vrot.slane %v928_v8, 4  ;;  %v933_v16 = vrot.slane %v931_v9, 5  ;;  %v947_v23 = vshll.u32 %v908_v19, 16  ;;  %v544_v47 = vrot.slane %v542_v42, 7 }
  0x43   : > { %344 = vst [vmem:[#allocation2 + $0x2c] sm:$0x1] %v11829_v0  ;;  %v939_v17 = vrot.slane %v937_v10, 5  ;;  %v943_v18 = vrot.slane %v941_v11, 4  ;;  %v387_v44 = vld [vmem:[%s11981_s13] sm:$0xf] }
  0x44   : > { %345 = vst [vmem:[#allocation2 + $0x30] sm:$0xf] %v11829_v0  ;;  %1443 = vmatpush.bf16.msra.mxu0 %v11240_v13  ;;  %11535 = vmatpush.bf16.msra.mxu2 %v11240_v13  ;;  %v934_v21 = vor.u32 %v933_v16, %v930_v15  ;;  %v949_v28 = vrot.slane %v947_v23, 5  ;;  %v12097_v45 = vld [vmem:[%s11981_s13 + $0x4] sm:$0xf]  ;;  %v12104_v48 = vrot.slane %v550_v43, 7 }
  0x45   : > { %346 = vst [vmem:[#allocation2 + $0x34] sm:$0xf] %v11829_v0  ;;  %v944_v22 = vor.u32 %v943_v18, %v939_v17  ;;  %11543 = vmatpush.bf16.msra.mxu3 %v11232_v14  ;;  %1676 = vmatpush.bf16.msra.mxu1 %v11232_v14  ;;  %v12100_v46 = vld [vmem:[%s11981_s13 + $0x40] sm:$0xf]  ;;  %vm420_vm4 = vsmask.f32 4368 }
  0x46   : > { %347 = vst [vmem:[#allocation2 + $0x38] sm:$0x1] %v11829_v0  ;;  %v935_v26 = vrot.slane %v934_v21, 4  ;;  %v423_v50 = vshrl.u32 %v387_v44, 16  ;;  %vm744_vm6 = vsmask.f32 7938  ;;  %v555_v59 = vor.u32 %v553_v49, %v12104_v48  ;;  %vm12125_vm8 = vmor %vm419_vm3, %vm420_vm4 }
  0x47   : > { %348 = vst [vmem:[#allocation2 + $0x3c] sm:$0xf] %v11829_v0  ;;  %v945_v27 = vrot.slane %v944_v22, 4  ;;  %v431_v51 = vshrl.u32 %v12097_v45, 16  ;;  %v559_v52 = vshrl.u32 %v12100_v46, 16  ;;  %v545_v53 = vshll.u32 %v401_v40, 16  ;;  %vm12134_vm9 = vmand %vm743_vm5, %vm744_vm6 }
  0x48   : > { %349 = vst [vmem:[#allocation2 + $0x40] sm:$0xf] %v11829_v0  ;;  %1444 = vmatpush.bf16.msra.mxu0 %v11239_v20  ;;  %11536 = vmatpush.bf16.msra.mxu2 %v11239_v20  ;;  %v940_v32 = vsel %vm12014_vm2, %v935_v26, %v939_v17  ;;  %v12111_v54 = vld [vmem:[%s11981_s13 + $0x44] sm:$0xf]  ;;  %v548_v55 = vrot.slane %v544_v47, 4  ;;  %v11251_v56 = vld [vmem:[#allocation7 + $0xb8] sm:$0xff] }
  0x49   : > { %350 = vst [vmem:[#allocation2 + $0x44] sm:$0x1] %v11829_v0  ;;  %11544 = vmatpush.bf16.msra.mxu3 %v11231_v24  ;;  %1677 = vmatpush.bf16.msra.mxu1 %v11231_v24  ;;  %v950_v33 = vsel %vm12014_vm2, %v945_v27, %v949_v28  ;;  %v1328_v35 = vunpack.c.l.b16 %v940_v32  ;;  %v11212_v57 = vld [vmem:[#allocation2] sm:$0xff]  ;;  %v11275_v58 = vld [vmem:[#allocation7 + $0xf8] sm:$0xff]  ;;  %v557_v60 = vrot.slane %v12104_v48, 4  ;;  %v425_v62 = vrot.slane %v423_v50, 7 }
  0x4a   : > { %351 = vst [vmem:[#allocation2 + $0x48] sm:$0xf] %v11829_v0  ;;  %v1329_v36 = vunpack.c.l.b16 %v950_v33  ;;  %v11283_v61 = vld [vmem:[#allocation7 + $0x138] sm:$0xff]  ;;  %v426_v63 = vshll.u32 %v387_v44, 16  ;;  %v433_v2 = vrot.slane %v431_v51, 7  ;;  %v434_v3 = vshll.u32 %v12097_v45, 16 }
  0x4b   : > { %352 = vst [vmem:[#allocation2 + $0x4c] sm:$0xf] %v11829_v0  ;;  %v12119_v4 = vrot.slane %v559_v52, 7  ;;  %v567_v5 = vshrl.u32 %v12111_v54, 16  ;;  %v547_v7 = vor.u32 %v545_v53, %v544_v47  ;;  %v389_v9 = vld [vmem:[%s11981_s13 + $0x8] sm:$0xf]  ;;  %v556_v20 = vsel %vm12125_vm8, %v548_v55, %v555_v59 }
  0x4c   : > { %353 = vst [vmem:[#allocation2 + $0x50] sm:$0x1] %v11829_v0  ;;  %1445 = vmatpush.bf16.msra.mxu0 %v11238_v25  ;;  %11537 = vmatpush.bf16.msra.mxu2 %v11238_v25  ;;  %v1360_v39 = vpack.c.b16 %v1329_v36, %v1328_v35  ;;  %v390_v10 = vld [vmem:[%s11981_s13 + $0xc] sm:$0xf]  ;;  %v562_v12 = vshll.u32 %v12100_v46, 16  ;;  %v570_v13 = vshll.u32 %v12111_v54, 16  ;;  %v428_v16 = vor.u32 %v426_v63, %v425_v62 }
  0x4d   : > { %354 = vst [vmem:[#allocation2 + $0x54] sm:$0xf] %v11829_v0  ;;  %11545 = vmatpush.bf16.msra.mxu3 %v11230_v29  ;;  %1678 = vmatpush.bf16.msra.mxu1 %v11230_v29  ;;  %v405_v14 = vld [vmem:[%s11981_s13 + $0x48] sm:$0xf]  ;;  %v440_v17 = vshrl.u32 %v389_v9, 16  ;;  %v448_v18 = vshrl.u32 %v390_v10, 16  ;;  %v436_v26 = vor.u32 %v434_v3, %v433_v2 }
  0x4e   : > { %355 = vst [vmem:[#allocation2 + $0x58] sm:$0xf] %v11829_v0  ;;  %v406_v19 = vld [vmem:[%s11981_s13 + $0x4c] sm:$0xf]  ;;  %v746_v21 = vld [vmem:[#allocation2 + $0xc] sm:$0xf]  ;;  %v564_v32 = vor.u32 %v562_v12, %v12119_v4 }
  0x4f   : > { %356 = vst [vmem:[#allocation2 + $0x5c] sm:$0x1] %v11829_v0  ;;  %v569_v22 = vrot.slane %v567_v5, 7  ;;  %v576_v23 = vshrl.u32 %v405_v14, 16  ;;  %v429_v25 = vrot.slane %v425_v62, 4  ;;  %v584_v27 = vshrl.u32 %v406_v19, 16 }
  0x50   : > { %357 = vst [vmem:[#allocation2 + $0x60] sm:$0xf] %v11829_v0  ;;  %1446 = vmatpush.bf16.msra.mxu0 %v11237_v31  ;;  %11538 = vmatpush.bf16.msra.mxu2 %v11237_v31  ;;  %v438_v29 = vrot.slane %v433_v2, 4  ;;  %v752_v31 = vld [vmem:[#allocation2 + $0x14] sm:$0x1]  ;;  %v565_v33 = vrot.slane %v12119_v4, 4  ;;  %v747_v35 = vsel %vm12134_vm9, %v428_v16, %v746_v21 }
  0x51   : > { %358 = vst [vmem:[#allocation2 + $0x64] sm:$0xf] %v11829_v0  ;;  %11546 = vmatpush.bf16.msra.mxu3 %v11229_v34  ;;  %1679 = vmatpush.bf16.msra.mxu1 %v11229_v34  ;;  %v442_v36 = vrot.slane %v440_v17, 7  ;;  %v443_v40 = vshll.u32 %v389_v9, 16  ;;  %v578_v41 = vrot.slane %v576_v23, 7  ;;  %v579_v42 = vshll.u32 %v405_v14, 16 }
  0x52   : > { %359 = vst [vmem:[#allocation2 + $0x68] sm:$0x1] %v11829_v0  ;;  %v437_v43 = vsel %vm12125_vm8, %v429_v25, %v436_v26  ;;  %v586_v44 = vrot.slane %v584_v27, 7  ;;  %v587_v45 = vshll.u32 %v406_v19, 16  ;;  %v574_v46 = vrot.slane %v569_v22, 4  ;;  %v11274_v62 = vld [vmem:[#allocation7 + $0xf0] sm:$0xff] }
  0x53   : > { %360 = vst [vmem:[#allocation2 + $0x6c] sm:$0xf] %v11829_v0  ;;  %v446_v49 = vrot.slane %v442_v36, 4  ;;  %v12171_v52 = vor.u32 %v443_v40, %v442_v36  ;;  %v12173_v53 = vld [vmem:[#allocation2 + $0x18] sm:$0xf]  ;;  %v12175_v54 = vor.u32 %v579_v42, %v578_v41  ;;  %v11282_v63 = vld [vmem:[#allocation7 + $0x130] sm:$0xff] }
  0x54   : > { %361 = vst [vmem:[#allocation2 + $0x70] sm:$0xf] %v11829_v0  ;;  %1447 = vmatpush.bf16.msra.mxu0 %v11236_v37  ;;  %11539 = vmatpush.bf16.msra.mxu2 %v11236_v37  ;;  %v450_v37 = vrot.slane %v448_v18, 7  ;;  %v589_v59 = vor.u32 %v587_v45, %v586_v44  ;;  %s10149_s21 = sshll.u32 %s11977_s14, 8  ;;  %s11452_s23 = sshll.u32 %s11893_s28, 8 }
  0x55   : > { %362 = vst [vmem:[#allocation2 + $0x74] sm:$0x1] %v11829_v0  ;;  %11547 = vmatpush.bf16.msra.mxu3 %v11228_v38  ;;  %1680 = vmatpush.bf16.msra.mxu1 %v11228_v38  ;;  %v451_v38 = vshll.u32 %v390_v10, 16  ;;  %v756_v10 = vsel %vm12134_vm9, %v12171_v52, %v12173_v53  ;;  %s15236_s29 = scalar_lea.vmem [#allocation10], %s10149_s21  ;;  %s10041_s16 = scalar_lea.hbm %s15518_s7, %s11452_s23 }
  0x56   : > { %363 = vst [vmem:[#allocation2 + $0x78] sm:$0xf] %v11829_v0  ;;  %s10042_s17 = sshll.u32 %s15236_s29, 4  ;;  %s10044_s11 = sshll.u32 %s10041_s16, 4  ;;  %s10043_s17 = int_to_ptr.vmem [resolvable:$true] %s10042_s17  ;;  %s10045_s11 = int_to_ptr.hbm [resolvable:$true] %s10044_s11 }
  0x57   : > { %364 = vst [vmem:[#allocation2 + $0x7c] sm:$0xf] %v11829_v0  ;;  %1448 = vmatmul.bf16.vlgmr.msra.gmra.mxu0 %v1360_v39  ;;  %v797_v1 = vld [vmem:[#allocation2 + $0x60] sm:$0xf]  ;;  %v572_v39 = vor.u32 %v570_v13, %v569_v22  ;;  %v453_v50 = vor.u32 %v451_v38, %v450_v37  ;;  %s10030_s28 = scalar_lea.sflag [#allocation6], %s11977_s14  ;;  %s11767_s20 = sshra.s32 %s10045_s11, 4  ;;  %s11768_s20 = int_to_ptr.hbm [resolvable:$true] %s11767_s20 }
  0x58   : > { %365 = vst [vmem:[#allocation2 + $0x80] sm:$0x1] %v11829_v0  ;;  %2054 = vmatpush.bf16.msrb.mxu2 %v11251_v56  ;;  %1681 = vmatmul.bf16.vlgmr.msra.gmra.mxu1 %v11212_v57  ;;  %v798_v24 = vsel %vm12134_vm9, %v547_v7, %v797_v1  ;;  %v455_v56 = vrot.slane %v450_v37, 4  ;;  %v759_v57 = vld [vmem:[#allocation2 + $0x20] sm:$0x1]  ;;  %v591_v1 = vrot.slane %v586_v44, 4  ;;  %p11774_p11 = scmp.lt.s32.totalorder %s11768_s20, %s15518_s7 }
  0x59   : > { %366 = vst [vmem:[#allocation2 + $0x84] sm:$0xf] %v11829_v0  ;;  %v801_v8 = vld [vmem:[#allocation2 + $0x68] sm:$0x1]  ;;  %2368 = vmatpush.bf16.msrb.mxu3 %v11275_v58  ;;  %3050 = vmatpush.bf16.msrb.mxu0 %v11283_v61  ;;  %v573_v51 = vsel %vm12125_vm8, %v565_v33, %v572_v39  ;;  %v582_v58 = vrot.slane %v578_v41, 4  ;;  %v11250_v61 = vld [vmem:[#allocation7 + $0xb0] sm:$0xff]  ;;  %v454_v3 = vsel %vm12125_vm8, %v446_v49, %v453_v50 }
  0x5a   : > { %367 = vst [vmem:[#allocation2 + $0x88] sm:$0xf] %v11829_v0  ;;  %v802_v28 = vsel %vm12144_vm10, %v557_v60, %v801_v8  ;;  %v804_v34 = vld [vmem:[#allocation2 + $0x6c] sm:$0xf]  ;;  %v760_v17 = vsel %vm12144_vm10, %v455_v56, %v759_v57  ;;  %s11769_s19 = scalar_lea.hbm %s11768_s20, 256  ;;  %s11773_s12 = scalar_lea.hbm %s15518_s7, 512 }
  0x5b   : > { %368 = vst [vmem:[#allocation2 + $0x8c] sm:$0x1] %v11829_v0  ;;  %v805_v47 = vsel %vm12134_vm9, %v564_v32, %v804_v34  ;;  %v590_v18 = vsel %vm12125_vm8, %v582_v58, %v589_v59  ;;  %v391_v58 = vld [vmem:[%s11981_s13 + $0x10] sm:$0xf]  ;;  %p11770_p1 = scmp.ne.s32.totalorder %s11768_s20, %s11769_s19  ;;  %p11775_p2 = scmp.lt.s32.totalorder %s11773_s12, %s11769_s19 }
  0x5c   : > { %369 = vst [vmem:[#allocation2 + $0x90] sm:$0xf] %v11829_v0  ;;  %v808_v48 = vld [vmem:[#allocation2 + $0x74] sm:$0x1]  ;;  %2055 = vmatpush.bf16.msrb.mxu2 %v11250_v61 }
  0x5d   : > { %370 = vst [vmem:[#allocation2 + $0x94] sm:$0xf] %v11829_v0  ;;  %v12177_v55 = vld [vmem:[#allocation2 + $0x78] sm:$0xf]  ;;  %v809_v60 = vsel %vm12144_vm10, %v574_v46, %v808_v48  ;;  %2369 = vmatpush.bf16.msrb.mxu3 %v11274_v62  ;;  %3051 = vmatpush.bf16.msrb.mxu0 %v11282_v63  ;;  %p11771_p4 = pnand %p11770_p1, %p11944_p3  ;;  %p11776_p9 = por %p11775_p2, %p11774_p11 }
  0x5e   : > { %371 = vst [vmem:[#allocation2 + $0x98] sm:$0x1] %v11829_v0  ;;  %v812_v12 = vsel %vm12134_vm9, %v12175_v54, %v12177_v55 }
  0x5f   : > { %372 = vst [vmem:[#allocation2 + $0x9c] sm:$0xf] %v11829_v0  ;;  %v815_v4 = vld [vmem:[#allocation2 + $0x80] sm:$0x1]  ;;  %p11772_p8 = pneg %p11771_p4 }
  0x60   : > { %373 = vst [vmem:[#allocation2 + $0xa0] sm:$0xf] %v11829_v0  ;;  %v816_v23 = vsel %vm12144_vm10, %v591_v1, %v815_v4  ;;  %v457_v4 = vshrl.u32 %v391_v58, 16 }
  0x61   : > { %374 = vst [vmem:[#allocation2 + $0xa4] sm:$0x1] %v11829_v0  ;;  %p11777_p10 = pnand %p11776_p9, %p11772_p8 }
  0x62   : > { %375 = vst [vmem:[#allocation2 + $0xa8] sm:$0xf] %v11829_v0 }
  0x63   : > { %376 = vst [vmem:[#allocation2 + $0xac] sm:$0xf] %v11829_v0 }
  0x64   : > { %377 = vst [vmem:[#allocation2 + $0xb0] sm:$0x1] %v11829_v0 }
  0x65   : > { %378 = vst [vmem:[#allocation2 + $0xb4] sm:$0xf] %v11829_v0 }
  0x66   : > { %379 = vst [vmem:[#allocation2 + $0xb8] sm:$0xf] %v11829_v0 }
  0x67   : > { %380 = vst [vmem:[#allocation2 + $0xbc] sm:$0x1] %v11829_v0 }
  0x68   : > { %381 = vst [vmem:[#allocation2 + $0xc0] sm:$0xf] %v11829_v0 }
  0x69   : > { %382 = vst [vmem:[#allocation2 + $0xc4] sm:$0xf] %v11829_v0 }
  0x6a   : > { %383 = vst [vmem:[#allocation2 + $0xc8] sm:$0x1] %v11829_v0 }
  0x6b   : > { %384 = vst [vmem:[#allocation2 + $0xcc] sm:$0xf] %v11829_v0 }
  0x6c   : > { %385 = vst [vmem:[#allocation2 + $0xd0] sm:$0xf] %v11829_v0 }
  0x6d   : > { %386 = vst [vmem:[#allocation2 + $0xd4] sm:$0x1] %v11829_v0 }
  0x6e   : > { %5124 = vst [vmem:[#allocation3] sm:$0xf] %v11829_v0 }
  0x6f   : > { %5125 = vst [vmem:[#allocation3 + $0x4] sm:$0xf] %v11829_v0 }
  0x70   : > { %5126 = vst [vmem:[#allocation3 + $0x8] sm:$0x1] %v11829_v0 }
  0x71   : > { %5127 = vst [vmem:[#allocation3 + $0xc] sm:$0xf] %v11829_v0 }
  0x72   : > { %5128 = vst [vmem:[#allocation3 + $0x10] sm:$0xf] %v11829_v0 }
  0x73   : > { %5129 = vst [vmem:[#allocation3 + $0x14] sm:$0x1] %v11829_v0 }
  0x74   : > { %5130 = vst [vmem:[#allocation3 + $0x18] sm:$0xf] %v11829_v0 }
  0x75   : > { %5131 = vst [vmem:[#allocation3 + $0x1c] sm:$0xf] %v11829_v0 }
  0x76   : > { %5132 = vst [vmem:[#allocation3 + $0x20] sm:$0x1] %v11829_v0 }
  0x77   : > { %5133 = vst [vmem:[#allocation3 + $0x24] sm:$0xf] %v11829_v0 }
  0x78   : > { %5134 = vst [vmem:[#allocation3 + $0x28] sm:$0xf] %v11829_v0 }
  0x79   : > { %5135 = vst [vmem:[#allocation3 + $0x2c] sm:$0x1] %v11829_v0 }
  0x7a   : > { %5136 = vst [vmem:[#allocation3 + $0x30] sm:$0xf] %v11829_v0 }
  0x7b   : > { %5137 = vst [vmem:[#allocation3 + $0x34] sm:$0xf] %v11829_v0 }
  0x7c   : > { %5138 = vst [vmem:[#allocation3 + $0x38] sm:$0x1] %v11829_v0 }
  0x7d   : > { %5139 = vst [vmem:[#allocation3 + $0x3c] sm:$0xf] %v11829_v0 }
  0x7e   : > { %5140 = vst [vmem:[#allocation3 + $0x40] sm:$0xf] %v11829_v0 }
  0x7f   : > { %5141 = vst [vmem:[#allocation3 + $0x44] sm:$0x1] %v11829_v0 }
  0x80   : > { %5142 = vst [vmem:[#allocation3 + $0x48] sm:$0xf] %v11829_v0 }
  0x81   : > { %5143 = vst [vmem:[#allocation3 + $0x4c] sm:$0xf] %v11829_v0 }
  0x82   : > { %5144 = vst [vmem:[#allocation3 + $0x50] sm:$0x1] %v11829_v0 }
  0x83   : > { %5145 = vst [vmem:[#allocation3 + $0x54] sm:$0xf] %v11829_v0 }
  0x84   : > { %5146 = vst [vmem:[#allocation3 + $0x58] sm:$0xf] %v11829_v0 }
  0x85   : > { %5147 = vst [vmem:[#allocation3 + $0x5c] sm:$0x1] %v11829_v0 }
  0x86   : > { %5148 = vst [vmem:[#allocation3 + $0x60] sm:$0xf] %v11829_v0 }
  0x87   : > { %5149 = vst [vmem:[#allocation3 + $0x64] sm:$0xf] %v11829_v0 }
  0x88   : > { %5150 = vst [vmem:[#allocation3 + $0x68] sm:$0x1] %v11829_v0 }
  0x89   : > { %5151 = vst [vmem:[#allocation3 + $0x6c] sm:$0xf] %v11829_v0 }
  0x8a   : > { %5152 = vst [vmem:[#allocation3 + $0x70] sm:$0xf] %v11829_v0 }
  0x8b   : > { %5153 = vst [vmem:[#allocation3 + $0x74] sm:$0x1] %v11829_v0 }
  0x8c   : > { %5154 = vst [vmem:[#allocation3 + $0x78] sm:$0xf] %v11829_v0 }
  0x8d   : > { %5155 = vst [vmem:[#allocation3 + $0x7c] sm:$0xf] %v11829_v0 }
  0x8e   : > { %5156 = vst [vmem:[#allocation3 + $0x80] sm:$0x1] %v11829_v0 }
  0x8f   : > { %5157 = vst [vmem:[#allocation3 + $0x84] sm:$0xf] %v11829_v0 }
  0x90   : > { %5158 = vst [vmem:[#allocation3 + $0x88] sm:$0xf] %v11829_v0 }
  0x91   : > { %5159 = vst [vmem:[#allocation3 + $0x8c] sm:$0x1] %v11829_v0 }
  0x92   : > { %5160 = vst [vmem:[#allocation3 + $0x90] sm:$0xf] %v11829_v0 }
  0x93   : > { %5161 = vst [vmem:[#allocation3 + $0x94] sm:$0xf] %v11829_v0 }
  0x94   : > { %5162 = vst [vmem:[#allocation3 + $0x98] sm:$0x1] %v11829_v0 }
  0x95   : > { %5163 = vst [vmem:[#allocation3 + $0x9c] sm:$0xf] %v11829_v0 }
  0x96   : > { %5164 = vst [vmem:[#allocation3 + $0xa0] sm:$0xf] %v11829_v0 }
  0x97   : > { %5165 = vst [vmem:[#allocation3 + $0xa4] sm:$0x1] %v11829_v0 }
  0x98   : > { %5166 = vst [vmem:[#allocation3 + $0xa8] sm:$0xf] %v11829_v0 }
  0x99   : > { %5167 = vst [vmem:[#allocation3 + $0xac] sm:$0xf] %v11829_v0 }
  0x9a   : > { %5168 = vst [vmem:[#allocation3 + $0xb0] sm:$0x1] %v11829_v0 }
  0x9b   : > { %5169 = vst [vmem:[#allocation3 + $0xb4] sm:$0xf] %v11829_v0 }
  0x9c   : > { %5170 = vst [vmem:[#allocation3 + $0xb8] sm:$0xf] %v11829_v0 }
  0x9d   : > { %5171 = vst [vmem:[#allocation3 + $0xbc] sm:$0x1] %v11829_v0 }
  0x9e   : > { %5172 = vst [vmem:[#allocation3 + $0xc0] sm:$0xf] %v11829_v0 }
  0x9f   : > { %5173 = vst [vmem:[#allocation3 + $0xc4] sm:$0xf] %v11829_v0 }
  0xa0   : > { %5174 = vst [vmem:[#allocation3 + $0xc8] sm:$0x1] %v11829_v0 }
  0xa1   : > { %5175 = vst [vmem:[#allocation3 + $0xcc] sm:$0xf] %v11829_v0 }
  0xa2   : > { %5176 = vst [vmem:[#allocation3 + $0xd0] sm:$0xf] %v11829_v0 }
  0xa3   : > { %5177 = vst [vmem:[#allocation3 + $0xd4] sm:$0x1] %v11829_v0  ;;  %v753_v0 = vsel %vm12144_vm10, %v438_v29, %v752_v31 }
  0xa4   : > { %799 = vst [vmem:[#allocation2 + $0x60] sm:$0xf] %v798_v24 }
  0xa5   : > { %800 = vst [vmem:[#allocation2 + $0x64] sm:$0xf] %v556_v20 }
  0xa6   : > { %803 = vst [vmem:[#allocation2 + $0x68] sm:$0x1] %v802_v28 }
  0xa7   : > { %748 = vst [vmem:[#allocation2 + $0xc] sm:$0xf] %v747_v35 }
  0xa8   : > { %749 = vst [vmem:[#allocation2 + $0x10] sm:$0xf] %v437_v43 }
  0xa9   : > { %754 = vst [vmem:[#allocation2 + $0x14] sm:$0x1] %v753_v0 }
  0xaa   : > { %806 = vst [vmem:[#allocation2 + $0x6c] sm:$0xf] %v805_v47 }
  0xab   : > { %v876_v2 = vld [vmem:[#allocation2 + $0x60] sm:$0xf]  ;;  %807 = vst [vmem:[#allocation2 + $0x70] sm:$0xf] %v573_v51 }
  0xac   : > { %v877_v5 = vld [vmem:[#allocation2 + $0x64] sm:$0xf]  ;;  %v1120_v7 = vshrl.u32 %v876_v2, 16  ;;  %v1123_v8 = vshll.u32 %v876_v2, 16  ;;  %810 = vst [vmem:[#allocation2 + $0x74] sm:$0x1] %v809_v60 }
  0xad   : > { %v11220_v9 = vld [vmem:[#allocation2 + $0x60] sm:$0xff]  ;;  %v916_v13 = vld [vmem:[#allocation2 + $0x68] sm:$0x1]  ;;  %v1129_v14 = vshll.u32 %v877_v5, 16  ;;  %v1133_v16 = vshrl.u32 %v877_v5, 16 }
  0xae   : > { %v1122_v19 = vrot.slane %v1120_v7, 4  ;;  %v1125_v20 = vrot.slane %v1123_v8, 5  ;;  %v1139_v21 = vshll.u32 %v916_v13, 16  ;;  %1721 = vmatmul.bf16.vlgmr.msra.gmra.mxu3 %v11220_v9  ;;  %v862_v22 = vld [vmem:[#allocation2 + $0xc] sm:$0xf] }
  0xaf   : > { %v1131_v24 = vrot.slane %v1129_v14, 5  ;;  %v1135_v25 = vrot.slane %v1133_v16, 4  ;;  %v863_v26 = vld [vmem:[#allocation2 + $0x10] sm:$0xf]  ;;  %v952_v27 = vshrl.u32 %v862_v22, 16  ;;  %v955_v28 = vshll.u32 %v862_v22, 16 }
  0xb0   : > { %v1126_v29 = vor.u32 %v1125_v20, %v1122_v19  ;;  %v1141_v31 = vrot.slane %v1139_v21, 5  ;;  %v909_v32 = vld [vmem:[#allocation2 + $0x14] sm:$0x1]  ;;  %v961_v33 = vshll.u32 %v863_v26, 16  ;;  %v965_v34 = vshrl.u32 %v863_v26, 16  ;;  %v11213_v35 = vld [vmem:[#allocation2 + $0xc] sm:$0xff] }
  0xb1   : > { %v1136_v36 = vor.u32 %v1135_v25, %v1131_v24  ;;  %v954_v37 = vrot.slane %v952_v27, 4  ;;  %v957_v38 = vrot.slane %v955_v28, 5  ;;  %v971_v39 = vshll.u32 %v909_v32, 16  ;;  %v878_v40 = vld [vmem:[#allocation2 + $0x6c] sm:$0xf]  ;;  %1686 = vmatmul.bf16.gmra.mxu1 %v11213_v35  ;;  %v11273_v20 = vld [vmem:[#allocation7 + $0xe8] sm:$0xff] }
  0xb2   : > { %v1127_v41 = vrot.slane %v1126_v29, 4  ;;  %v963_v42 = vrot.slane %v961_v33, 5  ;;  %v967_v43 = vrot.slane %v965_v34, 4  ;;  %v879_v44 = vld [vmem:[#allocation2 + $0x70] sm:$0xf]  ;;  %v1144_v45 = vshrl.u32 %v878_v40, 16  ;;  %2370 = vmatpush.bf16.msrb.mxu3 %v11273_v20 }
  0xb3   : > { %v1137_v0 = vrot.slane %v1136_v36, 4  ;;  %v958_v46 = vor.u32 %v957_v38, %v954_v37  ;;  %v973_v47 = vrot.slane %v971_v39, 5  ;;  %v1147_v48 = vshll.u32 %v878_v40, 16  ;;  %757 = vst [vmem:[#allocation2 + $0x18] sm:$0xf] %v756_v10  ;;  %v11281_v28 = vld [vmem:[#allocation7 + $0x128] sm:$0xff] }
  0xb4   : > { %v1132_v49 = vsel %vm12014_vm2, %v1127_v41, %v1131_v24  ;;  %v968_v50 = vor.u32 %v967_v43, %v963_v42  ;;  %v917_v51 = vld [vmem:[#allocation2 + $0x74] sm:$0x1]  ;;  %v1146_v52 = vrot.slane %v1144_v45, 4  ;;  %v1153_v53 = vshll.u32 %v879_v44, 16  ;;  %758 = vst [vmem:[#allocation2 + $0x1c] sm:$0xf] %v454_v3  ;;  %3052 = vmatpush.bf16.msrb.mxu0 %v11281_v28 }
  0xb5   : > { %v1142_v54 = vsel %vm12014_vm2, %v1137_v0, %v1141_v31  ;;  %v1344_v55 = vunpack.c.l.b16 %v1132_v49  ;;  %v959_v56 = vrot.slane %v958_v46, 4  ;;  %v1149_v57 = vrot.slane %v1147_v48, 5  ;;  %761 = vst [vmem:[#allocation2 + $0x20] sm:$0x1] %v760_v17  ;;  %v12205_v3 = vld [vmem:[%s11981_s13 + $0x14] sm:$0xf] }
  0xb6   : > { %v1345_v59 = vunpack.c.l.b16 %v1142_v54  ;;  %v969_v60 = vrot.slane %v968_v50, 4  ;;  %v1155_v61 = vrot.slane %v1153_v53, 5  ;;  %v1157_v62 = vshrl.u32 %v879_v44, 16  ;;  %813 = vst [vmem:[#allocation2 + $0x78] sm:$0xf] %v812_v12  ;;  %v11221_v12 = vld [vmem:[#allocation2 + $0x6c] sm:$0xff] }
  0xb7   : > { %v964_v63 = vsel %vm12014_vm2, %v959_v56, %v963_v42  ;;  %v1150_v1 = vor.u32 %v1149_v57, %v1146_v52  ;;  %v1163_v2 = vshll.u32 %v917_v51, 16  ;;  %814 = vst [vmem:[#allocation2 + $0x7c] sm:$0xf] %v590_v18  ;;  %v12209_v16 = vrot.slane %v457_v4, 7  ;;  %v11249_v18 = vld [vmem:[#allocation7 + $0xa8] sm:$0xff] }
  0xb8   : > { %v1368_v5 = vpack.c.b16 %v1345_v59, %v1344_v55  ;;  %v974_v7 = vsel %vm12014_vm2, %v969_v60, %v973_v47  ;;  %v1330_v8 = vunpack.c.l.b16 %v964_v63  ;;  %v1159_v9 = vrot.slane %v1157_v62, 4  ;;  %817 = vst [vmem:[#allocation2 + $0x80] sm:$0x1] %v816_v23  ;;  %2056 = vmatpush.bf16.msrb.mxu2 %v11249_v18  ;;  %v762_v62 = vld [vmem:[#allocation2 + $0x24] sm:$0xf] }
  0xb9   : > { %v1331_v10 = vunpack.c.l.b16 %v974_v7  ;;  %v1151_v13 = vrot.slane %v1150_v1, 4  ;;  %v1165_v14 = vrot.slane %v1163_v2, 5  ;;  %v460_v21 = vshll.u32 %v391_v58, 16  ;;  %v393_v18 = vld [vmem:[%s11981_s13 + $0x18] sm:$0xf] }
  0xba   : > { %1488 = vmatmul.bf16.vlgmr.msra.gmra.mxu2 %v1368_v5  ;;  %v1160_v17 = vor.u32 %v1159_v9, %v1155_v61  ;;  %v864_v19 = vld [vmem:[#allocation2 + $0x18] sm:$0xf]  ;;  %v465_v22 = vshrl.u32 %v12205_v3, 16  ;;  %v407_v5 = vld [vmem:[%s11981_s13 + $0x50] sm:$0xf] }
  0xbb   : > { %v1361_v24 = vpack.c.b16 %v1331_v10, %v1330_v8  ;;  %v1156_v25 = vsel %vm12014_vm2, %v1151_v13, %v1155_v61  ;;  %v865_v26 = vld [vmem:[#allocation2 + $0x1c] sm:$0xf]  ;;  %v976_v23 = vshrl.u32 %v864_v19, 16  ;;  %v979_v27 = vshll.u32 %v864_v19, 16  ;;  %v766_v13 = vld [vmem:[#allocation2 + $0x2c] sm:$0x1] }
  0xbc   : > { %v1161_v29 = vrot.slane %v1160_v17, 4  ;;  %v12214_v31 = vunpack.c.l.b16 %v1156_v25  ;;  %v910_v32 = vld [vmem:[#allocation2 + $0x20] sm:$0x1]  ;;  %v985_v33 = vshll.u32 %v865_v26, 16  ;;  %v989_v34 = vshrl.u32 %v865_v26, 16  ;;  %v11214_v45 = vld [vmem:[#allocation2 + $0x18] sm:$0xff] }
  0xbd   : > { %1453 = vmatmul.bf16.gmra.mxu0 %v1361_v24  ;;  %v978_v35 = vrot.slane %v976_v23, 4  ;;  %v981_v36 = vrot.slane %v979_v27, 5  ;;  %v995_v37 = vshll.u32 %v910_v32, 16  ;;  %v880_v38 = vld [vmem:[#allocation2 + $0x78] sm:$0xf]  ;;  %v462_v39 = vor.u32 %v460_v21, %v12209_v16 }
  0xbe   : > { %v1166_v40 = vsel %vm12014_vm2, %v1161_v29, %v1165_v14  ;;  %1726 = vmatmul.bf16.gmra.mxu3 %v11221_v12  ;;  %v987_v41 = vrot.slane %v985_v33, 5  ;;  %v991_v42 = vrot.slane %v989_v34, 4  ;;  %v881_v43 = vld [vmem:[#allocation2 + $0x7c] sm:$0xf]  ;;  %v1168_v44 = vshrl.u32 %v880_v38, 16 }
  0xbf   : > { %v1347_v0 = vunpack.c.l.b16 %v1166_v40  ;;  %v982_v46 = vor.u32 %v981_v36, %v978_v35  ;;  %v997_v47 = vrot.slane %v995_v37, 5  ;;  %v918_v48 = vld [vmem:[#allocation2 + $0x80] sm:$0x1]  ;;  %v1171_v49 = vshll.u32 %v880_v38, 16  ;;  %v408_v14 = vld [vmem:[%s11981_s13 + $0x54] sm:$0xf] }
  0xc0   : > { %v992_v50 = vor.u32 %v991_v42, %v987_v41  ;;  %v1170_v51 = vrot.slane %v1168_v44, 4  ;;  %v1177_v52 = vshll.u32 %v881_v43, 16  ;;  %v1181_v53 = vshrl.u32 %v881_v43, 16  ;;  %v818_v26 = vld [vmem:[#allocation2 + $0x84] sm:$0xf]  ;;  %v11222_v35 = vld [vmem:[#allocation2 + $0x78] sm:$0xff] }
  0xc1   : > { %v1369_v54 = vpack.c.b16 %v1347_v0, %v12214_v31  ;;  %v983_v55 = vrot.slane %v982_v46, 4  ;;  %v1173_v56 = vrot.slane %v1171_v49, 5  ;;  %v1187_v57 = vshll.u32 %v918_v48, 16  ;;  %1691 = vmatmul.bf16.gmra.mxu1 %v11214_v45  ;;  %v394_v23 = vld [vmem:[%s11981_s13 + $0x1c] sm:$0xf]  ;;  %v11272_v42 = vld [vmem:[#allocation7 + $0xe0] sm:$0xff] }
  0xc2   : > { %v993_v58 = vrot.slane %v992_v50, 4  ;;  %v1179_v59 = vrot.slane %v1177_v52, 5  ;;  %v1183_v60 = vrot.slane %v1181_v53, 4  ;;  %v463_v61 = vrot.slane %v12209_v16, 4  ;;  %v822_v32 = vld [vmem:[#allocation2 + $0x8c] sm:$0x1]  ;;  %2371 = vmatpush.bf16.msrb.mxu3 %v11272_v42 }
  0xc3   : > { %v988_v63 = vsel %vm12014_vm2, %v983_v55, %v987_v41  ;;  %v1174_v1 = vor.u32 %v1173_v56, %v1170_v51  ;;  %v12223_v2 = vrot.slane %v1187_v57, 5  ;;  %v467_v4 = vrot.slane %v465_v22, 7  ;;  %v409_v33 = vld [vmem:[%s11981_s13 + $0x58] sm:$0xf]  ;;  %v11248_v41 = vld [vmem:[#allocation7 + $0xa0] sm:$0xff] }
  0xc4   : > { %v998_v7 = vsel %vm12014_vm2, %v993_v58, %v997_v47  ;;  %v1332_v8 = vunpack.c.l.b16 %v988_v63  ;;  %v1184_v9 = vor.u32 %v1183_v60, %v1179_v59  ;;  %v468_v10 = vshll.u32 %v12205_v3, 16  ;;  %v11280_v43 = vld [vmem:[#allocation7 + $0x120] sm:$0xff]  ;;  %2057 = vmatpush.bf16.msrb.mxu2 %v11248_v41  ;;  %v773_v53 = vld [vmem:[#allocation2 + $0x38] sm:$0x1]  ;;  %v410_v60 = vld [vmem:[%s11981_s13 + $0x5c] sm:$0xf] }
  0xc5   : > { %v1333_v12 = vunpack.c.l.b16 %v998_v7  ;;  %v1175_v16 = vrot.slane %v1174_v1, 4  ;;  %v472_v17 = vrot.slane %v467_v4, 4  ;;  %v763_v19 = vsel %vm12134_vm9, %v462_v39, %v762_v62  ;;  %v769_v49 = vld [vmem:[#allocation2 + $0x30] sm:$0xf]  ;;  %3053 = vmatpush.bf16.msrb.mxu0 %v11280_v43 }
  0xc6   : > { %v1185_v20 = vrot.slane %v1184_v9, 4  ;;  %v470_v21 = vor.u32 %v468_v10, %v467_v4  ;;  %764 = vst [vmem:[#allocation2 + $0x24] sm:$0xf] %v763_v19  ;;  %v593_v22 = vshrl.u32 %v407_v5, 16  ;;  %v596_v24 = vshll.u32 %v407_v5, 16 }
  0xc7   : > { %v767_v25 = vsel %vm12144_vm10, %v472_v17, %v766_v13  ;;  %v601_v3 = vshrl.u32 %v408_v14, 16  ;;  %v1362_v27 = vpack.c.b16 %v1333_v12, %v1332_v8  ;;  %v1180_v28 = vsel %vm12014_vm2, %v1175_v16, %v1179_v59 }
  0xc8   : > { %v471_v29 = vsel %vm12125_vm8, %v463_v61, %v470_v21  ;;  %768 = vst [vmem:[#allocation2 + $0x2c] sm:$0x1] %v767_v25  ;;  %v595_v31 = vrot.slane %v593_v22, 7  ;;  %v1190_v34 = vsel %vm12014_vm2, %v1185_v20, %v12223_v2  ;;  %v604_v37 = vshll.u32 %v408_v14, 16  ;;  %v825_v2 = vld [vmem:[#allocation2 + $0x90] sm:$0xf] }
  0xc9   : > { %765 = vst [vmem:[#allocation2 + $0x28] sm:$0xf] %v471_v29  ;;  %v603_v36 = vrot.slane %v601_v3, 7  ;;  %v474_v38 = vshrl.u32 %v393_v18, 16  ;;  %v477_v44 = vshll.u32 %v393_v18, 16  ;;  %v482_v45 = vshrl.u32 %v394_v23, 16 }
  0xca   : > { %1493 = vmatmul.bf16.gmra.mxu2 %v1369_v54  ;;  %v598_v39 = vor.u32 %v596_v24, %v595_v31  ;;  %v599_v40 = vrot.slane %v595_v31, 4  ;;  %v12244_v0 = vunpack.c.l.b16 %v1180_v28  ;;  %v485_v52 = vshll.u32 %v394_v23, 16 }
  0xcb   : > { %v606_v46 = vor.u32 %v604_v37, %v603_v36  ;;  %v608_v47 = vrot.slane %v603_v36, 4  ;;  %v476_v48 = vrot.slane %v474_v38, 7  ;;  %v484_v51 = vrot.slane %v482_v45, 7 }
  0xcc   : > { %v819_v50 = vsel %vm12134_vm9, %v598_v39, %v818_v26  ;;  %v610_v54 = vshrl.u32 %v409_v33, 16  ;;  %v1349_v4 = vunpack.c.l.b16 %v1190_v34  ;;  %v613_v9 = vshll.u32 %v409_v33, 16 }
  0xcd   : > { %1458 = vmatmul.bf16.gmra.mxu0 %v1362_v27  ;;  %v866_v55 = vld [vmem:[#allocation2 + $0x24] sm:$0xf]  ;;  %v607_v56 = vsel %vm12125_vm8, %v599_v40, %v606_v46  ;;  %820 = vst [vmem:[#allocation2 + $0x84] sm:$0xf] %v819_v50  ;;  %v823_v57 = vsel %vm12144_vm10, %v608_v47, %v822_v32  ;;  %v479_v58 = vor.u32 %v477_v44, %v476_v48  ;;  %v480_v59 = vrot.slane %v476_v48, 4 }
  0xce   : > { %1731 = vmatmul.bf16.gmra.mxu3 %v11222_v35  ;;  %v1000_v61 = vshrl.u32 %v866_v55, 16  ;;  %v1003_v62 = vshll.u32 %v866_v55, 16  ;;  %821 = vst [vmem:[#allocation2 + $0x88] sm:$0xf] %v607_v56  ;;  %v487_v63 = vor.u32 %v485_v52, %v484_v51  ;;  %v489_v1 = vrot.slane %v484_v51, 4 }
  0xcf   : > { %v911_v5 = vld [vmem:[#allocation2 + $0x2c] sm:$0x1]  ;;  %824 = vst [vmem:[#allocation2 + $0x8c] sm:$0x1] %v823_v57  ;;  %v770_v7 = vsel %vm12134_vm9, %v479_v58, %v769_v49  ;;  %v612_v8 = vrot.slane %v610_v54, 7  ;;  %v618_v25 = vshrl.u32 %v410_v60, 16  ;;  %v1370_v28 = vpack.c.b16 %v1349_v4, %v12244_v0 }
  0xd0   : > { %v867_v10 = vld [vmem:[#allocation2 + $0x28] sm:$0xf]  ;;  %v1002_v13 = vrot.slane %v1000_v61, 4  ;;  %v1005_v14 = vrot.slane %v1003_v62, 5  ;;  %v1019_v12 = vshll.u32 %v911_v5, 16  ;;  %v488_v17 = vsel %vm12125_vm8, %v480_v59, %v487_v63 }
  0xd1   : > { %v11215_v16 = vld [vmem:[#allocation2 + $0x24] sm:$0xff]  ;;  %v1009_v19 = vshll.u32 %v867_v10, 16  ;;  %v1013_v18 = vshrl.u32 %v867_v10, 16  ;;  %771 = vst [vmem:[#allocation2 + $0x30] sm:$0xf] %v770_v7  ;;  %v774_v20 = vsel %vm12144_vm10, %v489_v1, %v773_v53  ;;  %v615_v21 = vor.u32 %v613_v9, %v612_v8 }
  0xd2   : > { %v1006_v22 = vor.u32 %v1005_v14, %v1002_v13  ;;  %1696 = vmatmul.bf16.gmra.mxu1 %v11215_v16  ;;  %772 = vst [vmem:[#allocation2 + $0x34] sm:$0xf] %v488_v17  ;;  %v616_v24 = vrot.slane %v612_v8, 4  ;;  %v621_v23 = vshll.u32 %v410_v60, 16  ;;  %v12262_v32 = vrot.slane %v618_v25, 7  ;;  %v11247_v1 = vld [vmem:[#allocation7 + $0x98] sm:$0xff] }
  0xd3   : > { %v1011_v3 = vrot.slane %v1009_v19, 5  ;;  %v1015_v26 = vrot.slane %v1013_v18, 4  ;;  %775 = vst [vmem:[#allocation2 + $0x38] sm:$0x1] %v774_v20  ;;  %v826_v27 = vsel %vm12134_vm9, %v615_v21, %v825_v2  ;;  %v1021_v34 = vrot.slane %v1019_v12, 5  ;;  %2058 = vmatpush.bf16.msrb.mxu2 %v11247_v1  ;;  %v11271_v12 = vld [vmem:[#allocation7 + $0xd8] sm:$0xff] }
  0xd4   : > { %v1007_v29 = vrot.slane %v1006_v22, 4  ;;  %v882_v31 = vld [vmem:[#allocation2 + $0x84] sm:$0xf]  ;;  %827 = vst [vmem:[#allocation2 + $0x90] sm:$0xf] %v826_v27  ;;  %v623_v42 = vor.u32 %v621_v23, %v12262_v32  ;;  %v11279_v16 = vld [vmem:[#allocation7 + $0x118] sm:$0xff]  ;;  %2372 = vmatpush.bf16.msrb.mxu3 %v11271_v12 }
  0xd5   : > { %v1016_v33 = vor.u32 %v1015_v26, %v1011_v3  ;;  %v883_v35 = vld [vmem:[#allocation2 + $0x88] sm:$0xf]  ;;  %v1192_v36 = vshrl.u32 %v882_v31, 16  ;;  %v1195_v37 = vshll.u32 %v882_v31, 16  ;;  %v12272_v56 = vld [vmem:[%s11981_s13 + $0x20] sm:$0xf]  ;;  %3054 = vmatpush.bf16.msrb.mxu0 %v11279_v16 }
  0xd6   : > { %v1012_v38 = vsel %vm12014_vm2, %v1007_v29, %v1011_v3  ;;  %v919_v39 = vld [vmem:[#allocation2 + $0x8c] sm:$0x1]  ;;  %v1201_v40 = vshll.u32 %v883_v35, 16  ;;  %v1205_v41 = vshrl.u32 %v883_v35, 16  ;;  %v624_v50 = vsel %vm12125_vm8, %v616_v24, %v623_v42  ;;  %v11223_v60 = vld [vmem:[#allocation2 + $0x84] sm:$0xff] }
  0xd7   : > { %v1017_v43 = vrot.slane %v1016_v33, 4  ;;  %v1334_v44 = vunpack.c.l.b16 %v1012_v38  ;;  %v1194_v45 = vrot.slane %v1192_v36, 4  ;;  %v1197_v0 = vrot.slane %v1195_v37, 5  ;;  %828 = vst [vmem:[#allocation2 + $0x94] sm:$0xf] %v624_v50 }
  0xd8   : > { %v1203_v46 = vrot.slane %v1201_v40, 5  ;;  %v1207_v47 = vrot.slane %v1205_v41, 4  ;;  %v1211_v48 = vshll.u32 %v919_v39, 16  ;;  %v868_v49 = vld [vmem:[#allocation2 + $0x30] sm:$0xf]  ;;  %v625_v20 = vrot.slane %v12262_v32, 4 }
  0xd9   : > { %v1022_v51 = vsel %vm12014_vm2, %v1017_v43, %v1021_v34  ;;  %v1198_v52 = vor.u32 %v1197_v0, %v1194_v45  ;;  %v869_v53 = vld [vmem:[#allocation2 + $0x34] sm:$0xf]  ;;  %v1024_v54 = vshrl.u32 %v868_v49, 16  ;;  %v1027_v55 = vshll.u32 %v868_v49, 16  ;;  %v829_v63 = vld [vmem:[#allocation2 + $0x98] sm:$0x1] }
  0xda   : > { %1498 = vmatmul.bf16.gmra.mxu2 %v1370_v28  ;;  %v1335_v57 = vunpack.c.l.b16 %v1022_v51  ;;  %v1208_v58 = vor.u32 %v1207_v47, %v1203_v46  ;;  %v1213_v59 = vrot.slane %v1211_v48, 5  ;;  %v912_v61 = vld [vmem:[#allocation2 + $0x38] sm:$0x1]  ;;  %v1033_v62 = vshll.u32 %v869_v53, 16  ;;  %v11216_v24 = vld [vmem:[#allocation2 + $0x30] sm:$0xff] }
  0xdb   : > { %v1199_v2 = vrot.slane %v1198_v52, 4  ;;  %v1026_v4 = vrot.slane %v1024_v54, 4  ;;  %v1029_v5 = vrot.slane %v1027_v55, 5  ;;  %v1037_v7 = vshrl.u32 %v869_v53, 16  ;;  %v884_v8 = vld [vmem:[#allocation2 + $0x90] sm:$0xf] }
  0xdc   : > { %v1363_v9 = vpack.c.b16 %v1335_v57, %v1334_v44  ;;  %v1209_v10 = vrot.slane %v1208_v58, 4  ;;  %v1035_v13 = vrot.slane %v1033_v62, 5  ;;  %v1043_v14 = vshll.u32 %v912_v61, 16  ;;  %v396_v28 = vld [vmem:[%s11981_s13 + $0x24] sm:$0xf] }
  0xdd   : > { %v1204_v17 = vsel %vm12014_vm2, %v1199_v2, %v1203_v46  ;;  %v1030_v19 = vor.u32 %v1029_v5, %v1026_v4  ;;  %v1039_v18 = vrot.slane %v1037_v7, 4  ;;  %v1216_v22 = vshrl.u32 %v884_v8, 16  ;;  %v411_v42 = vld [vmem:[%s11981_s13 + $0x60] sm:$0xf]  ;;  %v776_v50 = vld [vmem:[#allocation2 + $0x3c] sm:$0xf] }
  0xde   : > { %1463 = vmatmul.bf16.gmra.mxu0 %v1363_v9  ;;  %v1214_v21 = vsel %vm12014_vm2, %v1209_v10, %v1213_v59  ;;  %1736 = vmatmul.bf16.gmra.mxu3 %v11223_v60  ;;  %v491_v25 = vshrl.u32 %v12272_v56, 16  ;;  %v1045_v23 = vrot.slane %v1043_v14, 5  ;;  %v830_v27 = vsel %vm12144_vm10, %v625_v20, %v829_v63  ;;  %v885_v31 = vld [vmem:[#allocation2 + $0x94] sm:$0xf]  ;;  %v780_v60 = vld [vmem:[#allocation2 + $0x44] sm:$0x1] }
  0xdf   : > { %v1031_v3 = vrot.slane %v1030_v19, 4  ;;  %v1040_v26 = vor.u32 %v1039_v18, %v1035_v13  ;;  %v1350_v29 = vunpack.c.l.b16 %v1204_v17  ;;  %831 = vst [vmem:[#allocation2 + $0x98] sm:$0x1] %v830_v27  ;;  %v1218_v32 = vrot.slane %v1216_v22, 4  ;;  %v412_v54 = vld [vmem:[%s11981_s13 + $0x64] sm:$0xf] }
  0xe0   : > { %v1219_v33 = vshll.u32 %v884_v8, 16  ;;  %v1351_v34 = vunpack.c.l.b16 %v1214_v21  ;;  %v1225_v37 = vshll.u32 %v885_v31, 16  ;;  %v1229_v40 = vshrl.u32 %v885_v31, 16  ;;  %v832_v62 = vld [vmem:[#allocation2 + $0x9c] sm:$0xf]  ;;  %v11224_v14 = vld [vmem:[#allocation2 + $0x90] sm:$0xff] }
  0xe1   : > { %v1036_v35 = vsel %vm12014_vm2, %v1031_v3, %v1035_v13  ;;  %v1041_v36 = vrot.slane %v1040_v26, 4  ;;  %v493_v41 = vrot.slane %v491_v25, 7  ;;  %v494_v45 = vshll.u32 %v12272_v56, 16  ;;  %v397_v5 = vld [vmem:[%s11981_s13 + $0x28] sm:$0xf]  ;;  %v11270_v27 = vld [vmem:[#allocation7 + $0xd0] sm:$0xff] }
  0xe2   : > { %v12285_v38 = vunpack.c.l.b16 %v1036_v35  ;;  %v1221_v39 = vrot.slane %v1219_v33, 5  ;;  %1701 = vmatmul.bf16.gmra.mxu1 %v11216_v24  ;;  %v1227_v44 = vrot.slane %v1225_v37, 5  ;;  %v499_v0 = vshrl.u32 %v396_v28, 16  ;;  %v836_v19 = vld [vmem:[#allocation2 + $0xa4] sm:$0x1]  ;;  %2373 = vmatpush.bf16.msrb.mxu3 %v11270_v27 }
  0xe3   : > { %v1046_v43 = vsel %vm12014_vm2, %v1041_v36, %v1045_v23  ;;  %v1231_v48 = vrot.slane %v1229_v40, 4  ;;  %v497_v49 = vrot.slane %v493_v41, 4  ;;  %v496_v51 = vor.u32 %v494_v45, %v493_v41  ;;  %v398_v18 = vld [vmem:[%s11981_s13 + $0x2c] sm:$0xf]  ;;  %v12304_v20 = vld [vmem:[%s11981_s13 + $0x68] sm:$0xf] }
  0xe4   : > { %v1337_v46 = vunpack.c.l.b16 %v1046_v43  ;;  %v1222_v47 = vor.u32 %v1221_v39, %v1218_v32  ;;  %v501_v52 = vrot.slane %v499_v0, 7  ;;  %v502_v53 = vshll.u32 %v396_v28, 16  ;;  %v11246_v23 = vld [vmem:[#allocation7 + $0x90] sm:$0xff]  ;;  %v414_v39 = vld [vmem:[%s11981_s13 + $0x6c] sm:$0xf] }
  0xe5   : > { %v627_v55 = vshrl.u32 %v411_v42, 16  ;;  %v1371_v57 = vpack.c.b16 %v1351_v34, %v1350_v29  ;;  %v1232_v59 = vor.u32 %v1231_v48, %v1227_v44  ;;  %v630_v61 = vshll.u32 %v411_v42, 16  ;;  %v11278_v28 = vld [vmem:[#allocation7 + $0x110] sm:$0xff]  ;;  %2059 = vmatpush.bf16.msrb.mxu2 %v11246_v23  ;;  %v783_v42 = vld [vmem:[#allocation2 + $0x48] sm:$0xf] }
  0xe6   : > { %v1223_v58 = vrot.slane %v1222_v47, 4  ;;  %v920_v63 = vld [vmem:[#allocation2 + $0x98] sm:$0x1]  ;;  %v504_v56 = vor.u32 %v502_v53, %v501_v52  ;;  %v506_v1 = vrot.slane %v501_v52, 4  ;;  %v777_v2 = vsel %vm12134_vm9, %v496_v51, %v776_v50  ;;  %v787_v43 = vld [vmem:[#allocation2 + $0x50] sm:$0x1]  ;;  %3055 = vmatpush.bf16.msrb.mxu0 %v11278_v28 }
  0xe7   : > { %v629_v4 = vrot.slane %v627_v55, 7  ;;  %v1233_v8 = vrot.slane %v1232_v59, 4  ;;  %v1235_v9 = vshll.u32 %v920_v63, 16  ;;  %778 = vst [vmem:[#allocation2 + $0x3c] sm:$0xf] %v777_v2  ;;  %v635_v10 = vshrl.u32 %v412_v54, 16 }
  0xe8   : > { %v1228_v7 = vsel %vm12014_vm2, %v1223_v58, %v1227_v44  ;;  %v1364_v13 = vpack.c.b16 %v1337_v46, %v12285_v38  ;;  %v505_v12 = vsel %vm12125_vm8, %v497_v49, %v504_v56  ;;  %v781_v16 = vsel %vm12144_vm10, %v506_v1, %v780_v60 }
  0xe9   : > { %v632_v17 = vor.u32 %v630_v61, %v629_v4  ;;  %v1237_v21 = vrot.slane %v1235_v9, 5  ;;  %779 = vst [vmem:[#allocation2 + $0x40] sm:$0xf] %v505_v12  ;;  %v633_v22 = vrot.slane %v629_v4, 4  ;;  %v637_v24 = vrot.slane %v635_v10, 7 }
  0xea   : > { %1503 = vmatmul.bf16.gmra.mxu2 %v1371_v57  ;;  %v638_v25 = vshll.u32 %v412_v54, 16  ;;  %v12306_v3 = vunpack.c.l.b16 %v1228_v7  ;;  %782 = vst [vmem:[#allocation2 + $0x44] sm:$0x1] %v781_v16  ;;  %v508_v29 = vshrl.u32 %v397_v5, 16  ;;  %v511_v34 = vshll.u32 %v397_v5, 16 }
  0xeb   : > { %v833_v26 = vsel %vm12134_vm9, %v632_v17, %v832_v62  ;;  %v1238_v31 = vsel %vm12014_vm2, %v1233_v8, %v1237_v21  ;;  %v642_v33 = vrot.slane %v637_v24, 4  ;;  %v516_v37 = vshrl.u32 %v398_v18, 16  ;;  %v839_v61 = vld [vmem:[#allocation2 + $0xa8] sm:$0xf] }
  0xec   : > { %v640_v32 = vor.u32 %v638_v25, %v637_v24  ;;  %834 = vst [vmem:[#allocation2 + $0x9c] sm:$0xf] %v833_v26  ;;  %v12312_v35 = vunpack.c.l.b16 %v1238_v31  ;;  %v510_v36 = vrot.slane %v508_v29, 7  ;;  %v519_v38 = vshll.u32 %v398_v18, 16 }
  0xed   : > { %v837_v41 = vsel %vm12144_vm10, %v642_v33, %v836_v19  ;;  %v644_v44 = vshrl.u32 %v12304_v20, 16  ;;  %v647_v45 = vshll.u32 %v12304_v20, 16  ;;  %v518_v49 = vrot.slane %v516_v37, 7 }
  0xee   : > { %1468 = vmatmul.bf16.gmra.mxu0 %v1364_v13  ;;  %1741 = vmatmul.bf16.gmra.mxu3 %v11224_v14  ;;  %v641_v40 = vsel %vm12125_vm8, %v633_v22, %v640_v32  ;;  %v1372_v0 = vpack.c.b16 %v12312_v35, %v12306_v3  ;;  %v870_v46 = vld [vmem:[#allocation2 + $0x3c] sm:$0xf]  ;;  %v513_v47 = vor.u32 %v511_v34, %v510_v36  ;;  %v514_v48 = vrot.slane %v510_v36, 4  ;;  %v843_v3 = vld [vmem:[#allocation2 + $0xb0] sm:$0x1] }
  0xef   : > { %835 = vst [vmem:[#allocation2 + $0xa0] sm:$0xf] %v641_v40  ;;  %v1048_v50 = vshrl.u32 %v870_v46, 16  ;;  %v1051_v51 = vshll.u32 %v870_v46, 16  ;;  %v646_v52 = vrot.slane %v644_v44, 7  ;;  %v652_v53 = vshrl.u32 %v414_v39, 16 }
  0xf0   : > { %838 = vst [vmem:[#allocation2 + $0xa4] sm:$0x1] %v837_v41  ;;  %v871_v54 = vld [vmem:[#allocation2 + $0x40] sm:$0xf]  ;;  %v521_v57 = vor.u32 %v519_v38, %v518_v49  ;;  %v523_v58 = vrot.slane %v518_v49, 4  ;;  %v784_v59 = vsel %vm12134_vm9, %v513_v47, %v783_v42  ;;  %v655_v60 = vshll.u32 %v414_v39, 16 }
  0xf1   : > { %v11217_v55 = vld [vmem:[#allocation2 + $0x3c] sm:$0xff]  ;;  %v913_v62 = vld [vmem:[#allocation2 + $0x44] sm:$0x1]  ;;  %v1050_v63 = vrot.slane %v1048_v50, 4  ;;  %v1053_v56 = vrot.slane %v1051_v51, 5  ;;  %v1057_v1 = vshll.u32 %v871_v54, 16  ;;  %v649_v9 = vor.u32 %v647_v45, %v646_v52 }
  0xf2   : > { %v1061_v2 = vshrl.u32 %v871_v54, 16  ;;  %v1067_v4 = vshll.u32 %v913_v62, 16  ;;  %1706 = vmatmul.bf16.gmra.mxu1 %v11217_v55  ;;  %v522_v7 = vsel %vm12125_vm8, %v514_v48, %v521_v57  ;;  %785 = vst [vmem:[#allocation2 + $0x48] sm:$0xf] %v784_v59  ;;  %v788_v8 = vsel %vm12144_vm10, %v523_v58, %v787_v43  ;;  %v11245_v45 = vld [vmem:[#allocation7 + $0x88] sm:$0xff]  ;;  %v11291_v62 = vld [vmem:[#allocation7 + $0x178] sm:$0xff] }
  0xf3   : > { %v886_v5 = vld [vmem:[#allocation2 + $0x9c] sm:$0xf]  ;;  %v1054_v10 = vor.u32 %v1053_v56, %v1050_v63  ;;  %v1059_v13 = vrot.slane %v1057_v1, 5  ;;  %786 = vst [vmem:[#allocation2 + $0x4c] sm:$0xf] %v522_v7  ;;  %v650_v19 = vrot.slane %v646_v52, 4  ;;  %v840_v25 = vsel %vm12134_vm9, %v649_v9, %v839_v61  ;;  %2060 = vmatpush.bf16.msrb.mxu2 %v11245_v45  ;;  %3476 = vmatpush.bf16.msrb.mxu1 %v11291_v62 }
  0xf4   : > { %v1063_v14 = vrot.slane %v1061_v2, 4  ;;  %v1240_v12 = vshrl.u32 %v886_v5, 16  ;;  %v1069_v16 = vrot.slane %v1067_v4, 5  ;;  %v1243_v17 = vshll.u32 %v886_v5, 16  ;;  %789 = vst [vmem:[#allocation2 + $0x50] sm:$0x1] %v788_v8 }
  0xf5   : > { %v654_v18 = vrot.slane %v652_v53, 7  ;;  %v1055_v20 = vrot.slane %v1054_v10, 4  ;;  %841 = vst [vmem:[#allocation2 + $0xa8] sm:$0xf] %v840_v25  ;;  %v11269_v46 = vld [vmem:[#allocation7 + $0xc8] sm:$0xff] }
  0xf6   : > { %v1064_v21 = vor.u32 %v1063_v14, %v1059_v13  ;;  %v887_v22 = vld [vmem:[#allocation2 + $0xa0] sm:$0xf]  ;;  %v1242_v24 = vrot.slane %v1240_v12, 4  ;;  %v1245_v23 = vrot.slane %v1243_v17, 5  ;;  %2374 = vmatpush.bf16.msrb.mxu3 %v11269_v46  ;;  %v11277_v61 = vld [vmem:[#allocation7 + $0x108] sm:$0xff] }
  0xf7   : > { %v921_v26 = vld [vmem:[#allocation2 + $0xa4] sm:$0x1]  ;;  %v1249_v27 = vshll.u32 %v887_v22, 16  ;;  %v1253_v28 = vshrl.u32 %v887_v22, 16  ;;  %v657_v29 = vor.u32 %v655_v60, %v654_v18  ;;  %v1060_v31 = vsel %vm12014_vm2, %v1055_v20, %v1059_v13  ;;  %v11225_v39 = vld [vmem:[#allocation2 + $0x9c] sm:$0xff]  ;;  %3056 = vmatpush.bf16.msrb.mxu0 %v11277_v61 }
  0xf8   : > { %v1065_v32 = vrot.slane %v1064_v21, 4  ;;  %v1259_v33 = vshll.u32 %v921_v26, 16  ;;  %v659_v34 = vrot.slane %v654_v18, 4  ;;  %v1338_v35 = vunpack.c.l.b16 %v1060_v31  ;;  %v399_v47 = vld [vmem:[%s11981_s13 + $0x30] sm:$0xf] }
  0xf9   : > { %v1246_v36 = vor.u32 %v1245_v23, %v1242_v24  ;;  %v1251_v37 = vrot.slane %v1249_v27, 5  ;;  %v1255_v38 = vrot.slane %v1253_v28, 4  ;;  %v872_v42 = vld [vmem:[#allocation2 + $0x48] sm:$0xf]  ;;  %v658_v43 = vsel %vm12125_vm8, %v650_v19, %v657_v29  ;;  %v400_v4 = vld [vmem:[%s11981_s13 + $0x34] sm:$0xf] }
  0xfa   : > { %1508 = vmatmul.bf16.gmra.mxu2 %v1372_v0  ;;  %v1070_v40 = vsel %vm12014_vm2, %v1065_v32, %v1069_v16  ;;  %v1261_v41 = vrot.slane %v1259_v33, 5  ;;  %v844_v44 = vsel %vm12144_vm10, %v659_v34, %v843_v3  ;;  %v873_v51 = vld [vmem:[#allocation2 + $0x4c] sm:$0xf]  ;;  %v1072_v52 = vshrl.u32 %v872_v42, 16  ;;  %842 = vst [vmem:[#allocation2 + $0xac] sm:$0xf] %v658_v43 }
  0xfb   : > { %v1339_v48 = vunpack.c.l.b16 %v1070_v40  ;;  %v1247_v49 = vrot.slane %v1246_v36, 4  ;;  %v1256_v50 = vor.u32 %v1255_v38, %v1251_v37  ;;  %v914_v0 = vld [vmem:[#allocation2 + $0x50] sm:$0x1]  ;;  %v1075_v53 = vshll.u32 %v872_v42, 16  ;;  %845 = vst [vmem:[#allocation2 + $0xb0] sm:$0x1] %v844_v44 }
  0xfc   : > { %v1081_v54 = vshll.u32 %v873_v51, 16  ;;  %v1085_v55 = vshrl.u32 %v873_v51, 16  ;;  %v1074_v60 = vrot.slane %v1072_v52, 4  ;;  %v1091_v7 = vshll.u32 %v914_v0, 16  ;;  %v888_v8 = vld [vmem:[#allocation2 + $0xa8] sm:$0xf] }
  0xfd   : > { %v1365_v57 = vpack.c.b16 %v1339_v48, %v1338_v35  ;;  %v1252_v58 = vsel %vm12014_vm2, %v1247_v49, %v1251_v37  ;;  %v1257_v59 = vrot.slane %v1256_v50, 4  ;;  %v1077_v56 = vrot.slane %v1075_v53, 5  ;;  %v11218_v9 = vld [vmem:[#allocation2 + $0x48] sm:$0xff]  ;;  %v415_v29 = vld [vmem:[%s11981_s13 + $0x70] sm:$0xf] }
  0xfe   : > { %v12342_v63 = vunpack.c.l.b16 %v1252_v58  ;;  %1746 = vmatmul.bf16.gmra.mxu3 %v11225_v39  ;;  %v1083_v1 = vrot.slane %v1081_v54, 5  ;;  %v1087_v2 = vrot.slane %v1085_v55, 4  ;;  %v525_v10 = vshrl.u32 %v399_v47, 16  ;;  %v790_v35 = vld [vmem:[#allocation2 + $0x54] sm:$0xf]  ;;  %v11290_v58 = vld [vmem:[#allocation7 + $0x170] sm:$0xff] }
  0xff   : > { %1473 = vmatmul.bf16.gmra.mxu0 %v1365_v57  ;;  %v1262_v5 = vsel %vm12014_vm2, %v1257_v59, %v1261_v41  ;;  %v528_v13 = vshll.u32 %v399_v47, 16  ;;  %v1078_v12 = vor.u32 %v1077_v56, %v1074_v60  ;;  %v1264_v17 = vshrl.u32 %v888_v8, 16  ;;  %v794_v40 = vld [vmem:[#allocation2 + $0x5c] sm:$0x1]  ;;  %v416_v45 = vld [vmem:[%s11981_s13 + $0x74] sm:$0xf]  ;;  %3477 = vmatpush.bf16.msrb.mxu1 %v11290_v58 }
 0x100   : > { %v1355_v14 = vunpack.c.l.b16 %v1262_v5  ;;  %v1088_v16 = vor.u32 %v1087_v2, %v1083_v1  ;;  %v1093_v19 = vrot.slane %v1091_v7, 5  ;;  %v1267_v18 = vshll.u32 %v888_v8, 16  ;;  %v846_v53 = vld [vmem:[#allocation2 + $0xb4] sm:$0xf]  ;;  %v11289_v8 = vld [vmem:[#allocation7 + $0x168] sm:$0xff] }
 0x101   : > { %v527_v20 = vrot.slane %v525_v10, 7  ;;  %v533_v21 = vshrl.u32 %v400_v4, 16  ;;  %v1079_v22 = vrot.slane %v1078_v12, 4  ;;  %v889_v25 = vld [vmem:[#allocation2 + $0xac] sm:$0xf]  ;;  %v1266_v3 = vrot.slane %v1264_v17, 4 }
 0x102   : > { %v1089_v24 = vrot.slane %v1088_v16, 4  ;;  %v1269_v26 = vrot.slane %v1267_v18, 5  ;;  %v1273_v23 = vshll.u32 %v889_v25, 16  ;;  %v1277_v27 = vshrl.u32 %v889_v25, 16  ;;  %1711 = vmatmul.bf16.gmra.mxu1 %v11218_v9  ;;  %v922_v33 = vld [vmem:[#allocation2 + $0xb0] sm:$0x1] }
 0x103   : > { %v530_v28 = vor.u32 %v528_v13, %v527_v20  ;;  %v1084_v31 = vsel %vm12014_vm2, %v1079_v22, %v1083_v1  ;;  %v535_v34 = vrot.slane %v533_v21, 7  ;;  %v1373_v36 = vpack.c.b16 %v1355_v14, %v12342_v63  ;;  %v11226_v61 = vld [vmem:[#allocation2 + $0xa8] sm:$0xff]  ;;  %v11244_v56 = vld [vmem:[#allocation7 + $0x80] sm:$0xff]  ;;  %v850_v10 = vld [vmem:[#allocation2 + $0xbc] sm:$0x1]  ;;  %3478 = vmatpush.bf16.msrb.mxu1 %v11289_v8 }
 0x104   : > { %v1094_v32 = vsel %vm12014_vm2, %v1089_v24, %v1093_v19  ;;  %v1270_v37 = vor.u32 %v1269_v26, %v1266_v3  ;;  %v1275_v38 = vrot.slane %v1273_v23, 5  ;;  %v531_v39 = vrot.slane %v527_v20, 4  ;;  %v11268_v1 = vld [vmem:[#allocation7 + $0xc0] sm:$0xff]  ;;  %2061 = vmatpush.bf16.msrb.mxu2 %v11244_v56  ;;  %v2489_v22 = vld [vmem:[#allocation2 + $0xc] sm:$0xf]  ;;  %v1449_v56 = vpop.f32.mrf.mxu0 }
 0x105   : > { %v1279_v41 = vrot.slane %v1277_v27, 4  ;;  %v1283_v42 = vshll.u32 %v922_v33, 16  ;;  %v536_v43 = vshll.u32 %v400_v4, 16  ;;  %v540_v44 = vrot.slane %v535_v34, 4  ;;  %v11276_v9 = vld [vmem:[#allocation7 + $0x100] sm:$0xff]  ;;  %2375 = vmatpush.bf16.msrb.mxu3 %v11268_v1  ;;  %v1682_v1 = vpop.f32.mrf.mxu1 }
 0x106   : > { %v1340_v46 = vunpack.c.l.b16 %v1084_v31  ;;  %v1341_v47 = vunpack.c.l.b16 %v1094_v32  ;;  %v791_v48 = vsel %vm12134_vm9, %v530_v28, %v790_v35  ;;  %v661_v49 = vshrl.u32 %v415_v29, 16  ;;  %3057 = vmatpush.bf16.msrb.mxu0 %v11276_v9  ;;  %v11288_v21 = vld [vmem:[#allocation7 + $0x160] sm:$0xff] }
 0x107   : > { %v1271_v50 = vrot.slane %v1270_v37, 4  ;;  %v1280_v51 = vor.u32 %v1279_v41, %v1275_v38  ;;  %v538_v52 = vor.u32 %v536_v43, %v535_v34  ;;  %792 = vst [vmem:[#allocation2 + $0x54] sm:$0xf] %v791_v48  ;;  %v795_v0 = vsel %vm12144_vm10, %v540_v44, %v794_v40  ;;  %v12370_v27 = vld [vmem:[#allocation2 + $0x10] sm:$0xf]  ;;  %3479 = vmatpush.bf16.msrb.mxu1 %v11288_v21  ;;  %v11287_v37 = vld [vmem:[#allocation7 + $0x158] sm:$0xff] }
 0x108   : > { %796 = vst [vmem:[#allocation2 + $0x5c] sm:$0x1] %v795_v0  ;;  %v663_v54 = vrot.slane %v661_v49, 7  ;;  %v664_v55 = vshll.u32 %v415_v29, 16  ;;  %v669_v57 = vshrl.u32 %v416_v45, 16  ;;  %v1285_v60 = vrot.slane %v1283_v42, 5 }
 0x109   : > { %v1281_v59 = vrot.slane %v1280_v51, 4  ;;  %v539_v62 = vsel %vm12125_vm8, %v531_v39, %v538_v52  ;;  %v672_v63 = vshll.u32 %v416_v45, 16  ;;  %v1366_v2 = vpack.c.b16 %v1341_v47, %v1340_v46  ;;  %v12374_v0 = vld [vmem:[#allocation2 + $0x14] sm:$0x1] }
 0x10a   : > { %1513 = vmatmul.bf16.gmra.mxu2 %v1373_v36  ;;  %793 = vst [vmem:[#allocation2 + $0x58] sm:$0xf] %v539_v62  ;;  %v666_v4 = vor.u32 %v664_v55, %v663_v54  ;;  %v667_v5 = vrot.slane %v663_v54, 4  ;;  %v671_v7 = vrot.slane %v669_v57, 7  ;;  %v1276_v16 = vsel %vm12014_vm2, %v1271_v50, %v1275_v38 }
 0x10b   : > { %v1286_v17 = vsel %vm12014_vm2, %v1281_v59, %v1285_v60  ;;  %v1356_v26 = vunpack.c.l.b16 %v1276_v16  ;;  %v2538_v33 = vshrl.u32 %v2489_v22, 16  ;;  %v2541_v38 = vshll.u32 %v2489_v22, 16  ;;  %3480 = vmatpush.bf16.msrb.mxu1 %v11287_v37 }
 0x10c   : > { %v674_v13 = vor.u32 %v672_v63, %v671_v7  ;;  %v676_v14 = vrot.slane %v671_v7, 4  ;;  %v847_v12 = vsel %vm12134_vm9, %v666_v4, %v846_v53  ;;  %v1357_v23 = vunpack.c.l.b16 %v1286_v17  ;;  %v11286_v4 = vld [vmem:[#allocation7 + $0x150] sm:$0xff] }
 0x10d   : > { %848 = vst [vmem:[#allocation2 + $0xb4] sm:$0xf] %v847_v12  ;;  %v2547_v40 = vshll.u32 %v12370_v27, 16  ;;  %v2551_v45 = vshrl.u32 %v12370_v27, 16  ;;  %v2540_v49 = vrot.slane %v2538_v33, 4  ;;  %v2543_v53 = vrot.slane %v2541_v38, 5 }
 0x10e   : > { %1751 = vmatmul.bf16.gmra.mxu3 %v11226_v61  ;;  %v874_v19 = vld [vmem:[#allocation2 + $0x54] sm:$0xf]  ;;  %v675_v18 = vsel %vm12125_vm8, %v667_v5, %v674_v13  ;;  %v851_v20 = vsel %vm12144_vm10, %v676_v14, %v850_v10  ;;  %v1374_v41 = vpack.c.b16 %v1357_v23, %v1356_v26  ;;  %v12380_v10 = vadd.f32 %v1682_v1, %v1449_v56  ;;  %v11315_v13 = vld [vmem:[#allocation7 + $0x1b8] sm:$0xff] }
 0x10f   : > { %1478 = vmatmul.bf16.gmra.mxu0 %v1366_v2  ;;  %v915_v24 = vld [vmem:[#allocation2 + $0x5c] sm:$0x1]  ;;  %v1096_v25 = vshrl.u32 %v874_v19, 16  ;;  %v1099_v3 = vshll.u32 %v874_v19, 16  ;;  %849 = vst [vmem:[#allocation2 + $0xb8] sm:$0xf] %v675_v18  ;;  %3481 = vmatpush.bf16.msrb.mxu1 %v11286_v4  ;;  %v2544_v18 = vor.u32 %v2543_v53, %v2540_v49 }
 0x110   : > { %852 = vst [vmem:[#allocation2 + $0xbc] sm:$0x1] %v851_v20  ;;  %v1115_v36 = vshll.u32 %v915_v24, 16  ;;  %v12376_v54 = vrot.slane %v2547_v40, 5  ;;  %v2553_v2 = vrot.slane %v2551_v45, 4  ;;  %v11323_v14 = vld [vmem:[#allocation7 + $0x1f8] sm:$0xff]  ;;  %3791 = vmatpush.bf16.msra.mxu2 %v11315_v13 }
 0x111   : > { %v875_v28 = vld [vmem:[#allocation2 + $0x58] sm:$0xf]  ;;  %v1098_v29 = vrot.slane %v1096_v25, 4  ;;  %v1101_v31 = vrot.slane %v1099_v3, 5  ;;  %v2557_v20 = vshll.u32 %v12374_v0, 16  ;;  %4473 = vmatpush.bf16.msra.mxu3 %v11323_v14  ;;  %v3237_v3 = vrot.slane %v12370_v27, 5 }
 0x112   : > { %v11219_v32 = vld [vmem:[#allocation2 + $0x54] sm:$0xff]  ;;  %v1105_v34 = vshll.u32 %v875_v28, 16  ;;  %v1109_v35 = vshrl.u32 %v875_v28, 16  ;;  %v1117_v51 = vrot.slane %v1115_v36, 5  ;;  %v2554_v24 = vor.u32 %v2553_v2, %v12376_v54  ;;  %v11331_v23 = vld [vmem:[#allocation7 + $0x238] sm:$0xff] }
 0x113   : > { %v1102_v39 = vor.u32 %v1101_v31, %v1098_v29  ;;  %1716 = vmatmul.bf16.gmra.mxu1 %v11219_v32  ;;  %v11285_v25 = vld [vmem:[#allocation7 + $0x148] sm:$0xff]  ;;  %v3171_v28 = vld [vmem:[#allocation2 + $0xc] sm:$0xe]  ;;  %v11284_v32 = vld [vmem:[#allocation7 + $0x140] sm:$0xff]  ;;  %v3239_v27 = vrot.slane %v3237_v3, 4  ;;  %v3240_v36 = vrot.slane %v12374_v0, 5  ;;  %4899 = vmatpush.bf16.msra.mxu0 %v11331_v23 }
 0x114   : > { %v1107_v42 = vrot.slane %v1105_v34, 5  ;;  %v1111_v43 = vrot.slane %v1109_v35, 4  ;;  %v890_v44 = vld [vmem:[#allocation2 + $0xb4] sm:$0xf]  ;;  %3482 = vmatpush.bf16.msrb.mxu1 %v11285_v25  ;;  %v10454_v33 = vrot.slane %v3171_v28, 9  ;;  %v2545_v35 = vrot.slane %v2544_v18, 4  ;;  %v12413_v28 = vpop.f32.mrf.mxu0 }
 0x115   : > { %v1103_v46 = vrot.slane %v1102_v39, 4  ;;  %v1288_v47 = vshrl.u32 %v890_v44, 16  ;;  %v1291_v48 = vshll.u32 %v890_v44, 16  ;;  %v2555_v38 = vrot.slane %v2554_v24, 4  ;;  %v2493_v45 = vld [vmem:[#allocation2 + $0x1c] sm:$0xf] }
 0x116   : > { %v1112_v50 = vor.u32 %v1111_v43, %v1107_v42  ;;  %v891_v52 = vld [vmem:[#allocation2 + $0xb8] sm:$0xf]  ;;  %v2559_v39 = vrot.slane %v2557_v20, 5  ;;  %v3238_v40 = vsel %vm12391_vm13, %v10454_v33, %v3237_v3  ;;  %v3241_v44 = vsel %vm12391_vm13, %v3239_v27, %v3240_v36  ;;  %v11624_v49 = vld [vmem:[#allocation2 + $0x4] sm:$0xf] }
 0x117   : > { %v1108_v55 = vsel %vm12014_vm2, %v1103_v46, %v1107_v42  ;;  %v923_v57 = vld [vmem:[#allocation2 + $0xbc] sm:$0x1]  ;;  %v1290_v58 = vrot.slane %v1288_v47, 4  ;;  %v1293_v59 = vrot.slane %v1291_v48, 5  ;;  %v1297_v60 = vshll.u32 %v891_v52, 16  ;;  %v11227_v9 = vld [vmem:[#allocation2 + $0xb4] sm:$0xff] }
 0x118   : > { %v1113_v61 = vrot.slane %v1112_v50, 4  ;;  %v1301_v62 = vshrl.u32 %v891_v52, 16  ;;  %v1307_v63 = vshll.u32 %v923_v57, 16  ;;  %v1342_v5 = vunpack.c.l.b16 %v1108_v55  ;;  %3483 = vmatpush.bf16.msrb.mxu1 %v11284_v32  ;;  %v1762_v48 = vld [vmem:[#allocation2] sm:$0xe]  ;;  %v12407_v55 = vpop.f32.mrf.mxu1 }
 0x119   : > { %v1294_v7 = vor.u32 %v1293_v59, %v1290_v58  ;;  %v1299_v8 = vrot.slane %v1297_v60, 5  ;;  %v3364_v46 = vunpack.c.l.b16 %v3238_v40  ;;  %v3365_v47 = vunpack.c.l.b16 %v3241_v44  ;;  %v11625_v4 = vld [vmem:[#allocation2 + $0x8] sm:$0x1]  ;;  %v3172_v20 = vld [vmem:[#allocation2 + $0x18] sm:$0xe] }
 0x11a   : > { %1518 = vmatmul.bf16.gmra.mxu2 %v1374_v41  ;;  %v1118_v12 = vsel %vm12014_vm2, %v1113_v61, %v1117_v51  ;;  %v1303_v16 = vrot.slane %v1301_v62, 4  ;;  %v1309_v22 = vrot.slane %v1307_v63, 5  ;;  %v2492_v41 = vld [vmem:[#allocation2 + $0x18] sm:$0xf]  ;;  %v1815_v50 = vrot.slane %v11624_v49, 5 }
 0x11b   : > { %v1343_v17 = vunpack.c.l.b16 %v1118_v12  ;;  %v1295_v19 = vrot.slane %v1294_v7, 4  ;;  %v2550_v51 = vsel %vm12014_vm2, %v2545_v35, %v12376_v54  ;;  %v2562_v52 = vshrl.u32 %v2492_v41, 16  ;;  %v2495_v3 = vld [vmem:[#allocation2 + $0x24] sm:$0xf] }
 0x11c   : > { %v1304_v21 = vor.u32 %v1303_v16, %v1299_v8  ;;  %v2565_v0 = vshll.u32 %v2492_v41, 16  ;;  %v2560_v53 = vsel %vm12014_vm2, %v2555_v38, %v2559_v39  ;;  %v3396_v57 = vpack.c.b16 %v3365_v47, %v3364_v46  ;;  %v1763_v47 = vld [vmem:[#allocation2 + $0xc] sm:$0xe] }
 0x11d   : > { %v1367_v26 = vpack.c.b16 %v1343_v17, %v1342_v5  ;;  %v1300_v29 = vsel %vm12014_vm2, %v1295_v19, %v1299_v8  ;;  %v2571_v58 = vshll.u32 %v2493_v45, 16  ;;  %v2575_v59 = vshrl.u32 %v2493_v45, 16  ;;  %v11252_v8 = vld [vmem:[#allocation2 + $0xc] sm:$0xff] }
 0x11e   : > { %1756 = vmatmul.bf16.gmra.mxu3 %v11227_v9  ;;  %v1305_v31 = vrot.slane %v1304_v21, 4  ;;  %v1358_v42 = vunpack.c.l.b16 %v1300_v29  ;;  %v10278_v61 = vrot.slane %v1762_v48, 9  ;;  %v2938_v62 = vunpack.c.l.b16 %v2550_v51  ;;  %v2494_v9 = vld [vmem:[#allocation2 + $0x20] sm:$0x1]  ;;  %v11626_v48 = vld [vmem:[#allocation2 + $0x10] sm:$0xf] }
 0x11f   : > { %1483 = vmatmul.bf16.gmra.mxu0 %v1367_v26  ;;  %v2939_v63 = vunpack.c.l.b16 %v2560_v53  ;;  %v2564_v56 = vrot.slane %v2562_v52, 4  ;;  %v2567_v1 = vrot.slane %v2565_v0, 5  ;;  %v1817_v2 = vrot.slane %v1815_v50, 4  ;;  %v2497_v0 = vld [vmem:[#allocation2 + $0x2c] sm:$0x1] }
 0x120   : > { %v1310_v37 = vsel %vm12014_vm2, %v1305_v31, %v1309_v22  ;;  %v1818_v54 = vrot.slane %v11625_v4, 5  ;;  %v2573_v5 = vrot.slane %v2571_v58, 5  ;;  %v2577_v7 = vrot.slane %v2575_v59, 4  ;;  %v12415_v31 = vld [vmem:[#allocation2 + $0x28] sm:$0xf] }
 0x121   : > { %v1359_v43 = vunpack.c.l.b16 %v1310_v37  ;;  %v1816_v13 = vsel %vm12391_vm13, %v10278_v61, %v1815_v50  ;;  %v2970_v14 = vpack.c.b16 %v2939_v63, %v2938_v62  ;;  %v2568_v12 = vor.u32 %v2567_v1, %v2564_v56  ;;  %v11627_v56 = vld [vmem:[#allocation2 + $0x14] sm:$0x1] }
 0x122   : > { %v1819_v16 = vsel %vm12391_vm13, %v1817_v2, %v1818_v54  ;;  %v2578_v17 = vor.u32 %v2577_v7, %v2573_v5  ;;  %v2581_v19 = vshll.u32 %v2494_v9, 16  ;;  %v3244_v18 = vrot.slane %v2493_v45, 5  ;;  %v11253_v2 = vld [vmem:[#allocation2 + $0x18] sm:$0xff]  ;;  %v11322_v7 = vld [vmem:[#allocation7 + $0x1f0] sm:$0xff] }
 0x123   : > { %v1375_v60 = vpack.c.b16 %v1359_v43, %v1358_v42  ;;  %3484 = vmatmul.bf16.vlgmr.msrb.gmra.mxu1 %v3396_v57  ;;  %v10455_v22 = vrot.slane %v3172_v20, 9  ;;  %v3247_v25 = vrot.slane %v2494_v9, 5  ;;  %v1942_v26 = vunpack.c.l.b16 %v1816_v13  ;;  %4474 = vmatpush.bf16.msra.mxu3 %v11322_v7 }
 0x124   : > { %v3246_v24 = vrot.slane %v3244_v18, 4  ;;  %v1943_v23 = vunpack.c.l.b16 %v1819_v16  ;;  %v2569_v29 = vrot.slane %v2568_v12, 4  ;;  %v2579_v33 = vrot.slane %v2578_v17, 4 }
 0x125   : > { %v2583_v35 = vrot.slane %v2581_v19, 5  ;;  %v3245_v27 = vsel %vm12391_vm13, %v10455_v22, %v3244_v18  ;;  %v2586_v39 = vshrl.u32 %v2495_v3, 16  ;;  %v2589_v40 = vshll.u32 %v2495_v3, 16  ;;  %v3173_v22 = vld [vmem:[#allocation2 + $0x24] sm:$0xe] }
 0x126   : > { %v3248_v36 = vsel %vm12391_vm13, %v3246_v24, %v3247_v25  ;;  %v3366_v37 = vunpack.c.l.b16 %v3245_v27  ;;  %v2595_v41 = vshll.u32 %v12415_v31, 16  ;;  %v2599_v42 = vshrl.u32 %v12415_v31, 16 }
 0x127   : > { %v3367_v38 = vunpack.c.l.b16 %v3248_v36  ;;  %v2574_v44 = vsel %vm12014_vm2, %v2569_v29, %v2573_v5  ;;  %v2584_v45 = vsel %vm12014_vm2, %v2579_v33, %v2583_v35  ;;  %v1974_v46 = vpack.c.b16 %v1943_v23, %v1942_v26  ;;  %v11314_v5 = vld [vmem:[#allocation7 + $0x1b0] sm:$0xff]  ;;  %v2498_v29 = vld [vmem:[#allocation2 + $0x30] sm:$0xf]  ;;  %v12443_v35 = vld [vmem:[#allocation2 + $0x34] sm:$0xf] }
 0x128   : > { %v1822_v49 = vrot.slane %v11626_v48, 5  ;;  %v2588_v50 = vrot.slane %v2586_v39, 4  ;;  %v2591_v51 = vrot.slane %v2589_v40, 5  ;;  %v12427_v53 = vrot.slane %v2595_v41, 5  ;;  %3792 = vmatpush.bf16.msra.mxu2 %v11314_v5  ;;  %v2500_v5 = vld [vmem:[#allocation2 + $0x38] sm:$0x1] }
 0x129   : > { %v3397_v43 = vpack.c.b16 %v3367_v38, %v3366_v37  ;;  %v2601_v57 = vrot.slane %v2599_v42, 4  ;;  %v2940_v58 = vunpack.c.l.b16 %v2574_v44  ;;  %v2941_v59 = vunpack.c.l.b16 %v2584_v45  ;;  %v1764_v44 = vld [vmem:[#allocation2 + $0x18] sm:$0xe] }
 0x12a   : > { %1523 = vmatmul.bf16.gmra.mxu2 %v1375_v60  ;;  %v10279_v61 = vrot.slane %v1763_v47, 9  ;;  %v1824_v63 = vrot.slane %v1822_v49, 4  ;;  %v1825_v1 = vrot.slane %v11627_v56, 5  ;;  %v2592_v4 = vor.u32 %v2591_v51, %v2588_v50  ;;  %v11628_v50 = vld [vmem:[#allocation2 + $0x1c] sm:$0xf] }
 0x12b   : > { %v2605_v54 = vshll.u32 %v2497_v0, 16  ;;  %v2602_v9 = vor.u32 %v2601_v57, %v12427_v53  ;;  %v2971_v13 = vpack.c.b16 %v2941_v59, %v2940_v58  ;;  %v3251_v16 = vrot.slane %v12415_v31, 5 }
 0x12c   : > { %v1823_v12 = vsel %vm12391_vm13, %v10279_v61, %v1822_v49  ;;  %v1826_v19 = vsel %vm12391_vm13, %v1824_v63, %v1825_v1  ;;  %v2593_v18 = vrot.slane %v2592_v4, 4  ;;  %v10456_v3 = vrot.slane %v3173_v22, 9  ;;  %v11629_v4 = vld [vmem:[#allocation2 + $0x20] sm:$0x1] }
 0x12d   : > { %v2607_v20 = vrot.slane %v2605_v54, 5  ;;  %v2603_v25 = vrot.slane %v2602_v9, 4  ;;  %v3253_v26 = vrot.slane %v3251_v16, 4  ;;  %v3254_v23 = vrot.slane %v2497_v0, 5  ;;  %v11254_v9 = vld [vmem:[#allocation2 + $0x24] sm:$0xff] }
 0x12e   : > { %2376 = vmatmul.bf16.vlgmr.msrb.gmra.mxu3 %v11252_v8  ;;  %v1687_v21 = vpop.f32.mrf.mxu1  ;;  %v3252_v31 = vsel %vm12391_vm13, %v10456_v3, %v3251_v16  ;;  %v1944_v27 = vunpack.c.l.b16 %v1823_v12  ;;  %v1945_v36 = vunpack.c.l.b16 %v1826_v19  ;;  %v2598_v41 = vsel %vm12014_vm2, %v2593_v18, %v12427_v53  ;;  %v2501_v3 = vld [vmem:[#allocation2 + $0x3c] sm:$0xf] }
 0x12f   : > { %3058 = vmatmul.bf16.vlgmr.msrb.gmra.mxu0 %v2970_v14  ;;  %v3368_v38 = vunpack.c.l.b16 %v3252_v31  ;;  %v2608_v42 = vsel %vm12014_vm2, %v2603_v25, %v2607_v20  ;;  %v2619_v47 = vshll.u32 %v12443_v35, 16  ;;  %v2623_v48 = vshrl.u32 %v12443_v35, 16  ;;  %v3174_v25 = vld [vmem:[#allocation2 + $0x30] sm:$0xe] }
 0x130   : > { %v1829_v51 = vrot.slane %v11628_v50, 5  ;;  %v1975_v0 = vpack.c.b16 %v1945_v36, %v1944_v27  ;;  %v10280_v57 = vrot.slane %v1764_v44, 9  ;;  %v2942_v58 = vunpack.c.l.b16 %v2598_v41 }
 0x131   : > { %v1722_v32 = vpop.f32.mrf.mxu3  ;;  %v2943_v53 = vunpack.c.l.b16 %v2608_v42  ;;  %v2621_v63 = vrot.slane %v2619_v47, 5  ;;  %v2625_v56 = vrot.slane %v2623_v48, 4  ;;  %v1832_v54 = vrot.slane %v11629_v4, 5 }
 0x132   : > { %v2629_v19 = vshll.u32 %v2500_v5, 16  ;;  %v3261_v31 = vrot.slane %v2500_v5, 5  ;;  %v2634_v41 = vshrl.u32 %v2501_v3, 16  ;;  %v2637_v42 = vshll.u32 %v2501_v3, 16 }
 0x133   : > { %3489 = vmatmul.bf16.gmra.mxu1 %v3397_v43  ;;  %v2610_v43 = vshrl.u32 %v2498_v29, 16  ;;  %v2626_v16 = vor.u32 %v2625_v56, %v2621_v63  ;;  %v1765_v56 = vld [vmem:[#allocation2 + $0x24] sm:$0xe] }
 0x135   : > { %v2612_v61 = vrot.slane %v2610_v43, 4 }
 0x136   : > { %v1689_v52 = vpop.f32.mrf.mxu1 }
 0x139   : > { %v1724_v60 = vpop.f32.mrf.mxu3 }
 0x13a   : > { %2062 = vmatmul.bf16.vlgmr.msrb.gmra.mxu2 %v1974_v46  ;;  %v1454_v62 = vpop.f32.mrf.mxu0  ;;  %v2613_v46 = vshll.u32 %v2498_v29, 16 }
 0x13b   : > { %v12429_v8 = vadd.f32 %v1687_v21, %v1454_v62  ;;  %v11330_v21 = vld [vmem:[#allocation7 + $0x230] sm:$0xff] }
 0x13c   : > { %4900 = vmatpush.bf16.msra.mxu0 %v11330_v21  ;;  %v2615_v62 = vrot.slane %v2613_v46, 5  ;;  %v3258_v21 = vrot.slane %v12443_v35, 5 }
 0x13d   : > { %v1489_v14 = vpop.f32.mrf.mxu2 }
 0x13e   : > { %v12435_v17 = vadd.f32 %v1722_v32, %v1489_v14  ;;  %2381 = vmatmul.bf16.gmra.mxu3 %v11253_v2  ;;  %v1692_v24 = vpop.f32.mrf.mxu1  ;;  %v3255_v32 = vsel %vm12391_vm13, %v3253_v26, %v3254_v23  ;;  %v1831_v2 = vrot.slane %v1829_v51, 4  ;;  %v2972_v14 = vpack.c.b16 %v2943_v53, %v2942_v58 }
 0x13f   : > { %3063 = vmatmul.bf16.gmra.mxu0 %v2971_v13  ;;  %v3369_v39 = vunpack.c.l.b16 %v3255_v32  ;;  %v1830_v13 = vsel %vm12391_vm13, %v10280_v57, %v1829_v51  ;;  %v2616_v12 = vor.u32 %v2615_v62, %v2612_v61  ;;  %v10457_v23 = vrot.slane %v3174_v25, 9  ;;  %v12465_v32 = vld [vmem:[#allocation2 + $0x40] sm:$0xf] }
 0x140   : > { %v1833_v20 = vsel %vm12391_vm13, %v1831_v2, %v1832_v54  ;;  %v3260_v29 = vrot.slane %v3258_v21, 4  ;;  %v2643_v46 = vshll.u32 %v12465_v32, 16  ;;  %v2647_v47 = vshrl.u32 %v12465_v32, 16 }
 0x141   : > { %v1727_v33 = vpop.f32.mrf.mxu3  ;;  %v3398_v45 = vpack.c.b16 %v3369_v39, %v3368_v38  ;;  %v1947_v27 = vunpack.c.l.b16 %v1833_v20  ;;  %v2617_v36 = vrot.slane %v2616_v12, 4  ;;  %v2631_v38 = vrot.slane %v2629_v19, 5  ;;  %v11631_v12 = vld [vmem:[#allocation2 + $0x2c] sm:$0x1]  ;;  %v11255_v19 = vld [vmem:[#allocation2 + $0x30] sm:$0xff]  ;;  %v11313_v20 = vld [vmem:[#allocation7 + $0x1a8] sm:$0xff] }
 0x142   : > { %v1456_v37 = vpop.f32.mrf.mxu0  ;;  %v3262_v35 = vsel %vm12391_vm13, %v3260_v29, %v3261_v31  ;;  %v2636_v61 = vrot.slane %v2634_v41, 4  ;;  %v2639_v2 = vrot.slane %v2637_v42, 5  ;;  %v12481_v4 = vrot.slane %v2643_v46, 5  ;;  %3793 = vmatpush.bf16.msra.mxu2 %v11313_v20  ;;  %v2504_v46 = vld [vmem:[#allocation2 + $0x48] sm:$0xf] }
 0x143   : > { %v12445_v40 = vadd.f32 %v1689_v52, %v1456_v37  ;;  %3494 = vmatmul.bf16.gmra.mxu1 %v3398_v45  ;;  %v2627_v37 = vrot.slane %v2626_v16, 4  ;;  %v3371_v45 = vunpack.c.l.b16 %v3262_v35  ;;  %v2622_v58 = vsel %vm12014_vm2, %v2617_v36, %v2621_v63  ;;  %v11329_v35 = vld [vmem:[#allocation7 + $0x228] sm:$0xff] }
 0x144   : > { %v2944_v5 = vunpack.c.l.b16 %v2622_v58  ;;  %v1839_v16 = vrot.slane %v11631_v12, 5  ;;  %4901 = vmatpush.bf16.msra.mxu0 %v11329_v35 }
 0x145   : > { %v1491_v49 = vpop.f32.mrf.mxu2  ;;  %v2632_v53 = vsel %vm12014_vm2, %v2627_v37, %v2631_v38 }
 0x146   : > { %v12454_v52 = vadd.f32 %v1724_v60, %v1491_v49  ;;  %v1694_v59 = vpop.f32.mrf.mxu1 }
 0x149   : > { %v1729_v1 = vpop.f32.mrf.mxu3 }
 0x14a   : > { %2067 = vmatmul.bf16.gmra.mxu2 %v1975_v0  ;;  %v1459_v7 = vpop.f32.mrf.mxu0  ;;  %v11630_v0 = vld [vmem:[#allocation2 + $0x28] sm:$0xf] }
 0x14b   : > { %v12456_v60 = vadd.f32 %v1692_v24, %v1459_v7  ;;  %v1946_v24 = vunpack.c.l.b16 %v1830_v13  ;;  %v1836_v57 = vrot.slane %v11630_v0, 5  ;;  %v2945_v7 = vunpack.c.l.b16 %v2632_v53 }
 0x14d   : > { %v1494_v18 = vpop.f32.mrf.mxu2  ;;  %v1976_v49 = vpack.c.b16 %v1947_v27, %v1946_v24  ;;  %v1838_v63 = vrot.slane %v1836_v57, 4  ;;  %v3265_v27 = vrot.slane %v12465_v32, 5 }
 0x14e   : > { %v12463_v22 = vadd.f32 %v1727_v33, %v1494_v18  ;;  %2386 = vmatmul.bf16.gmra.mxu3 %v11254_v9  ;;  %v3259_v33 = vsel %vm12391_vm13, %v10457_v23, %v3258_v21  ;;  %v2503_v9 = vld [vmem:[#allocation2 + $0x44] sm:$0x1]  ;;  %v2640_v18 = vor.u32 %v2639_v2, %v2636_v61  ;;  %v11321_v21 = vld [vmem:[#allocation7 + $0x1e8] sm:$0xff]  ;;  %v2973_v23 = vpack.c.b16 %v2945_v7, %v2944_v5 }
 0x14f   : > { %v1697_v26 = vpop.f32.mrf.mxu1  ;;  %3068 = vmatmul.bf16.gmra.mxu0 %v2972_v14  ;;  %v3370_v44 = vunpack.c.l.b16 %v3259_v33  ;;  %v10281_v14 = vrot.slane %v1765_v56, 9  ;;  %v2653_v3 = vshll.u32 %v2503_v9, 16  ;;  %4475 = vmatpush.bf16.msra.mxu3 %v11321_v21  ;;  %v1840_v37 = vsel %vm12391_vm13, %v1838_v63, %v1839_v16  ;;  %v1766_v16 = vld [vmem:[#allocation2 + $0x30] sm:$0xe] }
 0x150   : > { %v2641_v38 = vrot.slane %v2640_v18, 4  ;;  %v2658_v56 = vshrl.u32 %v2504_v46, 16  ;;  %v2661_v2 = vshll.u32 %v2504_v46, 16 }
 0x151   : > { %v1732_v39 = vpop.f32.mrf.mxu3  ;;  %v3399_v50 = vpack.c.b16 %v3371_v45, %v3370_v44  ;;  %v1837_v31 = vsel %vm12391_vm13, %v10281_v14, %v1836_v57  ;;  %v2655_v42 = vrot.slane %v2653_v3, 5  ;;  %v3267_v44 = vrot.slane %v3265_v27, 4 }
 0x152   : > { %v1461_v43 = vpop.f32.mrf.mxu0  ;;  %v3268_v45 = vrot.slane %v2503_v9, 5  ;;  %v2646_v53 = vsel %vm12014_vm2, %v2641_v38, %v12481_v4  ;;  %v2660_v21 = vrot.slane %v2658_v56, 4  ;;  %v11633_v38 = vld [vmem:[#allocation2 + $0x38] sm:$0x1] }
 0x153   : > { %v12473_v48 = vadd.f32 %v1694_v59, %v1461_v43  ;;  %v2649_v59 = vrot.slane %v2647_v47, 4  ;;  %3499 = vmatmul.bf16.gmra.mxu1 %v3399_v50  ;;  %v1948_v50 = vunpack.c.l.b16 %v1837_v31  ;;  %v10282_v31 = vrot.slane %v1766_v16, 9  ;;  %v12518_v16 = vld [vmem:[#allocation2 + $0x58] sm:$0xf] }
 0x155   : > { %v1496_v51 = vpop.f32.mrf.mxu2 }
 0x156   : > { %v12479_v62 = vadd.f32 %v1729_v1, %v1496_v51  ;;  %v2650_v1 = vor.u32 %v2649_v59, %v12481_v4  ;;  %v1949_v51 = vunpack.c.l.b16 %v1840_v37 }
 0x157   : > { %v1699_v54 = vpop.f32.mrf.mxu1 }
 0x158   : > { %v2651_v33 = vrot.slane %v2650_v1, 4  ;;  %v1977_v12 = vpack.c.b16 %v1949_v51, %v1948_v50  ;;  %v2946_v1 = vunpack.c.l.b16 %v2646_v53  ;;  %v3176_v50 = vld [vmem:[#allocation2 + $0x48] sm:$0xe] }
 0x159   : > { %v1734_v13 = vpop.f32.mrf.mxu3 }
 0x15a   : > { %2072 = vmatmul.bf16.gmra.mxu2 %v1976_v49  ;;  %v2505_v49 = vld [vmem:[#allocation2 + $0x4c] sm:$0xf]  ;;  %v2656_v61 = vsel %vm12014_vm2, %v2651_v33, %v2655_v42  ;;  %v1846_v33 = vrot.slane %v11633_v38, 5  ;;  %v2695_v38 = vshrl.u32 %v12518_v16, 16 }
 0x15b   : > { %v1464_v25 = vpop.f32.mrf.mxu0  ;;  %v2667_v7 = vshll.u32 %v2505_v49, 16  ;;  %v2671_v9 = vshrl.u32 %v2505_v49, 16  ;;  %v2947_v20 = vunpack.c.l.b16 %v2656_v61  ;;  %v3272_v46 = vrot.slane %v2505_v49, 5 }
 0x15c   : > { %v12484_v24 = vadd.f32 %v1697_v26, %v1464_v25  ;;  %v3175_v26 = vld [vmem:[#allocation2 + $0x3c] sm:$0xe]  ;;  %v2663_v25 = vrot.slane %v2661_v2, 5 }
 0x15d   : > { %v1499_v29 = vpop.f32.mrf.mxu2  ;;  %v10458_v43 = vrot.slane %v3175_v26, 9  ;;  %v2669_v3 = vrot.slane %v2667_v7, 5  ;;  %v2974_v35 = vpack.c.b16 %v2947_v20, %v2946_v1 }
 0x15e   : > { %v12489_v36 = vadd.f32 %v1732_v39, %v1499_v29  ;;  %2391 = vmatmul.bf16.gmra.mxu3 %v11255_v19  ;;  %v3269_v39 = vsel %vm12391_vm13, %v3267_v44, %v3268_v45  ;;  %v11632_v19 = vld [vmem:[#allocation2 + $0x34] sm:$0xf]  ;;  %v2506_v29 = vld [vmem:[#allocation2 + $0x50] sm:$0x1]  ;;  %v2664_v42 = vor.u32 %v2663_v25, %v2660_v21  ;;  %v1767_v21 = vld [vmem:[#allocation2 + $0x3c] sm:$0xe] }
 0x15f   : > { %v1702_v41 = vpop.f32.mrf.mxu1  ;;  %3073 = vmatmul.bf16.gmra.mxu0 %v2973_v23  ;;  %v3266_v32 = vsel %vm12391_vm13, %v10458_v43, %v3265_v27  ;;  %v3373_v57 = vunpack.c.l.b16 %v3269_v39  ;;  %v1843_v18 = vrot.slane %v11632_v19, 5  ;;  %v2673_v23 = vrot.slane %v2671_v9, 4  ;;  %v11256_v27 = vld [vmem:[#allocation2 + $0x3c] sm:$0xff] }
 0x160   : > { %v3372_v0 = vunpack.c.l.b16 %v3266_v32  ;;  %v2677_v44 = vshll.u32 %v2506_v29, 16  ;;  %v2665_v53 = vrot.slane %v2664_v42, 4 }
 0x161   : > { %v1737_v47 = vpop.f32.mrf.mxu3  ;;  %v2674_v43 = vor.u32 %v2673_v23, %v2669_v3  ;;  %v1844_v39 = vsel %vm12391_vm13, %v10282_v31, %v1843_v18 }
 0x162   : > { %v3400_v5 = vpack.c.b16 %v3373_v57, %v3372_v0  ;;  %v10459_v0 = vrot.slane %v3176_v50, 9  ;;  %v3274_v57 = vrot.slane %v3272_v46, 4  ;;  %v2679_v56 = vrot.slane %v2677_v44, 5  ;;  %v2509_v50 = vld [vmem:[#allocation2 + $0x5c] sm:$0x1] }
 0x163   : > { %v1466_v58 = vpop.f32.mrf.mxu0  ;;  %v2675_v61 = vrot.slane %v2674_v43, 4  ;;  %v2670_v25 = vsel %vm12014_vm2, %v2665_v53, %v2669_v3  ;;  %v11635_v43 = vld [vmem:[#allocation2 + $0x44] sm:$0x1]  ;;  %v11257_v53 = vld [vmem:[#allocation2 + $0x48] sm:$0xff] }
 0x164   : > { %v12502_v59 = vadd.f32 %v1699_v54, %v1466_v58  ;;  %3504 = vmatmul.bf16.gmra.mxu1 %v3400_v5  ;;  %v3275_v58 = vrot.slane %v2506_v29, 5  ;;  %v1950_v5 = vunpack.c.l.b16 %v1844_v39  ;;  %v1853_v44 = vrot.slane %v11635_v43, 5 }
 0x165   : > { %v1501_v14 = vpop.f32.mrf.mxu2  ;;  %v2680_v23 = vsel %vm12014_vm2, %v2675_v61, %v2679_v56  ;;  %v2948_v3 = vunpack.c.l.b16 %v2670_v25  ;;  %v11312_v61 = vld [vmem:[#allocation7 + $0x1a0] sm:$0xff] }
 0x166   : > { %v12504_v63 = vadd.f32 %v1734_v13, %v1501_v14  ;;  %v1845_v13 = vrot.slane %v1843_v18, 4  ;;  %v3276_v49 = vsel %vm12391_vm13, %v3274_v57, %v3275_v58  ;;  %v11634_v18 = vld [vmem:[#allocation2 + $0x40] sm:$0xf]  ;;  %v2697_v58 = vrot.slane %v2695_v38, 4  ;;  %3794 = vmatpush.bf16.msra.mxu2 %v11312_v61  ;;  %v11328_v25 = vld [vmem:[#allocation7 + $0x220] sm:$0xff] }
 0x167   : > { %v1704_v4 = vpop.f32.mrf.mxu1  ;;  %v3375_v14 = vunpack.c.l.b16 %v3276_v49  ;;  %v1850_v1 = vrot.slane %v11634_v18, 5  ;;  %v3279_v18 = vrot.slane %v12518_v16, 5  ;;  %4902 = vmatpush.bf16.msra.mxu0 %v11328_v25  ;;  %v2512_v25 = vld [vmem:[#allocation2 + $0x68] sm:$0x1] }
 0x168   : > { %v1847_v51 = vsel %vm12391_vm13, %v1845_v13, %v1846_v33  ;;  %v2691_v13 = vshll.u32 %v12518_v16, 16 }
 0x169   : > { %v1739_v54 = vpop.f32.mrf.mxu3  ;;  %v1951_v7 = vunpack.c.l.b16 %v1847_v51  ;;  %v1852_v42 = vrot.slane %v1850_v1, 4 }
 0x16a   : > { %2077 = vmatmul.bf16.gmra.mxu2 %v1977_v12  ;;  %v2507_v12 = vld [vmem:[#allocation2 + $0x54] sm:$0xf]  ;;  %v2693_v57 = vrot.slane %v2691_v13, 5 }
 0x16b   : > { %v1469_v37 = vpop.f32.mrf.mxu0  ;;  %v1854_v49 = vsel %vm12391_vm13, %v1852_v42, %v1853_v44 }
 0x16c   : > { %v12506_v26 = vadd.f32 %v1702_v41, %v1469_v37  ;;  %v2685_v37 = vshll.u32 %v2507_v12, 16  ;;  %v1953_v13 = vunpack.c.l.b16 %v1854_v49 }
 0x16d   : > { %v1504_v45 = vpop.f32.mrf.mxu2 }
 0x16e   : > { %v12508_v32 = vadd.f32 %v1737_v47, %v1504_v45  ;;  %2396 = vmatmul.bf16.gmra.mxu3 %v11256_v27  ;;  %v3273_v47 = vsel %vm12391_vm13, %v10459_v0, %v3272_v46  ;;  %v2682_v27 = vshrl.u32 %v2507_v12, 16  ;;  %v2949_v45 = vunpack.c.l.b16 %v2680_v23  ;;  %v3177_v23 = vld [vmem:[#allocation2 + $0x54] sm:$0xe] }
 0x16f   : > { %3078 = vmatmul.bf16.gmra.mxu0 %v2974_v35  ;;  %v1707_v41 = vpop.f32.mrf.mxu1  ;;  %v3374_v9 = vunpack.c.l.b16 %v3273_v47  ;;  %v1978_v35 = vpack.c.b16 %v1951_v7, %v1950_v5  ;;  %v2687_v0 = vrot.slane %v2685_v37, 5  ;;  %v2701_v7 = vshll.u32 %v2509_v50, 16 }
 0x170   : > { %v2684_v51 = vrot.slane %v2682_v27, 4  ;;  %v2975_v5 = vpack.c.b16 %v2949_v45, %v2948_v3  ;;  %v2510_v27 = vld [vmem:[#allocation2 + $0x60] sm:$0xf] }
 0x171   : > { %v1742_v2 = vpop.f32.mrf.mxu3  ;;  %v3401_v29 = vpack.c.b16 %v3375_v14, %v3374_v9  ;;  %v2706_v45 = vshrl.u32 %v2510_v27, 16 }
 0x172   : > { %v2688_v12 = vor.u32 %v2687_v0, %v2684_v51 }
 0x173   : > { %v1471_v19 = vpop.f32.mrf.mxu0 }
 0x174   : > { %v12520_v20 = vadd.f32 %v1704_v4, %v1471_v19  ;;  %v10283_v4 = vrot.slane %v1767_v21, 9  ;;  %3509 = vmatmul.bf16.gmra.mxu1 %v3401_v29  ;;  %v2698_v19 = vor.u32 %v2697_v58, %v2693_v57  ;;  %v3281_v29 = vrot.slane %v3279_v18, 4 }
 0x175   : > { %v1506_v31 = vpop.f32.mrf.mxu2  ;;  %v2689_v42 = vrot.slane %v2688_v12, 4 }
 0x176   : > { %v12528_v33 = vadd.f32 %v1739_v54, %v1506_v31  ;;  %v11320_v54 = vld [vmem:[#allocation7 + $0x1e0] sm:$0xff]  ;;  %v1851_v47 = vsel %vm12391_vm13, %v10283_v4, %v1850_v1  ;;  %v10460_v1 = vrot.slane %v3177_v23, 9  ;;  %v3282_v31 = vrot.slane %v2509_v50, 5 }
 0x177   : > { %v1709_v46 = vpop.f32.mrf.mxu1  ;;  %4476 = vmatpush.bf16.msra.mxu3 %v11320_v54  ;;  %v1952_v37 = vunpack.c.l.b16 %v1851_v47  ;;  %v2699_v43 = vrot.slane %v2698_v19, 4  ;;  %v2709_v50 = vshll.u32 %v2510_v27, 16  ;;  %v2694_v47 = vsel %vm12014_vm2, %v2689_v42, %v2693_v57 }
 0x178   : > { %15543 = vst [vmem:[#allocation14_spill] sm:$0xff] %v12528_v33  ;;  %v3283_v16 = vsel %vm12391_vm13, %v3281_v29, %v3282_v31  ;;  %v2708_v19 = vrot.slane %v2706_v45, 4  ;;  %v2950_v29 = vunpack.c.l.b16 %v2694_v47 }
 0x179   : > { %v1744_v39 = vpop.f32.mrf.mxu3  ;;  %v3377_v3 = vunpack.c.l.b16 %v3283_v16  ;;  %v1979_v54 = vpack.c.b16 %v1953_v13, %v1952_v37  ;;  %v11637_v13 = vld [vmem:[#allocation2 + $0x50] sm:$0x1] }
 0x17a   : > { %2082 = vmatmul.bf16.gmra.mxu2 %v1978_v35  ;;  %v2703_v35 = vrot.slane %v2701_v7, 5  ;;  %v1768_v7 = vld [vmem:[#allocation2 + $0x48] sm:$0xe] }
 0x17b   : > { %v10284_v37 = vrot.slane %v1768_v7, 9 }
 0x17c   : > { %v1474_v56 = vpop.f32.mrf.mxu0  ;;  %v2704_v49 = vsel %vm12014_vm2, %v2699_v43, %v2703_v35  ;;  %v1860_v35 = vrot.slane %v11637_v13, 5  ;;  %v2725_v43 = vshll.u32 %v2512_v25, 16 }
 0x17d   : > { %v1509_v9 = vpop.f32.mrf.mxu2  ;;  %v12534_v14 = vadd.f32 %v1707_v41, %v1474_v56  ;;  %v12539_v41 = vld [vmem:[#allocation2 + $0x64] sm:$0xf] }
 0x17e   : > { %v12537_v21 = vadd.f32 %v1742_v2, %v1509_v9  ;;  %2401 = vmatmul.bf16.gmra.mxu3 %v11257_v53  ;;  %v3280_v2 = vsel %vm12391_vm13, %v10460_v1, %v3279_v18  ;;  %v2715_v51 = vshll.u32 %v12539_v41, 16  ;;  %v2719_v0 = vshrl.u32 %v12539_v41, 16  ;;  %v11636_v9 = vld [vmem:[#allocation2 + $0x4c] sm:$0xf] }
 0x17f   : > { %3083 = vmatmul.bf16.gmra.mxu0 %v2975_v5  ;;  %v1712_v38 = vpop.f32.mrf.mxu1  ;;  %v3376_v44 = vunpack.c.l.b16 %v3280_v2  ;;  %v1857_v12 = vrot.slane %v11636_v9, 5  ;;  %v2711_v18 = vrot.slane %v2709_v50, 5  ;;  %v3289_v9 = vrot.slane %v2512_v25, 5 }
 0x180   : > { %15544 = vst [vmem:[#allocation15_spill] sm:$0xff] %v12537_v21  ;;  %v2717_v23 = vrot.slane %v2715_v51, 5  ;;  %v2721_v1 = vrot.slane %v2719_v0, 4  ;;  %v3286_v51 = vrot.slane %v12539_v41, 5 }
 0x181   : > { %v1747_v4 = vpop.f32.mrf.mxu3  ;;  %v3402_v53 = vpack.c.b16 %v3377_v3, %v3376_v44  ;;  %v1859_v57 = vrot.slane %v1857_v12, 4  ;;  %v2712_v42 = vor.u32 %v2711_v18, %v2708_v19  ;;  %v1858_v50 = vsel %vm12391_vm13, %v10284_v37, %v1857_v12 }
 0x182   : > { %v2722_v2 = vor.u32 %v2721_v1, %v2717_v23  ;;  %v3288_v7 = vrot.slane %v3286_v51, 4  ;;  %v1954_v18 = vunpack.c.l.b16 %v1858_v50 }
 0x184   : > { %v1476_v58 = vpop.f32.mrf.mxu0  ;;  %3514 = vmatmul.bf16.gmra.mxu1 %v3402_v53  ;;  %v2713_v53 = vrot.slane %v2712_v42, 4  ;;  %v2723_v47 = vrot.slane %v2722_v2, 4  ;;  %v3290_v41 = vsel %vm12391_vm13, %v3288_v7, %v3289_v9 }
 0x185   : > { %v1511_v61 = vpop.f32.mrf.mxu2  ;;  %v12547_v56 = vadd.f32 %v1709_v46, %v1476_v58  ;;  %v2951_v46 = vunpack.c.l.b16 %v2704_v49  ;;  %v1861_v58 = vsel %vm12391_vm13, %v1859_v57, %v1860_v35  ;;  %v3379_v37 = vunpack.c.l.b16 %v3290_v41  ;;  %v11311_v41 = vld [vmem:[#allocation7 + $0x198] sm:$0xff] }
 0x186   : > { %v12553_v5 = vadd.f32 %v1744_v39, %v1511_v61  ;;  %v11258_v39 = vld [vmem:[#allocation2 + $0x54] sm:$0xff]  ;;  %v2727_v61 = vrot.slane %v2725_v43, 5  ;;  %v1955_v1 = vunpack.c.l.b16 %v1861_v58  ;;  %v2718_v57 = vsel %vm12014_vm2, %v2713_v53, %v2717_v23  ;;  %3795 = vmatpush.bf16.msra.mxu2 %v11311_v41 }
 0x187   : > { %v1714_v31 = vpop.f32.mrf.mxu1  ;;  %v2976_v44 = vpack.c.b16 %v2951_v46, %v2950_v29  ;;  %v11638_v58 = vld [vmem:[#allocation2 + $0x58] sm:$0xf]  ;;  %v2952_v53 = vunpack.c.l.b16 %v2718_v57 }
 0x188   : > { %15545 = vst [vmem:[#allocation16_spill] sm:$0xff] %v12553_v5  ;;  %v2728_v25 = vsel %vm12014_vm2, %v2723_v47, %v2727_v61  ;;  %v1980_v50 = vpack.c.b16 %v1955_v1, %v1954_v18  ;;  %v1864_v23 = vrot.slane %v11638_v58, 5  ;;  %v11639_v18 = vld [vmem:[#allocation2 + $0x5c] sm:$0x1] }
 0x189   : > { %v1749_v27 = vpop.f32.mrf.mxu3  ;;  %v1867_v1 = vrot.slane %v11639_v18, 5  ;;  %v2516_v18 = vld [vmem:[#allocation2 + $0x78] sm:$0xf] }
 0x18a   : > { %2087 = vmatmul.bf16.gmra.mxu2 %v1979_v54  ;;  %v3178_v54 = vld [vmem:[#allocation2 + $0x60] sm:$0xe] }
 0x18b   : > { %v10461_v49 = vrot.slane %v3178_v54, 9  ;;  %v2953_v54 = vunpack.c.l.b16 %v2728_v25 }
 0x18c   : > { %v1479_v16 = vpop.f32.mrf.mxu0 }
 0x18d   : > { %v1514_v3 = vpop.f32.mrf.mxu2  ;;  %v12555_v45 = vadd.f32 %v1712_v38, %v1479_v16  ;;  %v2513_v38 = vld [vmem:[#allocation2 + $0x6c] sm:$0xf]  ;;  %v3287_v12 = vsel %vm12391_vm13, %v10461_v49, %v3286_v51  ;;  %v1769_v51 = vld [vmem:[#allocation2 + $0x54] sm:$0xe] }
 0x18e   : > { %v12560_v0 = vadd.f32 %v1747_v4, %v1514_v3  ;;  %2406 = vmatmul.bf16.gmra.mxu3 %v11258_v39  ;;  %v12568_v4 = vld [vmem:[#allocation2 + $0x70] sm:$0xf]  ;;  %v3378_v46 = vunpack.c.l.b16 %v3287_v12  ;;  %v2730_v13 = vshrl.u32 %v2513_v38, 16  ;;  %v2733_v42 = vshll.u32 %v2513_v38, 16  ;;  %v2515_v38 = vld [vmem:[#allocation2 + $0x74] sm:$0x1] }
 0x18f   : > { %3088 = vmatmul.bf16.gmra.mxu0 %v2976_v44  ;;  %v2739_v43 = vshll.u32 %v12568_v4, 16  ;;  %v2743_v2 = vshrl.u32 %v12568_v4, 16  ;;  %v10285_v12 = vrot.slane %v1769_v51, 9  ;;  %v3179_v51 = vld [vmem:[#allocation2 + $0x6c] sm:$0xe] }
 0x190   : > { %15546 = vst [vmem:[#allocation17_spill] sm:$0xff] %v12560_v0  ;;  %v1717_v29 = vpop.f32.mrf.mxu1  ;;  %v3403_v39 = vpack.c.b16 %v3379_v37, %v3378_v46  ;;  %v2732_v61 = vrot.slane %v2730_v13, 4  ;;  %v2735_v47 = vrot.slane %v2733_v42, 5  ;;  %v1866_v46 = vrot.slane %v1864_v23, 4 }
 0x191   : > { %v1752_v19 = vpop.f32.mrf.mxu3  ;;  %v12580_v49 = vrot.slane %v2739_v43, 5  ;;  %v2745_v7 = vrot.slane %v2743_v2, 4  ;;  %v2977_v37 = vpack.c.b16 %v2953_v54, %v2952_v53  ;;  %v2749_v13 = vshll.u32 %v2515_v38, 16 }
 0x192   : > { %v2736_v57 = vor.u32 %v2735_v47, %v2732_v61  ;;  %v3293_v43 = vrot.slane %v12568_v4, 5  ;;  %v1868_v58 = vsel %vm12391_vm13, %v1866_v46, %v1867_v1  ;;  %v10462_v53 = vrot.slane %v3179_v51, 9  ;;  %v2517_v46 = vld [vmem:[#allocation2 + $0x7c] sm:$0xf] }
 0x193   : > { %v2746_v25 = vor.u32 %v2745_v7, %v12580_v49  ;;  %v3296_v61 = vrot.slane %v2515_v38, 5  ;;  %v2751_v41 = vrot.slane %v2749_v13, 5  ;;  %v2767_v51 = vshrl.u32 %v2517_v46, 16 }
 0x194   : > { %v1481_v35 = vpop.f32.mrf.mxu0  ;;  %3519 = vmatmul.bf16.gmra.mxu1 %v3403_v39  ;;  %v3295_v54 = vrot.slane %v3293_v43, 4  ;;  %v2737_v47 = vrot.slane %v2736_v57, 4  ;;  %v11327_v57 = vld [vmem:[#allocation7 + $0x218] sm:$0xff] }
 0x195   : > { %v1516_v16 = vpop.f32.mrf.mxu2  ;;  %v12576_v44 = vadd.f32 %v1714_v31, %v1481_v35  ;;  %v11259_v31 = vld [vmem:[#allocation2 + $0x60] sm:$0xff]  ;;  %v2747_v7 = vrot.slane %v2746_v25, 4  ;;  %4903 = vmatpush.bf16.msra.mxu0 %v11327_v57 }
 0x196   : > { %v12578_v3 = vadd.f32 %v1749_v27, %v1516_v16  ;;  %v11319_v27 = vld [vmem:[#allocation7 + $0x1d8] sm:$0xff]  ;;  %v2742_v38 = vsel %vm12014_vm2, %v2737_v47, %v12580_v49  ;;  %v1770_v49 = vld [vmem:[#allocation2 + $0x60] sm:$0xe] }
 0x197   : > { %4477 = vmatpush.bf16.msra.mxu3 %v11319_v27  ;;  %v2752_v1 = vsel %vm12014_vm2, %v2747_v7, %v2751_v41  ;;  %v2954_v7 = vunpack.c.l.b16 %v2742_v38 }
 0x198   : > { %15547 = vst [vmem:[#allocation18_spill] sm:$0xff] %v12578_v3  ;;  %v1719_v35 = vpop.f32.mrf.mxu1  ;;  %v2955_v41 = vunpack.c.l.b16 %v2752_v1  ;;  %v10286_v3 = vrot.slane %v1770_v49, 9 }
 0x199   : > { %v1754_v9 = vpop.f32.mrf.mxu3 }
 0x19a   : > { %2092 = vmatmul.bf16.gmra.mxu2 %v1980_v50  ;;  %v1865_v50 = vsel %vm12391_vm13, %v10285_v12, %v1864_v23  ;;  %v1957_v12 = vunpack.c.l.b16 %v1868_v58 }
 0x19b   : > { %v1956_v23 = vunpack.c.l.b16 %v1865_v50  ;;  %v2763_v50 = vshll.u32 %v2517_v46, 16 }
 0x19c   : > { %v1484_v42 = vpop.f32.mrf.mxu0 }
 0x19d   : > { %v1519_v39 = vpop.f32.mrf.mxu2  ;;  %v12586_v16 = vadd.f32 %v1717_v29, %v1484_v42  ;;  %v3297_v29 = vsel %vm12391_vm13, %v3295_v54, %v3296_v61  ;;  %v2754_v42 = vshrl.u32 %v2516_v18, 16  ;;  %v11640_v61 = vld [vmem:[#allocation2 + $0x64] sm:$0xf] }
 0x19e   : > { %v12584_v2 = vadd.f32 %v1752_v19, %v1519_v39  ;;  %2411 = vmatmul.bf16.gmra.mxu3 %v11259_v31  ;;  %v3294_v19 = vsel %vm12391_vm13, %v10462_v53, %v3293_v43  ;;  %v3381_v27 = vunpack.c.l.b16 %v3297_v29  ;;  %v2757_v43 = vshll.u32 %v2516_v18, 16  ;;  %v2518_v29 = vld [vmem:[#allocation2 + $0x80] sm:$0x1] }
 0x19f   : > { %3093 = vmatmul.bf16.gmra.mxu0 %v2977_v37  ;;  %v3380_v31 = vunpack.c.l.b16 %v3294_v19  ;;  %v1981_v53 = vpack.c.b16 %v1957_v12, %v1956_v23  ;;  %v1871_v47 = vrot.slane %v11640_v61, 5  ;;  %v2769_v18 = vrot.slane %v2767_v51, 4  ;;  %v11641_v23 = vld [vmem:[#allocation2 + $0x68] sm:$0x1] }
 0x1a0   : > { %15548 = vst [vmem:[#allocation19_spill] sm:$0xff] %v12584_v2  ;;  %v12601_v37 = vpop.f32.mrf.mxu1  ;;  %v2765_v2 = vrot.slane %v2763_v50, 5  ;;  %v2978_v12 = vpack.c.b16 %v2955_v41, %v2954_v7  ;;  %v2773_v57 = vshll.u32 %v2518_v29, 16  ;;  %v3180_v50 = vld [vmem:[#allocation2 + $0x78] sm:$0xe]  ;;  %v3303_v7 = vrot.slane %v2518_v29, 5 }
 0x1a1   : > { %v1757_v4 = vpop.f32.mrf.mxu3  ;;  %v3404_v25 = vpack.c.b16 %v3381_v27, %v3380_v31  ;;  %v2756_v31 = vrot.slane %v2754_v42, 4  ;;  %v2759_v27 = vrot.slane %v2757_v43, 5  ;;  %v1872_v43 = vsel %vm12391_vm13, %v10286_v3, %v1871_v47 }
 0x1a2   : > { %v2770_v1 = vor.u32 %v2769_v18, %v2765_v2  ;;  %v2775_v41 = vrot.slane %v2773_v57, 5 }
 0x1a3   : > { %v2760_v38 = vor.u32 %v2759_v27, %v2756_v31 }
 0x1a4   : > { %v1486_v39 = vpop.f32.mrf.mxu0  ;;  %3524 = vmatmul.bf16.gmra.mxu1 %v3404_v25  ;;  %v2771_v27 = vrot.slane %v2770_v1, 4 }
 0x1a5   : > { %v1521_v13 = vpop.f32.mrf.mxu2  ;;  %v12605_v54 = vadd.f32 %v1719_v35, %v1486_v39  ;;  %v1874_v35 = vrot.slane %v11641_v23, 5  ;;  %v2519_v23 = vld [vmem:[#allocation2 + $0x84] sm:$0xf]  ;;  %v2761_v31 = vrot.slane %v2760_v38, 4 }
 0x1a6   : > { %v12603_v58 = vadd.f32 %v1754_v9, %v1521_v13  ;;  %v11260_v9 = vld [vmem:[#allocation2 + $0x6c] sm:$0xff]  ;;  %v1873_v13 = vrot.slane %v1871_v47, 4 }
 0x1a7   : > { %v2766_v38 = vsel %vm12014_vm2, %v2761_v31, %v2765_v2 }
 0x1a8   : > { %15549 = vst [vmem:[#allocation20_spill] sm:$0xff] %v12603_v58  ;;  %v12607_v39 = vpop.f32.mrf.mxu1  ;;  %v3300_v58 = vrot.slane %v2517_v46, 5  ;;  %v1875_v51 = vsel %vm12391_vm13, %v1873_v13, %v1874_v35  ;;  %v1958_v46 = vunpack.c.l.b16 %v1872_v43  ;;  %v2520_v13 = vld [vmem:[#allocation2 + $0x88] sm:$0xf]  ;;  %v2778_v35 = vshrl.u32 %v2519_v23, 16 }
 0x1a9   : > { %v1759_v19 = vpop.f32.mrf.mxu3  ;;  %v1959_v47 = vunpack.c.l.b16 %v1875_v51  ;;  %v2787_v1 = vshll.u32 %v2520_v13, 16  ;;  %v2791_v43 = vshrl.u32 %v2520_v13, 16 }
 0x1aa   : > { %2097 = vmatmul.bf16.gmra.mxu2 %v1981_v53  ;;  %v10463_v53 = vrot.slane %v3180_v50, 9  ;;  %v3302_v49 = vrot.slane %v3300_v58, 4 }
 0x1ab   : > { %v12633_v2 = vrot.slane %v2787_v1, 5  ;;  %v2793_v31 = vrot.slane %v2791_v43, 4 }
 0x1ac   : > { %v12609_v25 = vpop.f32.mrf.mxu0  ;;  %v3304_v3 = vsel %vm12391_vm13, %v3302_v49, %v3303_v7  ;;  %v1771_v49 = vld [vmem:[#allocation2 + $0x6c] sm:$0xe]  ;;  %v11642_v7 = vld [vmem:[#allocation2 + $0x70] sm:$0xf] }
 0x1ad   : > { %v1524_v61 = vpop.f32.mrf.mxu2  ;;  %v10287_v5 = vrot.slane %v1771_v49, 9  ;;  %v2794_v1 = vor.u32 %v2793_v31, %v12633_v2 }
 0x1ae   : > { %v12611_v42 = vadd.f32 %v1757_v4, %v1524_v61  ;;  %2416 = vmatmul.bf16.gmra.mxu3 %v11260_v9  ;;  %v3301_v4 = vsel %vm12391_vm13, %v10463_v53, %v3300_v58  ;;  %v3383_v9 = vunpack.c.l.b16 %v3304_v3  ;;  %v2781_v61 = vshll.u32 %v2519_v23, 16 }
 0x1af   : > { %3098 = vmatmul.bf16.gmra.mxu0 %v2978_v12  ;;  %v3382_v18 = vunpack.c.l.b16 %v3301_v4  ;;  %v2776_v58 = vsel %vm12014_vm2, %v2771_v27, %v2775_v41  ;;  %v1982_v53 = vpack.c.b16 %v1959_v47, %v1958_v46  ;;  %v1878_v23 = vrot.slane %v11642_v7, 5  ;;  %v11643_v27 = vld [vmem:[#allocation2 + $0x74] sm:$0x1]  ;;  %v2521_v46 = vld [vmem:[#allocation2 + $0x8c] sm:$0x1]  ;;  %v11310_v47 = vld [vmem:[#allocation7 + $0x190] sm:$0xff] }
 0x1b0   : > { %15550 = vst [vmem:[#allocation21_spill] sm:$0xff] %v12611_v42  ;;  %v12621_v29 = vpop.f32.mrf.mxu1  ;;  %v2780_v4 = vrot.slane %v2778_v35, 4  ;;  %v2783_v3 = vrot.slane %v2781_v61, 5  ;;  %3796 = vmatpush.bf16.msra.mxu2 %v11310_v47  ;;  %v11318_v61 = vld [vmem:[#allocation7 + $0x1d0] sm:$0xff]  ;;  %v2797_v43 = vshll.u32 %v2521_v46, 16  ;;  %v3310_v47 = vrot.slane %v2521_v46, 5 }
 0x1b1   : > { %v2377_v0 = vpop.f32.mrf.mxu3  ;;  %v3405_v12 = vpack.c.b16 %v3383_v9, %v3382_v18  ;;  %v2956_v18 = vunpack.c.l.b16 %v2766_v38  ;;  %v2957_v9 = vunpack.c.l.b16 %v2776_v58  ;;  %v1880_v41 = vrot.slane %v1878_v23, 4  ;;  %4478 = vmatpush.bf16.msra.mxu3 %v11318_v61  ;;  %v12652_v61 = vld [vmem:[#allocation2 + $0x94] sm:$0xf] }
 0x1b2   : > { %v1879_v58 = vsel %vm12391_vm13, %v10287_v5, %v1878_v23  ;;  %v11363_v5 = vld [vmem:[#allocation9 + $0x78] sm:$0xff]  ;;  %v2795_v31 = vrot.slane %v2794_v1, 4 }
 0x1b3   : > { %v2979_v7 = vpack.c.b16 %v2957_v9, %v2956_v18  ;;  %v1960_v33 = vunpack.c.l.b16 %v1879_v58  ;;  %6220 = vmatpush.bf16.msra.mxu1 %v11363_v5 }
 0x1b4   : > { %v12623_v50 = vpop.f32.mrf.mxu0  ;;  %3529 = vmatmul.bf16.gmra.mxu1 %v3405_v12 }
 0x1b5   : > { %v1526_v57 = vpop.f32.mrf.mxu2 }
 0x1b6   : > { %v12629_v51 = vadd.f32 %v1759_v19, %v1526_v57  ;;  %v1881_v19 = vrot.slane %v11643_v27, 5  ;;  %v11261_v57 = vld [vmem:[#allocation2 + $0x78] sm:$0xff] }
 0x1b8   : > { %15551 = vst [vmem:[#allocation22_spill] sm:$0xff] %v12629_v51  ;;  %v2784_v51 = vor.u32 %v2783_v3, %v2780_v4  ;;  %v12635_v35 = vpop.f32.mrf.mxu1  ;;  %v1882_v4 = vsel %vm12391_vm13, %v1880_v41, %v1881_v19  ;;  %v3181_v3 = vld [vmem:[#allocation2 + $0x84] sm:$0xe]  ;;  %v2522_v19 = vld [vmem:[#allocation2 + $0x90] sm:$0xf] }
 0x1b9   : > { %v12631_v42 = vpop.f32.mrf.mxu3  ;;  %v10464_v9 = vrot.slane %v3181_v3, 9 }
 0x1ba   : > { %2102 = vmatmul.bf16.gmra.mxu2 %v1982_v53  ;;  %v3307_v53 = vrot.slane %v2520_v13, 5  ;;  %v2785_v18 = vrot.slane %v2784_v51, 4  ;;  %v2799_v13 = vrot.slane %v2797_v43, 5  ;;  %v11326_v43 = vld [vmem:[#allocation7 + $0x210] sm:$0xff] }
 0x1bb   : > { %4904 = vmatpush.bf16.msra.mxu0 %v11326_v43  ;;  %v11645_v43 = vld [vmem:[#allocation2 + $0x80] sm:$0x1] }
 0x1bc   : > { %v12637_v38 = vpop.f32.mrf.mxu0  ;;  %v3309_v27 = vrot.slane %v3307_v53, 4  ;;  %v2800_v3 = vsel %vm12014_vm2, %v2795_v31, %v2799_v13 }
 0x1bd   : > { %v2063_v12 = vpop.f32.mrf.mxu2 }
 0x1be   : > { %v2143_v49 = vadd.f32 %v2063_v12, %v12380_v10  ;;  %2421 = vmatmul.bf16.gmra.mxu3 %v11261_v57  ;;  %v3308_v10 = vsel %vm12391_vm13, %v10464_v9, %v3307_v53  ;;  %v3311_v41 = vsel %vm12391_vm13, %v3309_v27, %v3310_v47  ;;  %v1961_v57 = vunpack.c.l.b16 %v1882_v4  ;;  %v11644_v9 = vld [vmem:[#allocation2 + $0x7c] sm:$0xf] }
 0x1bf   : > { %3103 = vmatmul.bf16.gmra.mxu0 %v2979_v7  ;;  %v3384_v46 = vunpack.c.l.b16 %v3308_v10  ;;  %v1685_v7 = vadd.f32 %v12407_v55, %v12413_v28  ;;  %v2790_v12 = vsel %vm12014_vm2, %v2785_v18, %v12633_v2  ;;  %v2805_v53 = vshll.u32 %v2522_v19, 16 }
 0x1c0   : > { %v2457_v21 = vadd.f32 %v2377_v0, %v2143_v49  ;;  %v3385_v0 = vunpack.c.l.b16 %v3311_v41  ;;  %v12662_v1 = vpop.f32.mrf.mxu1  ;;  %v2811_v55 = vshll.u32 %v12652_v61, 16  ;;  %v2815_v28 = vshrl.u32 %v12652_v61, 16 }
 0x1c1   : > { %v12645_v23 = vpop.f32.mrf.mxu3  ;;  %v1983_v18 = vpack.c.b16 %v1961_v57, %v1960_v33  ;;  %v1885_v27 = vrot.slane %v11644_v9, 5  ;;  %v2958_v47 = vunpack.c.l.b16 %v2790_v12  ;;  %v2959_v10 = vunpack.c.l.b16 %v2800_v3  ;;  %v2524_v33 = vld [vmem:[#allocation2 + $0x98] sm:$0x1] }
 0x1c2   : > { %v3139_v51 = vadd.f32 %v12609_v25, %v2457_v21  ;;  %v3406_v21 = vpack.c.b16 %v3385_v0, %v3384_v46  ;;  %v2802_v25 = vshrl.u32 %v2522_v19, 16  ;;  %v2807_v19 = vrot.slane %v2805_v53, 5 }
 0x1c3   : > { %v2813_v31 = vrot.slane %v2811_v55, 5  ;;  %v2817_v13 = vrot.slane %v2815_v28, 4  ;;  %v1887_v57 = vrot.slane %v1885_v27, 4 }
 0x1c4   : > { %v12660_v58 = vadd.f32 %v12601_v37, %v3139_v51  ;;  %v12664_v4 = vpop.f32.mrf.mxu0  ;;  %v1772_v37 = vld [vmem:[#allocation2 + $0x78] sm:$0xe]  ;;  %3534 = vmatmul.bf16.gmra.mxu1 %v3406_v21  ;;  %v2804_v41 = vrot.slane %v2802_v25, 4  ;;  %v2980_v21 = vpack.c.b16 %v2959_v10, %v2958_v47 }
 0x1c5   : > { %v2065_v49 = vpop.f32.mrf.mxu2  ;;  %v10288_v46 = vrot.slane %v1772_v37, 9  ;;  %v2818_v28 = vor.u32 %v2817_v13, %v2813_v31  ;;  %v3182_v37 = vld [vmem:[#allocation2 + $0x90] sm:$0xe] }
 0x1c6   : > { %v2144_v2 = vadd.f32 %v2065_v49, %v1685_v7  ;;  %v11262_v7 = vld [vmem:[#allocation2 + $0x84] sm:$0xff]  ;;  %v1888_v49 = vrot.slane %v11645_v43, 5  ;;  %v10465_v9 = vrot.slane %v3182_v37, 9 }
 0x1c7   : > { %v1886_v55 = vsel %vm12391_vm13, %v10288_v46, %v1885_v27  ;;  %v2525_v27 = vld [vmem:[#allocation2 + $0x9c] sm:$0xf]  ;;  %v2819_v13 = vrot.slane %v2818_v28, 4 }
 0x1c8   : > { %v2458_v5 = vadd.f32 %v12631_v42, %v2144_v2  ;;  %v2808_v42 = vor.u32 %v2807_v19, %v2804_v41  ;;  %v12675_v3 = vpop.f32.mrf.mxu1  ;;  %v3314_v2 = vrot.slane %v12652_v61, 5  ;;  %v1962_v41 = vunpack.c.l.b16 %v1886_v55 }
 0x1c9   : > { %v2384_v51 = vpop.f32.mrf.mxu3 }
 0x1ca   : > { %2107 = vmatmul.bf16.gmra.mxu2 %v1983_v18  ;;  %v3140_v0 = vadd.f32 %v12623_v50, %v2458_v5  ;;  %v2821_v50 = vshll.u32 %v2524_v33, 16  ;;  %v3316_v47 = vrot.slane %v3314_v2, 4  ;;  %v3317_v5 = vrot.slane %v2524_v33, 5 }
 0x1cb   : > { %v2809_v19 = vrot.slane %v2808_v42, 4 }
 0x1cc   : > { %v12673_v12 = vadd.f32 %v12607_v39, %v3140_v0  ;;  %v12677_v53 = vpop.f32.mrf.mxu0  ;;  %v1889_v39 = vsel %vm12391_vm13, %v1887_v57, %v1888_v49  ;;  %v2823_v61 = vrot.slane %v2821_v50, 5  ;;  %v3318_v0 = vsel %vm12391_vm13, %v3316_v47, %v3317_v5  ;;  %v11646_v47 = vld [vmem:[#allocation2 + $0x88] sm:$0xf] }
 0x1cd   : > { %v2068_v25 = vpop.f32.mrf.mxu2  ;;  %v1963_v57 = vunpack.c.l.b16 %v1889_v39  ;;  %v3387_v43 = vunpack.c.l.b16 %v3318_v0  ;;  %v2826_v49 = vshrl.u32 %v2525_v27, 16  ;;  %v1892_v5 = vrot.slane %v11646_v47, 5 }
 0x1ce   : > { %v2145_v18 = vadd.f32 %v2068_v25, %v12429_v8  ;;  %2426 = vmatmul.bf16.gmra.mxu3 %v11262_v7  ;;  %v3315_v8 = vsel %vm12391_vm13, %v10465_v9, %v3314_v2  ;;  %v2814_v2 = vsel %vm12014_vm2, %v2809_v19, %v2813_v31  ;;  %v1773_v9 = vld [vmem:[#allocation2 + $0x84] sm:$0xe] }
 0x1cf   : > { %3108 = vmatmul.bf16.gmra.mxu0 %v2980_v21  ;;  %v3386_v33 = vunpack.c.l.b16 %v3315_v8  ;;  %v2829_v21 = vshll.u32 %v2525_v27, 16  ;;  %v2960_v0 = vunpack.c.l.b16 %v2814_v2  ;;  %v10289_v19 = vrot.slane %v1773_v9, 9 }
 0x1d0   : > { %v2459_v10 = vadd.f32 %v12645_v23, %v2145_v18  ;;  %v12693_v23 = vld [vmem:[#allocation2 + $0xa0] sm:$0xf]  ;;  %v12698_v25 = vpop.f32.mrf.mxu1 }
 0x1d1   : > { %v12686_v46 = vpop.f32.mrf.mxu3  ;;  %v3407_v55 = vpack.c.b16 %v3387_v43, %v3386_v33  ;;  %v2835_v18 = vshll.u32 %v12693_v23, 16  ;;  %v2839_v37 = vshrl.u32 %v12693_v23, 16  ;;  %v2831_v27 = vrot.slane %v2829_v21, 5  ;;  %v11263_v43 = vld [vmem:[#allocation2 + $0x90] sm:$0xff] }
 0x1d2   : > { %v3141_v7 = vadd.f32 %v12637_v38, %v2459_v10  ;;  %v2824_v38 = vsel %vm12014_vm2, %v2819_v13, %v2823_v61  ;;  %v2828_v10 = vrot.slane %v2826_v49, 4  ;;  %v3321_v9 = vrot.slane %v12693_v23, 5 }
 0x1d3   : > { %v12711_v13 = vrot.slane %v2835_v18, 5  ;;  %v2841_v61 = vrot.slane %v2839_v37, 4 }
 0x1d4   : > { %v12696_v42 = vadd.f32 %v12621_v29, %v3141_v7  ;;  %v12700_v50 = vpop.f32.mrf.mxu0  ;;  %v1984_v29 = vpack.c.b16 %v1963_v57, %v1962_v41  ;;  %3539 = vmatmul.bf16.gmra.mxu1 %v3407_v55  ;;  %v2961_v7 = vunpack.c.l.b16 %v2824_v38  ;;  %v11647_v41 = vld [vmem:[#allocation2 + $0x8c] sm:$0x1]  ;;  %v11309_v55 = vld [vmem:[#allocation7 + $0x188] sm:$0xff]  ;;  %v2832_v49 = vor.u32 %v2831_v27, %v2828_v10 }
 0x1d5   : > { %v2070_v28 = vpop.f32.mrf.mxu2  ;;  %v1895_v57 = vrot.slane %v11647_v41, 5  ;;  %3797 = vmatpush.bf16.msra.mxu2 %v11309_v55  ;;  %v11317_v38 = vld [vmem:[#allocation7 + $0x1c8] sm:$0xff] }
 0x1d6   : > { %v2146_v39 = vadd.f32 %v2070_v28, %v12445_v40  ;;  %v1894_v40 = vrot.slane %v1892_v5, 4  ;;  %v2527_v28 = vld [vmem:[#allocation2 + $0xa4] sm:$0x1]  ;;  %v2981_v21 = vpack.c.b16 %v2961_v7, %v2960_v0  ;;  %v3183_v10 = vld [vmem:[#allocation2 + $0x9c] sm:$0xe]  ;;  %v2833_v27 = vrot.slane %v2832_v49, 4  ;;  %4479 = vmatpush.bf16.msra.mxu3 %v11317_v38 }
 0x1d7   : > { %v3323_v0 = vrot.slane %v3321_v9, 4  ;;  %v3324_v7 = vrot.slane %v2527_v28, 5  ;;  %v12736_v49 = vld [vmem:[#allocation2 + $0xac] sm:$0xf] }
 0x1d8   : > { %v2460_v8 = vadd.f32 %v2384_v51, %v2146_v39  ;;  %v12717_v2 = vpop.f32.mrf.mxu1  ;;  %v2842_v39 = vor.u32 %v2841_v61, %v12711_v13 }
 0x1d9   : > { %v12709_v31 = vpop.f32.mrf.mxu3 }
 0x1da   : > { %2112 = vmatmul.bf16.gmra.mxu2 %v1984_v29  ;;  %v3142_v33 = vadd.f32 %v12664_v4, %v2460_v8  ;;  %v1893_v4 = vsel %vm12391_vm13, %v10289_v19, %v1892_v5  ;;  %v2845_v29 = vshll.u32 %v2527_v28, 16  ;;  %v10466_v8 = vrot.slane %v3183_v10, 9  ;;  %v11362_v19 = vld [vmem:[#allocation9 + $0x70] sm:$0xff]  ;;  %v11648_v10 = vld [vmem:[#allocation2 + $0x94] sm:$0xf] }
 0x1db   : > { %v1964_v5 = vunpack.c.l.b16 %v1893_v4  ;;  %v2843_v23 = vrot.slane %v2842_v39, 4  ;;  %6221 = vmatpush.bf16.msra.mxu1 %v11362_v19  ;;  %v11325_v39 = vld [vmem:[#allocation7 + $0x208] sm:$0xff] }
 0x1dc   : > { %v12715_v51 = vadd.f32 %v12635_v35, %v3142_v33  ;;  %v12719_v37 = vpop.f32.mrf.mxu0  ;;  %v1896_v35 = vsel %vm12391_vm13, %v1894_v40, %v1895_v57  ;;  %v2847_v41 = vrot.slane %v2845_v29, 5  ;;  %v3325_v40 = vsel %vm12391_vm13, %v3323_v0, %v3324_v7  ;;  %v2528_v57 = vld [vmem:[#allocation2 + $0xa8] sm:$0xf]  ;;  %4905 = vmatpush.bf16.msra.mxu0 %v11325_v39 }
 0x1dd   : > { %v2073_v18 = vpop.f32.mrf.mxu2  ;;  %v1965_v55 = vunpack.c.l.b16 %v1896_v35 }
 0x1de   : > { %15552 = vst [vmem:[#allocation23_spill] sm:$0xff] %v12715_v51  ;;  %v2147_v47 = vadd.f32 %v2073_v18, %v12456_v60  ;;  %2431 = vmatmul.bf16.gmra.mxu3 %v11263_v43  ;;  %v3322_v60 = vsel %vm12391_vm13, %v10466_v8, %v3321_v9  ;;  %v1774_v18 = vld [vmem:[#allocation2 + $0x90] sm:$0xe]  ;;  %v2850_v9 = vshrl.u32 %v2528_v57, 16  ;;  %v1899_v8 = vrot.slane %v11648_v10, 5 }
 0x1df   : > { %3113 = vmatmul.bf16.gmra.mxu0 %v2981_v21  ;;  %v3388_v28 = vunpack.c.l.b16 %v3322_v60  ;;  %v2838_v21 = vsel %vm12014_vm2, %v2833_v27, %v12711_v13  ;;  %v2848_v0 = vsel %vm12014_vm2, %v2843_v23, %v2847_v41  ;;  %v2859_v13 = vshll.u32 %v12736_v49, 16  ;;  %v11649_v23 = vld [vmem:[#allocation2 + $0x98] sm:$0x1]  ;;  %v2530_v10 = vld [vmem:[#allocation2 + $0xb0] sm:$0x1] }
 0x1e0   : > { %v2461_v33 = vadd.f32 %v12686_v46, %v2147_v47  ;;  %v3389_v46 = vunpack.c.l.b16 %v3325_v40  ;;  %v1985_v7 = vpack.c.b16 %v1965_v55, %v1964_v5  ;;  %v2962_v19 = vunpack.c.l.b16 %v2838_v21  ;;  %v11264_v5 = vld [vmem:[#allocation2 + $0x9c] sm:$0xff] }
 0x1e1   : > { %v12729_v61 = vpop.f32.mrf.mxu3  ;;  %v12744_v4 = vpop.f32.mrf.mxu1  ;;  %v2963_v40 = vunpack.c.l.b16 %v2848_v0  ;;  %v1902_v41 = vrot.slane %v11649_v23, 5  ;;  %v2869_v39 = vshll.u32 %v2530_v10, 16  ;;  %v3328_v0 = vrot.slane %v12736_v49, 5 }
 0x1e2   : > { %v3143_v43 = vadd.f32 %v12677_v53, %v2461_v33  ;;  %v3408_v29 = vpack.c.b16 %v3389_v46, %v3388_v28  ;;  %v2853_v53 = vshll.u32 %v2528_v57, 16  ;;  %v10290_v33 = vrot.slane %v1774_v18, 9 }
 0x1e3   : > { %v2852_v57 = vrot.slane %v2850_v9, 4  ;;  %v1901_v46 = vrot.slane %v1899_v8, 4  ;;  %v2982_v21 = vpack.c.b16 %v2963_v40, %v2962_v19 }
 0x1e4   : > { %v12742_v38 = vadd.f32 %v12662_v1, %v3143_v43  ;;  %v12746_v35 = vpop.f32.mrf.mxu0  ;;  %v2863_v1 = vshrl.u32 %v12736_v49, 16  ;;  %3544 = vmatmul.bf16.gmra.mxu1 %v3408_v29  ;;  %v2855_v43 = vrot.slane %v2853_v53, 5 }
 0x1e5   : > { %v2075_v47 = vpop.f32.mrf.mxu2 }
 0x1e6   : > { %15553 = vst [vmem:[#allocation24_spill] sm:$0xff] %v12742_v38  ;;  %v2148_v27 = vadd.f32 %v2075_v47, %v12473_v48  ;;  %v12756_v38 = vrot.slane %v2859_v13, 5  ;;  %v2865_v51 = vrot.slane %v2863_v1, 4  ;;  %v2856_v18 = vor.u32 %v2855_v43, %v2852_v57  ;;  %v417_v13 = vld [vmem:[%s11981_s13 + $0x78] sm:$0xf] }
 0x1e7   : > { %v1903_v47 = vsel %vm12391_vm13, %v1901_v46, %v1902_v41  ;;  %v2871_v57 = vrot.slane %v2869_v39, 5  ;;  %v2531_v43 = vld [vmem:[#allocation2 + $0xb4] sm:$0xf]  ;;  %v678_v23 = vshrl.u32 %v417_v13, 16 }
 0x1e8   : > { %v2462_v60 = vadd.f32 %v12709_v31, %v2148_v27  ;;  %v1900_v31 = vsel %vm12391_vm13, %v10290_v33, %v1899_v8  ;;  %v3331_v33 = vrot.slane %v2530_v10, 5  ;;  %v2857_v40 = vrot.slane %v2856_v18, 4  ;;  %v11650_v10 = vld [vmem:[#allocation2 + $0xa0] sm:$0xf] }
 0x1e9   : > { %v12754_v28 = vpop.f32.mrf.mxu3  ;;  %v12764_v29 = vpop.f32.mrf.mxu1  ;;  %v1966_v1 = vunpack.c.l.b16 %v1900_v31  ;;  %v12782_v31 = vld [vmem:[#allocation2 + $0xb8] sm:$0xf]  ;;  %v2874_v18 = vshrl.u32 %v2531_v43, 16  ;;  %v2877_v39 = vshll.u32 %v2531_v43, 16 }
 0x1ea   : > { %2117 = vmatmul.bf16.gmra.mxu2 %v1985_v7  ;;  %v3144_v48 = vadd.f32 %v12700_v50, %v2462_v60  ;;  %15555 = vst [vmem:[#allocation26_spill] sm:$0xff] %v12764_v29  ;;  %v2866_v50 = vor.u32 %v2865_v51, %v12756_v38  ;;  %v3330_v7 = vrot.slane %v3328_v0, 4  ;;  %v1967_v60 = vunpack.c.l.b16 %v1903_v47 }
 0x1eb   : > { %v2862_v47 = vsel %vm12014_vm2, %v2857_v40, %v12756_v38  ;;  %v11651_v40 = vld [vmem:[#allocation2 + $0xa4] sm:$0x1] }
 0x1ec   : > { %v12762_v55 = vadd.f32 %v12675_v3, %v3144_v48  ;;  %v12766_v53 = vpop.f32.mrf.mxu0  ;;  %v3184_v3 = vld [vmem:[#allocation2 + $0xa8] sm:$0xe]  ;;  %v2867_v51 = vrot.slane %v2866_v50, 4  ;;  %v3332_v49 = vsel %vm12391_vm13, %v3330_v7, %v3331_v33  ;;  %v1906_v48 = vrot.slane %v11650_v10, 5  ;;  %v418_v33 = vld [vmem:[%s11981_s13 + $0x7c] sm:$0xf] }
 0x1ed   : > { %v2078_v9 = vpop.f32.mrf.mxu2  ;;  %v10467_v27 = vrot.slane %v3184_v3, 9  ;;  %v2887_v7 = vshrl.u32 %v12782_v31, 16  ;;  %v1986_v43 = vpack.c.b16 %v1967_v60, %v1966_v1  ;;  %v2879_v10 = vrot.slane %v2877_v39, 5  ;;  %v11308_v39 = vld [vmem:[#allocation7 + $0x180] sm:$0xff] }
 0x1ee   : > { %15554 = vst [vmem:[#allocation25_spill] sm:$0xff] %v12762_v55  ;;  %v2149_v8 = vadd.f32 %v2078_v9, %v12484_v24  ;;  %2436 = vmatmul.bf16.gmra.mxu3 %v11264_v5  ;;  %v3391_v5 = vunpack.c.l.b16 %v3332_v49  ;;  %v2872_v3 = vsel %vm12014_vm2, %v2867_v51, %v2871_v57  ;;  %v1908_v38 = vrot.slane %v1906_v48, 4  ;;  %3798 = vmatpush.bf16.msra.mxu2 %v11308_v39 }
 0x1ef   : > { %3118 = vmatmul.bf16.gmra.mxu0 %v2982_v21  ;;  %v3329_v24 = vsel %vm12391_vm13, %v10467_v27, %v3328_v0  ;;  %v1775_v21 = vld [vmem:[#allocation2 + $0x9c] sm:$0xe]  ;;  %v2883_v27 = vshll.u32 %v12782_v31, 16  ;;  %v1909_v49 = vrot.slane %v11651_v40, 5  ;;  %v2964_v57 = vunpack.c.l.b16 %v2862_v47 }
 0x1f0   : > { %v2463_v19 = vadd.f32 %v12729_v61, %v2149_v8  ;;  %v3390_v61 = vunpack.c.l.b16 %v3329_v24  ;;  %v10291_v24 = vrot.slane %v1775_v21, 9  ;;  %v2965_v51 = vunpack.c.l.b16 %v2872_v3  ;;  %v857_v3 = vld [vmem:[#allocation2 + $0xc8] sm:$0x1] }
 0x1f1   : > { %v12775_v46 = vpop.f32.mrf.mxu3  ;;  %v12790_v50 = vpop.f32.mrf.mxu1  ;;  %v686_v29 = vshrl.u32 %v418_v33, 16  ;;  %v689_v60 = vshll.u32 %v418_v33, 16  ;;  %v11316_v33 = vld [vmem:[#allocation7 + $0x1c0] sm:$0xff] }
 0x1f2   : > { %v3145_v41 = vadd.f32 %v12719_v37, %v2463_v19  ;;  %v3409_v37 = vpack.c.b16 %v3391_v5, %v3390_v61  ;;  %v681_v61 = vshll.u32 %v417_v13, 16  ;;  %4480 = vmatpush.bf16.msra.mxu3 %v11316_v33 }
 0x1f4   : > { %v12785_v9 = vadd.f32 %v12698_v25, %v3145_v41  ;;  %v12792_v8 = vpop.f32.mrf.mxu0  ;;  %v680_v25 = vrot.slane %v678_v23, 7  ;;  %3549 = vmatmul.bf16.gmra.mxu1 %v3409_v37  ;;  %v2876_v41 = vrot.slane %v2874_v18, 4  ;;  %v12803_v23 = vrot.slane %v2883_v27, 5  ;;  %v11265_v37 = vld [vmem:[#allocation2 + $0xa8] sm:$0xff]  ;;  %v2533_v18 = vld [vmem:[#allocation2 + $0xbc] sm:$0x1] }
 0x1f5   : > { %v2080_v0 = vpop.f32.mrf.mxu2  ;;  %v2983_v27 = vpack.c.b16 %v2965_v51, %v2964_v57 }
 0x1f6   : > { %15556 = vst [vmem:[#allocation27_spill] sm:$0xff] %v12785_v9  ;;  %v2150_v19 = vadd.f32 %v2080_v0, %v12502_v59  ;;  %v853_v9 = vld [vmem:[#allocation2 + $0xc0] sm:$0xf]  ;;  %v2889_v59 = vrot.slane %v2887_v7, 4  ;;  %v683_v1 = vor.u32 %v681_v61, %v680_v25  ;;  %v684_v13 = vrot.slane %v680_v25, 4 }
 0x1f7   : > { %v688_v0 = vrot.slane %v686_v29, 7  ;;  %v1907_v29 = vsel %vm12391_vm13, %v10291_v24, %v1906_v48  ;;  %v2893_v25 = vshll.u32 %v2533_v18, 16 }
 0x1f8   : > { %v2464_v5 = vadd.f32 %v12754_v28, %v2150_v19  ;;  %v2880_v28 = vor.u32 %v2879_v10, %v2876_v41  ;;  %v854_v47 = vsel %vm12134_vm9, %v683_v1, %v853_v9  ;;  %v2890_v9 = vor.u32 %v2889_v59, %v12803_v23 }
 0x1f9   : > { %v12801_v55 = vpop.f32.mrf.mxu3  ;;  %v12811_v7 = vpop.f32.mrf.mxu1  ;;  %855 = vst [vmem:[#allocation2 + $0xc0] sm:$0xf] %v854_v47  ;;  %v1910_v10 = vsel %vm12391_vm13, %v1908_v38, %v1909_v49  ;;  %v3338_v59 = vrot.slane %v2533_v18, 5 }
 0x1fa   : > { %2122 = vmatmul.bf16.gmra.mxu2 %v1986_v43  ;;  %v3146_v21 = vadd.f32 %v12746_v35, %v2464_v5  ;;  %v691_v43 = vor.u32 %v689_v60, %v688_v0  ;;  %v693_v35 = vrot.slane %v688_v0, 4  ;;  %v3185_v5 = vld [vmem:[#allocation2 + $0xb4] sm:$0xe]  ;;  %v2881_v1 = vrot.slane %v2880_v28, 4  ;;  %v11361_v60 = vld [vmem:[#allocation9 + $0x68] sm:$0xff] }
 0x1fb   : > { %v10468_v48 = vrot.slane %v3185_v5, 9  ;;  %v2891_v49 = vrot.slane %v2890_v9, 4  ;;  %v1969_v18 = vunpack.c.l.b16 %v1910_v10  ;;  %6222 = vmatpush.bf16.msra.mxu1 %v11361_v60 }
 0x1fc   : > { %v12809_v19 = vadd.f32 %v12717_v2, %v3146_v21  ;;  %v12813_v61 = vpop.f32.mrf.mxu0  ;;  %v3335_v2 = vrot.slane %v12782_v31, 5  ;;  %v692_v57 = vsel %vm12125_vm8, %v684_v13, %v691_v43  ;;  %v858_v51 = vsel %vm12144_vm10, %v693_v35, %v857_v3  ;;  %v11324_v43 = vld [vmem:[#allocation7 + $0x200] sm:$0xff] }
 0x1fd   : > { %v2083_v40 = vpop.f32.mrf.mxu2  ;;  %856 = vst [vmem:[#allocation2 + $0xc4] sm:$0xf] %v692_v57  ;;  %v2895_v21 = vrot.slane %v2893_v25, 5  ;;  %v2886_v28 = vsel %vm12014_vm2, %v2881_v1, %v12803_v23  ;;  %v11652_v25 = vld [vmem:[#allocation2 + $0xac] sm:$0xf]  ;;  %4906 = vmatpush.bf16.msra.mxu0 %v11324_v43 }
 0x1fe   : > { %v2151_v41 = vadd.f32 %v2083_v40, %v12506_v26  ;;  %2441 = vmatmul.bf16.gmra.mxu3 %v11265_v37  ;;  %v3337_v24 = vrot.slane %v3335_v2, 4  ;;  %v1968_v26 = vunpack.c.l.b16 %v1907_v29  ;;  %859 = vst [vmem:[#allocation2 + $0xc8] sm:$0x1] %v858_v51  ;;  %v3336_v37 = vsel %vm12391_vm13, %v10468_v48, %v3335_v2 }
 0x1ff   : > { %3123 = vmatmul.bf16.gmra.mxu0 %v2983_v27  ;;  %v3392_v0 = vunpack.c.l.b16 %v3336_v37  ;;  %v1776_v27 = vld [vmem:[#allocation2 + $0xa8] sm:$0xe]  ;;  %v1913_v2 = vrot.slane %v11652_v25, 5  ;;  %v2966_v57 = vunpack.c.l.b16 %v2886_v28  ;;  %v3912_v25 = vld [vmem:[#allocation2 + $0x18] sm:$0xf] }
 0x200   : > { %v2465_v31 = vadd.f32 %v12775_v46, %v2151_v41  ;;  %v3339_v39 = vsel %vm12391_vm13, %v3337_v24, %v3338_v59  ;;  %v2534_v47 = vld [vmem:[#allocation2 + $0xc0] sm:$0xf]  ;;  %v2896_v41 = vsel %vm12014_vm2, %v2891_v49, %v2895_v21  ;;  %v1987_v10 = vpack.c.b16 %v1969_v18, %v1968_v26  ;;  %v11266_v18 = vld [vmem:[#allocation2 + $0xb4] sm:$0xff] }
 0x201   : > { %v12827_v38 = vpop.f32.mrf.mxu3  ;;  %v3393_v46 = vunpack.c.l.b16 %v3339_v39  ;;  %v12840_v33 = vpop.f32.mrf.mxu1  ;;  %v2898_v40 = vshrl.u32 %v2534_v47, 16  ;;  %v2901_v29 = vshll.u32 %v2534_v47, 16  ;;  %v10292_v5 = vrot.slane %v1776_v27, 9  ;;  %v11653_v39 = vld [vmem:[#allocation2 + $0xb0] sm:$0x1] }
 0x202   : > { %v3147_v13 = vadd.f32 %v12766_v53, %v2465_v31  ;;  %v2967_v24 = vunpack.c.l.b16 %v2896_v41  ;;  %v1915_v37 = vrot.slane %v1913_v2, 4 }
 0x203   : > { %v3410_v35 = vpack.c.b16 %v3393_v46, %v3392_v0  ;;  %v2900_v59 = vrot.slane %v2898_v40, 4  ;;  %v2903_v31 = vrot.slane %v2901_v29, 5  ;;  %v1914_v0 = vsel %vm12391_vm13, %v10292_v5, %v1913_v2 }
 0x204   : > { %v12838_v3 = vadd.f32 %v12744_v4, %v3147_v13  ;;  %v12842_v9 = vpop.f32.mrf.mxu0  ;;  %v2535_v4 = vld [vmem:[#allocation2 + $0xc4] sm:$0xf]  ;;  %v1916_v13 = vrot.slane %v11653_v39, 5  ;;  %v2984_v46 = vpack.c.b16 %v2967_v24, %v2966_v57  ;;  %v1970_v41 = vunpack.c.l.b16 %v1914_v0 }
 0x205   : > { %v2085_v53 = vpop.f32.mrf.mxu2  ;;  %3554 = vmatmul.bf16.gmra.mxu1 %v3410_v35  ;;  %v2907_v51 = vshll.u32 %v2535_v4, 16  ;;  %v2911_v1 = vshrl.u32 %v2535_v4, 16  ;;  %v2536_v49 = vld [vmem:[#allocation2 + $0xc8] sm:$0x1]  ;;  %v3342_v29 = vrot.slane %v2535_v4, 5 }
 0x206   : > { %v2152_v23 = vadd.f32 %v2085_v53, %v12520_v20  ;;  %v2917_v28 = vshll.u32 %v2536_v49, 16  ;;  %v1917_v35 = vsel %vm12391_vm13, %v1915_v37, %v1916_v13  ;;  %v3186_v53 = vld [vmem:[#allocation2 + $0xc0] sm:$0xe] }
 0x207   : > { %v2909_v21 = vrot.slane %v2907_v51, 5  ;;  %v2913_v20 = vrot.slane %v2911_v1, 4  ;;  %v10469_v2 = vrot.slane %v3186_v53, 9  ;;  %v1971_v57 = vunpack.c.l.b16 %v1917_v35 }
 0x208   : > { %v2466_v48 = vadd.f32 %v12801_v55, %v2152_v23  ;;  %v2904_v55 = vor.u32 %v2903_v31, %v2900_v59  ;;  %v3344_v23 = vrot.slane %v3342_v29, 4  ;;  %v2919_v1 = vrot.slane %v2917_v28, 5 }
 0x209   : > { %v2404_v60 = vpop.f32.mrf.mxu3  ;;  %v12853_v47 = vpop.f32.mrf.mxu1  ;;  %v2914_v40 = vor.u32 %v2913_v20, %v2909_v21  ;;  %v3961_v31 = vshrl.u32 %v3912_v25, 16  ;;  %v1988_v28 = vpack.c.b16 %v1971_v57, %v1970_v41  ;;  %v3914_v57 = vld [vmem:[#allocation2 + $0x20] sm:$0x1] }
 0x20a   : > { %2127 = vmatmul.bf16.gmra.mxu2 %v1987_v10  ;;  %v12849_v26 = vadd.f32 %v12792_v8, %v2466_v48  ;;  %v3345_v10 = vrot.slane %v2536_v49, 5  ;;  %v2905_v51 = vrot.slane %v2904_v55, 4  ;;  %v12861_v48 = vld [vmem:[#allocation2 + $0x1c] sm:$0xf] }
 0x20b   : > { %v2915_v59 = vrot.slane %v2914_v40, 4  ;;  %v3970_v49 = vshll.u32 %v12861_v48, 16  ;;  %v3974_v20 = vshrl.u32 %v12861_v48, 16 }
 0x20c   : > { %v12855_v43 = vpop.f32.mrf.mxu0  ;;  %v3346_v4 = vsel %vm12391_vm13, %v3344_v23, %v3345_v10 }
 0x20d   : > { %v2088_v27 = vpop.f32.mrf.mxu2  ;;  %v3395_v13 = vunpack.c.l.b16 %v3346_v4  ;;  %v2920_v35 = vsel %vm12014_vm2, %v2915_v59, %v2919_v1  ;;  %v3976_v23 = vrot.slane %v3974_v20, 4  ;;  %v11267_v59 = vld [vmem:[#allocation2 + $0xc0] sm:$0xff] }
 0x20e   : > { %v2153_v8 = vadd.f32 %v2088_v27, %v12534_v14  ;;  %2446 = vmatmul.bf16.gmra.mxu3 %v11266_v18  ;;  %v3343_v14 = vsel %vm12391_vm13, %v10469_v2, %v3342_v29  ;;  %v1777_v29 = vld [vmem:[#allocation2 + $0xb4] sm:$0xe]  ;;  %v3972_v2 = vrot.slane %v3970_v49, 5 }
 0x20f   : > { %3128 = vmatmul.bf16.gmra.mxu0 %v2984_v46  ;;  %v3394_v39 = vunpack.c.l.b16 %v3343_v14  ;;  %v10293_v4 = vrot.slane %v1777_v29, 9  ;;  %v3915_v29 = vld [vmem:[#allocation2 + $0x24] sm:$0xf] }
 0x210   : > { %v2467_v5 = vadd.f32 %v12827_v38, %v2153_v8  ;;  %v3964_v38 = vshll.u32 %v3912_v25, 16  ;;  %v11654_v8 = vld [vmem:[#allocation2 + $0xb8] sm:$0xf] }
 0x211   : > { %v2407_v24 = vpop.f32.mrf.mxu3  ;;  %v12873_v0 = vpop.f32.mrf.mxu1  ;;  %v3411_v46 = vpack.c.b16 %v3395_v13, %v3394_v39  ;;  %v1920_v53 = vrot.slane %v11654_v8, 5  ;;  %v3980_v39 = vshll.u32 %v3914_v57, 16 }
 0x212   : > { %v3149_v37 = vadd.f32 %v12813_v61, %v2467_v5  ;;  %v2910_v61 = vsel %vm12014_vm2, %v2905_v51, %v2909_v21  ;;  %v3966_v25 = vrot.slane %v3964_v38, 5  ;;  %v2969_v5 = vunpack.c.l.b16 %v2920_v35 }
 0x213   : > { %v2968_v41 = vunpack.c.l.b16 %v2910_v61  ;;  %v1922_v51 = vrot.slane %v1920_v53, 4  ;;  %v1921_v20 = vsel %vm12391_vm13, %v10293_v4, %v1920_v53  ;;  %v4594_v61 = vld [vmem:[#allocation2 + $0x18] sm:$0xe] }
 0x214   : > { %v12871_v18 = vadd.f32 %v12790_v50, %v3149_v37  ;;  %v12875_v27 = vpop.f32.mrf.mxu0  ;;  %v3963_v50 = vrot.slane %v3961_v31, 4  ;;  %v3977_v31 = vor.u32 %v3976_v23, %v3972_v2  ;;  %v12895_v23 = vld [vmem:[#allocation2 + $0x28] sm:$0xf] }
 0x215   : > { %v2090_v55 = vpop.f32.mrf.mxu2  ;;  %3559 = vmatmul.bf16.gmra.mxu1 %v3411_v46  ;;  %v2985_v13 = vpack.c.b16 %v2969_v5, %v2968_v41  ;;  %v4660_v46 = vrot.slane %v12861_v48, 5  ;;  %v10630_v48 = vrot.slane %v4594_v61, 9 }
 0x216   : > { %v2154_v40 = vadd.f32 %v2090_v55, %v12547_v56  ;;  %v11655_v56 = vld [vmem:[#allocation2 + $0xbc] sm:$0x1]  ;;  %v3967_v37 = vor.u32 %v3966_v25, %v3963_v50  ;;  %v3978_v35 = vrot.slane %v3977_v31, 4  ;;  %v1972_v50 = vunpack.c.l.b16 %v1921_v20  ;;  %v11360_v25 = vld [vmem:[#allocation9 + $0x60] sm:$0xff] }
 0x217   : > { %v1923_v1 = vrot.slane %v11655_v56, 5  ;;  %v4662_v41 = vrot.slane %v4660_v46, 4  ;;  %6223 = vmatpush.bf16.msra.mxu1 %v11360_v25  ;;  %v3988_v56 = vshll.u32 %v3915_v29, 16 }
 0x218   : > { %v2468_v10 = vadd.f32 %v2404_v60, %v2154_v40  ;;  %v3982_v40 = vrot.slane %v3980_v39, 5 }
 0x219   : > { %v2409_v14 = vpop.f32.mrf.mxu3  ;;  %v12885_v38 = vpop.f32.mrf.mxu1  ;;  %v1924_v55 = vsel %vm12391_vm13, %v1922_v51, %v1923_v1  ;;  %v3985_v51 = vshrl.u32 %v3915_v29, 16  ;;  %v3994_v1 = vshll.u32 %v12895_v23, 16 }
 0x21a   : > { %2132 = vmatmul.bf16.gmra.mxu2 %v1988_v28  ;;  %v12883_v21 = vadd.f32 %v12842_v9, %v2468_v10  ;;  %v3968_v28 = vrot.slane %v3967_v37, 4  ;;  %v1973_v53 = vunpack.c.l.b16 %v1924_v55 }
 0x21b   : > { %v3987_v55 = vrot.slane %v3985_v51, 4 }
 0x21c   : > { %v12887_v49 = vpop.f32.mrf.mxu0  ;;  %v3973_v4 = vsel %vm12014_vm2, %v3968_v28, %v3972_v2  ;;  %v3990_v28 = vrot.slane %v3988_v56, 5  ;;  %v4595_v56 = vld [vmem:[#allocation2 + $0x24] sm:$0xe] }
 0x21d   : > { %v2093_v60 = vpop.f32.mrf.mxu2  ;;  %v4361_v2 = vunpack.c.l.b16 %v3973_v4  ;;  %v4667_v4 = vrot.slane %v12895_v23, 5 }
 0x21e   : > { %v2155_v9 = vadd.f32 %v2093_v60, %v12555_v45  ;;  %2451 = vmatmul.bf16.gmra.mxu3 %v11267_v59  ;;  %v4663_v45 = vrot.slane %v3914_v57, 5  ;;  %v3998_v59 = vshrl.u32 %v12895_v23, 16 }
 0x21f   : > { %3133 = vmatmul.bf16.gmra.mxu0 %v2985_v13  ;;  %v4661_v13 = vsel %vm12391_vm13, %v10630_v48, %v4660_v46 }
 0x220   : > { %v2469_v8 = vadd.f32 %v2407_v24, %v2155_v9  ;;  %v3983_v24 = vsel %vm12014_vm2, %v3978_v35, %v3982_v40  ;;  %v4664_v60 = vsel %vm12391_vm13, %v4662_v41, %v4663_v45  ;;  %v4000_v61 = vrot.slane %v3998_v59, 4  ;;  %v3918_v59 = vld [vmem:[#allocation2 + $0x30] sm:$0xf] }
 0x221   : > { %v2412_v10 = vpop.f32.mrf.mxu3  ;;  %v12907_v31 = vpop.f32.mrf.mxu1  ;;  %v4362_v9 = vunpack.c.l.b16 %v3983_v24  ;;  %v4787_v40 = vunpack.c.l.b16 %v4661_v13  ;;  %v4788_v29 = vunpack.c.l.b16 %v4664_v60  ;;  %v10631_v13 = vrot.slane %v4595_v56, 9 }
 0x222   : > { %v3151_v5 = vadd.f32 %v12855_v43, %v2469_v8  ;;  %v1989_v43 = vpack.c.b16 %v1973_v53, %v1972_v50  ;;  %v3917_v8 = vld [vmem:[#allocation2 + $0x2c] sm:$0x1]  ;;  %v3991_v53 = vor.u32 %v3990_v28, %v3987_v55  ;;  %v4669_v60 = vrot.slane %v4667_v4, 4 }
 0x223   : > { %v4393_v46 = vpack.c.b16 %v4362_v9, %v4361_v2  ;;  %v4004_v41 = vshll.u32 %v3917_v8, 16  ;;  %v4819_v45 = vpack.c.b16 %v4788_v29, %v4787_v40  ;;  %v4009_v9 = vshrl.u32 %v3918_v59, 16 }
 0x224   : > { %v12905_v37 = vadd.f32 %v12840_v33, %v3151_v5  ;;  %v12909_v39 = vpop.f32.mrf.mxu0  ;;  %v3996_v33 = vrot.slane %v3994_v1, 5  ;;  %v3992_v51 = vrot.slane %v3991_v53, 4  ;;  %v4012_v55 = vshll.u32 %v3918_v59, 16  ;;  %v11292_v53 = vld [vmem:[#allocation2 + $0x18] sm:$0xff] }
 0x225   : > { %v2095_v57 = vpop.f32.mrf.mxu2 }
 0x226   : > { %v2156_v20 = vadd.f32 %v2095_v57, %v12576_v44  ;;  %v4001_v48 = vor.u32 %v4000_v61, %v3996_v33 }
 0x228   : > { %v2470_v35 = vadd.f32 %v2409_v14, %v2156_v20  ;;  %v4002_v1 = vrot.slane %v4001_v48, 4  ;;  %v4670_v20 = vrot.slane %v3917_v8, 5 }
 0x229   : > { %v2414_v50 = vpop.f32.mrf.mxu3  ;;  %v12923_v24 = vpop.f32.mrf.mxu1 }
 0x22a   : > { %2137 = vmatmul.bf16.gmra.mxu2 %v1989_v43  ;;  %v12917_v25 = vadd.f32 %v12875_v27, %v2470_v35  ;;  %v4006_v27 = vrot.slane %v4004_v41, 5  ;;  %v12925_v43 = vld [vmem:[#allocation2 + $0x34] sm:$0xf]  ;;  %v4011_v41 = vrot.slane %v4009_v9, 4 }
 0x22b   : > { %v4018_v61 = vshll.u32 %v12925_v43, 16 }
 0x22c   : > { %v12919_v5 = vpop.f32.mrf.mxu0  ;;  %v4007_v28 = vsel %vm12014_vm2, %v4002_v1, %v4006_v27  ;;  %v3920_v27 = vld [vmem:[#allocation2 + $0x38] sm:$0x1] }
 0x22d   : > { %v2098_v44 = vpop.f32.mrf.mxu2  ;;  %v4364_v48 = vunpack.c.l.b16 %v4007_v28  ;;  %v4596_v28 = vld [vmem:[#allocation2 + $0x30] sm:$0xe] }
 0x22e   : > { %v2157_v14 = vadd.f32 %v2098_v44, %v12586_v16  ;;  %4481 = vmatmul.bf16.vlgmr.msra.gmra.mxu3 %v4393_v46  ;;  %v3997_v16 = vsel %vm12014_vm2, %v3992_v51, %v3996_v33  ;;  %v4671_v33 = vsel %vm12391_vm13, %v4669_v60, %v4670_v20  ;;  %v4020_v44 = vrot.slane %v4018_v61, 5 }
 0x22f   : > { %4907 = vmatmul.bf16.vlgmr.msra.gmra.mxu0 %v4819_v45  ;;  %v4363_v8 = vunpack.c.l.b16 %v3997_v16  ;;  %v4014_v45 = vrot.slane %v4012_v55, 5  ;;  %v4790_v56 = vunpack.c.l.b16 %v4671_v33  ;;  %v4028_v60 = vshll.u32 %v3920_v27, 16 }
 0x230   : > { %v2471_v57 = vadd.f32 %v2412_v10, %v2157_v14  ;;  %v4022_v10 = vshrl.u32 %v12925_v43, 16 }
 0x231   : > { %v2417_v2 = vpop.f32.mrf.mxu3  ;;  %v12944_v1 = vpop.f32.mrf.mxu1 }
 0x232   : > { %v3153_v23 = vadd.f32 %v12887_v49, %v2471_v57  ;;  %v4668_v49 = vsel %vm12391_vm13, %v10631_v13, %v4667_v4  ;;  %v4024_v14 = vrot.slane %v4022_v10, 4  ;;  %v4394_v57 = vpack.c.b16 %v4364_v48, %v4363_v8  ;;  %v11359_v8 = vld [vmem:[#allocation9 + $0x58] sm:$0xff] }
 0x233   : > { %v4789_v51 = vunpack.c.l.b16 %v4668_v49  ;;  %v4015_v13 = vor.u32 %v4014_v45, %v4011_v41  ;;  %v4030_v10 = vrot.slane %v4028_v60, 5  ;;  %v12953_v49 = vld [vmem:[#allocation2 + $0x40] sm:$0xf]  ;;  %v4677_v48 = vrot.slane %v3920_v27, 5  ;;  %6224 = vmatpush.bf16.msra.mxu1 %v11359_v8  ;;  %v11293_v60 = vld [vmem:[#allocation2 + $0x24] sm:$0xff] }
 0x234   : > { %v12935_v35 = vadd.f32 %v12873_v0, %v3153_v23  ;;  %v12937_v29 = vpop.f32.mrf.mxu0 }
 0x235   : > { %v2100_v40 = vpop.f32.mrf.mxu2  ;;  %v4820_v20 = vpack.c.b16 %v4790_v56, %v4789_v51  ;;  %v4016_v55 = vrot.slane %v4015_v13, 4  ;;  %v4046_v51 = vshrl.u32 %v12953_v49, 16 }
 0x236   : > { %v2158_v46 = vadd.f32 %v2100_v40, %v12605_v54  ;;  %v4025_v54 = vor.u32 %v4024_v14, %v4020_v44  ;;  %v3921_v40 = vld [vmem:[#allocation2 + $0x3c] sm:$0xf] }
 0x237   : > { %v4033_v45 = vshrl.u32 %v3921_v40, 16  ;;  %v4036_v14 = vshll.u32 %v3921_v40, 16  ;;  %v3923_v40 = vld [vmem:[#allocation2 + $0x44] sm:$0x1] }
 0x238   : > { %v2472_v0 = vadd.f32 %v2414_v50, %v2158_v46  ;;  %v4674_v50 = vrot.slane %v12925_v43, 5  ;;  %v4026_v61 = vrot.slane %v4025_v54, 4  ;;  %v10632_v46 = vrot.slane %v4596_v28, 9 }
 0x239   : > { %v2419_v59 = vpop.f32.mrf.mxu3  ;;  %v12958_v43 = vpop.f32.mrf.mxu1  ;;  %v4048_v28 = vrot.slane %v4046_v51, 4 }
 0x23a   : > { %3799 = vmatmul.bf16.vlgmr.msra.gmra.mxu2 %v11292_v53  ;;  %v12947_v4 = vadd.f32 %v12909_v39, %v2472_v0  ;;  %v4676_v53 = vrot.slane %v4674_v50, 4  ;;  %v4042_v0 = vshll.u32 %v12953_v49, 16 }
 0x23c   : > { %v12949_v16 = vpop.f32.mrf.mxu0  ;;  %v4678_v13 = vsel %vm12391_vm13, %v4676_v53, %v4677_v48  ;;  %v4052_v48 = vshll.u32 %v3923_v40, 16 }
 0x23d   : > { %v2103_v23 = vpop.f32.mrf.mxu2 }
 0x23e   : > { %v2159_v9 = vadd.f32 %v2103_v23, %v12435_v17  ;;  %4486 = vmatmul.bf16.gmra.mxu3 %v4394_v57  ;;  %v4021_v17 = vsel %vm12014_vm2, %v4016_v55, %v4020_v44  ;;  %v4675_v44 = vsel %vm12391_vm13, %v10632_v46, %v4674_v50  ;;  %v4035_v23 = vrot.slane %v4033_v45, 4 }
 0x23f   : > { %4912 = vmatmul.bf16.gmra.mxu0 %v4820_v20  ;;  %v4365_v57 = vunpack.c.l.b16 %v4021_v17  ;;  %v4044_v55 = vrot.slane %v4042_v0, 5  ;;  %v4597_v0 = vld [vmem:[#allocation2 + $0x3c] sm:$0xe] }
 0x240   : > { %v2473_v39 = vadd.f32 %v2417_v2, %v2159_v9  ;;  %v4031_v2 = vsel %vm12014_vm2, %v4026_v61, %v4030_v10  ;;  %v4038_v9 = vrot.slane %v4036_v14, 5  ;;  %v4791_v61 = vunpack.c.l.b16 %v4675_v44  ;;  %v12983_v44 = vld [vmem:[#allocation2 + $0x4c] sm:$0xf] }
 0x241   : > { %v2422_v33 = vpop.f32.mrf.mxu3  ;;  %v4366_v20 = vunpack.c.l.b16 %v4031_v2  ;;  %v4792_v10 = vunpack.c.l.b16 %v4678_v13  ;;  %v4049_v53 = vor.u32 %v4048_v28, %v4044_v55 }
 0x242   : > { %v3155_v41 = vadd.f32 %v12919_v5, %v2473_v39  ;;  %v4039_v46 = vor.u32 %v4038_v9, %v4035_v23 }
 0x243   : > { %v4395_v50 = vpack.c.b16 %v4366_v20, %v4365_v57  ;;  %v4050_v51 = vrot.slane %v4049_v53, 4  ;;  %v4684_v20 = vrot.slane %v3923_v40, 5  ;;  %v11294_v53 = vld [vmem:[#allocation2 + $0x30] sm:$0xff] }
 0x244   : > { %v12965_v56 = vadd.f32 %v12907_v31, %v3155_v41  ;;  %v12967_v5 = vpop.f32.mrf.mxu0  ;;  %v12977_v41 = vpop.f32.mrf.mxu1  ;;  %v4040_v2 = vrot.slane %v4039_v46, 4 }
 0x245   : > { %v2105_v27 = vpop.f32.mrf.mxu2 }
 0x246   : > { %v2160_v54 = vadd.f32 %v2105_v27, %v12454_v52  ;;  %v4821_v52 = vpack.c.b16 %v4792_v10, %v4791_v61  ;;  %v3924_v27 = vld [vmem:[#allocation2 + $0x48] sm:$0xf] }
 0x247   : > { %v4060_v9 = vshll.u32 %v3924_v27, 16 }
 0x248   : > { %v2474_v31 = vadd.f32 %v2419_v59, %v2160_v54  ;;  %v4681_v59 = vrot.slane %v12953_v49, 5  ;;  %v10633_v54 = vrot.slane %v4597_v0, 9  ;;  %v4045_v49 = vsel %vm12014_vm2, %v4040_v2, %v4044_v55 }
 0x249   : > { %v2424_v39 = vpop.f32.mrf.mxu3  ;;  %v4367_v40 = vunpack.c.l.b16 %v4045_v49 }
 0x24a   : > { %3804 = vmatmul.bf16.gmra.mxu2 %v11293_v60  ;;  %v12975_v8 = vadd.f32 %v12937_v29, %v2474_v31  ;;  %v4054_v29 = vrot.slane %v4052_v48, 5  ;;  %v4683_v60 = vrot.slane %v4681_v59, 4  ;;  %v4066_v31 = vshll.u32 %v12983_v44, 16 }
 0x24c   : > { %v12979_v45 = vpop.f32.mrf.mxu0  ;;  %v4055_v28 = vsel %vm12014_vm2, %v4050_v51, %v4054_v29  ;;  %v4685_v55 = vsel %vm12391_vm13, %v4683_v60, %v4684_v20 }
 0x24d   : > { %v2108_v17 = vpop.f32.mrf.mxu2  ;;  %v4368_v48 = vunpack.c.l.b16 %v4055_v28  ;;  %v4794_v29 = vunpack.c.l.b16 %v4685_v55  ;;  %v11358_v55 = vld [vmem:[#allocation9 + $0x50] sm:$0xff] }
 0x24e   : > { %v2161_v14 = vadd.f32 %v2108_v17, %v12463_v22  ;;  %4491 = vmatmul.bf16.gmra.mxu3 %v4395_v50  ;;  %v4057_v22 = vshrl.u32 %v3924_v27, 16  ;;  %v3926_v27 = vld [vmem:[#allocation2 + $0x50] sm:$0x1]  ;;  %6225 = vmatpush.bf16.msra.mxu1 %v11358_v55 }
 0x24f   : > { %4917 = vmatmul.bf16.gmra.mxu0 %v4821_v52  ;;  %v13002_v52 = vpop.f32.mrf.mxu1  ;;  %v4076_v20 = vshll.u32 %v3926_v27, 16 }
 0x250   : > { %v2475_v57 = vadd.f32 %v2422_v33, %v2161_v14  ;;  %v4070_v33 = vshrl.u32 %v12983_v44, 16  ;;  %15558 = vst [vmem:[#allocation29_spill] sm:$0xff] %v13002_v52  ;;  %v4059_v17 = vrot.slane %v4057_v22, 4  ;;  %v4062_v14 = vrot.slane %v4060_v9, 5  ;;  %v3942_v52 = vld [vmem:[#allocation2 + $0x90] sm:$0xf] }
 0x251   : > { %v2427_v13 = vpop.f32.mrf.mxu3  ;;  %v4688_v22 = vrot.slane %v12983_v44, 5 }
 0x252   : > { %v3157_v23 = vadd.f32 %v12949_v16, %v2475_v57  ;;  %v4682_v16 = vsel %vm12391_vm13, %v10633_v54, %v4681_v59  ;;  %v4072_v2 = vrot.slane %v4070_v33, 4  ;;  %v4396_v54 = vpack.c.b16 %v4368_v48, %v4367_v40 }
 0x253   : > { %v4793_v51 = vunpack.c.l.b16 %v4682_v16  ;;  %v4063_v60 = vor.u32 %v4062_v14, %v4059_v17  ;;  %v3927_v16 = vld [vmem:[#allocation2 + $0x54] sm:$0xf]  ;;  %v4690_v17 = vrot.slane %v4688_v22, 4  ;;  %v4691_v14 = vrot.slane %v3926_v27, 5 }
 0x254   : > { %v12993_v61 = vadd.f32 %v12944_v1, %v3157_v23  ;;  %v12995_v50 = vpop.f32.mrf.mxu0  ;;  %v4068_v1 = vrot.slane %v4066_v31, 5  ;;  %v4598_v31 = vld [vmem:[#allocation2 + $0x48] sm:$0xe] }
 0x255   : > { %v2110_v10 = vpop.f32.mrf.mxu2  ;;  %v4822_v23 = vpack.c.b16 %v4794_v29, %v4793_v51  ;;  %v4064_v9 = vrot.slane %v4063_v60, 4  ;;  %v10634_v48 = vrot.slane %v4598_v31, 9 }
 0x256   : > { %15557 = vst [vmem:[#allocation28_spill] sm:$0xff] %v12993_v61  ;;  %v2162_v46 = vadd.f32 %v2110_v10, %v12479_v62  ;;  %v4073_v62 = vor.u32 %v4072_v2, %v4068_v1  ;;  %v4078_v10 = vrot.slane %v4076_v20, 5  ;;  %v4081_v2 = vshrl.u32 %v3927_v16, 16 }
 0x257   : > { %v13011_v40 = vpop.f32.mrf.mxu1 }
 0x258   : > { %v2476_v0 = vadd.f32 %v2424_v39, %v2162_v46  ;;  %v4074_v33 = vrot.slane %v4073_v62, 4  ;;  %v13013_v46 = vld [vmem:[#allocation2 + $0x58] sm:$0xf]  ;;  %v4692_v62 = vsel %vm12391_vm13, %v4690_v17, %v4691_v14 }
 0x259   : > { %v2429_v57 = vpop.f32.mrf.mxu3  ;;  %v4090_v51 = vshll.u32 %v13013_v46, 16  ;;  %v4094_v29 = vshrl.u32 %v13013_v46, 16 }
 0x25a   : > { %3809 = vmatmul.bf16.gmra.mxu2 %v11294_v53  ;;  %v13005_v59 = vadd.f32 %v12967_v5, %v2476_v0  ;;  %v4084_v0 = vshll.u32 %v3927_v16, 16  ;;  %v4796_v16 = vunpack.c.l.b16 %v4692_v62  ;;  %v13041_v62 = vld [vmem:[#allocation2 + $0x64] sm:$0xf] }
 0x25b   : > { %v4092_v31 = vrot.slane %v4090_v51, 5 }
 0x25c   : > { %v13007_v28 = vpop.f32.mrf.mxu0 }
 0x25d   : > { %v2113_v49 = vpop.f32.mrf.mxu2 }
 0x25e   : > { %v2163_v39 = vadd.f32 %v2113_v49, %v12489_v36  ;;  %4496 = vmatmul.bf16.gmra.mxu3 %v4396_v54  ;;  %v4069_v36 = vsel %vm12014_vm2, %v4064_v9, %v4068_v1  ;;  %v4689_v1 = vsel %vm12391_vm13, %v10634_v48, %v4688_v22  ;;  %v4086_v9 = vrot.slane %v4084_v0, 5 }
 0x25f   : > { %4922 = vmatmul.bf16.gmra.mxu0 %v4822_v23  ;;  %v11295_v23 = vld [vmem:[#allocation2 + $0x3c] sm:$0xff]  ;;  %v13035_v48 = vpop.f32.mrf.mxu1 }
 0x260   : > { %v2477_v5 = vadd.f32 %v2427_v13, %v2163_v39  ;;  %v4079_v13 = vsel %vm12014_vm2, %v4074_v33, %v4078_v10  ;;  %v4083_v39 = vrot.slane %v4081_v2, 4  ;;  %v4096_v33 = vrot.slane %v4094_v29, 4  ;;  %15561 = vst [vmem:[#allocation32_spill] sm:$0xff] %v13035_v48  ;;  %v4599_v29 = vld [vmem:[#allocation2 + $0x54] sm:$0xe] }
 0x261   : > { %v2432_v53 = vpop.f32.mrf.mxu3  ;;  %v4370_v49 = vunpack.c.l.b16 %v4079_v13  ;;  %v4795_v10 = vunpack.c.l.b16 %v4689_v1  ;;  %v3930_v1 = vld [vmem:[#allocation2 + $0x60] sm:$0xf] }
 0x262   : > { %v3159_v44 = vadd.f32 %v12979_v45, %v2477_v5  ;;  %v4369_v45 = vunpack.c.l.b16 %v4069_v36  ;;  %v3929_v5 = vld [vmem:[#allocation2 + $0x5c] sm:$0x1]  ;;  %v4087_v17 = vor.u32 %v4086_v9, %v4083_v39 }
 0x263   : > { %v4100_v14 = vshll.u32 %v3929_v5, 16  ;;  %v4823_v36 = vpack.c.b16 %v4796_v16, %v4795_v10  ;;  %v4698_v39 = vrot.slane %v3929_v5, 5  ;;  %v4114_v10 = vshll.u32 %v13041_v62, 16 }
 0x264   : > { %v13023_v54 = vadd.f32 %v12977_v41, %v3159_v44  ;;  %v13025_v27 = vpop.f32.mrf.mxu0  ;;  %v4397_v22 = vpack.c.b16 %v4370_v49, %v4369_v45  ;;  %v4088_v51 = vrot.slane %v4087_v17, 4 }
 0x265   : > { %v2115_v60 = vpop.f32.mrf.mxu2 }
 0x266   : > { %15559 = vst [vmem:[#allocation30_spill] sm:$0xff] %v13023_v54  ;;  %v2164_v20 = vadd.f32 %v2115_v60, %v12504_v63  ;;  %v4097_v63 = vor.u32 %v4096_v33, %v4092_v31  ;;  %v4108_v33 = vshll.u32 %v3930_v1, 16 }
 0x268   : > { %v2478_v41 = vadd.f32 %v2429_v57, %v2164_v20  ;;  %v4695_v57 = vrot.slane %v13013_v46, 5  ;;  %v4098_v60 = vrot.slane %v4097_v63, 4  ;;  %v4093_v46 = vsel %vm12014_vm2, %v4088_v51, %v4092_v31 }
 0x269   : > { %v2434_v55 = vpop.f32.mrf.mxu3 }
 0x26a   : > { %3814 = vmatmul.bf16.gmra.mxu2 %v11295_v23  ;;  %v13033_v44 = vadd.f32 %v12995_v50, %v2478_v41  ;;  %v4102_v50 = vrot.slane %v4100_v14, 5  ;;  %v10635_v23 = vrot.slane %v4599_v29, 9  ;;  %v4697_v49 = vrot.slane %v4695_v57, 4  ;;  %v15563_v14 = vld [vmem:[#allocation14_spill] sm:$0xff] }
 0x26b   : > { %v4110_v29 = vrot.slane %v4108_v33, 5  ;;  %v15565_v33 = vld [vmem:[#allocation15_spill] sm:$0xff] }
 0x26c   : > { %15560 = vst [vmem:[#allocation31_spill] sm:$0xff] %v13033_v44  ;;  %v13037_v0 = vpop.f32.mrf.mxu0  ;;  %v4103_v41 = vsel %vm12014_vm2, %v4098_v60, %v4102_v50  ;;  %v4696_v31 = vsel %vm12391_vm13, %v10635_v23, %v4695_v57  ;;  %v4699_v63 = vsel %vm12391_vm13, %v4697_v49, %v4698_v39  ;;  %v4116_v60 = vrot.slane %v4114_v10, 5 }
 0x26d   : > { %v2118_v2 = vpop.f32.mrf.mxu2 }
 0x26e   : > { %v2165_v13 = vadd.f32 %v2118_v2, %v12508_v32  ;;  %4501 = vmatmul.bf16.gmra.mxu3 %v4397_v22  ;;  %v4105_v32 = vshrl.u32 %v3930_v1, 16  ;;  %v3545_v22 = vpop.f32.mrf.mxu1  ;;  %v11296_v2 = vld [vmem:[#allocation2 + $0x48] sm:$0xff]  ;;  %v4797_v1 = vunpack.c.l.b16 %v4696_v31  ;;  %v4600_v31 = vld [vmem:[#allocation2 + $0x60] sm:$0xe] }
 0x26f   : > { %4927 = vmatmul.bf16.gmra.mxu0 %v4823_v36 }
 0x270   : > { %v2479_v45 = vadd.f32 %v2432_v53, %v2165_v13  ;;  %v4118_v53 = vshrl.u32 %v13041_v62, 16  ;;  %v4372_v13 = vunpack.c.l.b16 %v4103_v41  ;;  %v4107_v51 = vrot.slane %v4105_v32, 4 }
 0x271   : > { %v2437_v20 = vpop.f32.mrf.mxu3  ;;  %v4702_v32 = vrot.slane %v13041_v62, 5 }
 0x272   : > { %v3161_v9 = vadd.f32 %v13007_v28, %v2479_v45  ;;  %v4371_v28 = vunpack.c.l.b16 %v4093_v46  ;;  %v4798_v45 = vunpack.c.l.b16 %v4699_v63  ;;  %v4111_v23 = vor.u32 %v4110_v29, %v4107_v51 }
 0x273   : > { %v10636_v29 = vrot.slane %v4600_v31, 9 }
 0x274   : > { %v13051_v16 = vadd.f32 %v13011_v40, %v3161_v9  ;;  %v13053_v5 = vpop.f32.mrf.mxu0  ;;  %v4120_v40 = vrot.slane %v4118_v53, 4  ;;  %v3932_v9 = vld [vmem:[#allocation2 + $0x68] sm:$0x1]  ;;  %v4398_v57 = vpack.c.b16 %v4372_v13, %v4371_v28  ;;  %v4112_v53 = vrot.slane %v4111_v23, 4  ;;  %v13069_v13 = vld [vmem:[#allocation2 + $0x70] sm:$0xf] }
 0x275   : > { %v2120_v17 = vpop.f32.mrf.mxu2  ;;  %v4124_v39 = vshll.u32 %v3932_v9, 16 }
 0x276   : > { %15562 = vst [vmem:[#allocation33_spill] sm:$0xff] %v13051_v16  ;;  %v2166_v36 = vadd.f32 %v2120_v17, %v15563_v14  ;;  %v4121_v49 = vor.u32 %v4120_v40, %v4116_v60  ;;  %v4824_v17 = vpack.c.b16 %v4798_v45, %v4797_v1  ;;  %v13067_v10 = vpop.f32.mrf.mxu1  ;;  %v4704_v40 = vrot.slane %v4702_v32, 4 }
 0x277   : > { %15566 = vst [vmem:[#allocation15_spill] sm:$0xff] %v13067_v10  ;;  %v4117_v1 = vsel %vm12014_vm2, %v4112_v53, %v4116_v60  ;;  %v11297_v53 = vld [vmem:[#allocation2 + $0x54] sm:$0xff] }
 0x278   : > { %v2480_v50 = vadd.f32 %v2434_v55, %v2166_v36  ;;  %v4122_v63 = vrot.slane %v4121_v49, 4  ;;  %v3933_v36 = vld [vmem:[#allocation2 + $0x6c] sm:$0xf]  ;;  %v4142_v49 = vshrl.u32 %v13069_v13, 16 }
 0x279   : > { %v2439_v48 = vpop.f32.mrf.mxu3  ;;  %v4129_v45 = vshrl.u32 %v3933_v36, 16 }
 0x27a   : > { %3819 = vmatmul.bf16.gmra.mxu2 %v11296_v2  ;;  %v13061_v46 = vadd.f32 %v13025_v27, %v2480_v50  ;;  %v4126_v27 = vrot.slane %v4124_v39, 5  ;;  %v11357_v2 = vld [vmem:[#allocation9 + $0x48] sm:$0xff]  ;;  %v4705_v50 = vrot.slane %v3932_v9, 5  ;;  %v4373_v9 = vunpack.c.l.b16 %v4117_v1 }
 0x27b   : > { %6226 = vmatpush.bf16.msra.mxu1 %v11357_v2 }
 0x27c   : > { %15564 = vst [vmem:[#allocation14_spill] sm:$0xff] %v13061_v46  ;;  %v13063_v41 = vpop.f32.mrf.mxu0  ;;  %v4127_v23 = vsel %vm12014_vm2, %v4122_v63, %v4126_v27  ;;  %v4706_v60 = vsel %vm12391_vm13, %v4704_v40, %v4705_v50  ;;  %v4131_v63 = vrot.slane %v4129_v45, 4 }
 0x27d   : > { %v2123_v14 = vpop.f32.mrf.mxu2  ;;  %v4374_v31 = vunpack.c.l.b16 %v4127_v23  ;;  %v4800_v10 = vunpack.c.l.b16 %v4706_v60 }
 0x27e   : > { %v2167_v55 = vadd.f32 %v2123_v14, %v15565_v33  ;;  %4506 = vmatmul.bf16.gmra.mxu3 %v4398_v57  ;;  %v4132_v57 = vshll.u32 %v3933_v36, 16  ;;  %v15568_v33 = vld [vmem:[#allocation16_spill] sm:$0xff]  ;;  %v3550_v2 = vpop.f32.mrf.mxu1 }
 0x27f   : > { %4932 = vmatmul.bf16.gmra.mxu0 %v4824_v17 }
 0x280   : > { %v2481_v28 = vadd.f32 %v2437_v20, %v2167_v55  ;;  %v4138_v20 = vshll.u32 %v13069_v13, 16  ;;  %v4134_v27 = vrot.slane %v4132_v57, 5  ;;  %v4709_v57 = vrot.slane %v13069_v13, 5 }
 0x281   : > { %v2442_v51 = vpop.f32.mrf.mxu3 }
 0x282   : > { %v3163_v62 = vadd.f32 %v13037_v0, %v2481_v28  ;;  %v4703_v0 = vsel %vm12391_vm13, %v10636_v29, %v4702_v32  ;;  %v4140_v36 = vrot.slane %v4138_v20, 5  ;;  %v4144_v28 = vrot.slane %v4142_v49, 4 }
 0x283   : > { %v4399_v29 = vpack.c.b16 %v4374_v31, %v4373_v9  ;;  %v4135_v40 = vor.u32 %v4134_v27, %v4131_v63  ;;  %v13094_v9 = vld [vmem:[#allocation2 + $0x7c] sm:$0xf] }
 0x284   : > { %v13078_v39 = vadd.f32 %v3545_v22, %v3163_v62  ;;  %v13080_v14 = vpop.f32.mrf.mxu0  ;;  %v4799_v62 = vunpack.c.l.b16 %v4703_v0  ;;  %v4145_v50 = vor.u32 %v4144_v28, %v4140_v36  ;;  %v4601_v0 = vld [vmem:[#allocation2 + $0x6c] sm:$0xe] }
 0x285   : > { %v2125_v17 = vpop.f32.mrf.mxu2  ;;  %v4136_v49 = vrot.slane %v4135_v40, 4  ;;  %v10637_v63 = vrot.slane %v4601_v0, 9 }
 0x286   : > { %15567 = vst [vmem:[#allocation34_spill] sm:$0xff] %v13078_v39  ;;  %v2168_v55 = vadd.f32 %v2125_v17, %v15568_v33  ;;  %v3935_v39 = vld [vmem:[#allocation2 + $0x74] sm:$0x1]  ;;  %v4825_v33 = vpack.c.b16 %v4800_v10, %v4799_v62  ;;  %v4146_v60 = vrot.slane %v4145_v50, 4  ;;  %v4711_v10 = vrot.slane %v4709_v57, 4 }
 0x287   : > { %v4148_v17 = vshll.u32 %v3935_v39, 16  ;;  %v4712_v27 = vrot.slane %v3935_v39, 5  ;;  %v4141_v13 = vsel %vm12014_vm2, %v4136_v49, %v4140_v36  ;;  %v4166_v50 = vshrl.u32 %v13094_v9, 16  ;;  %v11298_v49 = vld [vmem:[#allocation2 + $0x60] sm:$0xff] }
 0x288   : > { %v2482_v22 = vadd.f32 %v2439_v48, %v2168_v55  ;;  %v15570_v48 = vld [vmem:[#allocation17_spill] sm:$0xff] }
 0x289   : > { %v2444_v1 = vpop.f32.mrf.mxu3  ;;  %v4150_v55 = vrot.slane %v4148_v17, 5  ;;  %v4713_v36 = vsel %vm12391_vm13, %v4711_v10, %v4712_v27 }
 0x28a   : > { %3824 = vmatmul.bf16.gmra.mxu2 %v11297_v53  ;;  %v13088_v32 = vadd.f32 %v13053_v5, %v2482_v22  ;;  %v3936_v53 = vld [vmem:[#allocation2 + $0x78] sm:$0xf]  ;;  %v13097_v22 = vpop.f32.mrf.mxu1 }
 0x28b   : > { %15571 = vst [vmem:[#allocation17_spill] sm:$0xff] %v13097_v22  ;;  %v4153_v62 = vshrl.u32 %v3936_v53, 16  ;;  %v4151_v40 = vsel %vm12014_vm2, %v4146_v60, %v4150_v55  ;;  %v4802_v22 = vunpack.c.l.b16 %v4713_v36 }
 0x28c   : > { %15569 = vst [vmem:[#allocation16_spill] sm:$0xff] %v13088_v32  ;;  %v13090_v45 = vpop.f32.mrf.mxu0  ;;  %v4376_v0 = vunpack.c.l.b16 %v4151_v40 }
 0x28d   : > { %v2128_v23 = vpop.f32.mrf.mxu2  ;;  %v4155_v60 = vrot.slane %v4153_v62, 4 }
 0x28e   : > { %v2169_v20 = vadd.f32 %v2128_v23, %v15570_v48  ;;  %4511 = vmatmul.bf16.gmra.mxu3 %v4399_v29  ;;  %v4156_v29 = vshll.u32 %v3936_v53, 16  ;;  %v4710_v23 = vsel %vm12391_vm13, %v10637_v63, %v4709_v57  ;;  %v15573_v48 = vld [vmem:[#allocation18_spill] sm:$0xff] }
 0x28f   : > { %4937 = vmatmul.bf16.gmra.mxu0 %v4825_v33 }
 0x290   : > { %v2483_v5 = vadd.f32 %v2442_v51, %v2169_v20  ;;  %v4162_v51 = vshll.u32 %v13094_v9, 16  ;;  %v4158_v55 = vrot.slane %v4156_v29, 5  ;;  %v4602_v29 = vld [vmem:[#allocation2 + $0x78] sm:$0xe] }
 0x291   : > { %v2447_v31 = vpop.f32.mrf.mxu3 }
 0x292   : > { %v3165_v28 = vadd.f32 %v13063_v41, %v2483_v5  ;;  %v4375_v41 = vunpack.c.l.b16 %v4141_v13  ;;  %v4164_v53 = vrot.slane %v4162_v51, 5  ;;  %v4168_v5 = vrot.slane %v4166_v50, 4  ;;  %v3555_v40 = vpop.f32.mrf.mxu1 }
 0x293   : > { %v4159_v63 = vor.u32 %v4158_v55, %v4155_v60 }
 0x294   : > { %v13105_v17 = vadd.f32 %v3550_v2, %v3165_v28  ;;  %v13107_v39 = vpop.f32.mrf.mxu0  ;;  %v4801_v28 = vunpack.c.l.b16 %v4710_v23  ;;  %v4400_v57 = vpack.c.b16 %v4376_v0, %v4375_v41  ;;  %v4169_v10 = vor.u32 %v4168_v5, %v4164_v53  ;;  %v15575_v23 = vld [vmem:[#allocation19_spill] sm:$0xff] }
 0x295   : > { %v2130_v33 = vpop.f32.mrf.mxu2 }
 0x296   : > { %15572 = vst [vmem:[#allocation35_spill] sm:$0xff] %v13105_v17  ;;  %v2170_v20 = vadd.f32 %v2130_v33, %v15573_v48  ;;  %v3938_v17 = vld [vmem:[#allocation2 + $0x80] sm:$0x1]  ;;  %v4716_v33 = vrot.slane %v13094_v9, 5  ;;  %v4826_v62 = vpack.c.b16 %v4802_v22, %v4801_v28  ;;  %v4160_v48 = vrot.slane %v4159_v63, 4 }
 0x297   : > { %v4172_v27 = vshll.u32 %v3938_v17, 16  ;;  %v4719_v9 = vrot.slane %v3938_v17, 5 }
 0x298   : > { %v2484_v2 = vadd.f32 %v2444_v1, %v2170_v20  ;;  %v3939_v1 = vld [vmem:[#allocation2 + $0x84] sm:$0xf]  ;;  %v13121_v20 = vld [vmem:[#allocation2 + $0x88] sm:$0xf]  ;;  %v4718_v0 = vrot.slane %v4716_v33, 4 }
 0x299   : > { %v2449_v32 = vpop.f32.mrf.mxu3  ;;  %v4174_v41 = vrot.slane %v4172_v27, 5  ;;  %v4177_v55 = vshrl.u32 %v3939_v1, 16  ;;  %v4180_v22 = vshll.u32 %v3939_v1, 16  ;;  %v4190_v28 = vshrl.u32 %v13121_v20, 16 }
 0x29a   : > { %3829 = vmatmul.bf16.gmra.mxu2 %v11298_v49  ;;  %v13115_v13 = vadd.f32 %v13080_v14, %v2484_v2  ;;  %v4170_v14 = vrot.slane %v4169_v10, 4  ;;  %v10638_v49 = vrot.slane %v4602_v29, 9  ;;  %v4186_v2 = vshll.u32 %v13121_v20, 16 }
 0x29b   : > { %v4720_v17 = vsel %vm12391_vm13, %v4718_v0, %v4719_v9  ;;  %v4179_v27 = vrot.slane %v4177_v55, 4 }
 0x29c   : > { %15574 = vst [vmem:[#allocation18_spill] sm:$0xff] %v13115_v13  ;;  %v13118_v50 = vpop.f32.mrf.mxu0  ;;  %v4175_v63 = vsel %vm12014_vm2, %v4170_v14, %v4174_v41 }
 0x29d   : > { %v2133_v51 = vpop.f32.mrf.mxu2  ;;  %v4378_v41 = vunpack.c.l.b16 %v4175_v63  ;;  %v4723_v63 = vrot.slane %v13121_v20, 5 }
 0x29e   : > { %v2171_v36 = vadd.f32 %v2133_v51, %v15575_v23  ;;  %4516 = vmatmul.bf16.gmra.mxu3 %v4400_v57  ;;  %v4165_v57 = vsel %vm12014_vm2, %v4160_v48, %v4164_v53  ;;  %v4192_v23 = vrot.slane %v4190_v28, 4  ;;  %v15577_v53 = vld [vmem:[#allocation20_spill] sm:$0xff]  ;;  %v11299_v48 = vld [vmem:[#allocation2 + $0x6c] sm:$0xff] }
 0x29f   : > { %4942 = vmatmul.bf16.gmra.mxu0 %v4826_v62  ;;  %v4182_v62 = vrot.slane %v4180_v22, 5  ;;  %v4377_v14 = vunpack.c.l.b16 %v4165_v57  ;;  %v4725_v20 = vrot.slane %v4723_v63, 4 }
 0x2a0   : > { %v2485_v60 = vadd.f32 %v2447_v31, %v2171_v36  ;;  %v4717_v31 = vsel %vm12391_vm13, %v10638_v49, %v4716_v33  ;;  %v13141_v33 = vpop.f32.mrf.mxu1  ;;  %v4804_v49 = vunpack.c.l.b16 %v4720_v17 }
 0x2a1   : > { %v2452_v5 = vpop.f32.mrf.mxu3  ;;  %15578 = vst [vmem:[#allocation20_spill] sm:$0xff] %v13141_v33  ;;  %v4183_v0 = vor.u32 %v4182_v62, %v4179_v27  ;;  %v4401_v28 = vpack.c.b16 %v4378_v41, %v4377_v14  ;;  %v5644_v33 = vld [vmem:[#allocation3 + $0x4] sm:$0xf] }
 0x2a2   : > { %v3167_v51 = vadd.f32 %v13090_v45, %v2485_v60  ;;  %v13138_v45 = vrot.slane %v4186_v2, 5  ;;  %v3941_v60 = vld [vmem:[#allocation2 + $0x8c] sm:$0x1]  ;;  %v5717_v27 = vshll.u32 %v5644_v33, 16  ;;  %v5721_v13 = vshrl.u32 %v5644_v33, 16 }
 0x2a3   : > { %v4196_v22 = vshll.u32 %v3941_v60, 16 }
 0x2a4   : > { %v13132_v10 = vadd.f32 %v3555_v40, %v3167_v51  ;;  %v13136_v1 = vpop.f32.mrf.mxu0  ;;  %v4803_v40 = vunpack.c.l.b16 %v4717_v31  ;;  %v4193_v55 = vor.u32 %v4192_v23, %v13138_v45  ;;  %v4184_v31 = vrot.slane %v4183_v0, 4 }
 0x2a5   : > { %v2135_v29 = vpop.f32.mrf.mxu2  ;;  %v5723_v0 = vrot.slane %v5721_v13, 4 }
 0x2a6   : > { %15576 = vst [vmem:[#allocation19_spill] sm:$0xff] %v13132_v10  ;;  %v2172_v36 = vadd.f32 %v2135_v29, %v15577_v53  ;;  %v4603_v29 = vld [vmem:[#allocation2 + $0x84] sm:$0xe]  ;;  %v4827_v57 = vpack.c.b16 %v4804_v49, %v4803_v40  ;;  %v5643_v53 = vld [vmem:[#allocation3] sm:$0xf]  ;;  %v4194_v23 = vrot.slane %v4193_v55, 4  ;;  %v4189_v33 = vsel %vm12014_vm2, %v4184_v31, %v13138_v45 }
 0x2a7   : > { %v5708_v17 = vshrl.u32 %v5643_v53, 16  ;;  %v4198_v10 = vrot.slane %v4196_v22, 5  ;;  %v5719_v40 = vrot.slane %v5717_v27, 5  ;;  %v4726_v49 = vrot.slane %v3941_v60, 5 }
 0x2a8   : > { %v2486_v51 = vadd.f32 %v2449_v32, %v2172_v36  ;;  %v5711_v32 = vshll.u32 %v5643_v53, 16  ;;  %v3560_v44 = vpop.f32.mrf.mxu1  ;;  %v4201_v27 = vshrl.u32 %v3942_v52, 16  ;;  %v4204_v45 = vshll.u32 %v3942_v52, 16  ;;  %v11300_v52 = vld [vmem:[#allocation2 + $0x78] sm:$0xff] }
 0x2a9   : > { %v13143_v9 = vpop.f32.mrf.mxu3  ;;  %v5710_v14 = vrot.slane %v5708_v17, 4  ;;  %v4199_v13 = vsel %vm12014_vm2, %v4194_v23, %v4198_v10  ;;  %v4727_v17 = vsel %vm12391_vm13, %v4725_v20, %v4726_v49 }
 0x2aa   : > { %3834 = vmatmul.bf16.gmra.mxu2 %v11299_v48  ;;  %v13147_v2 = vadd.f32 %v13107_v39, %v2486_v51  ;;  %v10639_v48 = vrot.slane %v4603_v29, 9  ;;  %v15580_v39 = vld [vmem:[#allocation21_spill] sm:$0xff]  ;;  %v5713_v41 = vrot.slane %v5711_v32, 5  ;;  %v13158_v29 = vld [vmem:[#allocation2 + $0x94] sm:$0xf]  ;;  %v4203_v20 = vrot.slane %v4201_v27, 4 }
 0x2ab   : > { %v4206_v49 = vrot.slane %v4204_v45, 5  ;;  %v4730_v27 = vrot.slane %v13158_v29, 5 }
 0x2ac   : > { %15579 = vst [vmem:[#allocation36_spill] sm:$0xff] %v13147_v2  ;;  %v13150_v36 = vpop.f32.mrf.mxu0  ;;  %v5691_v2 = vld [vmem:[#allocation3 + $0x8] sm:$0x1]  ;;  %v5714_v53 = vor.u32 %v5713_v41, %v5710_v14  ;;  %v4724_v22 = vsel %vm12391_vm13, %v10639_v48, %v4723_v63  ;;  %v15582_v48 = vld [vmem:[#allocation22_spill] sm:$0xff] }
 0x2ad   : > { %v2138_v62 = vpop.f32.mrf.mxu2  ;;  %v5727_v16 = vshll.u32 %v5691_v2, 16  ;;  %v4805_v41 = vunpack.c.l.b16 %v4724_v22 }
 0x2ae   : > { %v2173_v51 = vadd.f32 %v2138_v62, %v15580_v39  ;;  %4521 = vmatmul.bf16.gmra.mxu3 %v4401_v28  ;;  %v5724_v28 = vor.u32 %v5723_v0, %v5719_v40  ;;  %v4210_v62 = vshll.u32 %v13158_v29, 16 }
 0x2af   : > { %4947 = vmatmul.bf16.gmra.mxu0 %v4827_v57  ;;  %v5729_v2 = vrot.slane %v5727_v16, 5  ;;  %v11356_v57 = vld [vmem:[#allocation9 + $0x40] sm:$0xff] }
 0x2b0   : > { %v2487_v46 = vadd.f32 %v2452_v5, %v2173_v51  ;;  %v5715_v5 = vrot.slane %v5714_v53, 4  ;;  %v5725_v32 = vrot.slane %v5724_v28, 4  ;;  %6227 = vmatpush.bf16.msra.mxu1 %v11356_v57  ;;  %v4380_v51 = vunpack.c.l.b16 %v4199_v13  ;;  %v3944_v28 = vld [vmem:[#allocation2 + $0x98] sm:$0x1] }
 0x2b1   : > { %v4482_v55 = vpop.f32.mrf.mxu3  ;;  %v4220_v13 = vshll.u32 %v3944_v28, 16 }
 0x2b2   : > { %v3169_v60 = vadd.f32 %v13118_v50, %v2487_v46  ;;  %v5720_v63 = vsel %vm12014_vm2, %v5715_v5, %v5719_v40  ;;  %v4214_v46 = vshrl.u32 %v13158_v29, 16  ;;  %v5730_v16 = vsel %vm12014_vm2, %v5725_v32, %v5729_v2  ;;  %v13191_v29 = vld [vmem:[%s15514_s3] ss:$0 sm:$0xff] }
 0x2b3   : > { %v6108_v23 = vunpack.c.l.b16 %v5720_v63  ;;  %v6109_v14 = vunpack.c.l.b16 %v5730_v16  ;;  %v4806_v40 = vunpack.c.l.b16 %v4727_v17  ;;  %v4604_v63 = vld [vmem:[#allocation2 + $0x90] sm:$0xe] }
 0x2b4   : > { %v13165_v31 = vadd.f32 %v3560_v44, %v3169_v60  ;;  %v13171_v10 = vpop.f32.mrf.mxu0  ;;  %v4379_v44 = vunpack.c.l.b16 %v4189_v33  ;;  %v4212_v60 = vrot.slane %v4210_v62, 5  ;;  %v4216_v5 = vrot.slane %v4214_v46, 4  ;;  %v13183_v62 = vld [vmem:[#allocation2 + $0xa0] sm:$0xf] }
 0x2b5   : > { %v2140_v50 = vpop.f32.mrf.mxu2  ;;  %v6140_v53 = vpack.c.b16 %v6109_v14, %v6108_v23  ;;  %v4207_v33 = vor.u32 %v4206_v49, %v4203_v20  ;;  %v4828_v22 = vpack.c.b16 %v4806_v40, %v4805_v41  ;;  %v4732_v41 = vrot.slane %v4730_v27, 4 }
 0x2b6   : > { %15581 = vst [vmem:[#allocation21_spill] sm:$0xff] %v13165_v31  ;;  %v2174_v39 = vadd.f32 %v2140_v50, %v15582_v48  ;;  %v4402_v32 = vpack.c.b16 %v4380_v51, %v4379_v44  ;;  %v4217_v17 = vor.u32 %v4216_v5, %v4212_v60  ;;  %v3945_v50 = vld [vmem:[#allocation2 + $0x9c] sm:$0xf]  ;;  %v4238_v44 = vshrl.u32 %v13183_v62, 16 }
 0x2b7   : > { %6228 = vmatmul.bf16.vlgmr.msra.gmra.mxu1 %v6140_v53  ;;  %v4225_v16 = vshrl.u32 %v3945_v50, 16  ;;  %v4228_v23 = vshll.u32 %v3945_v50, 16  ;;  %v4208_v48 = vrot.slane %v4207_v33, 4  ;;  %v13199_v53 = vld [vmem:[%s15515_s4] ss:$0 sm:$0xff] }
 0x2b8   : > { %v2488_v0 = vadd.f32 %v13143_v9, %v2174_v39  ;;  %v4222_v39 = vrot.slane %v4220_v13, 5  ;;  %v4218_v14 = vrot.slane %v4217_v17, 4 }
 0x2b9   : > { %v4484_v57 = vpop.f32.mrf.mxu3  ;;  %v4227_v20 = vrot.slane %v4225_v16, 4  ;;  %v4230_v49 = vrot.slane %v4228_v23, 5  ;;  %v4213_v5 = vsel %vm12014_vm2, %v4208_v48, %v4212_v60  ;;  %v4605_v23 = vld [vmem:[#allocation2 + $0x9c] sm:$0xe] }
 0x2ba   : > { %3839 = vmatmul.bf16.gmra.mxu2 %v11300_v52  ;;  %v13178_v2 = vadd.f32 %v13136_v1, %v2488_v0  ;;  %v10640_v1 = vrot.slane %v4604_v63, 9  ;;  %v4234_v52 = vshll.u32 %v13183_v62, 16 }
 0x2bb   : > { %v4231_v60 = vor.u32 %v4230_v49, %v4227_v20  ;;  %v10641_v49 = vrot.slane %v4605_v23, 9 }
 0x2bc   : > { %15583 = vst [vmem:[#allocation22_spill] sm:$0xff] %v13178_v2  ;;  %v13181_v9 = vpop.f32.mrf.mxu0  ;;  %v13205_v33 = vrot.slane %v4234_v52, 5 }
 0x2bd   : > { %v3800_v45 = vpop.f32.mrf.mxu2  ;;  %v4232_v20 = vrot.slane %v4231_v60, 4 }
 0x2be   : > { %v3880_v46 = vadd.f32 %v3800_v45, %v12660_v58  ;;  %4526 = vmatmul.bf16.gmra.mxu3 %v4402_v32  ;;  %v4733_v58 = vrot.slane %v3944_v28, 5  ;;  %v4731_v32 = vsel %vm12391_vm13, %v10640_v1, %v4730_v27  ;;  %v4240_v28 = vrot.slane %v4238_v44, 4 }
 0x2bf   : > { %4952 = vmatmul.bf16.gmra.mxu0 %v4828_v22  ;;  %v3947_v22 = vld [vmem:[#allocation2 + $0xa4] sm:$0x1]  ;;  %v4381_v1 = vunpack.c.l.b16 %v4213_v5  ;;  %v4807_v16 = vunpack.c.l.b16 %v4731_v32  ;;  %v4237_v60 = vsel %vm12014_vm2, %v4232_v20, %v13205_v33 }
 0x2c0   : > { %v4562_v51 = vadd.f32 %v4482_v55, %v3880_v46  ;;  %v11355_v55 = vld [vmem:[#allocation9 + $0x38] sm:$0xff]  ;;  %v4734_v63 = vsel %vm12391_vm13, %v4732_v41, %v4733_v58  ;;  %v4244_v44 = vshll.u32 %v3947_v22, 16  ;;  %v4737_v41 = vrot.slane %v13183_v62, 5 }
 0x2c1   : > { %v13193_v40 = vpop.f32.mrf.mxu3  ;;  %6453 = vmatpush.bf16.msrb.mxu2 %v11355_v55  ;;  %v11301_v46 = vld [vmem:[#allocation2 + $0x84] sm:$0xff]  ;;  %v4808_v52 = vunpack.c.l.b16 %v4734_v63 }
 0x2c2   : > { %v4988_v0 = vadd.f32 %v13150_v36, %v4562_v51  ;;  %v4223_v36 = vsel %vm12014_vm2, %v4218_v14, %v4222_v39  ;;  %v4241_v39 = vor.u32 %v4240_v28, %v13205_v33  ;;  %v11371_v63 = vld [vmem:[#allocation9 + $0xb8] sm:$0xff] }
 0x2c3   : > { %v4382_v48 = vunpack.c.l.b16 %v4223_v36  ;;  %v4829_v5 = vpack.c.b16 %v4808_v52, %v4807_v16  ;;  %6831 = vmatpush.bf16.msrb.mxu3 %v11371_v63  ;;  %v5531_v52 = vld [vmem:[#allocation3 + $0xc] sm:$0xf] }
 0x2c4   : > { %v5024_v13 = vmul.f32 %v13191_v29, %v4988_v0  ;;  %v13212_v45 = vpop.f32.mrf.mxu0  ;;  %v4242_v32 = vrot.slane %v4241_v39, 4 }
 0x2c5   : > { %v3802_v17 = vpop.f32.mrf.mxu2  ;;  %v4403_v55 = vpack.c.b16 %v4382_v48, %v4381_v1  ;;  %v13231_v1 = vld [vmem:[#allocation2 + $0xac] sm:$0xf] }
 0x2c6   : > { %v5060_v50 = vadd.f32 %v13199_v53, %v5024_v13  ;;  %v3881_v27 = vadd.f32 %v3802_v17, %v12673_v12  ;;  %v4246_v13 = vrot.slane %v4244_v44, 5  ;;  %v4739_v17 = vrot.slane %v4737_v41, 4 }
 0x2c7   : > { %v4258_v44 = vshll.u32 %v13231_v1, 16 }
 0x2c8   : > { %v5092_v51 = vmax.f32 %v5060_v50, 0.0  ;;  %v4563_v14 = vadd.f32 %v4484_v57, %v3881_v27  ;;  %v4740_v57 = vrot.slane %v3947_v22, 5  ;;  %v4247_v33 = vsel %vm12014_vm2, %v4242_v32, %v4246_v13 }
 0x2c9   : > { %v13218_v58 = vpop.f32.mrf.mxu3  ;;  %v13249_v32 = vrot.slane %v4258_v44, 5 }
 0x2ca   : > { %v5178_v0 = vpack.c.bf16 %v5092_v51, %v5092_v51  ;;  %v4989_v12 = vadd.f32 %v13171_v10, %v4563_v14  ;;  %3844 = vmatmul.bf16.gmra.mxu2 %v11301_v46  ;;  %v13229_v10 = vsel %vm12391_vm13, %v10641_v49, %v4737_v41  ;;  %v3948_v46 = vld [vmem:[#allocation2 + $0xa8] sm:$0xf]  ;;  %v4262_v51 = vshrl.u32 %v13231_v1, 16 }
 0x2cb   : > { %v4249_v48 = vshrl.u32 %v3948_v46, 16  ;;  %v4252_v39 = vshll.u32 %v3948_v46, 16 }
 0x2cc   : > { %v5211_v36 = vshrl.u32 %v5178_v0, 16  ;;  %v5025_v28 = vmul.f32 %v13191_v29, %v4989_v12  ;;  %v5214_v50 = vshll.u32 %v5178_v0, 16  ;;  %v13222_v27 = vpop.f32.mrf.mxu0  ;;  %v13247_v0 = vld [vmem:[#allocation2 + $0xb0] sm:$0x1]  ;;  %v4264_v13 = vrot.slane %v4262_v51, 4 }
 0x2cd   : > { %v3805_v62 = vpop.f32.mrf.mxu2  ;;  %v4251_v12 = vrot.slane %v4249_v48, 4  ;;  %v4384_v48 = vunpack.c.l.b16 %v4247_v33 }
 0x2ce   : > { %v13233_v16 = vrot.slane %v5211_v36, 7  ;;  %v5061_v23 = vadd.f32 %v13199_v53, %v5025_v28  ;;  %v3882_v22 = vadd.f32 %v3805_v62, %v12696_v42  ;;  %4531 = vmatmul.bf16.gmra.mxu3 %v4403_v55  ;;  %v4741_v42 = vsel %vm12391_vm13, %v4739_v17, %v4740_v57  ;;  %v11403_v17 = vld [vmem:[#allocation9 + $0x138] sm:$0xff] }
 0x2cf   : > { %4957 = vmatmul.bf16.gmra.mxu0 %v4829_v5  ;;  %v4254_v55 = vrot.slane %v4252_v39, 5  ;;  %v11395_v5 = vld [vmem:[#allocation9 + $0xf8] sm:$0xff]  ;;  %v4383_v57 = vunpack.c.l.b16 %v4237_v60  ;;  %v4265_v46 = vor.u32 %v4264_v13, %v13249_v32  ;;  %v4810_v39 = vunpack.c.l.b16 %v4741_v42  ;;  %7827 = vmatpush.bf16.msrb.mxu1 %v11403_v17  ;;  %v11302_v13 = vld [vmem:[#allocation2 + $0x90] sm:$0xff] }
 0x2d0   : > { %v5216_v14 = vor.u32 %v5214_v50, %v13233_v16  ;;  %v5093_v41 = vmax.f32 %v5061_v23, 0.0  ;;  %v4564_v20 = vadd.f32 %v13193_v40, %v3882_v22  ;;  %v4268_v40 = vshll.u32 %v13247_v0, 16  ;;  %7145 = vmatpush.bf16.msrb.mxu0 %v11395_v5  ;;  %v5535_v42 = vld [vmem:[#allocation3 + $0x14] sm:$0x1] }
 0x2d1   : > { %v13245_v49 = vpop.f32.mrf.mxu3  ;;  %v4809_v50 = vunpack.c.l.b16 %v13229_v10  ;;  %v4255_v62 = vor.u32 %v4254_v55, %v4251_v12  ;;  %v5217_v44 = vrot.slane %v13233_v16, 4  ;;  %v4744_v10 = vrot.slane %v13231_v1, 5  ;;  %v15584_v12 = vld [vmem:[#allocation23_spill] sm:$0xff] }
 0x2d2   : > { %v5532_v36 = vsel %vm12134_vm9, %v5216_v14, %v5531_v52  ;;  %v5179_v28 = vpack.c.bf16 %v5093_v41, %v5093_v41  ;;  %v4990_v63 = vadd.f32 %v13181_v9, %v4564_v20  ;;  %v4606_v52 = vld [vmem:[#allocation2 + $0xa8] sm:$0xe]  ;;  %v4270_v33 = vrot.slane %v4268_v40, 5 }
 0x2d3   : > { %5533 = vst [vmem:[#allocation3 + $0xc] sm:$0xf] %v5532_v36  ;;  %v4256_v60 = vrot.slane %v4255_v62, 4  ;;  %v4266_v36 = vrot.slane %v4265_v46, 4  ;;  %v4746_v16 = vrot.slane %v4744_v10, 4  ;;  %v4404_v1 = vpack.c.b16 %v4384_v48, %v4383_v57 }
 0x2d4   : > { %v5219_v23 = vshrl.u32 %v5179_v28, 16  ;;  %v5026_v22 = vmul.f32 %v13191_v29, %v4990_v63  ;;  %v5222_v9 = vshll.u32 %v5179_v28, 16  ;;  %v13259_v14 = vpop.f32.mrf.mxu0  ;;  %v10642_v63 = vrot.slane %v4606_v52, 9 }
 0x2d5   : > { %v3807_v51 = vpop.f32.mrf.mxu2  ;;  %v4747_v28 = vrot.slane %v13247_v0, 5  ;;  %v4271_v57 = vsel %vm12014_vm2, %v4266_v36, %v4270_v33  ;;  %v5538_v33 = vld [vmem:[#allocation3 + $0x18] sm:$0xf] }
 0x2d6   : > { %v5221_v41 = vrot.slane %v5219_v23, 7  ;;  %v5062_v20 = vadd.f32 %v13199_v53, %v5026_v22  ;;  %v3883_v55 = vadd.f32 %v3807_v51, %v15584_v12  ;;  %v4261_v23 = vsel %vm12014_vm2, %v4256_v60, %v13249_v32 }
 0x2d8   : > { %v5224_v5 = vor.u32 %v5222_v9, %v5221_v41  ;;  %v5226_v2 = vrot.slane %v5221_v41, 4  ;;  %v5094_v31 = vmax.f32 %v5062_v20, 0.0  ;;  %v4565_v17 = vadd.f32 %v13218_v58, %v3883_v55  ;;  %v15585_v55 = vld [vmem:[#allocation24_spill] sm:$0xff] }
 0x2d9   : > { %v13266_v62 = vpop.f32.mrf.mxu3  ;;  %v4830_v58 = vpack.c.b16 %v4810_v39, %v4809_v50  ;;  %v13285_v39 = vunpack.c.l.b16 %v4261_v23 }
 0x2da   : > { %v5225_v40 = vsel %vm12125_vm8, %v5217_v44, %v5224_v5  ;;  %v5536_v46 = vsel %vm12144_vm10, %v5226_v2, %v5535_v42  ;;  %v5180_v22 = vpack.c.bf16 %v5094_v31, %v5094_v31  ;;  %v4991_v0 = vadd.f32 %v13212_v45, %v4565_v17  ;;  %3849 = vmatmul.bf16.gmra.mxu2 %v11302_v13  ;;  %v5645_v52 = vld [vmem:[#allocation3 + $0xc] sm:$0xf] }
 0x2db   : > { %5534 = vst [vmem:[#allocation3 + $0x10] sm:$0xf] %v5225_v40  ;;  %v5732_v9 = vshrl.u32 %v5645_v52, 16  ;;  %v5735_v51 = vshll.u32 %v5645_v52, 16  ;;  %v4745_v44 = vsel %vm12391_vm13, %v10642_v63, %v4744_v10  ;;  %v4748_v31 = vsel %vm12391_vm13, %v4746_v16, %v4747_v28  ;;  %v3951_v16 = vld [vmem:[#allocation2 + $0xb4] sm:$0xf] }
 0x2dc   : > { %5537 = vst [vmem:[#allocation3 + $0x14] sm:$0x1] %v5536_v46  ;;  %v5228_v32 = vshrl.u32 %v5180_v22, 16  ;;  %v5027_v48 = vmul.f32 %v13191_v29, %v4991_v0  ;;  %v13283_v45 = vpop.f32.mrf.mxu0  ;;  %v5231_v20 = vshll.u32 %v5180_v22, 16  ;;  %v13291_v42 = vunpack.c.l.b16 %v4271_v57  ;;  %v13293_v28 = vld [vmem:[#allocation2 + $0xb8] sm:$0xf] }
 0x2dd   : > { %v3810_v2 = vpop.f32.mrf.mxu2  ;;  %v5734_v60 = vrot.slane %v5732_v9, 4  ;;  %v5737_v50 = vrot.slane %v5735_v51, 5  ;;  %v4811_v36 = vunpack.c.l.b16 %v4745_v44  ;;  %v4812_v63 = vunpack.c.l.b16 %v4748_v31 }
 0x2de   : > { %v13287_v41 = vrot.slane %v5228_v32, 7  ;;  %v5063_v12 = vadd.f32 %v13199_v53, %v5027_v48  ;;  %v3884_v13 = vadd.f32 %v3810_v2, %v15585_v55  ;;  %4536 = vmatmul.bf16.gmra.mxu3 %v4404_v1  ;;  %v4273_v1 = vshrl.u32 %v3951_v16, 16 }
 0x2df   : > { %v5738_v10 = vor.u32 %v5737_v50, %v5734_v60  ;;  %4962 = vmatmul.bf16.gmra.mxu0 %v4830_v58  ;;  %v4276_v0 = vshll.u32 %v3951_v16, 16  ;;  %v4282_v32 = vshll.u32 %v13293_v28, 16  ;;  %v13310_v31 = vpack.c.b16 %v4812_v63, %v4811_v36  ;;  %v15586_v36 = vld [vmem:[#allocation25_spill] sm:$0xff] }
 0x2e0   : > { %v5233_v5 = vor.u32 %v5231_v20, %v13287_v41  ;;  %v5095_v17 = vmax.f32 %v5063_v12, 0.0  ;;  %v4566_v23 = vadd.f32 %v13245_v49, %v3884_v13  ;;  %v5234_v40 = vrot.slane %v13287_v41, 4 }
 0x2e1   : > { %v13298_v46 = vpop.f32.mrf.mxu3  ;;  %v5739_v22 = vrot.slane %v5738_v10, 4  ;;  %v4286_v41 = vshrl.u32 %v13293_v28, 16  ;;  %v4278_v10 = vrot.slane %v4276_v0, 5 }
 0x2e2   : > { %v5539_v52 = vsel %vm12134_vm9, %v5233_v5, %v5538_v33  ;;  %v5181_v9 = vpack.c.bf16 %v5095_v17, %v5095_v17  ;;  %v4992_v51 = vadd.f32 %v13222_v27, %v4566_v23  ;;  %v13303_v57 = vld [vmem:[#allocation3 + $0x10] sm:$0xf]  ;;  %v11354_v27 = vld [vmem:[#allocation9 + $0x30] sm:$0xff]  ;;  %v4275_v33 = vrot.slane %v4273_v1, 4 }
 0x2e3   : > { %5540 = vst [vmem:[#allocation3 + $0x18] sm:$0xf] %v5539_v52  ;;  %v5692_v49 = vld [vmem:[#allocation3 + $0x14] sm:$0x1]  ;;  %v5741_v58 = vshll.u32 %v13303_v57, 16  ;;  %v5745_v48 = vshrl.u32 %v13303_v57, 16  ;;  %6454 = vmatpush.bf16.msrb.mxu2 %v11354_v27 }
 0x2e4   : > { %v5236_v2 = vshrl.u32 %v5181_v9, 16  ;;  %v5028_v60 = vmul.f32 %v13191_v29, %v4992_v51  ;;  %v5751_v50 = vshll.u32 %v5692_v49, 16  ;;  %v13314_v12 = vpop.f32.mrf.mxu0  ;;  %v5239_v5 = vshll.u32 %v5181_v9, 16  ;;  %v11303_v23 = vld [vmem:[#allocation2 + $0x9c] sm:$0xff]  ;;  %v5542_v52 = vld [vmem:[#allocation3 + $0x20] sm:$0x1] }
 0x2e5   : > { %v3812_v20 = vpop.f32.mrf.mxu2  ;;  %v5743_v55 = vrot.slane %v5741_v58, 5  ;;  %v5747_v13 = vrot.slane %v5745_v48, 4  ;;  %v4279_v54 = vor.u32 %v4278_v10, %v4275_v33  ;;  %v13328_v33 = vld [vmem:[#allocation2 + $0xbc] sm:$0x1] }
 0x2e6   : > { %v5238_v16 = vrot.slane %v5236_v2, 7  ;;  %v5064_v17 = vadd.f32 %v13199_v53, %v5028_v60  ;;  %v3885_v63 = vadd.f32 %v3812_v20, %v15586_v36  ;;  %v5753_v44 = vrot.slane %v5751_v50, 5 }
 0x2e7   : > { %v5744_v51 = vsel %vm12014_vm2, %v5739_v22, %v5743_v55  ;;  %v5748_v49 = vor.u32 %v5747_v13, %v5743_v55  ;;  %v4284_v60 = vrot.slane %v4282_v32, 5  ;;  %v4288_v20 = vrot.slane %v4286_v41, 4 }
 0x2e8   : > { %v5241_v61 = vor.u32 %v5239_v5, %v5238_v16  ;;  %v5243_v58 = vrot.slane %v5238_v16, 4  ;;  %v5096_v48 = vmax.f32 %v5064_v17, 0.0  ;;  %v4567_v1 = vadd.f32 %v13266_v62, %v3885_v63  ;;  %v11370_v17 = vld [vmem:[#allocation9 + $0xb0] sm:$0xff] }
 0x2e9   : > { %v5749_v0 = vrot.slane %v5748_v49, 4  ;;  %v6110_v9 = vunpack.c.l.b16 %v5744_v51  ;;  %v13321_v2 = vpop.f32.mrf.mxu3  ;;  %v4280_v41 = vrot.slane %v4279_v54, 4  ;;  %v4292_v51 = vshll.u32 %v13328_v33, 16  ;;  %v15587_v54 = vld [vmem:[#allocation27_spill] sm:$0xff]  ;;  %6832 = vmatpush.bf16.msrb.mxu3 %v11370_v17 }
 0x2ea   : > { %v5242_v27 = vsel %vm12125_vm8, %v5234_v40, %v5241_v61  ;;  %v5543_v22 = vsel %vm12144_vm10, %v5243_v58, %v5542_v52  ;;  %v5182_v55 = vpack.c.bf16 %v5096_v48, %v5096_v48  ;;  %v4993_v50 = vadd.f32 %v13259_v14, %v4567_v1  ;;  %3854 = vmatmul.bf16.gmra.mxu2 %v11303_v23  ;;  %v5647_v13 = vld [vmem:[#allocation3 + $0x18] sm:$0xf]  ;;  %v4607_v1 = vld [vmem:[#allocation2 + $0xb4] sm:$0xe] }
 0x2eb   : > { %5541 = vst [vmem:[#allocation3 + $0x1c] sm:$0xf] %v5242_v27  ;;  %v5754_v62 = vsel %vm12014_vm2, %v5749_v0, %v5753_v44  ;;  %v5756_v10 = vshrl.u32 %v5647_v13, 16  ;;  %v5759_v32 = vshll.u32 %v5647_v13, 16  ;;  %v4289_v52 = vor.u32 %v4288_v20, %v4284_v60  ;;  %v5545_v0 = vld [vmem:[#allocation3 + $0x24] sm:$0xf] }
 0x2ec   : > { %5544 = vst [vmem:[#allocation3 + $0x20] sm:$0x1] %v5543_v22  ;;  %v5245_v16 = vshrl.u32 %v5182_v55, 16  ;;  %v5248_v61 = vshll.u32 %v5182_v55, 16  ;;  %v5029_v40 = vmul.f32 %v13191_v29, %v4993_v50  ;;  %v6111_v5 = vunpack.c.l.b16 %v5754_v62  ;;  %v13333_v14 = vpop.f32.mrf.mxu0 }
 0x2ed   : > { %v3815_v36 = vpop.f32.mrf.mxu2  ;;  %v5758_v63 = vrot.slane %v5756_v10, 4  ;;  %v5761_v23 = vrot.slane %v5759_v32, 5  ;;  %v15588_v27 = vpack.c.b16 %v13291_v42, %v13285_v39  ;;  %v4290_v55 = vrot.slane %v4289_v52, 4 }
 0x2ee   : > { %v13336_v49 = vrot.slane %v5245_v16, 7  ;;  %v5065_v44 = vadd.f32 %v13199_v53, %v5029_v40  ;;  %v3886_v58 = vadd.f32 %v3815_v36, %v15587_v54  ;;  %v6141_v48 = vpack.c.b16 %v6111_v5, %v6110_v9 }
 0x2ef   : > { %4541 = vmatmul.bf16.gmra.mxu3 %v15588_v27  ;;  %v5762_v22 = vor.u32 %v5761_v23, %v5758_v63  ;;  %v4294_v50 = vrot.slane %v4292_v51, 5  ;;  %4967 = vmatmul.bf16.gmra.mxu0 %v13310_v31  ;;  %v4285_v9 = vsel %vm12014_vm2, %v4280_v41, %v4284_v60  ;;  %v10643_v42 = vrot.slane %v4607_v1, 9  ;;  %v11394_v60 = vld [vmem:[#allocation9 + $0xf0] sm:$0xff] }
 0x2f0   : > { %v5250_v20 = vor.u32 %v5248_v61, %v13336_v49  ;;  %v5097_v13 = vmax.f32 %v5065_v44, 0.0  ;;  %v4568_v62 = vadd.f32 %v13298_v46, %v3886_v58  ;;  %6233 = vmatmul.bf16.gmra.mxu1 %v6141_v48  ;;  %v5251_v10 = vrot.slane %v13336_v49, 4  ;;  %v11402_v51 = vld [vmem:[#allocation9 + $0x130] sm:$0xff]  ;;  %7146 = vmatpush.bf16.msrb.mxu0 %v11394_v60 }
 0x2f1   : > { %v13349_v32 = vpop.f32.mrf.mxu3  ;;  %v4295_v39 = vsel %vm12014_vm2, %v4290_v55, %v4294_v50  ;;  %v4751_v16 = vrot.slane %v13293_v28, 5  ;;  %v5763_v5 = vrot.slane %v5762_v22, 4  ;;  %v13362_v36 = vunpack.c.l.b16 %v4285_v9  ;;  %v11304_v55 = vld [vmem:[#allocation2 + $0xa8] sm:$0xff]  ;;  %7828 = vmatpush.bf16.msrb.mxu1 %v11402_v51 }
 0x2f2   : > { %v5546_v61 = vsel %vm12134_vm9, %v5250_v20, %v5545_v0  ;;  %v5183_v46 = vpack.c.bf16 %v5097_v13, %v5097_v13  ;;  %v4994_v40 = vadd.f32 %v13283_v45, %v4568_v62  ;;  %v13357_v31 = vld [vmem:[#allocation3 + $0x1c] sm:$0xf]  ;;  %v4388_v63 = vunpack.c.l.b16 %v4295_v39  ;;  %v3954_v20 = vld [vmem:[#allocation2 + $0xc0] sm:$0xf]  ;;  %v5549_v13 = vld [vmem:[#allocation3 + $0x2c] sm:$0x1] }
 0x2f3   : > { %5547 = vst [vmem:[#allocation3 + $0x24] sm:$0xf] %v5546_v61  ;;  %v13359_v41 = vld [vmem:[#allocation3 + $0x20] sm:$0x1]  ;;  %v5765_v17 = vshll.u32 %v13357_v31, 16  ;;  %v5769_v52 = vshrl.u32 %v13357_v31, 16  ;;  %v4752_v45 = vsel %vm12391_vm13, %v10643_v42, %v4751_v16 }
 0x2f4   : > { %v5253_v23 = vshrl.u32 %v5183_v46, 16  ;;  %v5030_v28 = vmul.f32 %v13191_v29, %v4994_v40  ;;  %v5256_v49 = vshll.u32 %v5183_v46, 16  ;;  %v13368_v54 = vpop.f32.mrf.mxu0  ;;  %v5775_v48 = vshll.u32 %v13359_v41, 16 }
 0x2f5   : > { %v3817_v44 = vpop.f32.mrf.mxu2  ;;  %v5767_v58 = vrot.slane %v5765_v17, 5  ;;  %v4753_v1 = vrot.slane %v4751_v16, 4  ;;  %v5771_v50 = vrot.slane %v5769_v52, 4  ;;  %v4406_v39 = vpack.c.b16 %v4388_v63, %v13362_v36 }
 0x2f6   : > { %v5255_v0 = vrot.slane %v5253_v23, 7  ;;  %v5066_v27 = vadd.f32 %v13199_v53, %v5030_v28  ;;  %v3887_v22 = vadd.f32 %v3817_v44, %v12809_v19  ;;  %v5777_v9 = vrot.slane %v5775_v48, 5 }
 0x2f7   : > { %v5768_v62 = vsel %vm12014_vm2, %v5763_v5, %v5767_v58  ;;  %v4754_v42 = vrot.slane %v13328_v33, 5  ;;  %v5772_v60 = vor.u32 %v5771_v50, %v5767_v58  ;;  %v4813_v23 = vunpack.c.l.b16 %v4752_v45  ;;  %v13387_v58 = vld [vmem:[#allocation2 + $0xc4] sm:$0xf] }
 0x2f8   : > { %v5258_v61 = vor.u32 %v5256_v49, %v5255_v0  ;;  %v5260_v16 = vrot.slane %v5255_v0, 4  ;;  %v5098_v46 = vmax.f32 %v5066_v27, 0.0  ;;  %v4569_v40 = vadd.f32 %v13321_v2, %v3887_v22 }
 0x2f9   : > { %v13378_v19 = vpop.f32.mrf.mxu3  ;;  %v4755_v17 = vsel %vm12391_vm13, %v4753_v1, %v4754_v42  ;;  %v4297_v28 = vshrl.u32 %v3954_v20, 16  ;;  %v5773_v2 = vrot.slane %v5772_v60, 4  ;;  %v6112_v51 = vunpack.c.l.b16 %v5768_v62 }
 0x2fa   : > { %v5259_v5 = vsel %vm12125_vm8, %v5251_v10, %v5258_v61  ;;  %v5550_v36 = vsel %vm12144_vm10, %v5260_v16, %v5549_v13  ;;  %v5184_v33 = vpack.c.bf16 %v5098_v46, %v5098_v46  ;;  %v4995_v63 = vadd.f32 %v13314_v12, %v4569_v40  ;;  %3859 = vmatmul.bf16.gmra.mxu2 %v11304_v55  ;;  %v5649_v52 = vld [vmem:[#allocation3 + $0x24] sm:$0xf]  ;;  %v5552_v16 = vld [vmem:[#allocation3 + $0x30] sm:$0xf] }
 0x2fb   : > { %5548 = vst [vmem:[#allocation3 + $0x28] sm:$0xf] %v5259_v5  ;;  %v4814_v49 = vunpack.c.l.b16 %v4755_v17  ;;  %v5780_v44 = vshrl.u32 %v5649_v52, 16  ;;  %v5783_v1 = vshll.u32 %v5649_v52, 16  ;;  %v5778_v27 = vsel %vm12014_vm2, %v5773_v2, %v5777_v9 }
 0x2fc   : > { %5551 = vst [vmem:[#allocation3 + $0x2c] sm:$0x1] %v5550_v36  ;;  %v5262_v45 = vshrl.u32 %v5184_v33, 16  ;;  %v5265_v48 = vshll.u32 %v5184_v33, 16  ;;  %v5031_v10 = vmul.f32 %v13191_v29, %v4995_v63  ;;  %v13392_v12 = vpop.f32.mrf.mxu0  ;;  %v4299_v50 = vrot.slane %v4297_v28, 4 }
 0x2fd   : > { %v3820_v0 = vpop.f32.mrf.mxu2  ;;  %v4832_v22 = vpack.c.b16 %v4814_v49, %v4813_v23  ;;  %v5782_v55 = vrot.slane %v5780_v44, 4  ;;  %v6113_v61 = vunpack.c.l.b16 %v5778_v27  ;;  %v5785_v46 = vrot.slane %v5783_v1, 5  ;;  %v15589_v44 = vld [vmem:[#allocation26_spill] sm:$0xff] }
 0x2fe   : > { %v13394_v13 = vrot.slane %v5262_v45, 7  ;;  %v5067_v62 = vadd.f32 %v13199_v53, %v5031_v10  ;;  %v3888_v42 = vadd.f32 %v3820_v0, %v12838_v3  ;;  %v4300_v40 = vshll.u32 %v3954_v20, 16 }
 0x2ff   : > { %4546 = vmatmul.bf16.gmra.mxu3 %v4406_v39  ;;  %v4306_v60 = vshll.u32 %v13387_v58, 16  ;;  %v4310_v9 = vshrl.u32 %v13387_v58, 16  ;;  %4972 = vmatmul.bf16.gmra.mxu0 %v4832_v22  ;;  %v6142_v5 = vpack.c.b16 %v6113_v61, %v6112_v51  ;;  %v5786_v33 = vor.u32 %v5785_v46, %v5782_v55  ;;  %v11353_v22 = vld [vmem:[#allocation9 + $0x28] sm:$0xff] }
 0x300   : > { %v5267_v17 = vor.u32 %v5265_v48, %v13394_v13  ;;  %v5099_v23 = vmax.f32 %v5067_v62, 0.0  ;;  %v4570_v28 = vadd.f32 %v13349_v32, %v3888_v42  ;;  %v4302_v3 = vrot.slane %v4300_v40, 5  ;;  %v11369_v55 = vld [vmem:[#allocation9 + $0xa8] sm:$0xff]  ;;  %6455 = vmatpush.bf16.msrb.mxu2 %v11353_v22 }
 0x301   : > { %v13402_v36 = vpop.f32.mrf.mxu3  ;;  %v4308_v63 = vrot.slane %v4306_v60, 5  ;;  %v4312_v49 = vrot.slane %v4310_v9, 4  ;;  %v3574_v45 = vadd.f32 %v15589_v44, %v12849_v26  ;;  %6238 = vmatmul.bf16.gmra.mxu1 %v6142_v5  ;;  %v5787_v51 = vrot.slane %v5786_v33, 4  ;;  %v11393_v62 = vld [vmem:[#allocation9 + $0xe8] sm:$0xff]  ;;  %6833 = vmatpush.bf16.msrb.mxu3 %v11369_v55  ;;  %v5556_v33 = vld [vmem:[#allocation3 + $0x38] sm:$0x1] }
 0x302   : > { %v5553_v39 = vsel %vm12134_vm9, %v5267_v17, %v5552_v16  ;;  %v5185_v20 = vpack.c.bf16 %v5099_v23, %v5099_v23  ;;  %v4996_v52 = vadd.f32 %v13333_v14, %v4570_v28  ;;  %v13407_v2 = vld [vmem:[#allocation3 + $0x28] sm:$0xf]  ;;  %v4303_v10 = vor.u32 %v4302_v3, %v4299_v50  ;;  %v11305_v17 = vld [vmem:[#allocation2 + $0xb4] sm:$0xff]  ;;  %v3956_v28 = vld [vmem:[#allocation2 + $0xc8] sm:$0x1]  ;;  %7147 = vmatpush.bf16.msrb.mxu0 %v11393_v62 }
 0x303   : > { %5554 = vst [vmem:[#allocation3 + $0x30] sm:$0xf] %v5553_v39  ;;  %v13411_v32 = vld [vmem:[#allocation3 + $0x2c] sm:$0x1]  ;;  %v5789_v48 = vshll.u32 %v13407_v2, 16  ;;  %v5793_v14 = vshrl.u32 %v13407_v2, 16  ;;  %v4313_v40 = vor.u32 %v4312_v49, %v4308_v63 }
 0x304   : > { %v5270_v1 = vshrl.u32 %v5185_v20, 16  ;;  %v5273_v0 = vshll.u32 %v5185_v20, 16  ;;  %v5032_v27 = vmul.f32 %v13191_v29, %v4996_v52  ;;  %v13416_v61 = vpop.f32.mrf.mxu0  ;;  %v5799_v16 = vshll.u32 %v13411_v32, 16 }
 0x305   : > { %v3822_v42 = vpop.f32.mrf.mxu2  ;;  %v5791_v26 = vrot.slane %v5789_v48, 5  ;;  %v4304_v46 = vrot.slane %v4303_v10, 4  ;;  %v5795_v23 = vrot.slane %v5793_v14, 4  ;;  %v5268_v5 = vrot.slane %v13394_v13, 4  ;;  %v4608_v13 = vld [vmem:[#allocation2 + $0xc0] sm:$0xe] }
 0x306   : > { %v5272_v60 = vrot.slane %v5270_v1, 7  ;;  %v5068_v50 = vadd.f32 %v13199_v53, %v5032_v27  ;;  %v3889_v9 = vadd.f32 %v3822_v42, %v3574_v45  ;;  %v5801_v48 = vrot.slane %v5799_v16, 5 }
 0x307   : > { %v5792_v3 = vsel %vm12014_vm2, %v5787_v51, %v5791_v26  ;;  %v4309_v39 = vsel %vm12014_vm2, %v4304_v46, %v4308_v63  ;;  %v5796_v45 = vor.u32 %v5795_v23, %v5791_v26  ;;  %v4314_v1 = vrot.slane %v4313_v40, 4 }
 0x308   : > { %v5275_v20 = vor.u32 %v5273_v0, %v5272_v60  ;;  %v5277_v52 = vrot.slane %v5272_v60, 4  ;;  %v5100_v49 = vmax.f32 %v5068_v50, 0.0  ;;  %v4571_v44 = vadd.f32 %v13378_v19, %v3889_v9 }
 0x309   : > { %v13426_v10 = vpop.f32.mrf.mxu3  ;;  %v4316_v27 = vshll.u32 %v3956_v28, 16  ;;  %v5797_v22 = vrot.slane %v5796_v45, 4  ;;  %v6114_v19 = vunpack.c.l.b16 %v5792_v3  ;;  %v4389_v62 = vunpack.c.l.b16 %v4309_v39  ;;  %v11392_v3 = vld [vmem:[#allocation9 + $0xe0] sm:$0xff] }
 0x30a   : > { %v5276_v14 = vsel %vm12125_vm8, %v5268_v5, %v5275_v20  ;;  %v5557_v51 = vsel %vm12144_vm10, %v5277_v52, %v5556_v33  ;;  %v5186_v63 = vpack.c.bf16 %v5100_v49, %v5100_v49  ;;  %v4997_v0 = vadd.f32 %v13368_v54, %v4571_v44  ;;  %3864 = vmatmul.bf16.gmra.mxu2 %v11305_v17  ;;  %v13433_v42 = vld [vmem:[#allocation3 + $0x30] sm:$0xf]  ;;  %v11352_v5 = vld [vmem:[#allocation9 + $0x20] sm:$0xff] }
 0x30b   : > { %5555 = vst [vmem:[#allocation3 + $0x34] sm:$0xf] %v5276_v14  ;;  %v4318_v55 = vrot.slane %v4316_v27, 5  ;;  %v10644_v40 = vrot.slane %v4608_v13, 9  ;;  %v5802_v50 = vsel %vm12014_vm2, %v5797_v22, %v5801_v48  ;;  %v4758_v17 = vrot.slane %v13387_v58, 5  ;;  %v11368_v33 = vld [vmem:[#allocation9 + $0xa0] sm:$0xff]  ;;  %6456 = vmatpush.bf16.msrb.mxu2 %v11352_v5  ;;  %7148 = vmatpush.bf16.msrb.mxu0 %v11392_v3 }
 0x30c   : > { %5558 = vst [vmem:[#allocation3 + $0x38] sm:$0x1] %v5557_v51  ;;  %v5279_v26 = vshrl.u32 %v5186_v63, 16  ;;  %v5282_v16 = vshll.u32 %v5186_v63, 16  ;;  %v5033_v46 = vmul.f32 %v13191_v29, %v4997_v0  ;;  %v13438_v9 = vpop.f32.mrf.mxu0  ;;  %v4761_v23 = vrot.slane %v3956_v28, 5  ;;  %6834 = vmatpush.bf16.msrb.mxu3 %v11368_v33 }
 0x30d   : > { %v3825_v60 = vpop.f32.mrf.mxu2  ;;  %v4319_v54 = vsel %vm12014_vm2, %v4314_v1, %v4318_v55  ;;  %v6115_v49 = vunpack.c.l.b16 %v5802_v50  ;;  %v5559_v44 = vld [vmem:[#allocation3 + $0x3c] sm:$0xf]  ;;  %v4759_v48 = vsel %vm12391_vm13, %v10644_v40, %v4758_v17  ;;  %v4760_v27 = vrot.slane %v4758_v17, 4  ;;  %v11351_v55 = vld [vmem:[#allocation9 + $0x18] sm:$0xff] }
 0x30e   : > { %v13443_v39 = vrot.slane %v5279_v26, 7  ;;  %v5069_v20 = vadd.f32 %v13199_v53, %v5033_v46  ;;  %v3890_v52 = vadd.f32 %v3825_v60, %v12871_v18  ;;  %v4390_v45 = vunpack.c.l.b16 %v4319_v54  ;;  %v11367_v26 = vld [vmem:[#allocation9 + $0x98] sm:$0xff] }
 0x30f   : > { %v5804_v1 = vshrl.u32 %v13433_v42, 16  ;;  %v3576_v58 = vadd.f32 %v12811_v7, %v12883_v21  ;;  %v6143_v18 = vpack.c.b16 %v6115_v49, %v6114_v19  ;;  %v4762_v63 = vsel %vm12391_vm13, %v4760_v27, %v4761_v23  ;;  %v11391_v46 = vld [vmem:[#allocation9 + $0xd8] sm:$0xff]  ;;  %6457 = vmatpush.bf16.msrb.mxu2 %v11351_v55 }
 0x310   : > { %v5284_v28 = vor.u32 %v5282_v16, %v13443_v39  ;;  %v5101_v13 = vmax.f32 %v5069_v20, 0.0  ;;  %v4572_v14 = vadd.f32 %v13402_v36, %v3890_v52  ;;  %v4407_v51 = vpack.c.b16 %v4390_v45, %v4389_v62  ;;  %v3957_v54 = vld [vmem:[#allocation2 + $0xcc] sm:$0xf]  ;;  %6835 = vmatpush.bf16.msrb.mxu3 %v11367_v26  ;;  %7149 = vmatpush.bf16.msrb.mxu0 %v11391_v46  ;;  %v11366_v52 = vld [vmem:[#allocation9 + $0x90] sm:$0xff] }
 0x311   : > { %v4815_v0 = vunpack.c.l.b16 %v4759_v48  ;;  %v13456_v22 = vpop.f32.mrf.mxu3  ;;  %v4816_v40 = vunpack.c.l.b16 %v4762_v63  ;;  %v13465_v19 = vadd.f32 %v12853_v47, %v12917_v25  ;;  %v13469_v62 = vadd.f32 %v12885_v38, %v12947_v4  ;;  %6243 = vmatmul.bf16.gmra.mxu1 %v6143_v18  ;;  %v11401_v47 = vld [vmem:[#allocation9 + $0x128] sm:$0xff]  ;;  %v11306_v48 = vld [vmem:[#allocation2 + $0xc0] sm:$0xff] }
 0x312   : > { %v5560_v7 = vsel %vm12134_vm9, %v5284_v28, %v5559_v44  ;;  %v5187_v21 = vpack.c.bf16 %v5101_v13, %v5101_v13  ;;  %v4998_v16 = vadd.f32 %v13392_v12, %v4572_v14  ;;  %v13461_v36 = vld [vmem:[#allocation3 + $0x34] sm:$0xf]  ;;  %4551 = vmatmul.bf16.gmra.mxu3 %v4407_v51  ;;  %v5806_v60 = vrot.slane %v5804_v1, 4  ;;  %7829 = vmatpush.bf16.msrb.mxu1 %v11401_v47  ;;  %v11390_v1 = vld [vmem:[#allocation9 + $0xd0] sm:$0xff]  ;;  %v5563_v28 = vld [vmem:[#allocation3 + $0x44] sm:$0x1] }
 0x313   : > { %5561 = vst [vmem:[#allocation3 + $0x3c] sm:$0xf] %v5560_v7  ;;  %v5807_v50 = vshll.u32 %v13433_v42, 16  ;;  %v5285_v12 = vrot.slane %v13443_v39, 4  ;;  %v4833_v5 = vpack.c.b16 %v4816_v40, %v4815_v0  ;;  %v13474_v33 = vld [vmem:[#allocation3 + $0x38] sm:$0x1] }
 0x314   : > { %v5287_v17 = vshrl.u32 %v5187_v21, 16  ;;  %v5034_v23 = vmul.f32 %v13191_v29, %v4998_v16  ;;  %v5290_v38 = vshll.u32 %v5187_v21, 16  ;;  %v13476_v4 = vpop.f32.mrf.mxu0  ;;  %v5813_v20 = vshll.u32 %v13461_v36, 16  ;;  %v11350_v39 = vld [vmem:[#allocation9 + $0x10] sm:$0xff]  ;;  %6836 = vmatpush.bf16.msrb.mxu3 %v11366_v52  ;;  %7150 = vmatpush.bf16.msrb.mxu0 %v11390_v1 }
 0x315   : > { %v3827_v25 = vpop.f32.mrf.mxu2  ;;  %v5809_v3 = vrot.slane %v5807_v50, 5  ;;  %v5817_v42 = vshrl.u32 %v13461_v36, 16  ;;  %4977 = vmatmul.bf16.gmra.mxu0 %v4833_v5  ;;  %v4321_v27 = vshrl.u32 %v3957_v54, 16  ;;  %v5823_v51 = vshll.u32 %v13474_v33, 16  ;;  %6458 = vmatpush.bf16.msrb.mxu2 %v11350_v39 }
 0x316   : > { %v5289_v49 = vrot.slane %v5287_v17, 7  ;;  %v5070_v44 = vadd.f32 %v13199_v53, %v5034_v23  ;;  %v3891_v45 = vadd.f32 %v3827_v25, %v3576_v58  ;;  %v5815_v14 = vrot.slane %v5813_v20, 5  ;;  %v13492_v23 = vld [vmem:[#allocation2 + $0xd4] sm:$0x1] }
 0x317   : > { %v5810_v13 = vor.u32 %v5809_v3, %v5806_v60  ;;  %v5819_v18 = vrot.slane %v5817_v42, 4  ;;  %v4323_v21 = vrot.slane %v4321_v27, 4  ;;  %v4324_v16 = vshll.u32 %v3957_v54, 16  ;;  %v11349_v42 = vld [vmem:[#allocation9 + $0x8] sm:$0xff] }
 0x318   : > { %v5292_v63 = vor.u32 %v5290_v38, %v5289_v49  ;;  %v5294_v0 = vrot.slane %v5289_v49, 4  ;;  %v5102_v55 = vmax.f32 %v5070_v44, 0.0  ;;  %v4573_v26 = vadd.f32 %v13426_v10, %v3891_v45  ;;  %v13490_v10 = vld [vmem:[#allocation2 + $0xd0] sm:$0xf]  ;;  %v11389_v27 = vld [vmem:[#allocation9 + $0xc8] sm:$0xff] }
 0x319   : > { %v5811_v46 = vrot.slane %v5810_v13, 4  ;;  %v5820_v58 = vor.u32 %v5819_v18, %v5815_v14  ;;  %v13483_v7 = vpop.f32.mrf.mxu3  ;;  %v5825_v47 = vrot.slane %v5823_v51, 5  ;;  %v4326_v38 = vrot.slane %v4324_v16, 5  ;;  %6459 = vmatpush.bf16.msrb.mxu2 %v11349_v42  ;;  %7151 = vmatpush.bf16.msrb.mxu0 %v11389_v27  ;;  %v4609_v16 = vld [vmem:[#allocation2 + $0xcc] sm:$0xe] }
 0x31a   : > { %v5293_v40 = vsel %vm12125_vm8, %v5285_v12, %v5292_v63  ;;  %v5564_v60 = vsel %vm12144_vm10, %v5294_v0, %v5563_v28  ;;  %v5188_v50 = vpack.c.bf16 %v5102_v55, %v5102_v55  ;;  %v4999_v17 = vadd.f32 %v13416_v61, %v4573_v26  ;;  %3869 = vmatmul.bf16.gmra.mxu2 %v11306_v48  ;;  %v11365_v61 = vld [vmem:[#allocation9 + $0x88] sm:$0xff]  ;;  %v5566_v28 = vld [vmem:[#allocation3 + $0x48] sm:$0xf]  ;;  %v11348_v55 = vld [vmem:[#allocation9] sm:$0xff] }
 0x31b   : > { %5562 = vst [vmem:[#allocation3 + $0x40] sm:$0xf] %v5293_v40  ;;  %v5816_v5 = vsel %vm12014_vm2, %v5811_v46, %v5815_v14  ;;  %v5821_v54 = vrot.slane %v5820_v58, 4  ;;  %v4327_v44 = vor.u32 %v4326_v38, %v4323_v21  ;;  %v4330_v45 = vshll.u32 %v13490_v10, 16  ;;  %6837 = vmatpush.bf16.msrb.mxu3 %v11365_v61  ;;  %v11364_v26 = vld [vmem:[#allocation9 + $0x80] sm:$0xff] }
 0x31c   : > { %5565 = vst [vmem:[#allocation3 + $0x44] sm:$0x1] %v5564_v60  ;;  %v5296_v12 = vshrl.u32 %v5188_v50, 16  ;;  %v5299_v25 = vshll.u32 %v5188_v50, 16  ;;  %v5035_v3 = vmul.f32 %v13191_v29, %v4999_v17  ;;  %v6116_v20 = vunpack.c.l.b16 %v5816_v5  ;;  %v13499_v49 = vpop.f32.mrf.mxu0 }
 0x31d   : > { %v3830_v39 = vpop.f32.mrf.mxu2  ;;  %v5826_v52 = vsel %vm12014_vm2, %v5821_v54, %v5825_v47  ;;  %v4334_v48 = vshrl.u32 %v13490_v10, 16  ;;  %v4328_v18 = vrot.slane %v4327_v44, 4  ;;  %v4332_v51 = vrot.slane %v4330_v45, 5  ;;  %v5653_v54 = vld [vmem:[#allocation3 + $0x3c] sm:$0xf]  ;;  %6460 = vmatpush.bf16.msrb.mxu2 %v11348_v55 }
 0x31e   : > { %v13503_v1 = vrot.slane %v5296_v12, 7  ;;  %v5071_v29 = vadd.f32 %v13199_v53, %v5035_v3  ;;  %v3892_v13 = vadd.f32 %v3830_v39, %v12905_v37  ;;  %v6117_v14 = vunpack.c.l.b16 %v5826_v52  ;;  %v11388_v37 = vld [vmem:[#allocation9 + $0xc0] sm:$0xff]  ;;  %v13523_v52 = vld [vmem:[%s15514_s3] ss:$0 sm:$0xff] }
 0x31f   : > { %v4336_v63 = vrot.slane %v4334_v48, 4  ;;  %v4340_v0 = vshll.u32 %v13492_v23, 16  ;;  %v4333_v60 = vsel %vm12014_vm2, %v4328_v18, %v4332_v51  ;;  %6838 = vmatpush.bf16.msrb.mxu3 %v11364_v26  ;;  %v10645_v3 = vrot.slane %v4609_v16, 9  ;;  %7152 = vmatpush.bf16.msrb.mxu0 %v11388_v37  ;;  %v11307_v18 = vld [vmem:[#allocation2 + $0xcc] sm:$0xff] }
 0x320   : > { %v5301_v46 = vor.u32 %v5299_v25, %v13503_v1  ;;  %v5302_v58 = vrot.slane %v13503_v1, 4  ;;  %v5103_v21 = vmax.f32 %v5071_v29, 0.0  ;;  %v4574_v53 = vadd.f32 %v13456_v22, %v3892_v13  ;;  %v13535_v29 = vld [vmem:[%s15515_s4] ss:$0 sm:$0xff] }
 0x321   : > { %v6144_v40 = vpack.c.b16 %v6117_v14, %v6116_v20  ;;  %v4337_v50 = vor.u32 %v4336_v63, %v4332_v51  ;;  %v4342_v17 = vrot.slane %v4340_v0, 5  ;;  %v13513_v5 = vpop.f32.mrf.mxu3  ;;  %v4391_v25 = vunpack.c.l.b16 %v4333_v60  ;;  %v5570_v0 = vld [vmem:[#allocation3 + $0x50] sm:$0x1] }
 0x322   : > { %v5567_v47 = vsel %vm12134_vm9, %v5301_v46, %v5566_v28  ;;  %v5189_v38 = vpack.c.bf16 %v5103_v21, %v5103_v21  ;;  %v5000_v12 = vadd.f32 %v13438_v9, %v4574_v53  ;;  %v4765_v20 = vrot.slane %v13490_v10, 5  ;;  %v13539_v63 = vld [vmem:[#allocation3 + $0x40] sm:$0xf] }
 0x323   : > { %5568 = vst [vmem:[#allocation3 + $0x48] sm:$0xf] %v5567_v47  ;;  %6248 = vmatmul.bf16.gmra.mxu1 %v6144_v40  ;;  %v4338_v22 = vrot.slane %v4337_v50, 4  ;;  %v4768_v42 = vrot.slane %v13492_v23, 5  ;;  %v5828_v44 = vshrl.u32 %v5653_v54, 16  ;;  %v5831_v1 = vshll.u32 %v5653_v54, 16 }
 0x324   : > { %v5304_v61 = vshrl.u32 %v5189_v38, 16  ;;  %v5307_v39 = vshll.u32 %v5189_v38, 16  ;;  %v5036_v9 = vmul.f32 %v13523_v52, %v5000_v12  ;;  %v4766_v10 = vsel %vm12391_vm13, %v10645_v3, %v4765_v20  ;;  %v13530_v23 = vpop.f32.mrf.mxu0 }
 0x325   : > { %v3832_v45 = vpop.f32.mrf.mxu2  ;;  %v4343_v48 = vsel %vm12014_vm2, %v4338_v22, %v4342_v17  ;;  %v4767_v27 = vrot.slane %v4765_v20, 4  ;;  %v4817_v26 = vunpack.c.l.b16 %v4766_v10  ;;  %v5830_v46 = vrot.slane %v5828_v44, 4  ;;  %v13544_v17 = vld [vmem:[#allocation3 + $0x44] sm:$0x1] }
 0x326   : > { %v5306_v28 = vrot.slane %v5304_v61, 7  ;;  %v5072_v13 = vadd.f32 %v13535_v29, %v5036_v9  ;;  %v3893_v14 = vadd.f32 %v3832_v45, %v13465_v19  ;;  %v4392_v51 = vunpack.c.l.b16 %v4343_v48 }
 0x327   : > { %v4769_v55 = vsel %vm12391_vm13, %v4767_v27, %v4768_v42  ;;  %v5833_v21 = vrot.slane %v5831_v1, 5  ;;  %v5837_v54 = vshll.u32 %v13539_v63, 16  ;;  %v5841_v61 = vshrl.u32 %v13539_v63, 16  ;;  %v11658_v1 = vld [vmem:[#allocation3 + $0x4] sm:$0xf] }
 0x328   : > { %v5309_v53 = vor.u32 %v5307_v39, %v5306_v28  ;;  %v5311_v16 = vrot.slane %v5306_v28, 4  ;;  %v5104_v37 = vmax.f32 %v5072_v13, 0.0  ;;  %v4575_v40 = vadd.f32 %v13483_v7, %v3893_v14  ;;  %v6542_v7 = vld [vmem:[#allocation3] sm:$0xe] }
 0x329   : > { %v4408_v60 = vpack.c.b16 %v4392_v51, %v4391_v25  ;;  %v4818_v50 = vunpack.c.l.b16 %v4769_v55  ;;  %v5834_v19 = vor.u32 %v5833_v21, %v5830_v46  ;;  %v13547_v47 = vpop.f32.mrf.mxu3  ;;  %v5839_v42 = vrot.slane %v5837_v54, 5  ;;  %v5573_v55 = vld [vmem:[#allocation3 + $0x54] sm:$0xf] }
 0x32a   : > { %v5310_v38 = vsel %vm12125_vm8, %v5302_v58, %v5309_v53  ;;  %v5571_v12 = vsel %vm12144_vm10, %v5311_v16, %v5570_v0  ;;  %v5190_v22 = vpack.c.bf16 %v5104_v37, %v5104_v37  ;;  %v5001_v3 = vadd.f32 %v13476_v4, %v4575_v40  ;;  %3874 = vmatmul.bf16.gmra.mxu2 %v11307_v18  ;;  %v5655_v0 = vld [vmem:[#allocation3 + $0x48] sm:$0xf] }
 0x32b   : > { %5569 = vst [vmem:[#allocation3 + $0x4c] sm:$0xf] %v5310_v38  ;;  %4556 = vmatmul.bf16.gmra.mxu3 %v4408_v60  ;;  %v4834_v25 = vpack.c.b16 %v4818_v50, %v4817_v26  ;;  %v5835_v20 = vrot.slane %v5834_v19, 4  ;;  %v5847_v44 = vshll.u32 %v13544_v17, 16  ;;  %v5843_v48 = vrot.slane %v5841_v61, 4 }
 0x32c   : > { %5572 = vst [vmem:[#allocation3 + $0x50] sm:$0x1] %v5571_v12  ;;  %v5313_v39 = vshrl.u32 %v5190_v22, 16  ;;  %v5316_v9 = vshll.u32 %v5190_v22, 16  ;;  %v5037_v58 = vmul.f32 %v13523_v52, %v5001_v3  ;;  %v13559_v10 = vpop.f32.mrf.mxu0  ;;  %v10806_v27 = vrot.slane %v6542_v7, 9 }
 0x32d   : > { %4982 = vmatmul.bf16.gmra.mxu0 %v4834_v25  ;;  %v3835_v45 = vpop.f32.mrf.mxu2  ;;  %v5840_v4 = vsel %vm12014_vm2, %v5835_v20, %v5839_v42  ;;  %v6592_v28 = vrot.slane %v11658_v1, 5  ;;  %v5849_v51 = vrot.slane %v5847_v44, 5  ;;  %v5844_v26 = vor.u32 %v5843_v48, %v5839_v42  ;;  %v11659_v19 = vld [vmem:[#allocation3 + $0x8] sm:$0x1] }
 0x32e   : > { %v13561_v13 = vrot.slane %v5313_v39, 7  ;;  %v5073_v14 = vadd.f32 %v13535_v29, %v5037_v58  ;;  %v3894_v18 = vadd.f32 %v3835_v45, %v12935_v35  ;;  %v6118_v46 = vunpack.c.l.b16 %v5840_v4 }
 0x32f   : > { %v6593_v21 = vsel %vm12391_vm13, %v10806_v27, %v6592_v28  ;;  %v6594_v53 = vrot.slane %v6592_v28, 4  ;;  %v5845_v50 = vrot.slane %v5844_v26, 4  ;;  %v6595_v54 = vrot.slane %v11659_v19, 5  ;;  %v11332_v26 = vld [vmem:[#allocation3] sm:$0xff] }
 0x330   : > { %v5318_v16 = vor.u32 %v5316_v9, %v13561_v13  ;;  %v5319_v37 = vrot.slane %v13561_v13, 4  ;;  %v5105_v40 = vmax.f32 %v5073_v14, 0.0  ;;  %v4576_v60 = vadd.f32 %v13513_v5, %v3894_v18 }
 0x331   : > { %v6719_v35 = vunpack.c.l.b16 %v6593_v21  ;;  %v13570_v38 = vpop.f32.mrf.mxu3  ;;  %v5852_v12 = vshrl.u32 %v5655_v0, 16  ;;  %v5855_v20 = vshll.u32 %v5655_v0, 16  ;;  %v5850_v5 = vsel %vm12014_vm2, %v5845_v50, %v5849_v51  ;;  %v5577_v21 = vld [vmem:[#allocation3 + $0x5c] sm:$0x1] }
 0x332   : > { %v5574_v22 = vsel %vm12134_vm9, %v5318_v16, %v5573_v55  ;;  %v5191_v3 = vpack.c.bf16 %v5105_v40, %v5105_v40  ;;  %v5002_v7 = vadd.f32 %v13499_v49, %v4576_v60  ;;  %v13575_v25 = vld [vmem:[#allocation3 + $0x4c] sm:$0xf]  ;;  %v6596_v42 = vsel %vm12391_vm13, %v6594_v53, %v6595_v54  ;;  %v11400_v49 = vld [vmem:[#allocation9 + $0x120] sm:$0xff] }
 0x333   : > { %5575 = vst [vmem:[#allocation3 + $0x54] sm:$0xf] %v5574_v22  ;;  %v5854_v61 = vrot.slane %v5852_v12, 4  ;;  %v5861_v39 = vshll.u32 %v13575_v25, 16  ;;  %v6119_v45 = vunpack.c.l.b16 %v5850_v5  ;;  %v13583_v4 = vld [vmem:[#allocation3 + $0x50] sm:$0x1]  ;;  %v6720_v27 = vunpack.c.l.b16 %v6596_v42  ;;  %7830 = vmatpush.bf16.msrb.mxu1 %v11400_v49 }
 0x334   : > { %v5321_v9 = vshrl.u32 %v5191_v3, 16  ;;  %v5324_v58 = vshll.u32 %v5191_v3, 16  ;;  %v5038_v44 = vmul.f32 %v13523_v52, %v5002_v7  ;;  %v13585_v1 = vpop.f32.mrf.mxu0  ;;  %v5857_v28 = vrot.slane %v5855_v20, 5  ;;  %v11372_v5 = vld [vmem:[#allocation3 + $0xc] sm:$0xff] }
 0x335   : > { %v3837_v48 = vpop.f32.mrf.mxu2  ;;  %v5863_v13 = vrot.slane %v5861_v39, 5  ;;  %v5865_v14 = vshrl.u32 %v13575_v25, 16  ;;  %v6145_v0 = vpack.c.b16 %v6119_v45, %v6118_v46  ;;  %v6751_v53 = vpack.c.b16 %v6720_v27, %v6719_v35  ;;  %v6543_v42 = vld [vmem:[#allocation3 + $0xc] sm:$0xe] }
 0x336   : > { %v5323_v18 = vrot.slane %v5321_v9, 7  ;;  %v5074_v51 = vadd.f32 %v13535_v29, %v5038_v44  ;;  %v3895_v55 = vadd.f32 %v3837_v48, %v13469_v62  ;;  %v5858_v16 = vor.u32 %v5857_v28, %v5854_v61  ;;  %v11660_v48 = vld [vmem:[#allocation3 + $0x14] sm:$0x1] }
 0x337   : > { %v5867_v40 = vrot.slane %v5865_v14, 4  ;;  %v5871_v60 = vshll.u32 %v13583_v4, 16  ;;  %6253 = vmatmul.bf16.gmra.mxu1 %v6145_v0  ;;  %v6599_v46 = vrot.slane %v13303_v57, 5  ;;  %v10807_v49 = vrot.slane %v6543_v42, 9  ;;  %v5580_v0 = vld [vmem:[#allocation3 + $0x60] sm:$0xf] }
 0x338   : > { %v5326_v50 = vor.u32 %v5324_v58, %v5323_v18  ;;  %v5328_v19 = vrot.slane %v5323_v18, 4  ;;  %v5106_v54 = vmax.f32 %v5074_v51, 0.0  ;;  %v4577_v12 = vadd.f32 %v13547_v47, %v3895_v55 }
 0x339   : > { %v5868_v22 = vor.u32 %v5867_v40, %v5863_v13  ;;  %v13592_v3 = vpop.f32.mrf.mxu3  ;;  %v5859_v47 = vrot.slane %v5858_v16, 4  ;;  %v5873_v39 = vrot.slane %v5871_v60, 5  ;;  %v6601_v9 = vrot.slane %v6599_v46, 4 }
 0x33a   : > { %v5327_v62 = vsel %vm12125_vm8, %v5319_v37, %v5326_v50  ;;  %v5578_v35 = vsel %vm12144_vm10, %v5328_v19, %v5577_v21  ;;  %v5192_v7 = vpack.c.bf16 %v5106_v54, %v5106_v54  ;;  %v5003_v20 = vadd.f32 %v13530_v23, %v4577_v12  ;;  %6461 = vmatmul.bf16.vlgmr.msrb.gmra.mxu2 %v11332_v26 }
 0x33b   : > { %5576 = vst [vmem:[#allocation3 + $0x58] sm:$0xf] %v5327_v62  ;;  %6839 = vmatmul.bf16.vlgmr.msrb.gmra.mxu3 %v6751_v53  ;;  %v5869_v61 = vrot.slane %v5868_v22, 4  ;;  %v5864_v44 = vsel %vm12014_vm2, %v5859_v47, %v5863_v13  ;;  %v6602_v27 = vrot.slane %v11660_v48, 5  ;;  %v6600_v26 = vsel %vm12391_vm13, %v10807_v49, %v6599_v46  ;;  %v5584_v49 = vld [vmem:[#allocation3 + $0x68] sm:$0x1] }
 0x33c   : > { %5579 = vst [vmem:[#allocation3 + $0x5c] sm:$0x1] %v5578_v35  ;;  %v5330_v57 = vshrl.u32 %v5192_v7, 16  ;;  %v5039_v58 = vmul.f32 %v13523_v52, %v5003_v20  ;;  %v13605_v45 = vpop.f32.mrf.mxu0  ;;  %v5333_v14 = vshll.u32 %v5192_v7, 16  ;;  %v6606_v40 = vrot.slane %v13357_v31, 5 }
 0x33d   : > { %7153 = vmatmul.bf16.vlgmr.msrb.gmra.mxu0 %v11372_v5  ;;  %v3840_v37 = vpop.f32.mrf.mxu2  ;;  %v5874_v23 = vsel %vm12014_vm2, %v5869_v61, %v5873_v39  ;;  %v6603_v13 = vsel %vm12391_vm13, %v6601_v9, %v6602_v27  ;;  %v6120_v60 = vunpack.c.l.b16 %v5864_v44  ;;  %v3582_v22 = vadd.f32 %v12923_v24, %v12975_v8 }
 0x33e   : > { %v5332_v28 = vrot.slane %v5330_v57, 7  ;;  %v5075_v18 = vadd.f32 %v13535_v29, %v5039_v58  ;;  %v3896_v51 = vadd.f32 %v3840_v37, %v12965_v56  ;;  %v6121_v55 = vunpack.c.l.b16 %v5874_v23 }
 0x33f   : > { %v6721_v62 = vunpack.c.l.b16 %v6600_v26  ;;  %v6722_v35 = vunpack.c.l.b16 %v6603_v13  ;;  %v6608_v61 = vrot.slane %v6606_v40, 4  ;;  %v11333_v26 = vld [vmem:[#allocation3 + $0xc] sm:$0xff]  ;;  %v6544_v13 = vld [vmem:[#allocation3 + $0x18] sm:$0xe]  ;;  %v6620_v31 = vrot.slane %v13461_v36, 5 }
 0x340   : > { %v5335_v21 = vor.u32 %v5333_v14, %v5332_v28  ;;  %v5107_v53 = vmax.f32 %v5075_v18, 0.0  ;;  %v4578_v16 = vadd.f32 %v13570_v38, %v3896_v51  ;;  %v5336_v19 = vrot.slane %v5332_v28, 4  ;;  %v5657_v38 = vld [vmem:[#allocation3 + $0x54] sm:$0xf] }
 0x341   : > { %v13615_v50 = vpop.f32.mrf.mxu3  ;;  %v6146_v46 = vpack.c.b16 %v6121_v55, %v6120_v60  ;;  %v5876_v47 = vshrl.u32 %v5657_v38, 16  ;;  %v5879_v24 = vshll.u32 %v5657_v38, 16 }
 0x342   : > { %v5581_v56 = vsel %vm12134_vm9, %v5335_v21, %v5580_v0  ;;  %v5193_v54 = vpack.c.bf16 %v5107_v53, %v5107_v53  ;;  %v5004_v12 = vadd.f32 %v13559_v10, %v4578_v16  ;;  %v13622_v7 = vld [vmem:[#allocation3 + $0x58] sm:$0xf]  ;;  %v6752_v21 = vpack.c.b16 %v6722_v35, %v6721_v62 }
 0x343   : > { %5582 = vst [vmem:[#allocation3 + $0x60] sm:$0xf] %v5581_v56  ;;  %v13625_v42 = vld [vmem:[#allocation3 + $0x5c] sm:$0x1]  ;;  %v5885_v8 = vshll.u32 %v13622_v7, 16  ;;  %v5889_v57 = vshrl.u32 %v13622_v7, 16 }
 0x344   : > { %v5338_v20 = vshrl.u32 %v5193_v54, 16  ;;  %v5040_v5 = vmul.f32 %v13523_v52, %v5004_v12  ;;  %v5341_v10 = vshll.u32 %v5193_v54, 16  ;;  %v13629_v9 = vpop.f32.mrf.mxu0  ;;  %v5878_v23 = vrot.slane %v5876_v47, 4  ;;  %v11373_v62 = vld [vmem:[#allocation3 + $0x18] sm:$0xff] }
 0x345   : > { %v3842_v39 = vpop.f32.mrf.mxu2  ;;  %v5881_v48 = vrot.slane %v5879_v24, 5  ;;  %v5887_v27 = vrot.slane %v5885_v8, 5  ;;  %v5891_v28 = vrot.slane %v5889_v57, 4  ;;  %v5895_v14 = vshll.u32 %v13625_v42, 16 }
 0x346   : > { %v5340_v58 = vrot.slane %v5338_v20, 7  ;;  %v5076_v37 = vadd.f32 %v13535_v29, %v5040_v5  ;;  %v3897_v44 = vadd.f32 %v3842_v39, %v3582_v22  ;;  %v6609_v56 = vrot.slane %v13359_v41, 5 }
 0x347   : > { %6258 = vmatmul.bf16.gmra.mxu1 %v6146_v46  ;;  %v5882_v53 = vor.u32 %v5881_v48, %v5878_v23  ;;  %v5892_v16 = vor.u32 %v5891_v28, %v5887_v27  ;;  %v5897_v38 = vrot.slane %v5895_v14, 5  ;;  %v10808_v41 = vrot.slane %v6544_v13, 9  ;;  %v6546_v23 = vld [vmem:[#allocation3 + $0x30] sm:$0xe] }
 0x348   : > { %v5343_v18 = vor.u32 %v5341_v10, %v5340_v58  ;;  %v5345_v51 = vrot.slane %v5340_v58, 4  ;;  %v5108_v0 = vmax.f32 %v5076_v37, 0.0  ;;  %v4579_v55 = vadd.f32 %v13592_v3, %v3897_v44  ;;  %v15590_v58 = vld [vmem:[#allocation28_spill] sm:$0xff] }
 0x349   : > { %v13636_v60 = vpop.f32.mrf.mxu3  ;;  %v13646_v3 = vadd.f32 %v12958_v43, %v13005_v59  ;;  %v5893_v35 = vrot.slane %v5892_v16, 4  ;;  %v5883_v5 = vrot.slane %v5882_v53, 4  ;;  %v6610_v47 = vsel %vm12391_vm13, %v6608_v61, %v6609_v56 }
 0x34a   : > { %v5344_v54 = vsel %vm12125_vm8, %v5336_v19, %v5343_v18  ;;  %v5585_v12 = vsel %vm12144_vm10, %v5345_v51, %v5584_v49  ;;  %v5194_v22 = vpack.c.bf16 %v5108_v0, %v5108_v0  ;;  %v5005_v46 = vadd.f32 %v13585_v1, %v4579_v55  ;;  %6466 = vmatmul.bf16.gmra.mxu2 %v11333_v26  ;;  %v6545_v1 = vld [vmem:[#allocation3 + $0x24] sm:$0xe]  ;;  %v5587_v49 = vld [vmem:[#allocation3 + $0x6c] sm:$0xf] }
 0x34b   : > { %5583 = vst [vmem:[#allocation3 + $0x64] sm:$0xf] %v5344_v54  ;;  %6844 = vmatmul.bf16.gmra.mxu3 %v6752_v21  ;;  %v5898_v43 = vsel %vm12014_vm2, %v5893_v35, %v5897_v38  ;;  %v6607_v24 = vsel %vm12391_vm13, %v10808_v41, %v6606_v40  ;;  %v6613_v8 = vrot.slane %v13407_v2, 5  ;;  %v5888_v44 = vsel %vm12014_vm2, %v5883_v5, %v5887_v27  ;;  %v13672_v27 = vpop.f32.mrf.mxu1 }
 0x34c   : > { %5586 = vst [vmem:[#allocation3 + $0x68] sm:$0x1] %v5585_v12  ;;  %v5347_v20 = vshrl.u32 %v5194_v22, 16  ;;  %v5041_v19 = vmul.f32 %v13523_v52, %v5005_v46  ;;  %v5350_v10 = vshll.u32 %v5194_v22, 16  ;;  %v13653_v59 = vpop.f32.mrf.mxu0  ;;  %v6123_v48 = vunpack.c.l.b16 %v5898_v43  ;;  %v5659_v12 = vld [vmem:[#allocation3 + $0x60] sm:$0xf] }
 0x34d   : > { %7158 = vmatmul.bf16.gmra.mxu0 %v11373_v62  ;;  %v3845_v39 = vpop.f32.mrf.mxu2  ;;  %v6724_v28 = vunpack.c.l.b16 %v6610_v47  ;;  %v10809_v14 = vrot.slane %v6545_v1, 9  ;;  %v6723_v51 = vunpack.c.l.b16 %v6607_v24  ;;  %v6122_v55 = vunpack.c.l.b16 %v5888_v44 }
 0x34e   : > { %v13660_v57 = vrot.slane %v5347_v20, 7  ;;  %v5077_v61 = vadd.f32 %v13535_v29, %v5041_v19  ;;  %v3898_v37 = vadd.f32 %v3845_v39, %v15590_v58  ;;  %v13670_v26 = vrot.slane %v6613_v8, 4  ;;  %v11399_v20 = vld [vmem:[#allocation9 + $0x118] sm:$0xff] }
 0x34f   : > { %v10810_v13 = vrot.slane %v6546_v23, 9  ;;  %v6622_v56 = vrot.slane %v6620_v31, 4  ;;  %v6753_v54 = vpack.c.b16 %v6724_v28, %v6723_v51  ;;  %v13683_v46 = vsel %vm12391_vm13, %v10809_v14, %v6613_v8  ;;  %7831 = vmatpush.bf16.msrb.mxu1 %v11399_v20  ;;  %v5591_v58 = vld [vmem:[#allocation3 + $0x74] sm:$0x1]  ;;  %v6547_v51 = vld [vmem:[#allocation3 + $0x3c] sm:$0xe] }
 0x350   : > { %v5352_v40 = vor.u32 %v5350_v10, %v13660_v57  ;;  %v5109_v18 = vmax.f32 %v5077_v61, 0.0  ;;  %v4580_v2 = vadd.f32 %v13615_v50, %v3898_v37  ;;  %v5353_v0 = vrot.slane %v13660_v57, 4 }
 0x351   : > { %v13677_v16 = vpop.f32.mrf.mxu3  ;;  %v6147_v50 = vpack.c.b16 %v6123_v48, %v6122_v55  ;;  %v6621_v62 = vsel %vm12391_vm13, %v10810_v13, %v6620_v31  ;;  %v5900_v41 = vshrl.u32 %v5659_v12, 16  ;;  %v6623_v19 = vrot.slane %v13474_v33, 5  ;;  %v11334_v31 = vld [vmem:[#allocation3 + $0x18] sm:$0xff] }
 0x352   : > { %v5588_v21 = vsel %vm12134_vm9, %v5352_v40, %v5587_v49  ;;  %v5195_v53 = vpack.c.bf16 %v5109_v18, %v5109_v18  ;;  %v5006_v36 = vadd.f32 %v13605_v45, %v4580_v2  ;;  %v13679_v22 = vld [vmem:[#allocation3 + $0x64] sm:$0xf]  ;;  %v5903_v10 = vshll.u32 %v5659_v12, 16 }
 0x353   : > { %5589 = vst [vmem:[#allocation3 + $0x6c] sm:$0xf] %v5588_v21  ;;  %v13688_v45 = vld [vmem:[#allocation3 + $0x68] sm:$0x1]  ;;  %v5909_v39 = vshll.u32 %v13679_v22, 16  ;;  %v5913_v43 = vshrl.u32 %v13679_v22, 16  ;;  %v6727_v12 = vunpack.c.l.b16 %v6621_v62 }
 0x354   : > { %v5355_v35 = vshrl.u32 %v5195_v53, 16  ;;  %v5042_v38 = vmul.f32 %v13523_v52, %v5006_v36  ;;  %v5358_v5 = vshll.u32 %v5195_v53, 16  ;;  %v13691_v1 = vpop.f32.mrf.mxu0  ;;  %v5902_v61 = vrot.slane %v5900_v41, 4  ;;  %v13707_v36 = vpop.f32.mrf.mxu1 }
 0x355   : > { %v3847_v47 = vpop.f32.mrf.mxu2  ;;  %v5905_v37 = vrot.slane %v5903_v10, 5  ;;  %v5911_v44 = vrot.slane %v5909_v39, 5  ;;  %v5915_v33 = vrot.slane %v5913_v43, 4  ;;  %v5919_v23 = vshll.u32 %v13688_v45, 16  ;;  %v15591_v43 = vld [vmem:[#allocation30_spill] sm:$0xff] }
 0x356   : > { %v5357_v24 = vrot.slane %v5355_v35, 7  ;;  %v5078_v8 = vadd.f32 %v13535_v29, %v5042_v38  ;;  %v3899_v57 = vadd.f32 %v3847_v47, %v13646_v3  ;;  %v6616_v2 = vrot.slane %v13411_v32, 5  ;;  %v11374_v32 = vld [vmem:[#allocation3 + $0x24] sm:$0xff] }
 0x357   : > { %6263 = vmatmul.bf16.gmra.mxu1 %v6147_v50  ;;  %v5906_v40 = vor.u32 %v5905_v37, %v5902_v61  ;;  %v5916_v18 = vor.u32 %v5915_v33, %v5911_v44  ;;  %v6624_v3 = vsel %vm12391_vm13, %v6622_v56, %v6623_v19  ;;  %v5921_v56 = vrot.slane %v5919_v23, 5 }
 0x358   : > { %v5360_v49 = vor.u32 %v5358_v5, %v5357_v24  ;;  %v5362_v48 = vrot.slane %v5357_v24, 4  ;;  %v5110_v28 = vmax.f32 %v5078_v8, 0.0  ;;  %v4581_v14 = vadd.f32 %v13636_v60, %v3899_v57  ;;  %v5594_v57 = vld [vmem:[#allocation3 + $0x78] sm:$0xf] }
 0x359   : > { %v13709_v60 = vpop.f32.mrf.mxu3  ;;  %v5917_v50 = vrot.slane %v5916_v18, 4  ;;  %v6728_v35 = vunpack.c.l.b16 %v6624_v3  ;;  %v5907_v41 = vrot.slane %v5906_v40, 4  ;;  %v10811_v20 = vrot.slane %v6547_v51, 9 }
 0x35a   : > { %v5361_v55 = vsel %vm12125_vm8, %v5353_v0, %v5360_v49  ;;  %v5592_v13 = vsel %vm12144_vm10, %v5362_v48, %v5591_v58  ;;  %v5196_v21 = vpack.c.bf16 %v5110_v28, %v5110_v28  ;;  %v5007_v53 = vadd.f32 %v13629_v9, %v4581_v14  ;;  %6471 = vmatmul.bf16.gmra.mxu2 %v11334_v31  ;;  %v15592_v28 = vld [vmem:[#allocation31_spill] sm:$0xff]  ;;  %v15593_v14 = vld [vmem:[#allocation29_spill] sm:$0xff] }
 0x35b   : > { %5590 = vst [vmem:[#allocation3 + $0x70] sm:$0xf] %v5361_v55  ;;  %6849 = vmatmul.bf16.gmra.mxu3 %v6753_v54  ;;  %v5922_v5 = vsel %vm12014_vm2, %v5917_v50, %v5921_v56  ;;  %v13716_v54 = vpack.c.b16 %v6728_v35, %v6727_v12  ;;  %v6627_v10 = vrot.slane %v13539_v63, 5  ;;  %v5912_v8 = vsel %vm12014_vm2, %v5907_v41, %v5911_v44 }
 0x35c   : > { %5593 = vst [vmem:[#allocation3 + $0x74] sm:$0x1] %v5592_v13  ;;  %v5364_v0 = vshrl.u32 %v5196_v21, 16  ;;  %v5043_v38 = vmul.f32 %v13523_v52, %v5007_v53  ;;  %v5367_v19 = vshll.u32 %v5196_v21, 16  ;;  %v13714_v47 = vpop.f32.mrf.mxu0  ;;  %v6125_v61 = vunpack.c.l.b16 %v5922_v5  ;;  %v5661_v13 = vld [vmem:[#allocation3 + $0x6c] sm:$0xf]  ;;  %v13743_v56 = vpop.f32.mrf.mxu1 }
 0x35d   : > { %7163 = vmatmul.bf16.gmra.mxu0 %v11374_v32  ;;  %v3850_v9 = vpop.f32.mrf.mxu2  ;;  %v6617_v58 = vsel %vm12391_vm13, %v13670_v26, %v6616_v2  ;;  %v6629_v37 = vrot.slane %v6627_v10, 4  ;;  %v6630_v33 = vrot.slane %v13544_v17, 5  ;;  %v6628_v48 = vsel %vm12391_vm13, %v10811_v20, %v6627_v10 }
 0x35e   : > { %v5366_v62 = vrot.slane %v5364_v0, 7  ;;  %v5079_v39 = vadd.f32 %v13535_v29, %v5043_v38  ;;  %v3900_v24 = vadd.f32 %v3850_v9, %v15591_v43  ;;  %v3586_v31 = vadd.f32 %v15593_v14, %v15592_v28 }
 0x35f   : > { %v6124_v44 = vunpack.c.l.b16 %v5912_v8  ;;  %v6631_v40 = vsel %vm12391_vm13, %v6629_v37, %v6630_v33  ;;  %v6725_v51 = vunpack.c.l.b16 %v13683_v46  ;;  %v6726_v55 = vunpack.c.l.b16 %v6617_v58 }
 0x360   : > { %v5369_v23 = vor.u32 %v5367_v19, %v5366_v62  ;;  %v5111_v49 = vmax.f32 %v5079_v39, 0.0  ;;  %v4582_v63 = vadd.f32 %v13677_v16, %v3900_v24  ;;  %v5370_v18 = vrot.slane %v5366_v62, 4  ;;  %v5598_v39 = vld [vmem:[#allocation3 + $0x80] sm:$0x1] }
 0x361   : > { %v13737_v3 = vpop.f32.mrf.mxu3  ;;  %v6148_v16 = vpack.c.b16 %v6125_v61, %v6124_v44  ;;  %v6729_v53 = vunpack.c.l.b16 %v6628_v48  ;;  %v5924_v35 = vshrl.u32 %v5661_v13, 16  ;;  %v5927_v20 = vshll.u32 %v5661_v13, 16 }
 0x362   : > { %v5595_v26 = vsel %vm12134_vm9, %v5369_v23, %v5594_v57  ;;  %v5197_v2 = vpack.c.bf16 %v5111_v49, %v5111_v49  ;;  %v5008_v17 = vadd.f32 %v13653_v59, %v4582_v63  ;;  %v13740_v21 = vld [vmem:[#allocation3 + $0x70] sm:$0xf]  ;;  %v6730_v59 = vunpack.c.l.b16 %v6631_v40  ;;  %v11335_v23 = vld [vmem:[#allocation3 + $0x24] sm:$0xff] }
 0x363   : > { %5596 = vst [vmem:[#allocation3 + $0x78] sm:$0xf] %v5595_v26  ;;  %v13745_v12 = vld [vmem:[#allocation3 + $0x74] sm:$0x1]  ;;  %v5933_v46 = vshll.u32 %v13740_v21, 16  ;;  %v5937_v19 = vshrl.u32 %v13740_v21, 16  ;;  %v6754_v49 = vpack.c.b16 %v6726_v55, %v6725_v51 }
 0x364   : > { %v5372_v32 = vshrl.u32 %v5197_v2, 16  ;;  %v5044_v50 = vmul.f32 %v13523_v52, %v5008_v17  ;;  %v5375_v0 = vshll.u32 %v5197_v2, 16  ;;  %v13747_v41 = vpop.f32.mrf.mxu0  ;;  %v5926_v62 = vrot.slane %v5924_v35, 4  ;;  %v6548_v2 = vld [vmem:[#allocation3 + $0x48] sm:$0xe] }
 0x365   : > { %v3852_v38 = vpop.f32.mrf.mxu2  ;;  %v5929_v43 = vrot.slane %v5927_v20, 5  ;;  %v5935_v24 = vrot.slane %v5933_v46, 5  ;;  %v5939_v8 = vrot.slane %v5937_v19, 4  ;;  %v5943_v57 = vshll.u32 %v13745_v12, 16 }
 0x366   : > { %v5374_v9 = vrot.slane %v5372_v32, 7  ;;  %v5080_v5 = vadd.f32 %v13535_v29, %v5044_v50  ;;  %v3901_v10 = vadd.f32 %v3852_v38, %v3586_v31  ;;  %v13754_v28 = vpack.c.b16 %v6730_v59, %v6729_v53  ;;  %v15594_v38 = vld [vmem:[#allocation33_spill] sm:$0xff] }
 0x367   : > { %6268 = vmatmul.bf16.gmra.mxu1 %v6148_v16  ;;  %v5930_v63 = vor.u32 %v5929_v43, %v5926_v62  ;;  %v5940_v48 = vor.u32 %v5939_v8, %v5935_v24  ;;  %v5945_v16 = vrot.slane %v5943_v57, 5  ;;  %v10812_v50 = vrot.slane %v6548_v2, 9 }
 0x368   : > { %v5377_v61 = vor.u32 %v5375_v0, %v5374_v9  ;;  %v5379_v58 = vrot.slane %v5374_v9, 4  ;;  %v5112_v37 = vmax.f32 %v5080_v5, 0.0  ;;  %v4583_v33 = vadd.f32 %v13709_v60, %v3901_v10  ;;  %v11375_v60 = vld [vmem:[#allocation3 + $0x30] sm:$0xff]  ;;  %v5601_v9 = vld [vmem:[#allocation3 + $0x84] sm:$0xf] }
 0x369   : > { %v13761_v26 = vpop.f32.mrf.mxu3  ;;  %v5941_v17 = vrot.slane %v5940_v48, 4  ;;  %v6634_v35 = vrot.slane %v13575_v25, 5  ;;  %v6637_v62 = vrot.slane %v13583_v4, 5  ;;  %v15595_v4 = vld [vmem:[#allocation14_spill] sm:$0xff] }
 0x36a   : > { %v5378_v14 = vsel %vm12125_vm8, %v5370_v18, %v5377_v61  ;;  %v5599_v31 = vsel %vm12144_vm10, %v5379_v58, %v5598_v39  ;;  %v5198_v44 = vpack.c.bf16 %v5112_v37, %v5112_v37  ;;  %v5009_v40 = vadd.f32 %v13691_v1, %v4583_v33  ;;  %6476 = vmatmul.bf16.gmra.mxu2 %v11335_v23  ;;  %v5663_v48 = vld [vmem:[#allocation3 + $0x78] sm:$0xf] }
 0x36b   : > { %5597 = vst [vmem:[#allocation3 + $0x7c] sm:$0xf] %v5378_v14  ;;  %6854 = vmatmul.bf16.gmra.mxu3 %v6754_v49  ;;  %v5931_v18 = vrot.slane %v5930_v63, 4  ;;  %v5946_v1 = vsel %vm12014_vm2, %v5941_v17, %v5945_v16  ;;  %v6636_v10 = vrot.slane %v6634_v35, 4  ;;  %v6635_v25 = vsel %vm12391_vm13, %v10812_v50, %v6634_v35  ;;  %v15596_v49 = vld [vmem:[#allocation32_spill] sm:$0xff] }
 0x36c   : > { %5600 = vst [vmem:[#allocation3 + $0x80] sm:$0x1] %v5599_v31  ;;  %v5381_v51 = vshrl.u32 %v5198_v44, 16  ;;  %v5045_v55 = vmul.f32 %v13523_v52, %v5009_v40  ;;  %v5384_v13 = vshll.u32 %v5198_v44, 16  ;;  %v13773_v19 = vpop.f32.mrf.mxu0  ;;  %v6127_v5 = vunpack.c.l.b16 %v5946_v1  ;;  %v11398_v17 = vld [vmem:[#allocation9 + $0x110] sm:$0xff] }
 0x36d   : > { %7168 = vmatmul.bf16.gmra.mxu0 %v11375_v60  ;;  %v3855_v53 = vpop.f32.mrf.mxu2  ;;  %v13764_v32 = vpop.f32.mrf.mxu1  ;;  %v5936_v46 = vsel %vm12014_vm2, %v5931_v18, %v5935_v24  ;;  %v6638_v61 = vsel %vm12391_vm13, %v6636_v10, %v6637_v62  ;;  %v3588_v63 = vadd.f32 %v15596_v49, %v15595_v4  ;;  %v6731_v31 = vunpack.c.l.b16 %v6635_v25  ;;  %7832 = vmatpush.bf16.msrb.mxu1 %v11398_v17  ;;  %v6549_v49 = vld [vmem:[#allocation3 + $0x54] sm:$0xe] }
 0x36e   : > { %v5383_v59 = vrot.slane %v5381_v51, 7  ;;  %v5081_v0 = vadd.f32 %v13535_v29, %v5045_v55  ;;  %v3902_v20 = vadd.f32 %v3855_v53, %v15594_v38  ;;  %v6126_v57 = vunpack.c.l.b16 %v5936_v46 }
 0x36f   : > { %v5948_v60 = vshrl.u32 %v5663_v48, 16  ;;  %v6732_v16 = vunpack.c.l.b16 %v6638_v61  ;;  %v5951_v55 = vshll.u32 %v5663_v48, 16  ;;  %v10813_v17 = vrot.slane %v6549_v49, 9 }
 0x370   : > { %v5386_v39 = vor.u32 %v5384_v13, %v5383_v59  ;;  %v5113_v43 = vmax.f32 %v5081_v0, 0.0  ;;  %v4584_v8 = vadd.f32 %v13737_v3, %v3902_v20  ;;  %v5387_v58 = vrot.slane %v5383_v59, 4  ;;  %v5605_v0 = vld [vmem:[#allocation3 + $0x8c] sm:$0x1] }
 0x371   : > { %v6149_v3 = vpack.c.b16 %v6127_v5, %v6126_v57  ;;  %v5950_v59 = vrot.slane %v5948_v60, 4  ;;  %v5953_v38 = vrot.slane %v5951_v55, 5  ;;  %v13802_v61 = vpack.c.b16 %v6732_v16, %v6731_v31 }
 0x372   : > { %v5602_v24 = vsel %vm12134_vm9, %v5386_v39, %v5601_v9  ;;  %v5199_v37 = vpack.c.bf16 %v5113_v43, %v5113_v43  ;;  %v5010_v33 = vadd.f32 %v13714_v47, %v4584_v8  ;;  %v13784_v23 = vpop.f32.mrf.mxu3  ;;  %v13788_v14 = vld [vmem:[#allocation3 + $0x7c] sm:$0xf]  ;;  %v11336_v43 = vld [vmem:[#allocation3 + $0x30] sm:$0xff]  ;;  %v6641_v16 = vrot.slane %v13622_v7, 5 }
 0x373   : > { %5603 = vst [vmem:[#allocation3 + $0x84] sm:$0xf] %v5602_v24  ;;  %v13791_v2 = vld [vmem:[#allocation3 + $0x80] sm:$0x1]  ;;  %v5957_v18 = vshll.u32 %v13788_v14, 16  ;;  %v5961_v13 = vshrl.u32 %v13788_v14, 16  ;;  %v5954_v25 = vor.u32 %v5953_v38, %v5950_v59 }
 0x374   : > { %v5389_v44 = vshrl.u32 %v5199_v37, 16  ;;  %v5046_v40 = vmul.f32 %v13523_v52, %v5010_v33  ;;  %v5392_v47 = vshll.u32 %v5199_v37, 16  ;;  %v5967_v9 = vshll.u32 %v13791_v2, 16  ;;  %v13800_v8 = vpop.f32.mrf.mxu0 }
 0x375   : > { %v3857_v51 = vpop.f32.mrf.mxu2  ;;  %v13796_v35 = vpop.f32.mrf.mxu1  ;;  %v5959_v20 = vrot.slane %v5957_v18, 5  ;;  %v5963_v46 = vrot.slane %v5961_v13, 4  ;;  %v5608_v13 = vld [vmem:[#allocation3 + $0x90] sm:$0xf]  ;;  %v6642_v7 = vsel %vm12391_vm13, %v10813_v17, %v6641_v16 }
 0x376   : > { %v5391_v53 = vrot.slane %v5389_v44, 7  ;;  %v5082_v1 = vadd.f32 %v13535_v29, %v5046_v40  ;;  %v3903_v50 = vadd.f32 %v3857_v51, %v3588_v63  ;;  %v5955_v44 = vrot.slane %v5954_v25, 4  ;;  %v15597_v51 = vld [vmem:[#allocation34_spill] sm:$0xff] }
 0x377   : > { %6273 = vmatmul.bf16.gmra.mxu1 %v6149_v3  ;;  %v5964_v57 = vor.u32 %v5963_v46, %v5959_v20  ;;  %v5969_v3 = vrot.slane %v5967_v9, 5 }
 0x378   : > { %v5394_v5 = vor.u32 %v5392_v47, %v5391_v53  ;;  %v5396_v10 = vrot.slane %v5391_v53, 4  ;;  %v5114_v62 = vmax.f32 %v5082_v1, 0.0  ;;  %v4585_v39 = vadd.f32 %v13761_v26, %v3903_v50  ;;  %v11376_v26 = vld [vmem:[#allocation3 + $0x3c] sm:$0xff] }
 0x379   : > { %v5965_v63 = vrot.slane %v5964_v57, 4  ;;  %v5960_v18 = vsel %vm12014_vm2, %v5955_v44, %v5959_v20  ;;  %v6643_v1 = vrot.slane %v6641_v16, 4  ;;  %v6644_v50 = vrot.slane %v13625_v42, 5 }
 0x37a   : > { %v5395_v24 = vsel %vm12125_vm8, %v5387_v58, %v5394_v5  ;;  %v5606_v37 = vsel %vm12144_vm10, %v5396_v10, %v5605_v0  ;;  %v5200_v33 = vpack.c.bf16 %v5114_v62, %v5114_v62  ;;  %v5011_v4 = vadd.f32 %v13747_v41, %v4585_v39  ;;  %6481 = vmatmul.bf16.gmra.mxu2 %v11336_v43  ;;  %v4544_v58 = vpop.f32.mrf.mxu3  ;;  %v15598_v43 = vld [vmem:[#allocation16_spill] sm:$0xff] }
 0x37b   : > { %5604 = vst [vmem:[#allocation3 + $0x88] sm:$0xf] %v5395_v24  ;;  %6859 = vmatmul.bf16.gmra.mxu3 %v13716_v54  ;;  %v5970_v41 = vsel %vm12014_vm2, %v5965_v63, %v5969_v3  ;;  %v6128_v9 = vunpack.c.l.b16 %v5960_v18  ;;  %v6645_v5 = vsel %vm12391_vm13, %v6643_v1, %v6644_v50  ;;  %v5665_v24 = vld [vmem:[#allocation3 + $0x84] sm:$0xf] }
 0x37c   : > { %5607 = vst [vmem:[#allocation3 + $0x8c] sm:$0x1] %v5606_v37  ;;  %v5398_v48 = vshrl.u32 %v5200_v33, 16  ;;  %v5047_v31 = vmul.f32 %v13523_v52, %v5011_v4  ;;  %v5401_v40 = vshll.u32 %v5200_v33, 16  ;;  %v6129_v53 = vunpack.c.l.b16 %v5970_v41  ;;  %v13829_v39 = vpop.f32.mrf.mxu0 }
 0x37d   : > { %7173 = vmatmul.bf16.gmra.mxu0 %v11376_v26  ;;  %v3860_v60 = vpop.f32.mrf.mxu2  ;;  %v6733_v33 = vunpack.c.l.b16 %v6642_v7  ;;  %v5972_v63 = vshrl.u32 %v5665_v24, 16  ;;  %v6734_v3 = vunpack.c.l.b16 %v6645_v5 }
 0x37e   : > { %v5400_v47 = vrot.slane %v5398_v48, 7  ;;  %v5083_v54 = vadd.f32 %v13535_v29, %v5047_v31  ;;  %v3904_v55 = vadd.f32 %v3860_v60, %v15597_v51  ;;  %v13820_v46 = vpop.f32.mrf.mxu1  ;;  %v6150_v57 = vpack.c.b16 %v6129_v53, %v6128_v9 }
 0x37f   : > { %v5975_v31 = vshll.u32 %v5665_v24, 16 }
 0x380   : > { %v5403_v59 = vor.u32 %v5401_v40, %v5400_v47  ;;  %v5115_v0 = vmax.f32 %v5083_v54, 0.0  ;;  %v4586_v38 = vadd.f32 %v13784_v23, %v3904_v55  ;;  %v5404_v10 = vrot.slane %v5400_v47, 4  ;;  %v15599_v23 = vld [vmem:[#allocation15_spill] sm:$0xff]  ;;  %v5612_v54 = vld [vmem:[#allocation3 + $0x98] sm:$0x1] }
 0x381   : > { %v3590_v25 = vadd.f32 %v15599_v23, %v15598_v43  ;;  %v5974_v47 = vrot.slane %v5972_v63, 4  ;;  %v5977_v51 = vrot.slane %v5975_v31, 5  ;;  %v6648_v63 = vrot.slane %v13679_v22, 5  ;;  %v15600_v31 = vld [vmem:[#allocation35_spill] sm:$0xff] }
 0x382   : > { %v5609_v20 = vsel %vm12134_vm9, %v5403_v59, %v5608_v13  ;;  %v5201_v62 = vpack.c.bf16 %v5115_v0, %v5115_v0  ;;  %v5012_v42 = vadd.f32 %v13773_v19, %v4586_v38  ;;  %v13833_v37 = vld [vmem:[#allocation3 + $0x88] sm:$0xf]  ;;  %v4547_v16 = vpop.f32.mrf.mxu3  ;;  %v11337_v0 = vld [vmem:[#allocation3 + $0x3c] sm:$0xff] }
 0x383   : > { %5610 = vst [vmem:[#allocation3 + $0x90] sm:$0xf] %v5609_v20  ;;  %v13836_v26 = vld [vmem:[#allocation3 + $0x8c] sm:$0x1]  ;;  %v5981_v44 = vshll.u32 %v13833_v37, 16  ;;  %v5985_v40 = vshrl.u32 %v13833_v37, 16  ;;  %v5978_v38 = vor.u32 %v5977_v51, %v5974_v47 }
 0x384   : > { %v5406_v4 = vshrl.u32 %v5201_v62, 16  ;;  %v5048_v49 = vmul.f32 %v13523_v52, %v5012_v42  ;;  %v5409_v48 = vshll.u32 %v5201_v62, 16  ;;  %v5991_v18 = vshll.u32 %v13836_v26, 16  ;;  %v6550_v42 = vld [vmem:[#allocation3 + $0x60] sm:$0xe]  ;;  %v13858_v24 = vpop.f32.mrf.mxu0 }
 0x385   : > { %v3862_v19 = vpop.f32.mrf.mxu2  ;;  %v5983_v52 = vrot.slane %v5981_v44, 5  ;;  %v5987_v55 = vrot.slane %v5985_v40, 4  ;;  %v6651_v47 = vrot.slane %v13688_v45, 5 }
 0x386   : > { %v5408_v60 = vrot.slane %v5406_v4, 7  ;;  %v5084_v41 = vadd.f32 %v13535_v29, %v5048_v49  ;;  %v3905_v17 = vadd.f32 %v3862_v19, %v3590_v25  ;;  %v13842_v59 = vpop.f32.mrf.mxu1  ;;  %v13844_v29 = vpack.c.b16 %v6734_v3, %v6733_v33 }
 0x387   : > { %6278 = vmatmul.bf16.gmra.mxu1 %v6150_v57  ;;  %v5988_v7 = vor.u32 %v5987_v55, %v5983_v52  ;;  %v5993_v23 = vrot.slane %v5991_v18, 5  ;;  %v10814_v49 = vrot.slane %v6550_v42, 9 }
 0x388   : > { %v5411_v13 = vor.u32 %v5409_v48, %v5408_v60  ;;  %v5413_v53 = vrot.slane %v5408_v60, 4  ;;  %v5116_v1 = vmax.f32 %v5084_v41, 0.0  ;;  %v4587_v50 = vadd.f32 %v4544_v58, %v3905_v17  ;;  %v11377_v58 = vld [vmem:[#allocation3 + $0x48] sm:$0xff]  ;;  %v5615_v60 = vld [vmem:[#allocation3 + $0x9c] sm:$0xf] }
 0x389   : > { %v5989_v43 = vrot.slane %v5988_v7, 4  ;;  %v13866_v48 = vld [vmem:[%s15515_s4] ss:$0 sm:$0xff]  ;;  %v6650_v17 = vrot.slane %v6648_v63, 4  ;;  %v15602_v7 = vld [vmem:[#allocation17_spill] sm:$0xff] }
 0x38a   : > { %v5412_v9 = vsel %vm12125_vm8, %v5404_v10, %v5411_v13  ;;  %v5613_v5 = vsel %vm12144_vm10, %v5413_v53, %v5612_v54  ;;  %v5202_v20 = vpack.c.bf16 %v5116_v1, %v5116_v1  ;;  %v5013_v62 = vadd.f32 %v13800_v8, %v4587_v50  ;;  %6486 = vmatmul.bf16.gmra.mxu2 %v11337_v0  ;;  %v13855_v10 = vld [vmem:[%s15514_s3] ss:$0 sm:$0xff]  ;;  %v4549_v18 = vpop.f32.mrf.mxu3 }
 0x38b   : > { %5611 = vst [vmem:[#allocation3 + $0x94] sm:$0xf] %v5412_v9  ;;  %6864 = vmatmul.bf16.gmra.mxu3 %v13754_v28  ;;  %v5979_v8 = vrot.slane %v5978_v38, 4  ;;  %v5994_v28 = vsel %vm12014_vm2, %v5989_v43, %v5993_v23  ;;  %v6649_v13 = vsel %vm12391_vm13, %v10814_v49, %v6648_v63  ;;  %v6652_v1 = vsel %vm12391_vm13, %v6650_v17, %v6651_v47  ;;  %v15601_v38 = vld [vmem:[#allocation18_spill] sm:$0xff] }
 0x38c   : > { %5614 = vst [vmem:[#allocation3 + $0x98] sm:$0x1] %v5613_v5  ;;  %v5415_v25 = vshrl.u32 %v5202_v20, 16  ;;  %v5049_v57 = vmul.f32 %v13855_v10, %v5013_v62  ;;  %v5418_v33 = vshll.u32 %v5202_v20, 16  ;;  %v6131_v41 = vunpack.c.l.b16 %v5994_v28  ;;  %v5667_v5 = vld [vmem:[#allocation3 + $0x90] sm:$0xf] }
 0x38d   : > { %7178 = vmatmul.bf16.gmra.mxu0 %v11377_v58  ;;  %v3865_v4 = vpop.f32.mrf.mxu2  ;;  %v5984_v40 = vsel %vm12014_vm2, %v5979_v8, %v5983_v52  ;;  %v6735_v62 = vunpack.c.l.b16 %v6649_v13  ;;  %v5996_v23 = vshrl.u32 %v5667_v5, 16 }
 0x38e   : > { %v5417_v3 = vrot.slane %v5415_v25, 7  ;;  %v5085_v19 = vadd.f32 %v13866_v48, %v5049_v57  ;;  %v3906_v44 = vadd.f32 %v3865_v4, %v15600_v31  ;;  %v13873_v55 = vpop.f32.mrf.mxu1  ;;  %v6130_v53 = vunpack.c.l.b16 %v5984_v40  ;;  %v11397_v25 = vld [vmem:[#allocation9 + $0x108] sm:$0xff] }
 0x38f   : > { %v6736_v57 = vunpack.c.l.b16 %v6652_v1  ;;  %v5998_v31 = vrot.slane %v5996_v23, 4  ;;  %7833 = vmatpush.bf16.msrb.mxu1 %v11397_v25 }
 0x390   : > { %v5420_v54 = vor.u32 %v5418_v33, %v5417_v3  ;;  %v5117_v22 = vmax.f32 %v5085_v19, 0.0  ;;  %v4588_v51 = vadd.f32 %v4547_v16, %v3906_v44  ;;  %v5421_v50 = vrot.slane %v5417_v3, 4  ;;  %v5619_v44 = vld [vmem:[#allocation3 + $0xa4] sm:$0x1] }
 0x391   : > { %v3592_v16 = vadd.f32 %v15602_v7, %v15601_v38  ;;  %v6151_v9 = vpack.c.b16 %v6131_v41, %v6130_v53  ;;  %v11338_v53 = vld [vmem:[#allocation3 + $0x48] sm:$0xff] }
 0x392   : > { %v5616_v52 = vsel %vm12134_vm9, %v5420_v54, %v5615_v60  ;;  %v5203_v0 = vpack.c.bf16 %v5117_v22, %v5117_v22  ;;  %v5014_v45 = vadd.f32 %v13829_v39, %v4588_v51  ;;  %v13884_v20 = vld [vmem:[#allocation3 + $0x94] sm:$0xf]  ;;  %v5999_v39 = vshll.u32 %v5667_v5, 16  ;;  %v4978_v19 = vpop.f32.mrf.mxu0 }
 0x393   : > { %5617 = vst [vmem:[#allocation3 + $0x9c] sm:$0xf] %v5616_v52  ;;  %v13887_v43 = vld [vmem:[#allocation3 + $0x98] sm:$0x1]  ;;  %v6005_v4 = vshll.u32 %v13884_v20, 16  ;;  %v6009_v28 = vshrl.u32 %v13884_v20, 16 }
 0x394   : > { %v5423_v42 = vshrl.u32 %v5203_v0, 16  ;;  %v5050_v58 = vmul.f32 %v13855_v10, %v5014_v45  ;;  %v5426_v8 = vshll.u32 %v5203_v0, 16  ;;  %v6001_v40 = vrot.slane %v5999_v39, 5 }
 0x395   : > { %v3867_v33 = vpop.f32.mrf.mxu2  ;;  %v6007_v60 = vrot.slane %v6005_v4, 5  ;;  %v6011_v41 = vrot.slane %v6009_v28, 4  ;;  %v6015_v17 = vshll.u32 %v13887_v43, 16  ;;  %v13895_v0 = vpack.c.b16 %v6736_v57, %v6735_v62  ;;  %v4552_v5 = vpop.f32.mrf.mxu3  ;;  %v15603_v4 = vld [vmem:[#allocation19_spill] sm:$0xff] }
 0x396   : > { %v5425_v49 = vrot.slane %v5423_v42, 7  ;;  %v5086_v63 = vadd.f32 %v13866_v48, %v5050_v58  ;;  %v3907_v3 = vadd.f32 %v3867_v33, %v3592_v16  ;;  %v13893_v13 = vpop.f32.mrf.mxu1  ;;  %v6002_v1 = vor.u32 %v6001_v40, %v5998_v31 }
 0x397   : > { %6283 = vmatmul.bf16.gmra.mxu1 %v6151_v9  ;;  %v6012_v52 = vor.u32 %v6011_v41, %v6007_v60  ;;  %v6551_v9 = vld [vmem:[#allocation3 + $0x6c] sm:$0xe]  ;;  %v6017_v58 = vrot.slane %v6015_v17, 5  ;;  %v6655_v33 = vrot.slane %v13740_v21, 5 }
 0x398   : > { %v5428_v47 = vor.u32 %v5426_v8, %v5425_v49  ;;  %v5430_v54 = vrot.slane %v5425_v49, 4  ;;  %v5118_v22 = vmax.f32 %v5086_v63, 0.0  ;;  %v4589_v51 = vadd.f32 %v4549_v18, %v3907_v3  ;;  %v11378_v18 = vld [vmem:[#allocation3 + $0x54] sm:$0xff]  ;;  %v5622_v63 = vld [vmem:[#allocation3 + $0xa8] sm:$0xf] }
 0x399   : > { %v6013_v42 = vrot.slane %v6012_v52, 4  ;;  %v10815_v8 = vrot.slane %v6551_v9, 9  ;;  %v6657_v31 = vrot.slane %v6655_v33, 4 }
 0x39a   : > { %v5429_v45 = vsel %vm12125_vm8, %v5421_v50, %v5428_v47  ;;  %v5620_v38 = vsel %vm12144_vm10, %v5430_v54, %v5619_v44  ;;  %v5204_v7 = vpack.c.bf16 %v5118_v22, %v5118_v22  ;;  %v5015_v16 = vadd.f32 %v13858_v24, %v4589_v51  ;;  %6491 = vmatmul.bf16.gmra.mxu2 %v11338_v53  ;;  %v4980_v47 = vpop.f32.mrf.mxu0 }
 0x39b   : > { %5618 = vst [vmem:[#allocation3 + $0xa0] sm:$0xf] %v5429_v45  ;;  %6869 = vmatmul.bf16.gmra.mxu3 %v13802_v61  ;;  %v6003_v50 = vrot.slane %v6002_v1, 4  ;;  %v6018_v24 = vsel %vm12014_vm2, %v6013_v42, %v6017_v58  ;;  %v6658_v44 = vrot.slane %v13745_v12, 5  ;;  %v6656_v21 = vsel %vm12391_vm13, %v10815_v8, %v6655_v33  ;;  %v15604_v12 = vld [vmem:[#allocation36_spill] sm:$0xff] }
 0x39c   : > { %5621 = vst [vmem:[#allocation3 + $0xa4] sm:$0x1] %v5620_v38  ;;  %v5432_v62 = vshrl.u32 %v5204_v7, 16  ;;  %v5051_v23 = vmul.f32 %v13855_v10, %v5015_v16  ;;  %v5435_v25 = vshll.u32 %v5204_v7, 16  ;;  %v6133_v3 = vunpack.c.l.b16 %v6018_v24  ;;  %v15605_v45 = vld [vmem:[#allocation20_spill] sm:$0xff] }
 0x39d   : > { %7183 = vmatmul.bf16.gmra.mxu0 %v11378_v18  ;;  %v3870_v57 = vpop.f32.mrf.mxu2  ;;  %v6008_v49 = vsel %vm12014_vm2, %v6003_v50, %v6007_v60  ;;  %v6659_v51 = vsel %vm12391_vm13, %v6657_v31, %v6658_v44  ;;  %v3594_v38 = vadd.f32 %v15605_v45, %v15604_v12  ;;  %v5669_v16 = vld [vmem:[#allocation3 + $0x9c] sm:$0xf]  ;;  %v6737_v9 = vunpack.c.l.b16 %v6656_v21  ;;  %v4554_v58 = vpop.f32.mrf.mxu3  ;;  %v11339_v21 = vld [vmem:[#allocation3 + $0x54] sm:$0xff] }
 0x39e   : > { %v5434_v39 = vrot.slane %v5432_v62, 7  ;;  %v5087_v61 = vadd.f32 %v13866_v48, %v5051_v23  ;;  %v3908_v28 = vadd.f32 %v3870_v57, %v15603_v4  ;;  %v6132_v22 = vunpack.c.l.b16 %v6008_v49 }
 0x39f   : > { %v6020_v23 = vshrl.u32 %v5669_v16, 16  ;;  %v6738_v50 = vunpack.c.l.b16 %v6659_v51 }
 0x3a0   : > { %v5437_v40 = vor.u32 %v5435_v25, %v5434_v39  ;;  %v5119_v41 = vmax.f32 %v5087_v61, 0.0  ;;  %v4590_v17 = vadd.f32 %v4552_v5, %v3908_v28  ;;  %v13914_v54 = vpop.f32.mrf.mxu1  ;;  %v5438_v53 = vrot.slane %v5434_v39, 4  ;;  %v5626_v28 = vld [vmem:[#allocation3 + $0xb0] sm:$0x1] }
 0x3a1   : > { %v6152_v7 = vpack.c.b16 %v6133_v3, %v6132_v22  ;;  %v6022_v4 = vrot.slane %v6020_v23, 4 }
 0x3a2   : > { %v5623_v60 = vsel %vm12134_vm9, %v5437_v40, %v5622_v63  ;;  %v5205_v1 = vpack.c.bf16 %v5119_v41, %v5119_v41  ;;  %v5016_v52 = vadd.f32 %v4978_v19, %v4590_v17  ;;  %v13922_v5 = vld [vmem:[#allocation3 + $0xa0] sm:$0xf]  ;;  %v6023_v19 = vshll.u32 %v5669_v16, 16 }
 0x3a3   : > { %5624 = vst [vmem:[#allocation3 + $0xa8] sm:$0xf] %v5623_v60  ;;  %v13925_v62 = vld [vmem:[#allocation3 + $0xa4] sm:$0x1]  ;;  %v6029_v24 = vshll.u32 %v13922_v5, 16  ;;  %v6033_v8 = vshrl.u32 %v13922_v5, 16  ;;  %v13931_v60 = vpack.c.b16 %v6738_v50, %v6737_v9 }
 0x3a4   : > { %v5440_v18 = vshrl.u32 %v5205_v1, 16  ;;  %v5052_v42 = vmul.f32 %v13855_v10, %v5016_v52  ;;  %v5443_v25 = vshll.u32 %v5205_v1, 16  ;;  %v6025_v49 = vrot.slane %v6023_v19, 5 }
 0x3a5   : > { %v3872_v57 = vpop.f32.mrf.mxu2  ;;  %v6031_v63 = vrot.slane %v6029_v24, 5  ;;  %v6035_v3 = vrot.slane %v6033_v8, 4  ;;  %v6039_v31 = vshll.u32 %v13925_v62, 16 }
 0x3a6   : > { %v5442_v33 = vrot.slane %v5440_v18, 7  ;;  %v5088_v39 = vadd.f32 %v13866_v48, %v5052_v42  ;;  %v3909_v61 = vadd.f32 %v3872_v57, %v3594_v38  ;;  %v6026_v22 = vor.u32 %v6025_v49, %v6022_v4  ;;  %v11396_v57 = vld [vmem:[#allocation9 + $0x100] sm:$0xff] }
 0x3a7   : > { %6288 = vmatmul.bf16.gmra.mxu1 %v6152_v7  ;;  %v6036_v51 = vor.u32 %v6035_v3, %v6031_v63  ;;  %v11379_v7 = vld [vmem:[#allocation3 + $0x60] sm:$0xff]  ;;  %v6041_v42 = vrot.slane %v6039_v31, 5  ;;  %v6552_v49 = vld [vmem:[#allocation3 + $0x78] sm:$0xe]  ;;  %v6662_v3 = vrot.slane %v13788_v14, 5 }
 0x3a8   : > { %v5445_v44 = vor.u32 %v5443_v25, %v5442_v33  ;;  %v5447_v40 = vrot.slane %v5442_v33, 4  ;;  %v5120_v41 = vmax.f32 %v5088_v39, 0.0  ;;  %v4591_v17 = vadd.f32 %v4554_v58, %v3909_v61  ;;  %v13937_v16 = vpop.f32.mrf.mxu1  ;;  %v5629_v61 = vld [vmem:[#allocation3 + $0xb4] sm:$0xf]  ;;  %7834 = vmatpush.bf16.msrb.mxu1 %v11396_v57 }
 0x3a9   : > { %v6037_v18 = vrot.slane %v6036_v51, 4  ;;  %v6664_v51 = vrot.slane %v6662_v3, 4 }
 0x3aa   : > { %v5446_v1 = vsel %vm12125_vm8, %v5438_v53, %v5445_v44  ;;  %v5627_v52 = vsel %vm12144_vm10, %v5447_v40, %v5626_v28  ;;  %v5206_v12 = vpack.c.bf16 %v5120_v41, %v5120_v41  ;;  %v5017_v45 = vadd.f32 %v4980_v47, %v4591_v17  ;;  %v4983_v38 = vpop.f32.mrf.mxu0  ;;  %6496 = vmatmul.bf16.gmra.mxu2 %v11339_v21  ;;  %v5671_v23 = vld [vmem:[#allocation3 + $0xa8] sm:$0xf]  ;;  %v15607_v41 = vld [vmem:[#allocation22_spill] sm:$0xff] }
 0x3ab   : > { %5625 = vst [vmem:[#allocation3 + $0xac] sm:$0xf] %v5446_v1  ;;  %6874 = vmatmul.bf16.gmra.mxu3 %v13844_v29  ;;  %v6027_v53 = vrot.slane %v6026_v22, 4  ;;  %v6042_v47 = vsel %vm12014_vm2, %v6037_v18, %v6041_v42  ;;  %v15606_v29 = vld [vmem:[#allocation21_spill] sm:$0xff]  ;;  %v6044_v28 = vshrl.u32 %v5671_v23, 16  ;;  %v3596_v17 = vadd.f32 %v13672_v27, %v15607_v41 }
 0x3ac   : > { %5628 = vst [vmem:[#allocation3 + $0xb0] sm:$0x1] %v5627_v52  ;;  %v5449_v9 = vshrl.u32 %v5206_v12, 16  ;;  %v5053_v58 = vmul.f32 %v13855_v10, %v5017_v45  ;;  %v5452_v50 = vshll.u32 %v5206_v12, 16  ;;  %v6135_v4 = vunpack.c.l.b16 %v6042_v47 }
 0x3ad   : > { %7188 = vmatmul.bf16.gmra.mxu0 %v11379_v7  ;;  %v3875_v25 = vpop.f32.mrf.mxu2  ;;  %v6032_v39 = vsel %vm12014_vm2, %v6027_v53, %v6031_v63  ;;  %v6047_v22 = vshll.u32 %v5671_v23, 16  ;;  %v10816_v7 = vrot.slane %v6552_v49, 9  ;;  %v6046_v18 = vrot.slane %v6044_v28, 4  ;;  %v5633_v28 = vld [vmem:[#allocation3 + $0xbc] sm:$0x1] }
 0x3ae   : > { %v5451_v19 = vrot.slane %v5449_v9, 7  ;;  %v5089_v24 = vadd.f32 %v13866_v48, %v5053_v58  ;;  %v3910_v8 = vadd.f32 %v3875_v25, %v15606_v29  ;;  %v4557_v33 = vpop.f32.mrf.mxu3  ;;  %v6134_v21 = vunpack.c.l.b16 %v6032_v39 }
 0x3af   : > { %v6665_v9 = vrot.slane %v13791_v2, 5  ;;  %v6049_v57 = vrot.slane %v6047_v22, 5  ;;  %v11340_v22 = vld [vmem:[#allocation3 + $0x60] sm:$0xff] }
 0x3b0   : > { %v5454_v31 = vor.u32 %v5452_v50, %v5451_v19  ;;  %v5121_v44 = vmax.f32 %v5089_v24, 0.0  ;;  %v4592_v40 = vadd.f32 %v4557_v33, %v3910_v8  ;;  %v6153_v14 = vpack.c.b16 %v6135_v4, %v6134_v21 }
 0x3b1   : > { %v6666_v29 = vsel %vm12391_vm13, %v6664_v51, %v6665_v9  ;;  %v5455_v4 = vrot.slane %v5451_v19, 4  ;;  %v6050_v51 = vor.u32 %v6049_v57, %v6046_v18  ;;  %v11435_v57 = vld [vmem:[#allocation9 + $0x1b8] sm:$0xff] }
 0x3b2   : > { %v5630_v1 = vsel %vm12134_vm9, %v5454_v31, %v5629_v61  ;;  %v5207_v63 = vpack.c.bf16 %v5121_v44, %v5121_v44  ;;  %v5018_v52 = vadd.f32 %v4983_v38, %v4592_v40  ;;  %v4985_v12 = vpop.f32.mrf.mxu0  ;;  %v13952_v45 = vld [vmem:[#allocation3 + $0xac] sm:$0xf]  ;;  %v6663_v38 = vsel %vm12391_vm13, %v10816_v7, %v6662_v3  ;;  %8568 = vmatpush.bf16.msra.mxu3 %v11435_v57 }
 0x3b3   : > { %5631 = vst [vmem:[#allocation3 + $0xb4] sm:$0xf] %v5630_v1  ;;  %v6053_v42 = vshll.u32 %v13952_v45, 16  ;;  %v13957_v53 = vld [vmem:[#allocation3 + $0xb0] sm:$0x1]  ;;  %v6057_v23 = vshrl.u32 %v13952_v45, 16  ;;  %v6739_v3 = vunpack.c.l.b16 %v6663_v38  ;;  %v6740_v31 = vunpack.c.l.b16 %v6666_v29 }
 0x3b4   : > { %v5457_v27 = vshrl.u32 %v5207_v63, 16  ;;  %v5054_v58 = vmul.f32 %v13855_v10, %v5018_v52  ;;  %v5460_v50 = vshll.u32 %v5207_v63, 16  ;;  %v13962_v25 = vpop.f32.mrf.mxu1  ;;  %v6063_v49 = vshll.u32 %v13957_v53, 16  ;;  %v11411_v1 = vld [vmem:[#allocation9 + $0x178] sm:$0xff] }
 0x3b5   : > { %v3877_v47 = vpop.f32.mrf.mxu2  ;;  %v6055_v24 = vrot.slane %v6053_v42, 5  ;;  %v6059_v61 = vrot.slane %v6057_v23, 4  ;;  %v13968_v52 = vpack.c.b16 %v6740_v31, %v6739_v3  ;;  %8253 = vmatpush.bf16.msra.mxu2 %v11411_v1 }
 0x3b6   : > { %v5459_v2 = vrot.slane %v5457_v27, 7  ;;  %v5090_v8 = vadd.f32 %v13866_v48, %v5054_v58  ;;  %v3911_v33 = vadd.f32 %v3877_v47, %v3596_v17  ;;  %v4559_v39 = vpop.f32.mrf.mxu3  ;;  %v6065_v18 = vrot.slane %v6063_v49, 5 }
 0x3b7   : > { %6293 = vmatmul.bf16.gmra.mxu1 %v6153_v14  ;;  %v6060_v63 = vor.u32 %v6059_v61, %v6055_v24  ;;  %v11380_v14 = vld [vmem:[#allocation3 + $0x6c] sm:$0xff]  ;;  %v6051_v47 = vrot.slane %v6050_v51, 4  ;;  %v5636_v61 = vld [vmem:[#allocation3 + $0xc0] sm:$0xf] }
 0x3b8   : > { %v5462_v44 = vor.u32 %v5460_v50, %v5459_v2  ;;  %v5464_v40 = vrot.slane %v5459_v2, 4  ;;  %v5122_v41 = vmax.f32 %v5090_v8, 0.0  ;;  %v4593_v21 = vadd.f32 %v4559_v39, %v3911_v33 }
 0x3b9   : > { %v6061_v27 = vrot.slane %v6060_v63, 4 }
 0x3ba   : > { %v5463_v17 = vsel %vm12125_vm8, %v5455_v4, %v5462_v44  ;;  %v5634_v19 = vsel %vm12144_vm10, %v5464_v40, %v5633_v28  ;;  %v5208_v7 = vpack.c.bf16 %v5122_v41, %v5122_v41  ;;  %v5019_v42 = vadd.f32 %v4985_v12, %v4593_v21  ;;  %v13974_v9 = vpop.f32.mrf.mxu0  ;;  %6501 = vmatmul.bf16.gmra.mxu2 %v11340_v22  ;;  %v5673_v39 = vld [vmem:[#allocation3 + $0xb4] sm:$0xf] }
 0x3bb   : > { %5632 = vst [vmem:[#allocation3 + $0xb8] sm:$0xf] %v5463_v17  ;;  %6879 = vmatmul.bf16.gmra.mxu3 %v13895_v0  ;;  %v6066_v12 = vsel %vm12014_vm2, %v6061_v27, %v6065_v18  ;;  %v6068_v31 = vshrl.u32 %v5673_v39, 16  ;;  %v6071_v44 = vshll.u32 %v5673_v39, 16  ;;  %v11443_v27 = vld [vmem:[#allocation9 + $0x1f8] sm:$0xff] }
 0x3bc   : > { %5635 = vst [vmem:[#allocation3 + $0xbc] sm:$0x1] %v5634_v19  ;;  %v5466_v58 = vshrl.u32 %v5208_v7, 16  ;;  %v5055_v23 = vmul.f32 %v13855_v10, %v5019_v42  ;;  %v13978_v38 = vpop.f32.mrf.mxu1  ;;  %v5469_v2 = vshll.u32 %v5208_v7, 16  ;;  %v6056_v10 = vsel %vm12014_vm2, %v6051_v47, %v6055_v24  ;;  %v5640_v47 = vld [vmem:[#allocation3 + $0xc8] sm:$0x1]  ;;  %9250 = vmatpush.bf16.msra.mxu0 %v11443_v27 }
 0x3bd   : > { %7193 = vmatmul.bf16.gmra.mxu0 %v11380_v14  ;;  %v6462_v50 = vpop.f32.mrf.mxu2  ;;  %v6137_v3 = vunpack.c.l.b16 %v6066_v12  ;;  %v6070_v11 = vrot.slane %v6068_v31, 4  ;;  %v6073_v7 = vrot.slane %v6071_v44, 5  ;;  %v11341_v39 = vld [vmem:[#allocation3 + $0x6c] sm:$0xff] }
 0x3be   : > { %v5468_v29 = vrot.slane %v5466_v58, 7  ;;  %v5091_v0 = vadd.f32 %v13866_v48, %v5055_v23  ;;  %v6463_v8 = vadd.f32 %v6462_v50, %v13707_v36  ;;  %v6840_v33 = vpop.f32.mrf.mxu3  ;;  %v6136_v36 = vunpack.c.l.b16 %v6056_v10  ;;  %v14011_v44 = vld [vmem:[#allocation3 + $0x10] sm:$0xf] }
 0x3bf   : > { %v6074_v10 = vor.u32 %v6073_v7, %v6070_v11 }
 0x3c0   : > { %v5471_v4 = vor.u32 %v5469_v2, %v5468_v29  ;;  %v5123_v28 = vmax.f32 %v5091_v0, 0.0  ;;  %v13986_v49 = vadd.f32 %v6840_v33, %v6463_v8  ;;  %v6154_v51 = vpack.c.b16 %v6137_v3, %v6136_v36 }
 0x3c1   : > { %v5472_v2 = vrot.slane %v5468_v29, 4  ;;  %v11381_v29 = vld [vmem:[#allocation3 + $0x78] sm:$0xff] }
 0x3c2   : > { %v5637_v40 = vsel %vm12134_vm9, %v5471_v4, %v5636_v61  ;;  %v5209_v48 = vpack.c.bf16 %v5123_v28, %v5123_v28  ;;  %v13990_v41 = vpop.f32.mrf.mxu0  ;;  %v13992_v21 = vld [vmem:[#allocation3 + $0xb8] sm:$0xf]  ;;  %v11451_v61 = vld [vmem:[#allocation9 + $0x238] sm:$0xff] }
 0x3c3   : > { %5638 = vst [vmem:[#allocation3 + $0xc0] sm:$0xf] %v5637_v40  ;;  %v6077_v24 = vshll.u32 %v13992_v21, 16  ;;  %v6081_v22 = vshrl.u32 %v13992_v21, 16  ;;  %v13996_v63 = vld [vmem:[#allocation3 + $0xbc] sm:$0x1]  ;;  %9676 = vmatpush.bf16.msra.mxu1 %v11451_v61 }
 0x3c4   : > { %v5474_v1 = vshrl.u32 %v5209_v48, 16  ;;  %v13998_v17 = vpop.f32.mrf.mxu1  ;;  %v5477_v58 = vshll.u32 %v5209_v48, 16  ;;  %v6087_v57 = vshll.u32 %v13996_v63, 16  ;;  %v6075_v48 = vrot.slane %v6074_v10, 4  ;;  %v11342_v61 = vld [vmem:[#allocation3 + $0x78] sm:$0xff]  ;;  %v11410_v10 = vld [vmem:[#allocation9 + $0x170] sm:$0xff] }
 0x3c5   : > { %v6464_v19 = vpop.f32.mrf.mxu2  ;;  %v6079_v42 = vrot.slane %v6077_v24, 5  ;;  %v6083_v14 = vrot.slane %v6081_v22, 4  ;;  %8254 = vmatpush.bf16.msra.mxu2 %v11410_v10 }
 0x3c6   : > { %v5476_v18 = vrot.slane %v5474_v1, 7  ;;  %v6465_v23 = vadd.f32 %v6464_v19, %v13743_v56  ;;  %v6842_v50 = vpop.f32.mrf.mxu3  ;;  %v6089_v31 = vrot.slane %v6087_v57, 5  ;;  %v7324_v1 = vshll.u32 %v14011_v44, 16  ;;  %v14029_v57 = vld [vmem:[#allocation3 + $0x14] sm:$0x1] }
 0x3c7   : > { %v6084_v12 = vor.u32 %v6083_v14, %v6079_v42  ;;  %6298 = vmatmul.bf16.gmra.mxu1 %v6154_v51  ;;  %v6080_v22 = vsel %vm12014_vm2, %v6075_v48, %v6079_v42  ;;  %v7328_v51 = vshrl.u32 %v14011_v44, 16 }
 0x3c8   : > { %v5479_v0 = vor.u32 %v5477_v58, %v5476_v18  ;;  %v5481_v8 = vrot.slane %v5476_v18, 4  ;;  %v14002_v33 = vadd.f32 %v6842_v50, %v6465_v23  ;;  %v6138_v14 = vunpack.c.l.b16 %v6080_v22 }
 0x3c9   : > { %v6085_v4 = vrot.slane %v6084_v12, 4  ;;  %v7326_v58 = vrot.slane %v7324_v1, 5  ;;  %v7330_v23 = vrot.slane %v7328_v51, 4 }
 0x3ca   : > { %v5480_v28 = vsel %vm12125_vm8, %v5472_v2, %v5479_v0  ;;  %v5641_v56 = vsel %vm12144_vm10, %v5481_v8, %v5640_v47  ;;  %v14008_v3 = vpop.f32.mrf.mxu0  ;;  %6506 = vmatmul.bf16.gmra.mxu2 %v11341_v39 }
 0x3cb   : > { %15608 = vst [vmem:[#allocation23_spill] sm:$0xff] %v14008_v3  ;;  %6884 = vmatmul.bf16.gmra.mxu3 %v13931_v60  ;;  %v6090_v15 = vsel %vm12014_vm2, %v6085_v4, %v6089_v31  ;;  %v7266_v60 = vld [vmem:[#allocation3 + $0xc] sm:$0xf]  ;;  %v7331_v8 = vor.u32 %v7330_v23, %v7326_v58  ;;  %v7334_v4 = vshll.u32 %v14029_v57, 16  ;;  %v6672_v23 = vrot.slane %v13836_v26, 5 }
 0x3cc   : > { %5639 = vst [vmem:[#allocation3 + $0xc4] sm:$0xf] %v5480_v28  ;;  %v14013_v40 = vpop.f32.mrf.mxu1  ;;  %v6139_v11 = vunpack.c.l.b16 %v6090_v15  ;;  %v7315_v27 = vshrl.u32 %v7266_v60, 16  ;;  %v7318_v18 = vshll.u32 %v7266_v60, 16 }
 0x3cd   : > { %5642 = vst [vmem:[#allocation3 + $0xc8] sm:$0x1] %v5641_v56  ;;  %7198 = vmatmul.bf16.gmra.mxu0 %v11381_v29  ;;  %v6467_v6 = vpop.f32.mrf.mxu2  ;;  %v6669_v29 = vrot.slane %v13833_v37, 5  ;;  %v7332_v31 = vrot.slane %v7331_v8, 4 }
 0x3ce   : > { %v6468_v36 = vadd.f32 %v6467_v6, %v13764_v32  ;;  %v6845_v24 = vpop.f32.mrf.mxu3  ;;  %v6155_v32 = vpack.c.b16 %v6139_v11, %v6138_v14  ;;  %v7317_v2 = vrot.slane %v7315_v27, 4  ;;  %v7320_v0 = vrot.slane %v7318_v18, 5  ;;  %v7270_v6 = vld [vmem:[#allocation3 + $0x1c] sm:$0xf]  ;;  %v6553_v11 = vld [vmem:[#allocation3 + $0x84] sm:$0xe] }
 0x3cf   : > { %v6671_v51 = vrot.slane %v6669_v29, 4  ;;  %v7348_v14 = vshll.u32 %v7270_v6, 16  ;;  %v7352_v27 = vshrl.u32 %v7270_v6, 16 }
 0x3d0   : > { %v14022_v19 = vadd.f32 %v6845_v24, %v6468_v36  ;;  %v7321_v56 = vor.u32 %v7320_v0, %v7317_v2  ;;  %v7336_v36 = vrot.slane %v7334_v4, 5  ;;  %v11434_v24 = vld [vmem:[#allocation9 + $0x1b0] sm:$0xff] }
 0x3d1   : > { %8569 = vmatpush.bf16.msra.mxu3 %v11434_v24  ;;  %v14052_v8 = vrot.slane %v7348_v14, 5  ;;  %v11450_v14 = vld [vmem:[#allocation9 + $0x230] sm:$0xff] }
 0x3d2   : > { %v14024_v7 = vpop.f32.mrf.mxu0  ;;  %v7322_v1 = vrot.slane %v7321_v56, 4  ;;  %v7337_v37 = vsel %vm12014_vm2, %v7332_v31, %v7336_v36  ;;  %v7949_v31 = vld [vmem:[#allocation3 + $0x18] sm:$0xe]  ;;  %9677 = vmatpush.bf16.msra.mxu1 %v11450_v14 }
 0x3d3   : > { %15609 = vst [vmem:[#allocation24_spill] sm:$0xff] %v14024_v7 }
 0x3d4   : > { %v14026_v50 = vpop.f32.mrf.mxu1 }
 0x3d5   : > { %v6469_v47 = vpop.f32.mrf.mxu2 }
 0x3d6   : > { %v6470_v42 = vadd.f32 %v6469_v47, %v13796_v35  ;;  %v6847_v12 = vpop.f32.mrf.mxu3  ;;  %v11382_v35 = vld [vmem:[#allocation3 + $0x84] sm:$0xff] }
 0x3d7   : > { %6303 = vmatmul.bf16.gmra.mxu1 %v6155_v32  ;;  %v7327_v32 = vsel %vm12014_vm2, %v7322_v1, %v7326_v58 }
 0x3d8   : > { %v14031_v39 = vadd.f32 %v6847_v12, %v6470_v42  ;;  %v10817_v42 = vrot.slane %v6553_v11, 9  ;;  %v6673_v12 = vsel %vm12391_vm13, %v6671_v51, %v6672_v23  ;;  %v7715_v10 = vunpack.c.l.b16 %v7327_v32 }
 0x3d9   : > { %v6742_v58 = vunpack.c.l.b16 %v6673_v12  ;;  %v8021_v11 = vrot.slane %v7270_v6, 5  ;;  %v7273_v12 = vld [vmem:[#allocation3 + $0x28] sm:$0xf] }
 0x3da   : > { %15610 = vst [vmem:[#allocation25_spill] sm:$0xff] %v14031_v39  ;;  %v14034_v28 = vpop.f32.mrf.mxu0  ;;  %6511 = vmatmul.bf16.gmra.mxu2 %v11342_v61  ;;  %v7354_v61 = vrot.slane %v7352_v27, 4  ;;  %v6670_v4 = vsel %vm12391_vm13, %v10817_v42, %v6669_v29  ;;  %v10983_v27 = vrot.slane %v7949_v31, 9  ;;  %v7272_v31 = vld [vmem:[#allocation3 + $0x24] sm:$0xf] }
 0x3db   : > { %15611 = vst [vmem:[#allocation27_spill] sm:$0xff] %v14034_v28  ;;  %6889 = vmatmul.bf16.gmra.mxu3 %v13968_v52  ;;  %v7269_v52 = vld [vmem:[#allocation3 + $0x18] sm:$0xf]  ;;  %v6741_v1 = vunpack.c.l.b16 %v6670_v4  ;;  %v11439_v28 = vld [vmem:[#allocation9 + $0x1d8] sm:$0xff] }
 0x3dc   : > { %v14038_v48 = vpop.f32.mrf.mxu1  ;;  %v7339_v2 = vshrl.u32 %v7269_v52, 16  ;;  %v7342_v0 = vshll.u32 %v7269_v52, 16  ;;  %v11343_v52 = vld [vmem:[#allocation3 + $0x84] sm:$0xff] }
 0x3dd   : > { %7203 = vmatmul.bf16.gmra.mxu0 %v11382_v35  ;;  %v6472_v15 = vpop.f32.mrf.mxu2  ;;  %v11442_v35 = vld [vmem:[#allocation9 + $0x1f0] sm:$0xff]  ;;  %v6762_v23 = vpack.c.b16 %v6742_v58, %v6741_v1 }
 0x3de   : > { %v6473_v22 = vadd.f32 %v6472_v15, %v13820_v46  ;;  %v6850_v60 = vpop.f32.mrf.mxu3  ;;  %v7716_v46 = vunpack.c.l.b16 %v7337_v37  ;;  %v7344_v51 = vrot.slane %v7342_v0, 5  ;;  %v7355_v37 = vor.u32 %v7354_v61, %v14052_v8  ;;  %9251 = vmatpush.bf16.msra.mxu0 %v11442_v35  ;;  %v11383_v0 = vld [vmem:[#allocation3 + $0x90] sm:$0xff] }
 0x3e0   : > { %v14043_v18 = vadd.f32 %v6850_v60, %v6473_v22  ;;  %v7747_v15 = vpack.c.b16 %v7716_v46, %v7715_v10  ;;  %v7271_v22 = vld [vmem:[#allocation3 + $0x20] sm:$0x1]  ;;  %v7341_v60 = vrot.slane %v7339_v2, 4  ;;  %v8023_v46 = vrot.slane %v8021_v11, 4 }
 0x3e1   : > { %v7358_v32 = vshll.u32 %v7271_v22, 16  ;;  %v8022_v2 = vsel %vm12391_vm13, %v10983_v27, %v8021_v11  ;;  %v8024_v6 = vrot.slane %v7271_v22, 5  ;;  %v7356_v10 = vrot.slane %v7355_v37, 4 }
 0x3e2   : > { %15612 = vst [vmem:[#allocation26_spill] sm:$0xff] %v14043_v18  ;;  %v14048_v47 = vpop.f32.mrf.mxu0  ;;  %v7345_v61 = vor.u32 %v7344_v51, %v7341_v60  ;;  %v7376_v11 = vshrl.u32 %v7273_v12, 16  ;;  %v6554_v51 = vld [vmem:[#allocation3 + $0x90] sm:$0xe]  ;;  %v6679_v27 = vrot.slane %v13887_v43, 5 }
 0x3e3   : > { %15613 = vst [vmem:[#allocation28_spill] sm:$0xff] %v14048_v47  ;;  %v8025_v4 = vsel %vm12391_vm13, %v8023_v46, %v8024_v6  ;;  %v7360_v35 = vrot.slane %v7358_v32, 5 }
 0x3e4   : > { %v14056_v26 = vpop.f32.mrf.mxu1 }
 0x3e5   : > { %v6474_v56 = vpop.f32.mrf.mxu2  ;;  %v7361_v60 = vsel %vm12014_vm2, %v7356_v10, %v7360_v35  ;;  %v7378_v10 = vrot.slane %v7376_v11, 4  ;;  %v7274_v35 = vld [vmem:[#allocation3 + $0x2c] sm:$0x1] }
 0x3e6   : > { %v6475_v36 = vadd.f32 %v6474_v56, %v13842_v59  ;;  %v6852_v24 = vpop.f32.mrf.mxu3  ;;  %v6676_v59 = vrot.slane %v13884_v20, 5  ;;  %v7372_v20 = vshll.u32 %v7273_v12, 16  ;;  %v7718_v6 = vunpack.c.l.b16 %v7361_v60 }
 0x3e7   : > { %7835 = vmatmul.bf16.vlgmr.msrb.gmra.mxu1 %v7747_v15  ;;  %v8143_v15 = vunpack.c.l.b16 %v8022_v2 }
 0x3e8   : > { %v14060_v29 = vadd.f32 %v6852_v24, %v6475_v36  ;;  %v8144_v36 = vunpack.c.l.b16 %v8025_v4  ;;  %v6678_v22 = vrot.slane %v6676_v59, 4  ;;  %v14082_v46 = vrot.slane %v7372_v20, 5  ;;  %v7950_v4 = vld [vmem:[#allocation3 + $0x24] sm:$0xe] }
 0x3ea   : > { %15614 = vst [vmem:[#allocation30_spill] sm:$0xff] %v14060_v29  ;;  %v14062_v42 = vpop.f32.mrf.mxu0  ;;  %6516 = vmatmul.bf16.gmra.mxu2 %v11343_v52  ;;  %v7346_v52 = vrot.slane %v7345_v61, 4  ;;  %v14074_v37 = vpack.c.b16 %v8144_v36, %v8143_v15  ;;  %v6680_v61 = vsel %vm12391_vm13, %v6678_v22, %v6679_v27  ;;  %v7379_v22 = vor.u32 %v7378_v10, %v14082_v46  ;;  %v6556_v29 = vld [vmem:[#allocation3 + $0xa8] sm:$0xe] }
 0x3eb   : > { %15615 = vst [vmem:[#allocation31_spill] sm:$0xff] %v14062_v42  ;;  %6894 = vmatmul.bf16.gmra.mxu3 %v6762_v23  ;;  %v7363_v23 = vshrl.u32 %v7272_v31, 16  ;;  %v11449_v42 = vld [vmem:[#allocation9 + $0x228] sm:$0xff] }
 0x3ec   : > { %v14069_v56 = vpop.f32.mrf.mxu1  ;;  %v7351_v32 = vsel %vm12014_vm2, %v7346_v52, %v14052_v8  ;;  %v7380_v10 = vrot.slane %v7379_v22, 4  ;;  %9678 = vmatpush.bf16.msra.mxu1 %v11449_v42  ;;  %v9371_v42 = vld [vmem:[#allocation3 + $0x18] sm:$0xe] }
 0x3ed   : > { %7208 = vmatmul.bf16.gmra.mxu0 %v11383_v0  ;;  %v6477_v58 = vpop.f32.mrf.mxu2  ;;  %v10818_v0 = vrot.slane %v6554_v51, 9  ;;  %v7365_v15 = vrot.slane %v7363_v23, 4 }
 0x3ee   : > { %v6478_v24 = vadd.f32 %v6477_v58, %v13873_v55  ;;  %v6855_v1 = vpop.f32.mrf.mxu3  ;;  %v7366_v55 = vshll.u32 %v7272_v31, 16  ;;  %v7717_v58 = vunpack.c.l.b16 %v7351_v32  ;;  %v6744_v31 = vunpack.c.l.b16 %v6680_v61 }
 0x3ef   : > { %v6677_v43 = vsel %vm12391_vm13, %v10818_v0, %v6676_v59  ;;  %v8031_v32 = vrot.slane %v7274_v35, 5  ;;  %v11344_v0 = vld [vmem:[#allocation3 + $0x90] sm:$0xff]  ;;  %v7382_v61 = vshll.u32 %v7274_v35, 16 }
 0x3f0   : > { %v14076_v14 = vadd.f32 %v6855_v1, %v6478_v24  ;;  %v7368_v20 = vrot.slane %v7366_v55, 5  ;;  %v10984_v24 = vrot.slane %v7950_v4, 9  ;;  %v8028_v1 = vrot.slane %v7273_v12, 5  ;;  %v7276_v55 = vld [vmem:[#allocation3 + $0x34] sm:$0xf]  ;;  %v11409_v4 = vld [vmem:[#allocation9 + $0x168] sm:$0xff] }
 0x3f1   : > { %v7748_v52 = vpack.c.b16 %v7718_v6, %v7717_v58  ;;  %v6743_v11 = vunpack.c.l.b16 %v6677_v43  ;;  %v6683_v43 = vrot.slane %v13922_v5, 5  ;;  %8255 = vmatpush.bf16.msra.mxu2 %v11409_v4  ;;  %v8035_v35 = vrot.slane %v7276_v55, 5 }
 0x3f2   : > { %15616 = vst [vmem:[#allocation29_spill] sm:$0xff] %v14076_v14  ;;  %v14084_v2 = vpop.f32.mrf.mxu0  ;;  %v8029_v27 = vsel %vm12391_vm13, %v10984_v24, %v8028_v1  ;;  %v8030_v59 = vrot.slane %v8028_v1, 4  ;;  %v7369_v6 = vor.u32 %v7368_v20, %v7365_v15  ;;  %v7951_v1 = vld [vmem:[#allocation3 + $0x30] sm:$0xe]  ;;  %v7396_v15 = vshll.u32 %v7276_v55, 16 }
 0x3f3   : > { %15617 = vst [vmem:[#allocation33_spill] sm:$0xff] %v14084_v2  ;;  %v6763_v12 = vpack.c.b16 %v6744_v31, %v6743_v11  ;;  %v14103_v31 = vld [vmem:[#allocation3 + $0x38] sm:$0x1]  ;;  %v7400_v20 = vshrl.u32 %v7276_v55, 16  ;;  %v7953_v14 = vld [vmem:[#allocation3 + $0x48] sm:$0xe] }
 0x3f4   : > { %v14090_v36 = vpop.f32.mrf.mxu1  ;;  %v7370_v5 = vrot.slane %v7369_v6, 4 }
 0x3f5   : > { %v6479_v8 = vpop.f32.mrf.mxu2 }
 0x3f6   : > { %v6480_v60 = vadd.f32 %v6479_v8, %v13893_v13  ;;  %v6857_v51 = vpop.f32.mrf.mxu3  ;;  %v8032_v13 = vsel %vm12391_vm13, %v8030_v59, %v8031_v32  ;;  %v8145_v8 = vunpack.c.l.b16 %v8029_v27  ;;  %v11433_v27 = vld [vmem:[#allocation9 + $0x1a8] sm:$0xff]  ;;  %v10985_v32 = vrot.slane %v7951_v1, 9 }
 0x3f7   : > { %7840 = vmatmul.bf16.gmra.mxu1 %v7748_v52  ;;  %v8146_v24 = vunpack.c.l.b16 %v8032_v13  ;;  %v11384_v52 = vld [vmem:[#allocation3 + $0x9c] sm:$0xff]  ;;  %8570 = vmatpush.bf16.msra.mxu3 %v11433_v27  ;;  %v6686_v1 = vrot.slane %v13925_v62, 5 }
 0x3f8   : > { %v14096_v23 = vadd.f32 %v6857_v51, %v6480_v60  ;;  %v7275_v60 = vld [vmem:[#allocation3 + $0x30] sm:$0xf]  ;;  %v7384_v51 = vrot.slane %v7382_v61, 5  ;;  %v6685_v61 = vrot.slane %v6683_v43, 4  ;;  %v8036_v55 = vsel %vm12391_vm13, %v10985_v32, %v8035_v35 }
 0x3f9   : > { %v14105_v11 = vpack.c.b16 %v8146_v24, %v8145_v8  ;;  %v7387_v13 = vshrl.u32 %v7275_v60, 16  ;;  %v7390_v2 = vshll.u32 %v7275_v60, 16  ;;  %v8037_v8 = vrot.slane %v8035_v35, 4 }
 0x3fa   : > { %15618 = vst [vmem:[#allocation14_spill] sm:$0xff] %v14096_v23  ;;  %v14100_v58 = vpop.f32.mrf.mxu0  ;;  %6521 = vmatmul.bf16.gmra.mxu2 %v11344_v0  ;;  %v7385_v4 = vsel %vm12014_vm2, %v7380_v10, %v7384_v51  ;;  %v8038_v24 = vrot.slane %v14103_v31, 5  ;;  %v7375_v10 = vsel %vm12014_vm2, %v7370_v5, %v14082_v46  ;;  %v6687_v27 = vsel %vm12391_vm13, %v6685_v61, %v6686_v1  ;;  %v14132_v5 = vld [vmem:[#allocation3 + $0x40] sm:$0xf] }
 0x3fb   : > { %15619 = vst [vmem:[#allocation32_spill] sm:$0xff] %v14100_v58  ;;  %6899 = vmatmul.bf16.gmra.mxu3 %v6763_v12  ;;  %v6555_v58 = vld [vmem:[#allocation3 + $0x9c] sm:$0xe]  ;;  %v7720_v51 = vunpack.c.l.b16 %v7385_v4  ;;  %v8147_v32 = vunpack.c.l.b16 %v8036_v55  ;;  %v7389_v62 = vrot.slane %v7387_v13, 4  ;;  %v6746_v61 = vunpack.c.l.b16 %v6687_v27  ;;  %v11441_v13 = vld [vmem:[#allocation9 + $0x1e8] sm:$0xff] }
 0x3fc   : > { %v14107_v59 = vpop.f32.mrf.mxu1  ;;  %v8039_v60 = vsel %vm12391_vm13, %v8037_v8, %v8038_v24  ;;  %v10819_v35 = vrot.slane %v6555_v58, 9  ;;  %v7952_v8 = vld [vmem:[#allocation3 + $0x3c] sm:$0xe]  ;;  %v7406_v55 = vshll.u32 %v14103_v31, 16  ;;  %9252 = vmatpush.bf16.msra.mxu0 %v11441_v13 }
 0x3fd   : > { %7213 = vmatmul.bf16.gmra.mxu0 %v11384_v52  ;;  %v6482_v22 = vpop.f32.mrf.mxu2  ;;  %v7402_v52 = vrot.slane %v7400_v20, 4  ;;  %v7719_v20 = vunpack.c.l.b16 %v7375_v10  ;;  %v11345_v27 = vld [vmem:[#allocation3 + $0x9c] sm:$0xff] }
 0x3fe   : > { %v6483_v0 = vadd.f32 %v6482_v22, %v13914_v54  ;;  %v6860_v12 = vpop.f32.mrf.mxu3  ;;  %v14118_v54 = vrot.slane %v7396_v15, 5  ;;  %v7392_v15 = vrot.slane %v7390_v2, 5 }
 0x3ff   : > { %v7749_v2 = vpack.c.b16 %v7720_v51, %v7719_v20  ;;  %v14145_v20 = vld [vmem:[#allocation3 + $0x1c] sm:$0xf] }
 0x400   : > { %v14115_v6 = vadd.f32 %v6860_v12, %v6483_v0  ;;  %v8148_v0 = vunpack.c.l.b16 %v8039_v60  ;;  %v7278_v12 = vld [vmem:[#allocation3 + $0x3c] sm:$0xf]  ;;  %v7403_v46 = vor.u32 %v7402_v52, %v14118_v54  ;;  %v14140_v60 = vld [vmem:[#allocation3 + $0x44] sm:$0x1] }
 0x401   : > { %v7414_v52 = vshll.u32 %v7278_v12, 16 }
 0x402   : > { %15620 = vst [vmem:[#allocation34_spill] sm:$0xff] %v14115_v6  ;;  %v14125_v22 = vpop.f32.mrf.mxu0  ;;  %v6684_v6 = vsel %vm12391_vm13, %v10819_v35, %v6683_v43  ;;  %v14134_v4 = vpack.c.b16 %v8148_v0, %v8147_v32  ;;  %v7411_v43 = vshrl.u32 %v7278_v12, 16  ;;  %v10986_v32 = vrot.slane %v7952_v8, 9  ;;  %v14153_v8 = vld [vmem:[#allocation3 + $0xc] sm:$0xe] }
 0x403   : > { %15621 = vst [vmem:[#allocation16_spill] sm:$0xff] %v14125_v22  ;;  %v6745_v35 = vunpack.c.l.b16 %v6684_v6  ;;  %v7393_v22 = vor.u32 %v7392_v15, %v7389_v62  ;;  %v8042_v0 = vrot.slane %v14132_v5, 5  ;;  %v7404_v31 = vrot.slane %v7403_v46, 4  ;;  %v11385_v46 = vld [vmem:[#allocation3 + $0xa8] sm:$0xff] }
 0x404   : > { %v14136_v58 = vpop.f32.mrf.mxu1  ;;  %v8045_v6 = vrot.slane %v14140_v60, 5  ;;  %v7408_v15 = vrot.slane %v7406_v55, 5  ;;  %v15521_v12 = vrot.slane %v13952_v45, 5  ;;  %v14155_v13 = vrot.slane %v7411_v43, 4 }
 0x405   : > { %v6484_v24 = vpop.f32.mrf.mxu2  ;;  %v6764_v51 = vpack.c.b16 %v6746_v61, %v6745_v35  ;;  %v7394_v61 = vrot.slane %v7393_v22, 4  ;;  %v14163_v35 = vld [vmem:[#allocation3 + $0x4c] sm:$0xf]  ;;  %v7420_v43 = vshll.u32 %v14132_v5, 16 }
 0x406   : > { %v6485_v1 = vadd.f32 %v6484_v24, %v13937_v16  ;;  %v6862_v10 = vpop.f32.mrf.mxu3  ;;  %v8043_v16 = vsel %vm12391_vm13, %v10986_v32, %v8042_v0  ;;  %v8044_v24 = vrot.slane %v8042_v0, 4  ;;  %v9437_v0 = vrot.slane %v14145_v20, 5 }
 0x407   : > { %7845 = vmatmul.bf16.gmra.mxu1 %v7749_v2  ;;  %v14157_v2 = vrot.slane %v7414_v52, 5  ;;  %v8149_v55 = vunpack.c.l.b16 %v8043_v16  ;;  %v7424_v52 = vshrl.u32 %v14132_v5, 16  ;;  %v14192_v7 = vrot.slane %v7420_v43, 5 }
 0x408   : > { %v14143_v23 = vadd.f32 %v6862_v10, %v6485_v1  ;;  %v8046_v1 = vsel %vm12391_vm13, %v8044_v24, %v8045_v6  ;;  %v7409_v10 = vsel %vm12014_vm2, %v7404_v31, %v7408_v15  ;;  %v11432_v24 = vld [vmem:[#allocation9 + $0x1a0] sm:$0xff]  ;;  %v6693_v31 = vrot.slane %v13957_v53, 5 }
 0x409   : > { %v8150_v32 = vunpack.c.l.b16 %v8046_v1  ;;  %v11440_v6 = vld [vmem:[#allocation9 + $0x1e0] sm:$0xff]  ;;  %v7399_v1 = vsel %vm12014_vm2, %v7394_v61, %v14118_v54  ;;  %v7722_v47 = vunpack.c.l.b16 %v7409_v10  ;;  %8571 = vmatpush.bf16.msra.mxu3 %v11432_v24  ;;  %v11407_v54 = vld [vmem:[#allocation9 + $0x158] sm:$0xff]  ;;  %v8049_v10 = vrot.slane %v14163_v35, 5 }
 0x40a   : > { %15622 = vst [vmem:[#allocation15_spill] sm:$0xff] %v14143_v23  ;;  %v14150_v62 = vpop.f32.mrf.mxu0  ;;  %6526 = vmatmul.bf16.gmra.mxu2 %v11345_v27  ;;  %v14179_v23 = vld [vmem:[#allocation3 + $0x20] sm:$0x1]  ;;  %v11431_v61 = vld [vmem:[#allocation9 + $0x198] sm:$0xff]  ;;  %9253 = vmatpush.bf16.msra.mxu0 %v11440_v6  ;;  %v9439_v18 = vrot.slane %v9437_v0, 4  ;;  %v7721_v53 = vunpack.c.l.b16 %v7399_v1  ;;  %v10820_v24 = vrot.slane %v6556_v29, 9 }
 0x40b   : > { %15623 = vst [vmem:[#allocation35_spill] sm:$0xff] %v14150_v62  ;;  %6904 = vmatmul.bf16.gmra.mxu3 %v6764_v51  ;;  %v11408_v51 = vld [vmem:[#allocation9 + $0x160] sm:$0xff]  ;;  %v14181_v5 = vpack.c.b16 %v8150_v32, %v8149_v55  ;;  %v14189_v55 = vld [vmem:[#allocation3 + $0x50] sm:$0x1]  ;;  %v11158_v32 = vrot.slane %v9371_v42, 9  ;;  %v9440_v6 = vrot.slane %v14179_v23, 5 }
 0x40c   : > { %v14166_v27 = vpop.f32.mrf.mxu1  ;;  %v14177_v62 = vld [vmem:[#allocation3 + $0x18] sm:$0xf]  ;;  %8256 = vmatpush.bf16.msra.mxu2 %v11408_v51  ;;  %v10987_v51 = vrot.slane %v7953_v14, 9  ;;  %v8051_v43 = vrot.slane %v8049_v10, 4  ;;  %v7750_v29 = vpack.c.b16 %v7722_v47, %v7721_v53  ;;  %v11438_v47 = vld [vmem:[#allocation9 + $0x1d0] sm:$0xff] }
 0x40d   : > { %7218 = vmatmul.bf16.gmra.mxu0 %v11385_v46  ;;  %v6487_v22 = vpop.f32.mrf.mxu2  ;;  %v6692_v46 = vrot.slane %v15521_v12, 4  ;;  %15624 = vst [vmem:[#allocation18_spill] sm:$0xff] %v14181_v5  ;;  %8572 = vmatpush.bf16.msra.mxu3 %v11431_v61  ;;  %v8741_v1 = vshll.u32 %v14177_v62, 16  ;;  %v7430_v5 = vshll.u32 %v14140_v60, 16  ;;  %v8017_v60 = vrot.slane %v14029_v57, 5 }
 0x40e   : > { %v6488_v15 = vadd.f32 %v6487_v22, %v13962_v25  ;;  %v6865_v16 = vpop.f32.mrf.mxu3  ;;  %v7426_v25 = vrot.slane %v7424_v52, 4  ;;  %v8050_v42 = vsel %vm12391_vm13, %v10987_v51, %v8049_v10  ;;  %v8052_v52 = vrot.slane %v14189_v55, 5  ;;  %9254 = vmatpush.bf16.msra.mxu0 %v11439_v28  ;;  %v11406_v51 = vld [vmem:[#allocation9 + $0x150] sm:$0xff] }
 0x40f   : > { %v6694_v39 = vsel %vm12391_vm13, %v6692_v46, %v6693_v31  ;;  %v15627_v31 = vrot.slane %v13952_v45, 5  ;;  %v14210_v46 = vld [vmem:[#allocation3 + $0x28] sm:$0xf] }
 0x410   : > { %v14187_v12 = vadd.f32 %v6865_v16, %v6488_v15  ;;  %v9438_v15 = vsel %vm12391_vm13, %v11158_v32, %v9437_v0  ;;  %8257 = vmatpush.bf16.msra.mxu2 %v11407_v54  ;;  %v8738_v16 = vshrl.u32 %v14177_v62, 16  ;;  %v9441_v54 = vsel %vm12391_vm13, %v9439_v18, %v9440_v6  ;;  %v11430_v22 = vld [vmem:[#allocation9 + $0x190] sm:$0xff] }
 0x411   : > { %v6691_v0 = vsel %vm12391_vm13, %v10820_v24, %v15627_v31  ;;  %v6748_v32 = vunpack.c.l.b16 %v6694_v39  ;;  %v8053_v45 = vsel %vm12391_vm13, %v8051_v43, %v8052_v52  ;;  %v9564_v53 = vunpack.c.l.b16 %v9438_v15  ;;  %v11346_v18 = vld [vmem:[#allocation3 + $0xa8] sm:$0xff]  ;;  %8573 = vmatpush.bf16.msra.mxu3 %v11430_v22 }
 0x412   : > { %15625 = vst [vmem:[#allocation17_spill] sm:$0xff] %v14187_v12  ;;  %v14203_v14 = vpop.f32.mrf.mxu0  ;;  %v9565_v24 = vunpack.c.l.b16 %v9441_v54  ;;  %v7427_v31 = vor.u32 %v7426_v25, %v14192_v7  ;;  %v8152_v12 = vunpack.c.l.b16 %v8053_v45  ;;  %v6747_v6 = vunpack.c.l.b16 %v6691_v0  ;;  %v14221_v39 = vld [vmem:[#allocation3 + $0x2c] sm:$0x1]  ;;  %9255 = vmatpush.bf16.msra.mxu0 %v11438_v47  ;;  %v11429_v25 = vld [vmem:[#allocation9 + $0x188] sm:$0xff]  ;;  %v14236_v45 = vld [vmem:[#allocation3 + $0x48] sm:$0xf] }
 0x413   : > { %15626 = vst [vmem:[#allocation19_spill] sm:$0xff] %v14203_v14  ;;  %v8151_v14 = vunpack.c.l.b16 %v8050_v42  ;;  %v15522_v15 = vrot.slane %v14210_v46, 5  ;;  %v11437_v42 = vld [vmem:[#allocation9 + $0x1c8] sm:$0xff]  ;;  %v15630_v52 = vrot.slane %v14011_v44, 5  ;;  %v15634_v47 = vrot.slane %v14153_v8, 9 }
 0x414   : > { %v14214_v61 = vpop.f32.mrf.mxu1  ;;  %8258 = vmatpush.bf16.msra.mxu2 %v11406_v51  ;;  %v14223_v3 = vpack.c.b16 %v9565_v24, %v9564_v53  ;;  %v6765_v22 = vpack.c.b16 %v6748_v32, %v6747_v6  ;;  %v8747_v24 = vshll.u32 %v14145_v20, 16  ;;  %v7428_v57 = vrot.slane %v7427_v31, 4 }
 0x415   : > { %v6489_v10 = vpop.f32.mrf.mxu2  ;;  %v8016_v0 = vrot.slane %v15630_v52, 4  ;;  %v14231_v54 = vpack.c.b16 %v8152_v12, %v8151_v14  ;;  %v6697_v12 = vrot.slane %v13992_v21, 5  ;;  %v14248_v14 = vrot.slane %v8738_v16, 4  ;;  %v6557_v21 = vld [vmem:[#allocation3 + $0xb4] sm:$0xe]  ;;  %8574 = vmatpush.bf16.msra.mxu3 %v11429_v25 }
 0x416   : > { %v6490_v28 = vadd.f32 %v6489_v10, %v13978_v38  ;;  %v6867_v62 = vpop.f32.mrf.mxu3  ;;  %15628 = vst [vmem:[#allocation36_spill] sm:$0xff] %v14223_v3  ;;  %v11405_v38 = vld [vmem:[#allocation9 + $0x148] sm:$0xff]  ;;  %v15632_v10 = vor.u32 %v14157_v2, %v14155_v13  ;;  %v8751_v13 = vshrl.u32 %v14145_v20, 16  ;;  %v11386_v2 = vld [vmem:[#allocation3 + $0xb4] sm:$0xff]  ;;  %v7432_v32 = vrot.slane %v7430_v5, 5  ;;  %9256 = vmatpush.bf16.msra.mxu0 %v11437_v42 }
 0x417   : > { %7850 = vmatmul.bf16.gmra.mxu1 %v7750_v29  ;;  %15631 = vst [vmem:[#allocation21_spill] sm:$0xff] %v14231_v54  ;;  %v15633_v29 = vmov %v15630_v52  ;;  %v14251_v44 = vrot.slane %v8741_v1, 5  ;;  %v9446_v8 = vrot.slane %v15522_v15, 4  ;;  %v7435_v16 = vshrl.u32 %v14236_v45, 16  ;;  %v9372_v1 = vld [vmem:[#allocation3 + $0x24] sm:$0xe] }
 0x418   : > { %v14226_v43 = vadd.f32 %v6867_v62, %v6490_v28  ;;  %v7418_v51 = vrot.slane %v15632_v10, 4  ;;  %v14244_v53 = vsel %vm12391_vm13, %v15634_v47, %v15633_v29  ;;  %8259 = vmatpush.bf16.msra.mxu2 %v11405_v38  ;;  %v9447_v28 = vrot.slane %v14221_v39, 5  ;;  %v11404_v38 = vld [vmem:[#allocation9 + $0x140] sm:$0xff] }
 0x419   : > { %v7438_v20 = vshll.u32 %v14236_v45, 16  ;;  %v14263_v5 = vsel %vm12391_vm13, %v8016_v0, %v8017_v60  ;;  %v7444_v6 = vshll.u32 %v14163_v35, 16  ;;  %v11428_v52 = vld [vmem:[#allocation9 + $0x180] sm:$0xff]  ;;  %v14269_v10 = vrot.slane %v8747_v24, 5 }
 0x41a   : > { %15629 = vst [vmem:[#allocation20_spill] sm:$0xff] %v14226_v43  ;;  %6531 = vmatmul.bf16.gmra.mxu2 %v11346_v18  ;;  %v7423_v62 = vsel %vm12014_vm2, %v7418_v51, %v14192_v7  ;;  %v7448_v7 = vshrl.u32 %v14163_v35, 16  ;;  %v9448_v25 = vsel %vm12391_vm13, %v9446_v8, %v9447_v28  ;;  %v14273_v42 = vpop.f32.mrf.mxu0  ;;  %v7433_v51 = vsel %vm12014_vm2, %v7428_v57, %v7432_v32  ;;  %v14284_v8 = vld [vmem:[#allocation3 + $0x58] sm:$0xf]  ;;  %v14286_v28 = vld [vmem:[#allocation3 + $0x34] sm:$0xf] }
 0x41b   : > { %6909 = vmatmul.bf16.gmra.mxu3 %v6765_v22  ;;  %v11436_v22 = vld [vmem:[#allocation9 + $0x1c0] sm:$0xff]  ;;  %15635 = vst [vmem:[#allocation22_spill] sm:$0xff] %v14273_v42  ;;  %v6699_v45 = vrot.slane %v6697_v12, 4  ;;  %v14278_v29 = vrot.slane %v8751_v13, 4  ;;  %v7723_v35 = vunpack.c.l.b16 %v7423_v62  ;;  %v8141_v47 = vunpack.c.l.b16 %v14244_v53 }
 0x41c   : > { %v14265_v31 = vpop.f32.mrf.mxu1  ;;  %8260 = vmatpush.bf16.msra.mxu2 %v11404_v38  ;;  %v8142_v24 = vunpack.c.l.b16 %v14263_v5  ;;  %v10821_v57 = vrot.slane %v6557_v21, 9  ;;  %v6700_v13 = vrot.slane %v13996_v63, 5  ;;  %8575 = vmatpush.bf16.msra.mxu3 %v11428_v52  ;;  %v14291_v32 = vld [vmem:[#allocation3 + $0x5c] sm:$0x1]  ;;  %v11159_v53 = vrot.slane %v9372_v1, 9 }
 0x41d   : > { %7223 = vmatmul.bf16.gmra.mxu0 %v11386_v2  ;;  %v6492_v18 = vpop.f32.mrf.mxu2  ;;  %v7724_v62 = vunpack.c.l.b16 %v7433_v51  ;;  %v14293_v5 = vrot.slane %v7444_v6, 5  ;;  %v7450_v38 = vrot.slane %v7448_v7, 4  ;;  %v8056_v2 = vrot.slane %v14284_v8, 5 }
 0x41e   : > { %v6493_v0 = vadd.f32 %v6492_v18, %v13998_v17  ;;  %v6870_v60 = vpop.f32.mrf.mxu3  ;;  %v7954_v17 = vld [vmem:[#allocation3 + $0x54] sm:$0xe]  ;;  %9257 = vmatpush.bf16.msra.mxu0 %v11436_v22  ;;  %v6698_v15 = vsel %vm12391_vm13, %v10821_v57, %v6697_v12  ;;  %v15637_v63 = vrot.slane %v14210_v46, 5  ;;  %v8059_v1 = vrot.slane %v14291_v32, 5 }
 0x41f   : > { %v10988_v21 = vrot.slane %v7954_v17, 9  ;;  %v8058_v22 = vrot.slane %v8056_v2, 4  ;;  %v9567_v6 = vunpack.c.l.b16 %v9448_v25  ;;  %v9451_v7 = vrot.slane %v14286_v28, 5  ;;  %v9373_v17 = vld [vmem:[#allocation3 + $0x30] sm:$0xe] }
 0x420   : > { %v14288_v18 = vadd.f32 %v6870_v60, %v6493_v0  ;;  %v6701_v0 = vsel %vm12391_vm13, %v6699_v45, %v6700_v13  ;;  %v9445_v52 = vsel %vm12391_vm13, %v11159_v53, %v15637_v63  ;;  %v7437_v60 = vrot.slane %v7435_v16, 4 }
 0x421   : > { %v7440_v51 = vrot.slane %v7438_v20, 5  ;;  %v8754_v12 = vor.u32 %v14278_v29, %v14269_v10  ;;  %v8057_v45 = vsel %vm12391_vm13, %v10988_v21, %v8056_v2  ;;  %v7751_v13 = vpack.c.b16 %v7724_v62, %v7723_v35  ;;  %v14316_v29 = vld [vmem:[#allocation3 + $0x38] sm:$0x1] }
 0x422   : > { %15636 = vst [vmem:[#allocation37_spill] sm:$0xff] %v14288_v18  ;;  %v6750_v53 = vunpack.c.l.b16 %v6701_v0  ;;  %v8060_v63 = vsel %vm12391_vm13, %v8058_v22, %v8059_v1  ;;  %v9566_v25 = vunpack.c.l.b16 %v9445_v52  ;;  %v6749_v20 = vunpack.c.l.b16 %v6698_v15  ;;  %v14320_v62 = vpop.f32.mrf.mxu0  ;;  %v11347_v52 = vld [vmem:[#allocation3 + $0xb4] sm:$0xff] }
 0x423   : > { %v7451_v18 = vor.u32 %v7450_v38, %v14293_v5  ;;  %v8154_v43 = vunpack.c.l.b16 %v8060_v63  ;;  %v8153_v2 = vunpack.c.l.b16 %v8057_v45  ;;  %v11160_v54 = vrot.slane %v9373_v17, 9  ;;  %15639 = vst [vmem:[#allocation39_spill] sm:$0xff] %v14320_v62  ;;  %v11448_v15 = vld [vmem:[#allocation9 + $0x220] sm:$0xff]  ;;  %v8692_v38 = vld [vmem:[#allocation3 + $0x24] sm:$0xf] }
 0x424   : > { %v14310_v57 = vpop.f32.mrf.mxu1  ;;  %v14318_v21 = vpack.c.b16 %v9567_v6, %v9566_v25  ;;  %v9453_v35 = vrot.slane %v9451_v7, 4  ;;  %v7441_v22 = vor.u32 %v7440_v51, %v7437_v60  ;;  %v6766_v1 = vpack.c.b16 %v6750_v53, %v6749_v20  ;;  %9679 = vmatpush.bf16.msra.mxu1 %v11448_v15  ;;  %v11387_v60 = vld [vmem:[#allocation3 + $0xc0] sm:$0xff]  ;;  %v7284_v15 = vld [vmem:[#allocation3 + $0x54] sm:$0xf] }
 0x425   : > { %v6494_v3 = vpop.f32.mrf.mxu2  ;;  %v14326_v63 = vpack.c.b16 %v8154_v43, %v8153_v2  ;;  %v9452_v6 = vsel %vm12391_vm13, %v11160_v54, %v9451_v7  ;;  %v9454_v45 = vrot.slane %v14316_v29, 5  ;;  %v7452_v17 = vrot.slane %v7451_v18, 4  ;;  %v14336_v25 = vld [vmem:[#allocation3 + $0x40] sm:$0xf] }
 0x426   : > { %v6495_v42 = vadd.f32 %v6494_v3, %v14013_v40  ;;  %v6872_v16 = vpop.f32.mrf.mxu3  ;;  %15638 = vst [vmem:[#allocation38_spill] sm:$0xff] %v14318_v21  ;;  %v7454_v3 = vshll.u32 %v14189_v55, 16  ;;  %v8757_v40 = vshll.u32 %v14179_v23, 16  ;;  %v8755_v55 = vrot.slane %v8754_v12, 4 }
 0x427   : > { %7855 = vmatmul.bf16.gmra.mxu1 %v7751_v13  ;;  %v8762_v51 = vshrl.u32 %v8692_v38, 16  ;;  %v8765_v23 = vshll.u32 %v8692_v38, 16  ;;  %v9455_v13 = vsel %vm12391_vm13, %v9453_v35, %v9454_v45  ;;  %v8771_v53 = vshll.u32 %v14210_v46, 16 }
 0x428   : > { %v14322_v0 = vadd.f32 %v6872_v16, %v6495_v42  ;;  %v14331_v42 = vpack.c.b16 %v8142_v24, %v8141_v47  ;;  %v7456_v43 = vrot.slane %v7454_v3, 5  ;;  %v9568_v54 = vunpack.c.l.b16 %v9452_v6 }
 0x429   : > { %v9569_v7 = vunpack.c.l.b16 %v9455_v13  ;;  %v7442_v24 = vrot.slane %v7441_v22, 4  ;;  %v15641_v18 = vor.u32 %v14251_v44, %v14248_v14  ;;  %v8759_v20 = vrot.slane %v8757_v40, 5  ;;  %v14356_v44 = vld [vmem:[#allocation3 + $0x64] sm:$0xf] }
 0x42a   : > { %15640 = vst [vmem:[#allocation40_spill] sm:$0xff] %v14322_v0  ;;  %6536 = vmatmul.bf16.gmra.mxu2 %v11347_v52  ;;  %v8775_v2 = vshrl.u32 %v14210_v46, 16  ;;  %v7457_v3 = vsel %vm12014_vm2, %v7452_v17, %v7456_v43  ;;  %v7468_v38 = vshll.u32 %v14284_v8, 16  ;;  %v7472_v46 = vshrl.u32 %v14284_v8, 16 }
 0x42b   : > { %6914 = vmatmul.bf16.gmra.mxu3 %v6766_v1  ;;  %v8745_v12 = vrot.slane %v15641_v18, 4  ;;  %v14348_v1 = vpack.c.b16 %v9569_v7, %v9568_v54  ;;  %v7447_v22 = vsel %vm12014_vm2, %v7442_v24, %v14293_v5  ;;  %v8760_v14 = vsel %vm12014_vm2, %v8755_v55, %v8759_v20  ;;  %v14363_v5 = vld [vmem:[#allocation3 + $0x68] sm:$0x1]  ;;  %v14366_v7 = vpop.f32.mrf.mxu0  ;;  %v14371_v18 = vld [vmem:[#allocation3 + $0x44] sm:$0x1] }
 0x42c   : > { %v14338_v16 = vpop.f32.mrf.mxu1  ;;  %v9458_v40 = vrot.slane %v14336_v25, 5  ;;  %v8764_v45 = vrot.slane %v8762_v51, 4  ;;  %v8767_v17 = vrot.slane %v8765_v23, 5  ;;  %v7726_v13 = vunpack.c.l.b16 %v7457_v3  ;;  %15644 = vst [vmem:[#allocation43_spill] sm:$0xff] %v14366_v7 }
 0x42d   : > { %7228 = vmatmul.bf16.gmra.mxu0 %v11387_v60  ;;  %v6497_v47 = vpop.f32.mrf.mxu2  ;;  %15642 = vst [vmem:[#allocation41_spill] sm:$0xff] %v14348_v1  ;;  %v14361_v60 = vrot.slane %v8771_v53, 5  ;;  %v7459_v43 = vshrl.u32 %v7284_v15, 16  ;;  %v8777_v54 = vrot.slane %v8775_v2, 4  ;;  %v8063_v55 = vrot.slane %v14356_v44, 5 }
 0x42e   : > { %v6498_v35 = vadd.f32 %v6497_v47, %v14026_v50  ;;  %v6875_v52 = vpop.f32.mrf.mxu3  ;;  %v7955_v50 = vld [vmem:[#allocation3 + $0x60] sm:$0xe]  ;;  %v7725_v8 = vunpack.c.l.b16 %v7447_v22  ;;  %v8750_v47 = vsel %vm12014_vm2, %v8745_v12, %v14269_v10  ;;  %v7462_v24 = vshll.u32 %v7284_v15, 16  ;;  %v9374_v2 = vld [vmem:[#allocation3 + $0x3c] sm:$0xe] }
 0x42f   : > { %v10989_v51 = vrot.slane %v7955_v50, 9  ;;  %v14373_v23 = vrot.slane %v7468_v38, 5  ;;  %v7474_v53 = vrot.slane %v7472_v46, 4  ;;  %v8065_v20 = vrot.slane %v8063_v55, 4 }
 0x430   : > { %v14359_v6 = vadd.f32 %v6875_v52, %v6498_v35  ;;  %v9460_v35 = vrot.slane %v9458_v40, 4  ;;  %v9139_v52 = vunpack.c.l.b16 %v8760_v14  ;;  %v8768_v3 = vor.u32 %v8767_v17, %v8764_v45 }
 0x431   : > { %v8064_v1 = vsel %vm12391_vm13, %v10989_v51, %v8063_v55  ;;  %v8066_v22 = vrot.slane %v14363_v5, 5  ;;  %v7752_v10 = vpack.c.b16 %v7726_v13, %v7725_v8  ;;  %v7461_v15 = vrot.slane %v7459_v43, 4  ;;  %v8695_v55 = vld [vmem:[#allocation3 + $0x30] sm:$0xf] }
 0x432   : > { %15643 = vst [vmem:[#allocation42_spill] sm:$0xff] %v14359_v6  ;;  %v8778_v50 = vor.u32 %v8777_v54, %v14361_v60  ;;  %v9461_v38 = vrot.slane %v14371_v18, 5  ;;  %v7464_v6 = vrot.slane %v7462_v24, 5  ;;  %v11161_v45 = vrot.slane %v9374_v2, 9  ;;  %v11412_v24 = vld [vmem:[#allocation3 + $0x18] sm:$0xff] }
 0x433   : > { %v8067_v14 = vsel %vm12391_vm13, %v8065_v20, %v8066_v22  ;;  %v7475_v17 = vor.u32 %v7474_v53, %v14373_v23  ;;  %v8155_v51 = vunpack.c.l.b16 %v8064_v1  ;;  %v9138_v54 = vunpack.c.l.b16 %v8750_v47 }
 0x434   : > { %v14378_v21 = vpop.f32.mrf.mxu1  ;;  %v8156_v62 = vunpack.c.l.b16 %v8067_v14  ;;  %v9462_v13 = vsel %vm12391_vm13, %v9460_v35, %v9461_v38  ;;  %v9459_v8 = vsel %vm12391_vm13, %v11161_v45, %v9458_v40  ;;  %v7478_v20 = vshll.u32 %v14291_v32, 16 }
 0x435   : > { %v6499_v12 = vpop.f32.mrf.mxu2  ;;  %v9170_v1 = vpack.c.b16 %v9139_v52, %v9138_v54  ;;  %v7465_v53 = vor.u32 %v7464_v6, %v7461_v15  ;;  %v8779_v22 = vrot.slane %v8778_v50, 4  ;;  %v8786_v35 = vshrl.u32 %v8695_v55, 16 }
 0x436   : > { %v6500_v46 = vadd.f32 %v6499_v12, %v14038_v48  ;;  %v6877_v7 = vpop.f32.mrf.mxu3  ;;  %v8781_v48 = vshll.u32 %v14221_v39, 16  ;;  %v14394_v2 = vpack.c.b16 %v8156_v62, %v8155_v51  ;;  %v9570_v47 = vunpack.c.l.b16 %v9459_v8  ;;  %v14397_v39 = vpop.f32.mrf.mxu0  ;;  %v14401_v62 = vld [vmem:[#allocation3 + $0x4c] sm:$0xf] }
 0x437   : > { %7860 = vmatmul.bf16.gmra.mxu1 %v7752_v10  ;;  %v8769_v10 = vrot.slane %v8768_v3, 4  ;;  %v9571_v12 = vunpack.c.l.b16 %v9462_v13  ;;  %15646 = vst [vmem:[#allocation45_spill] sm:$0xff] %v14397_v39  ;;  %v8789_v40 = vshll.u32 %v8695_v55, 16  ;;  %v8799_v32 = vshrl.u32 %v14286_v28, 16 }
 0x438   : > { %v14388_v43 = vadd.f32 %v6877_v7, %v6500_v46  ;;  %v7476_v7 = vrot.slane %v7475_v17, 4  ;;  %v8783_v38 = vrot.slane %v8781_v48, 5  ;;  %v8795_v46 = vshll.u32 %v14286_v28, 16  ;;  %v7287_v17 = vld [vmem:[#allocation3 + $0x60] sm:$0xf] }
 0x439   : > { %v7480_v52 = vrot.slane %v7478_v20, 5  ;;  %v8774_v3 = vsel %vm12014_vm2, %v8769_v10, %v14361_v60  ;;  %v14408_v15 = vpack.c.b16 %v9571_v12, %v9570_v47  ;;  %v7466_v45 = vrot.slane %v7465_v53, 4  ;;  %v14417_v48 = vld [vmem:[#allocation3 + $0x70] sm:$0xf]  ;;  %v14429_v47 = vld [vmem:[#allocation3 + $0x74] sm:$0x1] }
 0x43a   : > { %15645 = vst [vmem:[#allocation44_spill] sm:$0xff] %v14388_v43  ;;  %8261 = vmatmul.bf16.vlgmr.msra.gmra.mxu2 %v14331_v42  ;;  %v8784_v28 = vsel %vm12014_vm2, %v8779_v22, %v8783_v38  ;;  %v8788_v55 = vrot.slane %v8786_v35, 4  ;;  %v7492_v13 = vshll.u32 %v14356_v44, 16  ;;  %v7496_v54 = vshrl.u32 %v14356_v44, 16  ;;  %v7956_v35 = vld [vmem:[#allocation3 + $0x6c] sm:$0xe] }
 0x43b   : > { %8576 = vmatmul.bf16.vlgmr.msra.gmra.mxu3 %v11412_v24  ;;  %15647 = vst [vmem:[#allocation46_spill] sm:$0xff] %v14408_v15  ;;  %v7481_v51 = vsel %vm12014_vm2, %v7476_v7, %v7480_v52  ;;  %v9465_v60 = vrot.slane %v14401_v62, 5  ;;  %v14422_v24 = vrot.slane %v8795_v46, 5  ;;  %v8801_v20 = vrot.slane %v8799_v32, 4  ;;  %v14431_v12 = vld [vmem:[#allocation3 + $0x50] sm:$0x1] }
 0x43c   : > { %v14403_v42 = vpop.f32.mrf.mxu1  ;;  %v14427_v53 = vunpack.c.l.b16 %v8774_v3  ;;  %v7483_v22 = vshrl.u32 %v7287_v17, 16  ;;  %v7728_v7 = vunpack.c.l.b16 %v7481_v51  ;;  %v9141_v44 = vunpack.c.l.b16 %v8784_v28 }
 0x43d   : > { %9258 = vmatmul.bf16.vlgmr.msra.gmra.mxu0 %v9170_v1  ;;  %v6502_v6 = vpop.f32.mrf.mxu2  ;;  %v7471_v1 = vsel %vm12014_vm2, %v7466_v45, %v14373_v23  ;;  %v7486_v10 = vshll.u32 %v7287_v17, 16  ;;  %v8070_v38 = vrot.slane %v14417_v48, 5  ;;  %v7498_v46 = vrot.slane %v7496_v54, 4 }
 0x43e   : > { %v6503_v50 = vadd.f32 %v6502_v6, %v14056_v26  ;;  %v6880_v14 = vpop.f32.mrf.mxu3  ;;  %v8791_v26 = vrot.slane %v8789_v40, 5  ;;  %v14434_v40 = vrot.slane %v7492_v13, 5  ;;  %v8805_v32 = vshll.u32 %v14316_v29, 16 }
 0x43f   : > { %v9467_v6 = vrot.slane %v9465_v60, 4  ;;  %v7727_v23 = vunpack.c.l.b16 %v7471_v1  ;;  %v8802_v3 = vor.u32 %v8801_v20, %v14422_v24  ;;  %v7485_v17 = vrot.slane %v7483_v22, 4 }
 0x440   : > { %v14420_v8 = vadd.f32 %v6880_v14, %v6503_v50  ;;  %v8792_v52 = vor.u32 %v8791_v26, %v8788_v55  ;;  %v10990_v50 = vrot.slane %v7956_v35, 9  ;;  %v9375_v14 = vld [vmem:[#allocation3 + $0x48] sm:$0xe]  ;;  %v8072_v51 = vrot.slane %v8070_v38, 4  ;;  %v14445_v26 = vld [vmem:[#allocation3 + $0x58] sm:$0xf] }
 0x441   : > { %v8073_v15 = vrot.slane %v14429_v47, 5  ;;  %v9468_v13 = vrot.slane %v14431_v12, 5  ;;  %v7753_v54 = vpack.c.b16 %v7728_v7, %v7727_v23  ;;  %v7488_v55 = vrot.slane %v7486_v10, 5  ;;  %v11447_v23 = vld [vmem:[#allocation9 + $0x218] sm:$0xff] }
 0x442   : > { %15648 = vst [vmem:[#allocation47_spill] sm:$0xff] %v14420_v8  ;;  %v14442_v8 = vpop.f32.mrf.mxu0  ;;  %v8071_v20 = vsel %vm12391_vm13, %v10990_v50, %v8070_v38  ;;  %v7499_v35 = vor.u32 %v7498_v46, %v14434_v40  ;;  %v11162_v39 = vrot.slane %v9375_v14, 9  ;;  %v8793_v10 = vrot.slane %v8792_v52, 4  ;;  %v8698_v38 = vld [vmem:[#allocation3 + $0x3c] sm:$0xf]  ;;  %9680 = vmatpush.bf16.msra.mxu1 %v11447_v23 }
 0x443   : > { %15649 = vst [vmem:[#allocation48_spill] sm:$0xff] %v14442_v8  ;;  %v8074_v22 = vsel %vm12391_vm13, %v8072_v51, %v8073_v15  ;;  %v9469_v43 = vsel %vm12391_vm13, %v9467_v6, %v9468_v13  ;;  %v11413_v8 = vld [vmem:[#allocation3 + $0x24] sm:$0xff]  ;;  %v8157_v50 = vunpack.c.l.b16 %v8071_v20  ;;  %v15523_v14 = vrot.slane %v14445_v26, 5  ;;  %v14470_v13 = vld [vmem:[#allocation3 + $0x5c] sm:$0x1] }
 0x444   : > { %v14438_v45 = vpop.f32.mrf.mxu1  ;;  %v8158_v46 = vunpack.c.l.b16 %v8074_v22  ;;  %v9466_v15 = vsel %vm12391_vm13, %v11162_v39, %v9465_v60  ;;  %v9171_v6 = vpack.c.b16 %v9141_v44, %v14427_v53  ;;  %v14466_v52 = vrot.slane %v8802_v3, 4  ;;  %v7290_v3 = vld [vmem:[#allocation3 + $0x6c] sm:$0xf] }
 0x445   : > { %v6504_v28 = vpop.f32.mrf.mxu2  ;;  %v14468_v51 = vrot.slane %v8805_v32, 5  ;;  %v7500_v39 = vrot.slane %v7499_v35, 4  ;;  %v8823_v60 = vshrl.u32 %v14336_v25, 16  ;;  %v8813_v53 = vshll.u32 %v8698_v38, 16 }
 0x446   : > { %v6505_v29 = vadd.f32 %v6504_v28, %v14069_v56  ;;  %v6882_v1 = vpop.f32.mrf.mxu3  ;;  %v7502_v56 = vshll.u32 %v14363_v5, 16  ;;  %v8819_v28 = vshll.u32 %v14336_v25, 16  ;;  %v8798_v5 = vsel %vm12014_vm2, %v8793_v10, %v14422_v24 }
 0x447   : > { %7865 = vmatmul.bf16.gmra.mxu1 %v7753_v54  ;;  %v7489_v54 = vor.u32 %v7488_v55, %v7485_v17  ;;  %v9572_v44 = vunpack.c.l.b16 %v9466_v15  ;;  %v9475_v17 = vrot.slane %v14470_v13, 5  ;;  %v7516_v35 = vshll.u32 %v14417_v48, 16 }
 0x448   : > { %v14454_v7 = vadd.f32 %v6882_v1, %v6505_v29  ;;  %v14473_v29 = vpack.c.b16 %v8158_v46, %v8157_v50  ;;  %v9573_v1 = vunpack.c.l.b16 %v9469_v43  ;;  %v7504_v32 = vrot.slane %v7502_v56, 5 }
 0x449   : > { %v14477_v22 = vrot.slane %v8819_v28, 5  ;;  %v7520_v43 = vshrl.u32 %v14417_v48, 16  ;;  %v7490_v23 = vrot.slane %v7489_v54, 4  ;;  %v8825_v28 = vrot.slane %v8823_v60, 4 }
 0x44a   : > { %15650 = vst [vmem:[#allocation49_spill] sm:$0xff] %v14454_v7  ;;  %8266 = vmatmul.bf16.gmra.mxu2 %v14074_v37  ;;  %v8810_v37 = vshrl.u32 %v8698_v38, 16  ;;  %v14485_v10 = vpack.c.b16 %v9573_v1, %v9572_v44  ;;  %v7505_v56 = vsel %vm12014_vm2, %v7500_v39, %v7504_v32  ;;  %v14489_v38 = vld [vmem:[#allocation3 + $0x7c] sm:$0xf]  ;;  %v14493_v46 = vpop.f32.mrf.mxu0  ;;  %v9142_v15 = vunpack.c.l.b16 %v8798_v5  ;;  %v7957_v44 = vld [vmem:[#allocation3 + $0x78] sm:$0xe] }
 0x44b   : > { %8581 = vmatmul.bf16.gmra.mxu3 %v11413_v8  ;;  %v9474_v8 = vrot.slane %v15523_v14, 4  ;;  %15652 = vst [vmem:[#allocation51_spill] sm:$0xff] %v14493_v46  ;;  %v7495_v48 = vsel %vm12014_vm2, %v7490_v23, %v14434_v40  ;;  %v8808_v54 = vsel %vm12014_vm2, %v14466_v52, %v14468_v51  ;;  %v7510_v39 = vshll.u32 %v7290_v3, 16  ;;  %v9376_v1 = vld [vmem:[#allocation3 + $0x54] sm:$0xe] }
 0x44c   : > { %v14475_v20 = vpop.f32.mrf.mxu1  ;;  %15651 = vst [vmem:[#allocation50_spill] sm:$0xff] %v14485_v10  ;;  %v8829_v60 = vshll.u32 %v14371_v18, 16  ;;  %v7730_v32 = vunpack.c.l.b16 %v7505_v56  ;;  %v7522_v5 = vrot.slane %v7520_v43, 4  ;;  %v8815_v40 = vrot.slane %v8813_v53, 5 }
 0x44d   : > { %9263 = vmatmul.bf16.gmra.mxu0 %v9171_v6  ;;  %v6507_v24 = vpop.f32.mrf.mxu2  ;;  %v9476_v50 = vsel %vm12391_vm13, %v9474_v8, %v9475_v17  ;;  %v7507_v6 = vshrl.u32 %v7290_v3, 16  ;;  %v14505_v8 = vrot.slane %v7516_v35, 5  ;;  %v14507_v17 = vld [vmem:[#allocation3 + $0x80] sm:$0x1]  ;;  %v8826_v23 = vor.u32 %v8825_v28, %v14477_v22 }
 0x44e   : > { %v6508_v25 = vadd.f32 %v6507_v24, %v14090_v36  ;;  %v6885_v55 = vpop.f32.mrf.mxu3  ;;  %v8701_v24 = vld [vmem:[#allocation3 + $0x48] sm:$0xf]  ;;  %v7729_v10 = vunpack.c.l.b16 %v7495_v48  ;;  %v10991_v3 = vrot.slane %v7957_v44, 9  ;;  %v7512_v56 = vrot.slane %v7510_v39, 5 }
 0x44f   : > { %v8834_v14 = vshrl.u32 %v8701_v24, 16  ;;  %v7509_v52 = vrot.slane %v7507_v6, 4  ;;  %v8837_v51 = vshll.u32 %v8701_v24, 16  ;;  %v8080_v43 = vrot.slane %v14507_v17, 5 }
 0x450   : > { %v14495_v36 = vadd.f32 %v6885_v55, %v6508_v25  ;;  %v8077_v25 = vrot.slane %v14489_v38, 5  ;;  %v8812_v55 = vrot.slane %v8810_v37, 4  ;;  %v11163_v46 = vrot.slane %v9376_v1, 9 }
 0x451   : > { %v7754_v7 = vpack.c.b16 %v7730_v32, %v7729_v10  ;;  %v7523_v53 = vor.u32 %v7522_v5, %v14505_v8  ;;  %v9143_v6 = vunpack.c.l.b16 %v8808_v54  ;;  %v15654_v39 = vrot.slane %v14445_v26, 5  ;;  %v11414_v32 = vld [vmem:[#allocation3 + $0x30] sm:$0xff] }
 0x452   : > { %15653 = vst [vmem:[#allocation52_spill] sm:$0xff] %v14495_v36  ;;  %v8079_v35 = vrot.slane %v8077_v25, 4  ;;  %v8078_v28 = vsel %vm12391_vm13, %v10991_v3, %v8077_v25  ;;  %v8816_v24 = vor.u32 %v8815_v40, %v8812_v55  ;;  %v9575_v1 = vunpack.c.l.b16 %v9476_v50  ;;  %v14527_v40 = vpop.f32.mrf.mxu0 }
 0x453   : > { %v9473_v44 = vsel %vm12391_vm13, %v11163_v46, %v15654_v39  ;;  %v8836_v5 = vrot.slane %v8834_v14, 4  ;;  %v8839_v25 = vrot.slane %v8837_v51, 5  ;;  %v8159_v54 = vunpack.c.l.b16 %v8078_v28  ;;  %v14548_v39 = vld [vmem:[#allocation3 + $0x88] sm:$0xf] }
 0x454   : > { %v14511_v18 = vpop.f32.mrf.mxu1  ;;  %v8081_v48 = vsel %vm12391_vm13, %v8079_v35, %v8080_v43  ;;  %v7513_v3 = vor.u32 %v7512_v56, %v7509_v52  ;;  %v7524_v35 = vrot.slane %v7523_v53, 4  ;;  %v9574_v43 = vunpack.c.l.b16 %v9473_v44 }
 0x455   : > { %v6509_v36 = vpop.f32.mrf.mxu2  ;;  %v8160_v55 = vunpack.c.l.b16 %v8081_v48  ;;  %v8831_v46 = vrot.slane %v8829_v60, 5  ;;  %v8840_v51 = vor.u32 %v8839_v25, %v8836_v5  ;;  %v7540_v48 = vshll.u32 %v14489_v38, 16  ;;  %v7958_v25 = vld [vmem:[#allocation3 + $0x84] sm:$0xe] }
 0x456   : > { %v6510_v0 = vadd.f32 %v6509_v36, %v14107_v59  ;;  %v6887_v37 = vpop.f32.mrf.mxu3  ;;  %v7526_v59 = vshll.u32 %v14429_v47, 16  ;;  %v8827_v36 = vrot.slane %v8826_v23, 4  ;;  %v14532_v50 = vpack.c.b16 %v9575_v1, %v9574_v43 }
 0x457   : > { %7870 = vmatmul.bf16.gmra.mxu1 %v7754_v7  ;;  %v9172_v7 = vpack.c.b16 %v9143_v6, %v9142_v15  ;;  %v8843_v15 = vshll.u32 %v14401_v62, 16  ;;  %v7514_v53 = vrot.slane %v7513_v3, 4  ;;  %v7293_v6 = vld [vmem:[#allocation3 + $0x78] sm:$0xf]  ;;  %v14561_v5 = vrot.slane %v8840_v51, 4 }
 0x458   : > { %v14524_v10 = vadd.f32 %v6887_v37, %v6510_v0  ;;  %v8817_v0 = vrot.slane %v8816_v24, 4  ;;  %v14530_v37 = vpack.c.b16 %v8160_v55, %v8159_v54  ;;  %v7528_v47 = vrot.slane %v7526_v59, 5  ;;  %15655 = vst [vmem:[#allocation53_spill] sm:$0xff] %v14532_v50  ;;  %v14565_v3 = vld [vmem:[#allocation3 + $0x8c] sm:$0x1] }
 0x459   : > { %v8832_v52 = vsel %vm12014_vm2, %v8827_v36, %v8831_v46  ;;  %v8847_v24 = vshrl.u32 %v14401_v62, 16  ;;  %v14557_v36 = vld [vmem:[#allocation3 + $0x64] sm:$0xf]  ;;  %v7531_v62 = vshrl.u32 %v7293_v6, 16  ;;  %v14563_v54 = vrot.slane %v8843_v15, 5 }
 0x45a   : > { %8271 = vmatmul.bf16.gmra.mxu2 %v14105_v11  ;;  %v8822_v11 = vsel %vm12014_vm2, %v8817_v0, %v14477_v22  ;;  %v7529_v28 = vsel %vm12014_vm2, %v7524_v35, %v7528_v47  ;;  %v7544_v22 = vshrl.u32 %v14489_v38, 16  ;;  %v14555_v59 = vunpack.c.l.b16 %v8832_v52  ;;  %v14571_v46 = vpop.f32.mrf.mxu0  ;;  %v8704_v52 = vld [vmem:[#allocation3 + $0x54] sm:$0xf] }
 0x45b   : > { %8586 = vmatmul.bf16.gmra.mxu3 %v11414_v32  ;;  %v7732_v1 = vunpack.c.l.b16 %v7529_v28  ;;  %v14559_v32 = vunpack.c.l.b16 %v8822_v11  ;;  %v7534_v38 = vshll.u32 %v7293_v6, 16  ;;  %v8849_v55 = vrot.slane %v8847_v24, 4  ;;  %v9377_v24 = vld [vmem:[#allocation3 + $0x60] sm:$0xe] }
 0x45c   : > { %v14534_v14 = vpop.f32.mrf.mxu1  ;;  %v8084_v35 = vrot.slane %v14548_v39, 5  ;;  %v14568_v43 = vrot.slane %v7540_v48, 5  ;;  %v9479_v0 = vrot.slane %v14557_v36, 5  ;;  %v7234_v47 = vadd.f32 %v13974_v9, %v13986_v49 }
 0x45d   : > { %9268 = vmatmul.bf16.gmra.mxu0 %v9172_v7  ;;  %v6512_v23 = vpop.f32.mrf.mxu2  ;;  %v7546_v7 = vrot.slane %v7544_v22, 4  ;;  %v8853_v11 = vshll.u32 %v14431_v12, 16  ;;  %v10992_v51 = vrot.slane %v7958_v25, 9  ;;  %v8087_v6 = vrot.slane %v14565_v3, 5 }
 0x45e   : > { %v6513_v60 = vadd.f32 %v6512_v23, %v14136_v58  ;;  %v6890_v56 = vpop.f32.mrf.mxu3  ;;  %v7519_v58 = vsel %vm12014_vm2, %v7514_v53, %v14505_v8  ;;  %v9173_v23 = vpack.c.b16 %v14555_v59, %v14559_v32  ;;  %v7533_v53 = vrot.slane %v7531_v62, 4 }
 0x45f   : > { %v7731_v8 = vunpack.c.l.b16 %v7519_v58  ;;  %v8086_v28 = vrot.slane %v8084_v35, 4  ;;  %v7536_v49 = vrot.slane %v7534_v38, 5  ;;  %v14582_v58 = vld [vmem:[#allocation3 + $0x68] sm:$0x1]  ;;  %v8085_v12 = vsel %vm12391_vm13, %v10992_v51, %v8084_v35 }
 0x460   : > { %v14550_v44 = vadd.f32 %v6890_v56, %v6513_v60  ;;  %v7547_v59 = vor.u32 %v7546_v7, %v14568_v43  ;;  %v9481_v62 = vrot.slane %v9479_v0, 4  ;;  %v11164_v38 = vrot.slane %v9377_v24, 9 }
 0x461   : > { %v7755_v60 = vpack.c.b16 %v7732_v1, %v7731_v8  ;;  %v8850_v1 = vor.u32 %v8849_v55, %v14563_v54  ;;  %v8088_v32 = vsel %vm12391_vm13, %v8086_v28, %v8087_v6  ;;  %v11446_v8 = vld [vmem:[#allocation9 + $0x210] sm:$0xff]  ;;  %v8161_v50 = vunpack.c.l.b16 %v8085_v12  ;;  %v14601_v6 = vld [vmem:[#allocation3 + $0x70] sm:$0xf] }
 0x462   : > { %v8162_v35 = vunpack.c.l.b16 %v8088_v32  ;;  %v9482_v7 = vrot.slane %v14582_v58, 5  ;;  %v7537_v55 = vor.u32 %v7536_v49, %v7533_v53  ;;  %v8846_v51 = vsel %vm12014_vm2, %v14561_v5, %v14563_v54  ;;  %9681 = vmatpush.bf16.msra.mxu1 %v11446_v8  ;;  %v7296_v8 = vld [vmem:[#allocation3 + $0x84] sm:$0xf] }
 0x463   : > { %v7548_v28 = vrot.slane %v7547_v59, 4  ;;  %v7235_v53 = vadd.f32 %v13990_v41, %v14002_v33  ;;  %v8867_v54 = vshll.u32 %v14445_v26, 16  ;;  %v8871_v49 = vshrl.u32 %v14445_v26, 16 }
 0x464   : > { %v7836_v15 = vpop.f32.mrf.mxu1  ;;  %v14603_v24 = vpack.c.b16 %v8162_v35, %v8161_v50  ;;  %v9378_v50 = vld [vmem:[#allocation3 + $0x6c] sm:$0xe]  ;;  %v7538_v33 = vrot.slane %v7537_v55, 4  ;;  %v7568_v26 = vshrl.u32 %v14548_v39, 16 }
 0x465   : > { %v6514_v56 = vpop.f32.mrf.mxu2  ;;  %v14579_v48 = vadd.f32 %v7836_v15, %v7234_v47  ;;  %v8861_v47 = vshll.u32 %v8704_v52, 16  ;;  %v11415_v15 = vld [vmem:[#allocation3 + $0x3c] sm:$0xff] }
 0x466   : > { %v6515_v22 = vadd.f32 %v6514_v56, %v14166_v27  ;;  %v6892_v9 = vpop.f32.mrf.mxu3  ;;  %v8858_v27 = vshrl.u32 %v8704_v52, 16  ;;  %v7550_v56 = vshll.u32 %v14507_v17, 16  ;;  %v9480_v52 = vsel %vm12391_vm13, %v11164_v38, %v9479_v0  ;;  %v14621_v38 = vld [vmem:[#allocation3 + $0x74] sm:$0x1] }
 0x467   : > { %7875 = vmatmul.bf16.gmra.mxu1 %v7755_v60  ;;  %v8855_v60 = vrot.slane %v8853_v11, 5  ;;  %v8851_v17 = vrot.slane %v8850_v1, 4  ;;  %v8863_v5 = vrot.slane %v8861_v47, 5  ;;  %v9576_v12 = vunpack.c.l.b16 %v9480_v52  ;;  %v14611_v1 = vpop.f32.mrf.mxu0 }
 0x468   : > { %v14590_v25 = vadd.f32 %v6892_v9, %v6515_v22  ;;  %v8860_v22 = vrot.slane %v8858_v27, 4  ;;  %v7552_v9 = vrot.slane %v7550_v56, 5  ;;  %15657 = vst [vmem:[#allocation55_spill] sm:$0xff] %v14611_v1  ;;  %v9486_v27 = vrot.slane %v14601_v6, 5 }
 0x469   : > { %v7564_v47 = vshll.u32 %v14548_v39, 16  ;;  %v7543_v55 = vsel %vm12014_vm2, %v7538_v33, %v14568_v43  ;;  %v7555_v52 = vshrl.u32 %v7296_v8, 16  ;;  %v8707_v33 = vld [vmem:[#allocation3 + $0x60] sm:$0xf] }
 0x46a   : > { %15656 = vst [vmem:[#allocation54_spill] sm:$0xff] %v14590_v25  ;;  %8276 = vmatmul.bf16.gmra.mxu2 %v14134_v4  ;;  %v9483_v4 = vsel %vm12391_vm13, %v9481_v62, %v9482_v7  ;;  %v8864_v35 = vor.u32 %v8863_v5, %v8860_v22  ;;  %v11165_v7 = vrot.slane %v9378_v50, 9  ;;  %v15660_v22 = vld [vmem:[#allocation23_spill] sm:$0xff]  ;;  %v7733_v43 = vunpack.c.l.b16 %v7543_v55 }
 0x46b   : > { %8591 = vmatmul.bf16.gmra.mxu3 %v11415_v15  ;;  %v9577_v59 = vunpack.c.l.b16 %v9483_v4  ;;  %v8873_v4 = vrot.slane %v8871_v49, 4  ;;  %v7236_v5 = vadd.f32 %v15660_v22, %v14022_v19 }
 0x46c   : > { %v7838_v11 = vpop.f32.mrf.mxu1 }
 0x46d   : > { %9273 = vmatmul.bf16.gmra.mxu0 %v9173_v23  ;;  %v6517_v0 = vpop.f32.mrf.mxu2  ;;  %v14613_v32 = vadd.f32 %v7838_v11, %v7235_v53  ;;  %v7553_v23 = vsel %vm12014_vm2, %v7548_v28, %v7552_v9  ;;  %v14623_v15 = vpack.c.b16 %v9577_v59, %v9576_v12  ;;  %v14632_v28 = vrot.slane %v8867_v54, 5  ;;  %v14641_v54 = vld [vmem:[#allocation3 + $0x7c] sm:$0xf] }
 0x46e   : > { %v6518_v62 = vadd.f32 %v6517_v0, %v14214_v61  ;;  %v6895_v41 = vpop.f32.mrf.mxu3  ;;  %v8856_v61 = vsel %vm12014_vm2, %v8851_v17, %v8855_v60  ;;  %v7734_v39 = vunpack.c.l.b16 %v7553_v23  ;;  %v9487_v53 = vsel %vm12391_vm13, %v11165_v7, %v9486_v27  ;;  %v9379_v23 = vld [vmem:[#allocation3 + $0x78] sm:$0xe] }
 0x46f   : > { %15658 = vst [vmem:[#allocation56_spill] sm:$0xff] %v14623_v15  ;;  %v9488_v11 = vrot.slane %v9486_v27, 4  ;;  %v9489_v0 = vrot.slane %v14621_v38, 5  ;;  %v9146_v9 = vunpack.c.l.b16 %v8846_v51  ;;  %v7558_v12 = vshll.u32 %v7296_v8, 16  ;;  %v14657_v22 = vpop.f32.mrf.mxu0 }
 0x470   : > { %v14625_v56 = vadd.f32 %v6895_v41, %v6518_v62  ;;  %v14637_v60 = vrot.slane %v7564_v47, 5  ;;  %v7570_v17 = vrot.slane %v7568_v26, 4  ;;  %v9147_v59 = vunpack.c.l.b16 %v8856_v61  ;;  %15662 = vst [vmem:[#allocation58_spill] sm:$0xff] %v14657_v22 }
 0x471   : > { %v9490_v49 = vsel %vm12391_vm13, %v9488_v11, %v9489_v0  ;;  %v14645_v41 = vrot.slane %v8864_v35, 4  ;;  %v8874_v51 = vor.u32 %v8873_v4, %v14632_v28  ;;  %v9578_v8 = vunpack.c.l.b16 %v9487_v53  ;;  %v14652_v0 = vld [vmem:[#allocation3 + $0x80] sm:$0x1] }
 0x472   : > { %15659 = vst [vmem:[#allocation57_spill] sm:$0xff] %v14625_v56  ;;  %v9579_v27 = vunpack.c.l.b16 %v9490_v49  ;;  %v7756_v19 = vpack.c.b16 %v7734_v39, %v7733_v43  ;;  %v7557_v7 = vrot.slane %v7555_v52, 4  ;;  %v7560_v55 = vrot.slane %v7558_v12, 5  ;;  %v11416_v43 = vld [vmem:[#allocation3 + $0x48] sm:$0xff] }
 0x473   : > { %v7571_v11 = vor.u32 %v7570_v17, %v14637_v60  ;;  %v9493_v4 = vrot.slane %v14641_v54, 5  ;;  %v7574_v39 = vshll.u32 %v14565_v3, 16  ;;  %v9174_v52 = vpack.c.b16 %v9147_v59, %v9146_v9 }
 0x474   : > { %v7841_v50 = vpop.f32.mrf.mxu1  ;;  %v14654_v35 = vpack.c.b16 %v9579_v27, %v9578_v8  ;;  %v8870_v12 = vsel %vm12014_vm2, %v14645_v41, %v14632_v28  ;;  %v8877_v17 = vshll.u32 %v14470_v13, 16  ;;  %v8885_v49 = vshll.u32 %v8707_v33, 16  ;;  %v15665_v13 = vld [vmem:[#allocation25_spill] sm:$0xff]  ;;  %v15666_v41 = vld [vmem:[#allocation24_spill] sm:$0xff] }
 0x475   : > { %v6519_v62 = vpop.f32.mrf.mxu2  ;;  %v14648_v47 = vadd.f32 %v7841_v50, %v7236_v5  ;;  %v8882_v5 = vshrl.u32 %v8707_v33, 16  ;;  %v15664_v50 = vld [vmem:[#allocation18_spill] sm:$0xff]  ;;  %v8891_v8 = vshll.u32 %v14557_v36, 16  ;;  %v9495_v27 = vrot.slane %v9493_v4, 4 }
 0x476   : > { %v6520_v26 = vadd.f32 %v6519_v62, %v14265_v31  ;;  %v6897_v61 = vpop.f32.mrf.mxu3  ;;  %15661 = vst [vmem:[#allocation23_spill] sm:$0xff] %v14654_v35  ;;  %v11166_v31 = vrot.slane %v9379_v23, 9  ;;  %v14668_v62 = vld [vmem:[#allocation3 + $0x94] sm:$0xf]  ;;  %v9496_v9 = vrot.slane %v14652_v0, 5  ;;  %v7561_v59 = vor.u32 %v7560_v55, %v7557_v7 }
 0x477   : > { %7880 = vmatmul.bf16.gmra.mxu1 %v7756_v19  ;;  %v7572_v23 = vrot.slane %v7571_v11, 4  ;;  %v8875_v19 = vrot.slane %v8874_v51, 4  ;;  %v8895_v28 = vshrl.u32 %v14557_v36, 16  ;;  %v7237_v33 = vadd.f32 %v15666_v41, %v15665_v13 }
 0x478   : > { %v14659_v53 = vadd.f32 %v6897_v61, %v6520_v26  ;;  %v9494_v3 = vsel %vm12391_vm13, %v11166_v31, %v9493_v4  ;;  %v7576_v26 = vrot.slane %v7574_v39, 5  ;;  %v8884_v61 = vrot.slane %v8882_v5, 4  ;;  %v7299_v4 = vld [vmem:[#allocation3 + $0x90] sm:$0xf] }
 0x479   : > { %v7588_v15 = vshll.u32 %v14668_v62, 16  ;;  %v7592_v7 = vshrl.u32 %v14668_v62, 16  ;;  %v9580_v55 = vunpack.c.l.b16 %v9494_v3  ;;  %v8887_v39 = vrot.slane %v8885_v49, 5 }
 0x47a   : > { %15663 = vst [vmem:[#allocation59_spill] sm:$0xff] %v14659_v53  ;;  %8281 = vmatmul.bf16.gmra.mxu2 %v15664_v50  ;;  %v9497_v50 = vsel %vm12391_vm13, %v9495_v27, %v9496_v9  ;;  %v14684_v5 = vrot.slane %v8891_v8, 5  ;;  %v7562_v13 = vrot.slane %v7561_v59, 4  ;;  %v8897_v27 = vrot.slane %v8895_v28, 4  ;;  %v9380_v59 = vld [vmem:[#allocation3 + $0x84] sm:$0xe] }
 0x47b   : > { %8596 = vmatmul.bf16.gmra.mxu3 %v11416_v43  ;;  %v9581_v51 = vunpack.c.l.b16 %v9497_v50  ;;  %v8879_v53 = vrot.slane %v8877_v17, 5  ;;  %v7579_v3 = vshrl.u32 %v7299_v4, 16  ;;  %v14692_v50 = vld [vmem:[#allocation3 + $0x88] sm:$0xf]  ;;  %v14697_v49 = vrot.slane %v7588_v15, 5  ;;  %v15670_v15 = vld [vmem:[#allocation26_spill] sm:$0xff] }
 0x47c   : > { %v7843_v35 = vpop.f32.mrf.mxu1  ;;  %v7594_v8 = vrot.slane %v7592_v7, 4  ;;  %v14703_v17 = vld [vmem:[#allocation3 + $0x8c] sm:$0x1] }
 0x47d   : > { %9278 = vmatmul.bf16.gmra.mxu0 %v9174_v52  ;;  %v6522_v31 = vpop.f32.mrf.mxu2  ;;  %v14681_v11 = vadd.f32 %v7843_v35, %v7237_v33  ;;  %v7577_v52 = vsel %vm12014_vm2, %v7572_v23, %v7576_v26  ;;  %v14688_v9 = vpack.c.b16 %v9581_v51, %v9580_v55  ;;  %v7582_v35 = vshll.u32 %v7299_v4, 16  ;;  %v14699_v33 = vpop.f32.mrf.mxu0  ;;  %v15671_v4 = vld [vmem:[#allocation27_spill] sm:$0xff] }
 0x47e   : > { %v6523_v36 = vadd.f32 %v6522_v31, %v14310_v57  ;;  %v6900_v43 = vpop.f32.mrf.mxu3  ;;  %v7567_v57 = vsel %vm12014_vm2, %v7562_v13, %v14637_v60  ;;  %15669 = vst [vmem:[#allocation24_spill] sm:$0xff] %v14699_v33  ;;  %v7736_v23 = vunpack.c.l.b16 %v7577_v52  ;;  %v8880_v28 = vsel %vm12014_vm2, %v8875_v19, %v8879_v53 }
 0x47f   : > { %15667 = vst [vmem:[#allocation18_spill] sm:$0xff] %v14688_v9  ;;  %v9148_v26 = vunpack.c.l.b16 %v8870_v12  ;;  %v8888_v31 = vor.u32 %v8887_v39, %v8884_v61  ;;  %v8898_v55 = vor.u32 %v8897_v27, %v14684_v5  ;;  %v8901_v51 = vshll.u32 %v14582_v58, 16  ;;  %v8710_v61 = vld [vmem:[#allocation3 + $0x6c] sm:$0xf] }
 0x480   : > { %v14690_v41 = vadd.f32 %v6900_v43, %v6523_v36  ;;  %v9500_v60 = vrot.slane %v14692_v50, 5  ;;  %v7238_v7 = vadd.f32 %v15671_v4, %v15670_v15  ;;  %v7735_v36 = vunpack.c.l.b16 %v7567_v57  ;;  %v14710_v43 = vld [vmem:[#allocation3 + $0x98] sm:$0x1] }
 0x481   : > { %v7581_v13 = vrot.slane %v7579_v3, 4  ;;  %v11167_v52 = vrot.slane %v9380_v59, 9  ;;  %v7584_v12 = vrot.slane %v7582_v35, 5  ;;  %v7595_v19 = vor.u32 %v7594_v8, %v14697_v49 }
 0x482   : > { %15668 = vst [vmem:[#allocation25_spill] sm:$0xff] %v14690_v41  ;;  %v9502_v39 = vrot.slane %v9500_v60, 4  ;;  %v9503_v27 = vrot.slane %v14703_v17, 5  ;;  %v7757_v41 = vpack.c.b16 %v7736_v23, %v7735_v36  ;;  %v9149_v3 = vunpack.c.l.b16 %v8880_v28  ;;  %v11417_v36 = vld [vmem:[#allocation3 + $0x54] sm:$0xff] }
 0x483   : > { %v9501_v57 = vsel %vm12391_vm13, %v11167_v52, %v9500_v60  ;;  %v7598_v59 = vshll.u32 %v14710_v43, 16  ;;  %v8889_v4 = vrot.slane %v8888_v31, 4  ;;  %v8899_v56 = vrot.slane %v8898_v55, 4  ;;  %v15673_v60 = vld [vmem:[#allocation21_spill] sm:$0xff]  ;;  %v14725_v52 = vld [vmem:[#allocation3 + $0xa0] sm:$0xf] }
 0x484   : > { %v7846_v9 = vpop.f32.mrf.mxu1  ;;  %v9504_v35 = vsel %vm12391_vm13, %v9502_v39, %v9503_v27  ;;  %v8909_v23 = vshll.u32 %v8710_v61, 16  ;;  %v9582_v22 = vunpack.c.l.b16 %v9501_v57  ;;  %v8903_v28 = vrot.slane %v8901_v51, 5  ;;  %v15677_v51 = vld [vmem:[#allocation28_spill] sm:$0xff] }
 0x485   : > { %v6524_v53 = vpop.f32.mrf.mxu2  ;;  %v14714_v58 = vadd.f32 %v7846_v9, %v7238_v7  ;;  %v11445_v9 = vld [vmem:[#allocation9 + $0x208] sm:$0xff]  ;;  %v8906_v7 = vshrl.u32 %v8710_v61, 16  ;;  %v9583_v25 = vunpack.c.l.b16 %v9504_v35  ;;  %v8915_v31 = vshll.u32 %v14601_v6, 16  ;;  %v15676_v61 = vld [vmem:[#allocation30_spill] sm:$0xff] }
 0x486   : > { %v6525_v33 = vadd.f32 %v6524_v53, %v14338_v16  ;;  %v6902_v15 = vpop.f32.mrf.mxu3  ;;  %v7585_v16 = vor.u32 %v7584_v12, %v7581_v13  ;;  %v7596_v53 = vrot.slane %v7595_v19, 4  ;;  %9682 = vmatpush.bf16.msra.mxu1 %v11445_v9  ;;  %v7600_v55 = vrot.slane %v7598_v59, 5  ;;  %v14734_v19 = vpop.f32.mrf.mxu0 }
 0x487   : > { %7885 = vmatmul.bf16.gmra.mxu1 %v7757_v41  ;;  %v8919_v41 = vshrl.u32 %v14601_v6, 16  ;;  %v8894_v13 = vsel %vm12014_vm2, %v8889_v4, %v14684_v5  ;;  %v14732_v12 = vpack.c.b16 %v9583_v25, %v9582_v22  ;;  %15675 = vst [vmem:[#allocation21_spill] sm:$0xff] %v14734_v19  ;;  %v7239_v39 = vadd.f32 %v15677_v51, %v15676_v61  ;;  %v7302_v22 = vld [vmem:[#allocation3 + $0x9c] sm:$0xf]  ;;  %v7959_v51 = vld [vmem:[#allocation3 + $0x90] sm:$0xe] }
 0x488   : > { %v14722_v8 = vadd.f32 %v6902_v15, %v6525_v33  ;;  %v9175_v33 = vpack.c.b16 %v9149_v3, %v9148_v26  ;;  %v8904_v27 = vsel %vm12014_vm2, %v8899_v56, %v8903_v28  ;;  %v14740_v15 = vrot.slane %v8906_v7, 4 }
 0x489   : > { %15674 = vst [vmem:[#allocation27_spill] sm:$0xff] %v14732_v12  ;;  %v14742_v6 = vrot.slane %v8909_v23, 5  ;;  %v7586_v3 = vrot.slane %v7585_v16, 4  ;;  %v7601_v25 = vsel %vm12014_vm2, %v7596_v53, %v7600_v55  ;;  %v7612_v5 = vshll.u32 %v14725_v52, 16  ;;  %v8713_v16 = vld [vmem:[#allocation3 + $0x78] sm:$0xf] }
 0x48a   : > { %15672 = vst [vmem:[#allocation26_spill] sm:$0xff] %v14722_v8  ;;  %8286 = vmatmul.bf16.gmra.mxu2 %v15673_v60  ;;  %v7616_v59 = vshrl.u32 %v14725_v52, 16  ;;  %v14751_v9 = vrot.slane %v8915_v31, 5  ;;  %v8921_v7 = vrot.slane %v8919_v41, 4  ;;  %v7738_v60 = vunpack.c.l.b16 %v7601_v25  ;;  %v14760_v55 = vld [vmem:[#allocation3 + $0x94] sm:$0xf] }
 0x48b   : > { %8601 = vmatmul.bf16.gmra.mxu3 %v11417_v36  ;;  %v7591_v23 = vsel %vm12014_vm2, %v7586_v3, %v14697_v49  ;;  %v14756_v36 = vunpack.c.l.b16 %v8894_v13  ;;  %v7603_v28 = vshrl.u32 %v7302_v22, 16  ;;  %v9151_v61 = vunpack.c.l.b16 %v8904_v27  ;;  %v15679_v3 = vld [vmem:[#allocation29_spill] sm:$0xff]  ;;  %v15680_v25 = vld [vmem:[#allocation31_spill] sm:$0xff] }
 0x48c   : > { %v7848_v26 = vpop.f32.mrf.mxu1  ;;  %v7618_v31 = vrot.slane %v7616_v59, 4  ;;  %v8922_v49 = vor.u32 %v8921_v7, %v14751_v9  ;;  %v8925_v13 = vshll.u32 %v14621_v38, 16  ;;  %v8933_v27 = vshll.u32 %v8713_v16, 16 }
 0x48d   : > { %9283 = vmatmul.bf16.gmra.mxu0 %v9175_v33  ;;  %v6527_v57 = vpop.f32.mrf.mxu2  ;;  %v14748_v4 = vadd.f32 %v7848_v26, %v7239_v39  ;;  %v7606_v33 = vshll.u32 %v7302_v22, 16  ;;  %v7737_v39 = vunpack.c.l.b16 %v7591_v23  ;;  %v8930_v26 = vshrl.u32 %v8713_v16, 16  ;;  %v14774_v23 = vld [vmem:[#allocation3 + $0x98] sm:$0x1] }
 0x48e   : > { %v6528_v56 = vadd.f32 %v6527_v57, %v14378_v21  ;;  %v6905_v35 = vpop.f32.mrf.mxu3  ;;  %v14762_v21 = vrot.slane %v7612_v5, 5  ;;  %v9381_v57 = vld [vmem:[#allocation3 + $0x90] sm:$0xe]  ;;  %v7240_v22 = vadd.f32 %v15680_v25, %v15679_v3  ;;  %v8091_v5 = vrot.slane %v14668_v62, 5  ;;  %v14778_v1 = vpop.f32.mrf.mxu0 }
 0x48f   : > { %v9507_v59 = vrot.slane %v14760_v55, 5  ;;  %v7605_v41 = vrot.slane %v7603_v28, 4  ;;  %v7608_v12 = vrot.slane %v7606_v33, 5  ;;  %v10993_v7 = vrot.slane %v7959_v51, 9  ;;  %15681 = vst [vmem:[#allocation28_spill] sm:$0xff] %v14778_v1 }
 0x490   : > { %v14758_v53 = vadd.f32 %v6905_v35, %v6528_v56  ;;  %v14770_v56 = vld [vmem:[#allocation3 + $0xa4] sm:$0x1]  ;;  %v7758_v35 = vpack.c.b16 %v7738_v60, %v7737_v39  ;;  %v7619_v8 = vor.u32 %v7618_v31, %v14762_v21  ;;  %v8093_v19 = vrot.slane %v8091_v5, 4 }
 0x491   : > { %v8094_v3 = vrot.slane %v14710_v43, 5  ;;  %v11168_v25 = vrot.slane %v9381_v57, 9  ;;  %v7622_v28 = vshll.u32 %v14770_v56, 16  ;;  %v8092_v33 = vsel %vm12391_vm13, %v10993_v7, %v8091_v5 }
 0x492   : > { %15678 = vst [vmem:[#allocation30_spill] sm:$0xff] %v14758_v53  ;;  %v9509_v43 = vrot.slane %v9507_v59, 4  ;;  %v9510_v39 = vrot.slane %v14774_v23, 5  ;;  %v7609_v57 = vor.u32 %v7608_v12, %v7605_v41  ;;  %v7620_v1 = vrot.slane %v7619_v8, 4  ;;  %v14799_v41 = vld [vmem:[#allocation3 + $0xac] sm:$0xf] }
 0x493   : > { %v8095_v51 = vsel %vm12391_vm13, %v8093_v19, %v8094_v3  ;;  %v9508_v31 = vsel %vm12391_vm13, %v11168_v25, %v9507_v59  ;;  %v8163_v5 = vunpack.c.l.b16 %v8092_v33  ;;  %v9176_v59 = vpack.c.b16 %v9151_v61, %v14756_v36  ;;  %v15683_v8 = vld [vmem:[#allocation14_spill] sm:$0xff]  ;;  %v15684_v33 = vld [vmem:[#allocation33_spill] sm:$0xff] }
 0x494   : > { %v7851_v53 = vpop.f32.mrf.mxu1  ;;  %v8164_v7 = vunpack.c.l.b16 %v8095_v51  ;;  %v9511_v19 = vsel %vm12391_vm13, %v9509_v43, %v9510_v39  ;;  %v8923_v3 = vrot.slane %v8922_v49, 4  ;;  %v7624_v12 = vrot.slane %v7622_v28, 5 }
 0x495   : > { %v6529_v38 = vpop.f32.mrf.mxu2  ;;  %v14780_v16 = vadd.f32 %v7851_v53, %v7240_v22  ;;  %v8943_v22 = vshrl.u32 %v14641_v54, 16  ;;  %v9585_v25 = vunpack.c.l.b16 %v9511_v19  ;;  %v7241_v51 = vadd.f32 %v15684_v33, %v15683_v8 }
 0x496   : > { %v6530_v62 = vadd.f32 %v6529_v38, %v14403_v42  ;;  %v6907_v60 = vpop.f32.mrf.mxu3  ;;  %v8939_v42 = vshll.u32 %v14641_v54, 16  ;;  %v11418_v38 = vld [vmem:[#allocation3 + $0x60] sm:$0xff]  ;;  %v8935_v54 = vrot.slane %v8933_v27, 5  ;;  %v7610_v49 = vrot.slane %v7609_v57, 4 }
 0x497   : > { %7890 = vmatmul.bf16.gmra.mxu1 %v7758_v35  ;;  %v9584_v35 = vunpack.c.l.b16 %v9508_v31  ;;  %v8945_v43 = vrot.slane %v8943_v22, 4  ;;  %v7625_v28 = vsel %vm12014_vm2, %v7620_v1, %v7624_v12  ;;  %v8927_v31 = vrot.slane %v8925_v13, 5  ;;  %v7305_v22 = vld [vmem:[#allocation3 + $0xa8] sm:$0xf]  ;;  %v8716_v12 = vld [vmem:[#allocation3 + $0x84] sm:$0xf] }
 0x498   : > { %v14791_v53 = vadd.f32 %v6907_v60, %v6530_v62  ;;  %v8932_v62 = vrot.slane %v8930_v26, 4  ;;  %v14801_v60 = vpack.c.b16 %v8164_v7, %v8163_v5  ;;  %v15686_v26 = vor.u32 %v14742_v6, %v14740_v15  ;;  %v14824_v15 = vpop.f32.mrf.mxu0 }
 0x499   : > { %v7636_v5 = vshll.u32 %v14799_v41, 16  ;;  %v7640_v7 = vshrl.u32 %v14799_v41, 16  ;;  %v8928_v1 = vsel %vm12014_vm2, %v8923_v3, %v8927_v31 }
 0x49a   : > { %15682 = vst [vmem:[#allocation29_spill] sm:$0xff] %v14791_v53  ;;  %8291 = vmatmul.bf16.gmra.mxu2 %v14326_v63  ;;  %v14805_v53 = vrot.slane %v8939_v42, 5  ;;  %v14807_v63 = vpack.c.b16 %v9585_v25, %v9584_v35  ;;  %v8913_v27 = vrot.slane %v15686_v26, 4  ;;  %v8936_v13 = vor.u32 %v8935_v54, %v8932_v62 }
 0x49b   : > { %8606 = vmatmul.bf16.gmra.mxu3 %v11418_v38  ;;  %v7627_v35 = vshrl.u32 %v7305_v22, 16  ;;  %v7630_v25 = vshll.u32 %v7305_v22, 16  ;;  %v7642_v33 = vrot.slane %v7640_v7, 4  ;;  %v8098_v26 = vrot.slane %v14725_v52, 5 }
 0x49c   : > { %15685 = vst [vmem:[#allocation31_spill] sm:$0xff] %v14807_v63  ;;  %v7853_v36 = vpop.f32.mrf.mxu1  ;;  %v8918_v57 = vsel %vm12014_vm2, %v8913_v27, %v14751_v9  ;;  %v8946_v19 = vor.u32 %v8945_v43, %v14805_v53  ;;  %v14832_v9 = vrot.slane %v7636_v5, 5  ;;  %v15687_v27 = vld [vmem:[#allocation34_spill] sm:$0xff]  ;;  %v14838_v54 = vrot.slane %v8936_v13, 4 }
 0x49d   : > { %9288 = vmatmul.bf16.gmra.mxu0 %v9176_v59  ;;  %v6532_v61 = vpop.f32.mrf.mxu2  ;;  %v14814_v39 = vadd.f32 %v7853_v36, %v7241_v51  ;;  %v7740_v59 = vunpack.c.l.b16 %v7625_v28  ;;  %v9152_v8 = vunpack.c.l.b16 %v8918_v57  ;;  %v9153_v51 = vunpack.c.l.b16 %v8928_v1 }
 0x49e   : > { %v6533_v42 = vadd.f32 %v6532_v61, %v14438_v45  ;;  %v6910_v38 = vpop.f32.mrf.mxu3  ;;  %v7615_v45 = vsel %vm12014_vm2, %v7610_v49, %v14762_v21  ;;  %v8949_v36 = vshll.u32 %v14652_v0, 16  ;;  %v7960_v61 = vld [vmem:[#allocation3 + $0x9c] sm:$0xe]  ;;  %v15688_v21 = vld [vmem:[#allocation32_spill] sm:$0xff]  ;;  %v8947_v43 = vrot.slane %v8946_v19, 4 }
 0x49f   : > { %v7739_v3 = vunpack.c.l.b16 %v7615_v45  ;;  %v7242_v62 = vadd.f32 %v15688_v21, %v15687_v27  ;;  %v8954_v49 = vshrl.u32 %v8716_v12, 16  ;;  %v7629_v22 = vrot.slane %v7627_v35, 4 }
 0x4a0   : > { %v14826_v6 = vadd.f32 %v6910_v38, %v6533_v42  ;;  %v14840_v38 = vld [vmem:[#allocation3 + $0xb0] sm:$0x1]  ;;  %v7632_v5 = vrot.slane %v7630_v25, 5  ;;  %v8957_v7 = vshll.u32 %v8716_v12, 16  ;;  %v7643_v1 = vor.u32 %v7642_v33, %v14832_v9  ;;  %v14851_v25 = vld [vmem:[#allocation3 + $0xb8] sm:$0xf] }
 0x4a1   : > { %v7759_v31 = vpack.c.b16 %v7740_v59, %v7739_v3  ;;  %v10994_v45 = vrot.slane %v7960_v61, 9  ;;  %v8951_v13 = vrot.slane %v8949_v36, 5  ;;  %v8963_v19 = vshll.u32 %v14692_v50, 16  ;;  %v11444_v12 = vld [vmem:[#allocation9 + $0x200] sm:$0xff]  ;;  %v11419_v61 = vld [vmem:[#allocation3 + $0x6c] sm:$0xff] }
 0x4a2   : > { %v8967_v27 = vshrl.u32 %v14692_v50, 16  ;;  %v8100_v59 = vrot.slane %v8098_v26, 4  ;;  %v7646_v35 = vshll.u32 %v14840_v38, 16  ;;  %v8101_v33 = vrot.slane %v14770_v56, 5  ;;  %v14856_v50 = vpop.f32.mrf.mxu0  ;;  %9683 = vmatpush.bf16.msra.mxu1 %v11444_v12 }
 0x4a3   : > { %v9177_v36 = vpack.c.b16 %v9153_v51, %v9152_v8  ;;  %v7633_v21 = vor.u32 %v7632_v5, %v7629_v22  ;;  %v7660_v8 = vshll.u32 %v14851_v25, 16  ;;  %v7664_v51 = vshrl.u32 %v14851_v25, 16  ;;  %v15691_v22 = vld [vmem:[#allocation15_spill] sm:$0xff]  ;;  %v15692_v5 = vld [vmem:[#allocation16_spill] sm:$0xff] }
 0x4a4   : > { %v7856_v28 = vpop.f32.mrf.mxu1  ;;  %v8102_v56 = vsel %vm12391_vm13, %v8100_v59, %v8101_v33 }
 0x4a5   : > { %v6534_v42 = vpop.f32.mrf.mxu2  ;;  %v14842_v57 = vadd.f32 %v7856_v28, %v7242_v62  ;;  %v8956_v62 = vrot.slane %v8954_v49, 4  ;;  %v8959_v28 = vrot.slane %v8957_v7, 5  ;;  %v8166_v49 = vunpack.c.l.b16 %v8102_v56 }
 0x4a6   : > { %v6535_v0 = vadd.f32 %v6534_v42, %v14475_v20  ;;  %v6912_v52 = vpop.f32.mrf.mxu3  ;;  %v8099_v20 = vsel %vm12391_vm13, %v10994_v45, %v8098_v26  ;;  %v8942_v42 = vsel %vm12014_vm2, %v14838_v54, %v14805_v53  ;;  %v8952_v26 = vsel %vm12014_vm2, %v8947_v43, %v8951_v13 }
 0x4a7   : > { %15689 = vst [vmem:[#allocation14_spill] sm:$0xff] %v14842_v57  ;;  %7895 = vmatmul.bf16.gmra.mxu1 %v7759_v31  ;;  %v7644_v31 = vrot.slane %v7643_v1, 4  ;;  %v7243_v7 = vadd.f32 %v15692_v5, %v15691_v22  ;;  %v8965_v53 = vrot.slane %v8963_v19, 5  ;;  %v8969_v54 = vrot.slane %v8967_v27, 4  ;;  %v7961_v5 = vld [vmem:[#allocation3 + $0xa8] sm:$0xe] }
 0x4a8   : > { %v14848_v3 = vadd.f32 %v6912_v52, %v6535_v0  ;;  %v7308_v0 = vld [vmem:[#allocation3 + $0xb4] sm:$0xf]  ;;  %v7648_v52 = vrot.slane %v7646_v35, 5  ;;  %v7634_v45 = vrot.slane %v7633_v21, 4  ;;  %v8960_v12 = vor.u32 %v8959_v28, %v8956_v62 }
 0x4a9   : > { %v7651_v13 = vshrl.u32 %v7308_v0, 16  ;;  %v7654_v22 = vshll.u32 %v7308_v0, 16  ;;  %v14878_v35 = vunpack.c.l.b16 %v8952_v26  ;;  %v14880_v19 = vrot.slane %v7660_v8, 5  ;;  %v9382_v0 = vld [vmem:[#allocation3 + $0x9c] sm:$0xe] }
 0x4aa   : > { %15690 = vst [vmem:[#allocation33_spill] sm:$0xff] %v14848_v3  ;;  %8296 = vmatmul.bf16.gmra.mxu2 %v14394_v2  ;;  %v8165_v2 = vunpack.c.l.b16 %v8099_v20  ;;  %v7649_v56 = vsel %vm12014_vm2, %v7644_v31, %v7648_v52  ;;  %v7666_v27 = vrot.slane %v7664_v51, 4  ;;  %v7639_v62 = vsel %vm12014_vm2, %v7634_v45, %v14832_v9  ;;  %v14892_v8 = vld [vmem:[#allocation3 + $0xbc] sm:$0x1] }
 0x4ab   : > { %8611 = vmatmul.bf16.gmra.mxu3 %v11419_v61  ;;  %v8970_v28 = vor.u32 %v8969_v54, %v8965_v53  ;;  %v7653_v31 = vrot.slane %v7651_v13, 4  ;;  %v8961_v26 = vrot.slane %v8960_v12, 4  ;;  %v7656_v51 = vrot.slane %v7654_v22, 5  ;;  %v14899_v54 = vpop.f32.mrf.mxu0 }
 0x4ac   : > { %v7858_v1 = vpop.f32.mrf.mxu1  ;;  %v14871_v59 = vpack.c.b16 %v8166_v49, %v8165_v2  ;;  %v7742_v2 = vunpack.c.l.b16 %v7649_v56  ;;  %v14890_v49 = vunpack.c.l.b16 %v8942_v42  ;;  %v7741_v52 = vunpack.c.l.b16 %v7639_v62  ;;  %v15695_v42 = vld [vmem:[#allocation17_spill] sm:$0xff] }
 0x4ad   : > { %9293 = vmatmul.bf16.gmra.mxu0 %v9177_v36  ;;  %v6537_v43 = vpop.f32.mrf.mxu2  ;;  %v14873_v33 = vadd.f32 %v7858_v1, %v7243_v7  ;;  %v14882_v36 = vld [vmem:[#allocation3 + $0xa0] sm:$0xf]  ;;  %v7667_v9 = vor.u32 %v7666_v27, %v14880_v19  ;;  %v8966_v13 = vsel %vm12014_vm2, %v8961_v26, %v8965_v53  ;;  %v14905_v12 = vrot.slane %v8970_v28, 4  ;;  %v14910_v27 = vld [vmem:[#allocation3 + $0xa4] sm:$0x1] }
 0x4ae   : > { %v6538_v61 = vadd.f32 %v6537_v43, %v14511_v18  ;;  %v6915_v20 = vpop.f32.mrf.mxu3  ;;  %v8973_v18 = vshll.u32 %v14703_v17, 16  ;;  %v9514_v7 = vrot.slane %v14882_v36, 5  ;;  %v9178_v1 = vpack.c.b16 %v14878_v35, %v14890_v49  ;;  %v15696_v43 = vld [vmem:[#allocation35_spill] sm:$0xff]  ;;  %v14915_v53 = vld [vmem:[#allocation3 + $0x90] sm:$0xf] }
 0x4af   : > { %15693 = vst [vmem:[#allocation34_spill] sm:$0xff] %v14873_v33  ;;  %v8105_v17 = vrot.slane %v14799_v41, 5  ;;  %v7244_v45 = vadd.f32 %v15696_v43, %v15695_v42  ;;  %v7760_v56 = vpack.c.b16 %v7742_v2, %v7741_v52  ;;  %v7670_v35 = vshll.u32 %v14892_v8, 16  ;;  %v14917_v26 = vld [vmem:[#allocation3 + $0xac] sm:$0xf] }
 0x4b0   : > { %v14884_v21 = vadd.f32 %v6915_v20, %v6538_v61  ;;  %v14907_v61 = vrot.slane %v8973_v18, 5  ;;  %v10995_v41 = vrot.slane %v7961_v5, 9  ;;  %v11169_v62 = vrot.slane %v9382_v0, 9  ;;  %v9383_v5 = vld [vmem:[#allocation3 + $0xa8] sm:$0xe] }
 0x4b1   : > { %v7657_v33 = vor.u32 %v7656_v51, %v7653_v31  ;;  %v9516_v28 = vrot.slane %v9514_v7, 4  ;;  %v7668_v18 = vrot.slane %v7667_v9, 4  ;;  %v8107_v52 = vrot.slane %v8105_v17, 4  ;;  %v11420_v9 = vld [vmem:[#allocation3 + $0x78] sm:$0xff] }
 0x4b2   : > { %15694 = vst [vmem:[#allocation32_spill] sm:$0xff] %v14884_v21  ;;  %v8106_v2 = vsel %vm12391_vm13, %v10995_v41, %v8105_v17  ;;  %v8108_v57 = vrot.slane %v14840_v38, 5  ;;  %v14928_v31 = vunpack.c.l.b16 %v8966_v13  ;;  %v9517_v51 = vrot.slane %v14910_v27, 5  ;;  %v15699_v41 = vld [vmem:[#allocation20_spill] sm:$0xff]  ;;  %v7962_v21 = vld [vmem:[#allocation3 + $0xb4] sm:$0xe] }
 0x4b3   : > { %v8978_v17 = vshrl.u32 %v14915_v53, 16  ;;  %v8167_v13 = vunpack.c.l.b16 %v8106_v2 }
 0x4b4   : > { %v7861_v20 = vpop.f32.mrf.mxu1  ;;  %v8109_v38 = vsel %vm12391_vm13, %v8107_v52, %v8108_v57 }
 0x4b5   : > { %v6539_v22 = vpop.f32.mrf.mxu2  ;;  %v14912_v49 = vadd.f32 %v7861_v20, %v7244_v45  ;;  %v7672_v45 = vrot.slane %v7670_v35, 5  ;;  %v14931_v20 = vld [vmem:[#allocation3 + $0xc4] sm:$0xf]  ;;  %v9521_v35 = vrot.slane %v14917_v26, 5 }
 0x4b6   : > { %v6540_v42 = vadd.f32 %v6539_v22, %v14534_v14  ;;  %v6917_v43 = vpop.f32.mrf.mxu3  ;;  %v8976_v14 = vsel %vm12014_vm2, %v14905_v12, %v14907_v61  ;;  %v14939_v12 = vld [vmem:[#allocation3 + $0xb0] sm:$0x1]  ;;  %v8168_v61 = vunpack.c.l.b16 %v8109_v38  ;;  %v9518_v22 = vsel %vm12391_vm13, %v9516_v28, %v9517_v51 }
 0x4b7   : > { %15697 = vst [vmem:[#allocation15_spill] sm:$0xff] %v14912_v49  ;;  %7900 = vmatmul.bf16.gmra.mxu1 %v7760_v56  ;;  %v9515_v56 = vsel %vm12391_vm13, %v11169_v62, %v9514_v7  ;;  %v7658_v49 = vrot.slane %v7657_v33, 4  ;;  %v7673_v57 = vsel %vm12014_vm2, %v7668_v18, %v7672_v45  ;;  %v11170_v7 = vrot.slane %v9383_v5, 9  ;;  %v7311_v62 = vld [vmem:[#allocation3 + $0xc0] sm:$0xf]  ;;  %v14955_v18 = vpop.f32.mrf.mxu0 }
 0x4b8   : > { %v14922_v0 = vadd.f32 %v6917_v43, %v6540_v42  ;;  %v15700_v42 = vld [vmem:[#allocation19_spill] sm:$0xff]  ;;  %v14949_v52 = vpack.c.b16 %v8168_v61, %v8167_v13  ;;  %v9586_v2 = vunpack.c.l.b16 %v9515_v56  ;;  %v9587_v38 = vunpack.c.l.b16 %v9518_v22  ;;  %15701 = vst [vmem:[#allocation17_spill] sm:$0xff] %v14955_v18 }
 0x4b9   : > { %v7245_v43 = vadd.f32 %v15700_v42, %v15699_v41  ;;  %v7688_v51 = vshrl.u32 %v14931_v20, 16  ;;  %v9523_v33 = vrot.slane %v9521_v35, 4  ;;  %v9524_v41 = vrot.slane %v14939_v12, 5 }
 0x4ba   : > { %15698 = vst [vmem:[#allocation16_spill] sm:$0xff] %v14922_v0  ;;  %8301 = vmatmul.bf16.gmra.mxu2 %v14473_v29  ;;  %v7684_v29 = vshll.u32 %v14931_v20, 16  ;;  %v8987_v56 = vshll.u32 %v14760_v55, 16  ;;  %v7663_v61 = vsel %vm12014_vm2, %v7658_v49, %v14880_v19  ;;  %v7675_v22 = vshrl.u32 %v7311_v62, 16  ;;  %v14976_v49 = vld [vmem:[#allocation3 + $0xb8] sm:$0xf] }
 0x4bb   : > { %8616 = vmatmul.bf16.gmra.mxu3 %v11420_v9  ;;  %v9522_v9 = vsel %vm12391_vm13, %v11170_v7, %v9521_v35  ;;  %v14965_v42 = vpack.c.b16 %v9587_v38, %v9586_v2  ;;  %v9525_v35 = vsel %vm12391_vm13, %v9523_v33, %v9524_v41  ;;  %v7743_v3 = vunpack.c.l.b16 %v7663_v61  ;;  %v9384_v38 = vld [vmem:[#allocation3 + $0xb4] sm:$0xe] }
 0x4bc   : > { %v7863_v63 = vpop.f32.mrf.mxu1  ;;  %v14971_v0 = vrot.slane %v7684_v29, 5  ;;  %v14973_v18 = vrot.slane %v8978_v17, 4  ;;  %v8981_v19 = vshll.u32 %v14915_v53, 16  ;;  %v15705_v33 = vld [vmem:[#allocation37_spill] sm:$0xff]  ;;  %v14982_v41 = vrot.slane %v8987_v56, 5 }
 0x4bd   : > { %9298 = vmatmul.bf16.gmra.mxu0 %v9178_v1  ;;  %v8262_v28 = vpop.f32.mrf.mxu2  ;;  %v14957_v5 = vadd.f32 %v7863_v63, %v7245_v43  ;;  %v8991_v1 = vshrl.u32 %v14760_v55, 16  ;;  %15703 = vst [vmem:[#allocation20_spill] sm:$0xff] %v14965_v42  ;;  %v7744_v63 = vunpack.c.l.b16 %v7673_v57  ;;  %v9588_v43 = vunpack.c.l.b16 %v9522_v9  ;;  %v15706_v57 = vld [vmem:[#allocation22_spill] sm:$0xff] }
 0x4be   : > { %v8342_v45 = vadd.f32 %v8262_v28, %v14579_v48  ;;  %v8577_v13 = vpop.f32.mrf.mxu3  ;;  %v9589_v48 = vunpack.c.l.b16 %v9525_v35  ;;  %v9157_v28 = vunpack.c.l.b16 %v8976_v14  ;;  %v7690_v55 = vrot.slane %v7688_v51, 4  ;;  %v14988_v35 = vld [vmem:[#allocation3 + $0xc8] sm:$0x1] }
 0x4bf   : > { %15702 = vst [vmem:[#allocation35_spill] sm:$0xff] %v14957_v5  ;;  %v7678_v5 = vshll.u32 %v7311_v62, 16  ;;  %v7246_v9 = vadd.f32 %v15706_v57, %v15705_v33  ;;  %v8993_v14 = vrot.slane %v8991_v1, 4  ;;  %v8112_v62 = vrot.slane %v14851_v25, 5 }
 0x4c0   : > { %v14969_v7 = vadd.f32 %v8577_v13, %v8342_v45  ;;  %v14978_v2 = vpack.c.b16 %v9589_v48, %v9588_v43  ;;  %v7761_v29 = vpack.c.b16 %v7744_v63, %v7743_v3  ;;  %v7677_v51 = vrot.slane %v7675_v22, 4  ;;  %v14985_v45 = vld [vmem:[#allocation3 + $0xbc] sm:$0x1] }
 0x4c1   : > { %v10996_v17 = vrot.slane %v7962_v21, 9  ;;  %v9528_v53 = vrot.slane %v14976_v49, 5  ;;  %v7680_v43 = vrot.slane %v7678_v5, 5  ;;  %v7691_v48 = vor.u32 %v7690_v55, %v14971_v0  ;;  %v15000_v55 = vpop.f32.mrf.mxu0 }
 0x4c2   : > { %15704 = vst [vmem:[#allocation19_spill] sm:$0xff] %v14978_v2  ;;  %v8115_v56 = vrot.slane %v14892_v8, 5  ;;  %v11171_v33 = vrot.slane %v9384_v38, 9  ;;  %v8114_v22 = vrot.slane %v8112_v62, 4  ;;  %v8983_v63 = vrot.slane %v8981_v19, 5 }
 0x4c3   : > { %v8113_v21 = vsel %vm12391_vm13, %v10996_v17, %v8112_v62  ;;  %v9530_v2 = vrot.slane %v9528_v53, 4  ;;  %v9531_v5 = vrot.slane %v14985_v45, 5  ;;  %v7694_v38 = vshll.u32 %v14988_v35, 16  ;;  %v11421_v62 = vld [vmem:[#allocation3 + $0x84] sm:$0xff] }
 0x4c4   : > { %v7866_v13 = vpop.f32.mrf.mxu1  ;;  %v9529_v57 = vsel %vm12391_vm13, %v11171_v33, %v9528_v53  ;;  %v8997_v19 = vshll.u32 %v14774_v23, 16  ;;  %v8169_v17 = vunpack.c.l.b16 %v8113_v21  ;;  %v15709_v23 = vld [vmem:[#allocation39_spill] sm:$0xff] }
 0x4c5   : > { %v8264_v61 = vpop.f32.mrf.mxu2  ;;  %v14992_v1 = vadd.f32 %v7866_v13, %v7246_v9  ;;  %v8116_v9 = vsel %vm12391_vm13, %v8114_v22, %v8115_v56  ;;  %v9532_v53 = vsel %vm12391_vm13, %v9530_v2, %v9531_v5  ;;  %v9590_v33 = vunpack.c.l.b16 %v9529_v57  ;;  %v15708_v22 = vld [vmem:[#allocation40_spill] sm:$0xff] }
 0x4c6   : > { %v8343_v3 = vadd.f32 %v8264_v61, %v14613_v32  ;;  %v8579_v25 = vpop.f32.mrf.mxu3  ;;  %v8994_v32 = vor.u32 %v8993_v14, %v14982_v41  ;;  %v8170_v13 = vunpack.c.l.b16 %v8116_v9  ;;  %v7692_v61 = vrot.slane %v7691_v48, 4 }
 0x4c7   : > { %15707 = vst [vmem:[#allocation37_spill] sm:$0xff] %v14992_v1  ;;  %7905 = vmatmul.bf16.gmra.mxu1 %v7761_v29  ;;  %v7681_v29 = vor.u32 %v7680_v43, %v7677_v51  ;;  %v9179_v14 = vpack.c.b16 %v9157_v28, %v14928_v31  ;;  %v7247_v21 = vadd.f32 %v15709_v23, %v15708_v22  ;;  %v7696_v9 = vrot.slane %v7694_v38, 5  ;;  %v15044_v22 = vld [vmem:[#allocation3 + $0xc8] sm:$0x1] }
 0x4c8   : > { %v15002_v8 = vadd.f32 %v8579_v25, %v8343_v3  ;;  %v9591_v3 = vunpack.c.l.b16 %v9532_v53  ;;  %v8984_v25 = vor.u32 %v8983_v63, %v14973_v18  ;;  %v15014_v56 = vpack.c.b16 %v8170_v13, %v8169_v17  ;;  %v8722_v17 = vld [vmem:[#allocation3 + $0x9c] sm:$0xf]  ;;  %v15037_v13 = vld [vmem:[#allocation3 + $0xc4] sm:$0xf]  ;;  %v9385_v53 = vld [vmem:[#allocation3 + $0xc0] sm:$0xe] }
 0x4c9   : > { %v8995_v1 = vrot.slane %v8994_v32, 4  ;;  %v8999_v51 = vrot.slane %v8997_v19, 5  ;;  %v7682_v28 = vrot.slane %v7681_v29, 4  ;;  %v7697_v18 = vsel %vm12014_vm2, %v7692_v61, %v7696_v9  ;;  %v15032_v19 = vpop.f32.mrf.mxu0 }
 0x4ca   : > { %8306 = vmatmul.bf16.gmra.mxu2 %v14530_v37  ;;  %v15018_v42 = vpack.c.b16 %v9591_v3, %v9590_v33  ;;  %v8985_v5 = vrot.slane %v8984_v25, 4  ;;  %v7746_v32 = vunpack.c.l.b16 %v7697_v18  ;;  %v8119_v33 = vrot.slane %v14931_v20, 5  ;;  %v15710_v3 = vld [vmem:[#allocation42_spill] sm:$0xff] }
 0x4cb   : > { %8621 = vmatmul.bf16.gmra.mxu3 %v11421_v62  ;;  %v7687_v57 = vsel %vm12014_vm2, %v7682_v28, %v14971_v0  ;;  %v9000_v38 = vsel %vm12014_vm2, %v8995_v1, %v8999_v51  ;;  %v7963_v62 = vld [vmem:[#allocation3 + $0xc0] sm:$0xe]  ;;  %v9011_v0 = vshll.u32 %v14882_v36, 16  ;;  %v9015_v25 = vshrl.u32 %v14882_v36, 16 }
 0x4cc   : > { %v7868_v2 = vpop.f32.mrf.mxu1  ;;  %v7745_v29 = vunpack.c.l.b16 %v7687_v57  ;;  %v9159_v61 = vunpack.c.l.b16 %v9000_v38  ;;  %v15711_v1 = vld [vmem:[#allocation43_spill] sm:$0xff]  ;;  %v10997_v23 = vrot.slane %v7963_v62, 9  ;;  %v8122_v51 = vrot.slane %v14988_v35, 5 }
 0x4cd   : > { %9303 = vmatmul.bf16.gmra.mxu0 %v9179_v14  ;;  %v8267_v37 = vpop.f32.mrf.mxu2  ;;  %v15020_v43 = vadd.f32 %v7868_v2, %v7247_v21  ;;  %v7248_v14 = vadd.f32 %v15711_v1, %v15710_v3  ;;  %v8121_v18 = vrot.slane %v8119_v33, 4  ;;  %v9005_v57 = vshll.u32 %v8722_v17, 16 }
 0x4ce   : > { %v8344_v48 = vadd.f32 %v8267_v37, %v14648_v47  ;;  %v8582_v31 = vpop.f32.mrf.mxu3  ;;  %v8990_v47 = vsel %vm12014_vm2, %v8985_v5, %v14982_v41  ;;  %v9535_v41 = vrot.slane %v15037_v13, 5  ;;  %v7762_v9 = vpack.c.b16 %v7746_v32, %v7745_v29  ;;  %v11422_v29 = vld [vmem:[#allocation3 + $0x90] sm:$0xff] }
 0x4cf   : > { %v9002_v37 = vshrl.u32 %v8722_v17, 16  ;;  %v8120_v36 = vsel %vm12391_vm13, %v10997_v23, %v8119_v33  ;;  %v9538_v32 = vrot.slane %v15044_v22, 5  ;;  %v9013_v35 = vrot.slane %v9011_v0, 5 }
 0x4d0   : > { %v15025_v63 = vadd.f32 %v8582_v31, %v8344_v48  ;;  %v11172_v48 = vrot.slane %v9385_v53, 9  ;;  %v9537_v38 = vrot.slane %v9535_v41, 4  ;;  %v9017_v53 = vrot.slane %v9015_v25, 4 }
 0x4d1   : > { %v9158_v3 = vunpack.c.l.b16 %v8990_v47  ;;  %v8171_v1 = vunpack.c.l.b16 %v8120_v36  ;;  %v15065_v25 = vpop.f32.mrf.mxu0 }
 0x4d2   : > { %v9536_v5 = vsel %vm12391_vm13, %v11172_v48, %v9535_v41  ;;  %v9539_v17 = vsel %vm12391_vm13, %v9537_v38, %v9538_v32  ;;  %v9018_v48 = vor.u32 %v9017_v53, %v9013_v35  ;;  %v15715_v53 = vld [vmem:[#allocation48_spill] sm:$0xff] }
 0x4d3   : > { %v9592_v33 = vunpack.c.l.b16 %v9536_v5  ;;  %v9593_v23 = vunpack.c.l.b16 %v9539_v17  ;;  %v9180_v41 = vpack.c.b16 %v9159_v61, %v9158_v3  ;;  %v9035_v17 = vshll.u32 %v14917_v26, 16 }
 0x4d4   : > { %v7871_v21 = vpop.f32.mrf.mxu1  ;;  %v9019_v38 = vrot.slane %v9018_v48, 4 }
 0x4d5   : > { %v8269_v2 = vpop.f32.mrf.mxu2  ;;  %v15048_v31 = vadd.f32 %v7871_v21, %v7248_v14  ;;  %v9004_v21 = vrot.slane %v9002_v37, 4  ;;  %v9021_v37 = vshll.u32 %v14910_v27, 16 }
 0x4d6   : > { %v8345_v20 = vadd.f32 %v8269_v2, %v14681_v11  ;;  %v8584_v28 = vpop.f32.mrf.mxu3  ;;  %v8123_v11 = vsel %vm12391_vm13, %v8121_v18, %v8122_v51  ;;  %v15712_v2 = vld [vmem:[#allocation44_spill] sm:$0xff]  ;;  %v15713_v51 = vld [vmem:[#allocation45_spill] sm:$0xff] }
 0x4d7   : > { %7910 = vmatmul.bf16.gmra.mxu1 %v7762_v9  ;;  %v8172_v14 = vunpack.c.l.b16 %v8123_v11  ;;  %v9007_v9 = vrot.slane %v9005_v57, 5  ;;  %v7249_v47 = vadd.f32 %v15713_v51, %v15712_v2  ;;  %v9023_v32 = vrot.slane %v9021_v37, 5 }
 0x4d8   : > { %v15056_v62 = vadd.f32 %v8584_v28, %v8345_v20  ;;  %v15069_v20 = vpack.c.b16 %v9593_v23, %v9592_v33 }
 0x4d9   : > { %v15063_v0 = vpack.c.b16 %v8172_v14, %v8171_v1  ;;  %v9008_v57 = vor.u32 %v9007_v9, %v9004_v21  ;;  %v9024_v1 = vsel %vm12014_vm2, %v9019_v38, %v9023_v32  ;;  %v8725_v14 = vld [vmem:[#allocation3 + $0xa8] sm:$0xf]  ;;  %v15088_v2 = vpop.f32.mrf.mxu0  ;;  %v15718_v32 = vld [vmem:[#allocation51_spill] sm:$0xff] }
 0x4da   : > { %8311 = vmatmul.bf16.gmra.mxu2 %v14603_v24  ;;  %v9161_v51 = vunpack.c.l.b16 %v9024_v1  ;;  %v9029_v48 = vshll.u32 %v8725_v14, 16 }
 0x4db   : > { %8626 = vmatmul.bf16.gmra.mxu3 %v11422_v29  ;;  %v9009_v11 = vrot.slane %v9008_v57, 4  ;;  %v15714_v29 = vld [vmem:[#allocation47_spill] sm:$0xff] }
 0x4dc   : > { %v7873_v28 = vpop.f32.mrf.mxu1  ;;  %v7250_v3 = vadd.f32 %v15715_v53, %v15714_v29  ;;  %v9031_v38 = vrot.slane %v9029_v48, 5 }
 0x4dd   : > { %9308 = vmatmul.bf16.gmra.mxu0 %v9180_v41  ;;  %v8272_v36 = vpop.f32.mrf.mxu2  ;;  %v15071_v24 = vadd.f32 %v7873_v28, %v7249_v47  ;;  %v9014_v9 = vsel %vm12014_vm2, %v9009_v11, %v9013_v35  ;;  %v9026_v47 = vshrl.u32 %v8725_v14, 16  ;;  %v15716_v28 = vld [vmem:[#allocation36_spill] sm:$0xff]  ;;  %v15717_v35 = vld [vmem:[#allocation49_spill] sm:$0xff] }
 0x4de   : > { %v8346_v18 = vadd.f32 %v8272_v36, %v14714_v58  ;;  %v8587_v61 = vpop.f32.mrf.mxu3  ;;  %v9039_v58 = vshrl.u32 %v14917_v26, 16  ;;  %v9037_v26 = vrot.slane %v9035_v17, 5  ;;  %v9160_v37 = vunpack.c.l.b16 %v9014_v9 }
 0x4df   : > { %v9028_v57 = vrot.slane %v9026_v47, 4  ;;  %v7251_v11 = vadd.f32 %v15718_v32, %v15717_v35  ;;  %v15720_v32 = vld [vmem:[#allocation38_spill] sm:$0xff] }
 0x4e0   : > { %v15075_v5 = vadd.f32 %v8587_v61, %v8346_v18  ;;  %v9041_v18 = vrot.slane %v9039_v58, 4  ;;  %v11423_v61 = vld [vmem:[#allocation3 + $0x9c] sm:$0xff]  ;;  %v9045_v58 = vshll.u32 %v14939_v12, 16 }
 0x4e2   : > { %v9042_v29 = vor.u32 %v9041_v18, %v9037_v26  ;;  %v9063_v18 = vshrl.u32 %v14976_v49, 16 }
 0x4e4   : > { %v7876_v33 = vpop.f32.mrf.mxu1 }
 0x4e5   : > { %v8274_v23 = vpop.f32.mrf.mxu2  ;;  %v15083_v27 = vadd.f32 %v7876_v33, %v7250_v3  ;;  %v9032_v33 = vor.u32 %v9031_v38, %v9028_v57 }
 0x4e6   : > { %v8347_v41 = vadd.f32 %v8274_v23, %v14748_v4  ;;  %v8589_v21 = vpop.f32.mrf.mxu3  ;;  %v9181_v4 = vpack.c.b16 %v9161_v51, %v9160_v37  ;;  %v9043_v23 = vrot.slane %v9042_v29, 4  ;;  %v15719_v51 = vld [vmem:[#allocation52_spill] sm:$0xff] }
 0x4e7   : > { %9684 = vmatmul.bf16.vlgmr.msra.gmra.mxu1 %v15716_v28  ;;  %v9033_v9 = vrot.slane %v9032_v33, 4  ;;  %v7252_v47 = vadd.f32 %v14527_v40, %v15719_v51  ;;  %v8728_v28 = vld [vmem:[#allocation3 + $0xb4] sm:$0xf]  ;;  %v9069_v51 = vshll.u32 %v14985_v45, 16 }
 0x4e8   : > { %v15091_v36 = vadd.f32 %v8589_v21, %v8347_v41  ;;  %v15102_v41 = vpop.f32.mrf.mxu0  ;;  %v9047_v21 = vrot.slane %v9045_v58, 5  ;;  %v9050_v40 = vshrl.u32 %v8728_v28, 16  ;;  %v9053_v29 = vshll.u32 %v8728_v28, 16 }
 0x4e9   : > { %v9038_v57 = vsel %vm12014_vm2, %v9033_v9, %v9037_v26  ;;  %v7253_v26 = vadd.f32 %v14571_v46, %v14524_v10  ;;  %v9071_v28 = vrot.slane %v9069_v51, 5  ;;  %v9093_v51 = vshll.u32 %v15044_v22, 16 }
 0x4ea   : > { %8316 = vmatmul.bf16.gmra.mxu2 %v14801_v60  ;;  %v9048_v48 = vsel %vm12014_vm2, %v9043_v23, %v9047_v21  ;;  %v9052_v58 = vrot.slane %v9050_v40, 4  ;;  %v9055_v33 = vrot.slane %v9053_v29, 5 }
 0x4eb   : > { %8631 = vmatmul.bf16.gmra.mxu3 %v11423_v61  ;;  %v9163_v35 = vunpack.c.l.b16 %v9048_v48 }
 0x4ec   : > { %v7878_v53 = vpop.f32.mrf.mxu1 }
 0x4ed   : > { %9313 = vmatmul.bf16.gmra.mxu0 %v9181_v4  ;;  %v8277_v3 = vpop.f32.mrf.mxu2  ;;  %v15096_v1 = vadd.f32 %v7878_v53, %v7251_v11 }
 0x4ee   : > { %v8348_v14 = vadd.f32 %v8277_v3, %v14780_v16  ;;  %v8592_v17 = vpop.f32.mrf.mxu3  ;;  %v9059_v16 = vshll.u32 %v14976_v49, 16  ;;  %v9065_v3 = vrot.slane %v9063_v18, 4  ;;  %v11424_v49 = vld [vmem:[#allocation3 + $0xa8] sm:$0xff]  ;;  %v9087_v18 = vshrl.u32 %v15037_v13, 16 }
 0x4f0   : > { %v15100_v60 = vadd.f32 %v8592_v17, %v8348_v14  ;;  %v9061_v53 = vrot.slane %v9059_v16, 5  ;;  %v9162_v14 = vunpack.c.l.b16 %v9038_v57  ;;  %v15119_v17 = vpop.f32.mrf.mxu0  ;;  %v9083_v16 = vshll.u32 %v15037_v13, 16 }
 0x4f1   : > { %v9089_v13 = vrot.slane %v9087_v18, 4 }
 0x4f2   : > { %v9066_v23 = vor.u32 %v9065_v3, %v9061_v53  ;;  %v9085_v29 = vrot.slane %v9083_v16, 5  ;;  %v15722_v3 = vld [vmem:[#allocation41_spill] sm:$0xff]  ;;  %v9095_v16 = vrot.slane %v9093_v51, 5 }
 0x4f4   : > { %v7881_v12 = vpop.f32.mrf.mxu1  ;;  %v9067_v48 = vrot.slane %v9066_v23, 4  ;;  %v15724_v23 = vld [vmem:[#allocation58_spill] sm:$0xff] }
 0x4f5   : > { %v8279_v61 = vpop.f32.mrf.mxu2  ;;  %v15110_v37 = vadd.f32 %v7881_v12, %v7252_v47  ;;  %v9056_v47 = vor.u32 %v9055_v33, %v9052_v58  ;;  %v15721_v12 = vld [vmem:[#allocation55_spill] sm:$0xff]  ;;  %v9090_v58 = vor.u32 %v9089_v13, %v9085_v29  ;;  %v15723_v33 = vld [vmem:[#allocation54_spill] sm:$0xff]  ;;  %v15156_v13 = vld [vmem:[#allocation3 + $0xd0] sm:$0xf] }
 0x4f6   : > { %v8349_v4 = vadd.f32 %v8279_v61, %v14814_v39  ;;  %v8594_v38 = vpop.f32.mrf.mxu3  ;;  %v9182_v39 = vpack.c.b16 %v9163_v35, %v9162_v14  ;;  %v7254_v10 = vadd.f32 %v15721_v12, %v14550_v44  ;;  %v9072_v61 = vsel %vm12014_vm2, %v9067_v48, %v9071_v28  ;;  %v11425_v44 = vld [vmem:[#allocation3 + $0xb4] sm:$0xff] }
 0x4f7   : > { %9689 = vmatmul.bf16.gmra.mxu1 %v15720_v32  ;;  %v9057_v46 = vrot.slane %v9056_v47, 4  ;;  %v9165_v40 = vunpack.c.l.b16 %v9072_v61  ;;  %v15725_v12 = vld [vmem:[#allocation57_spill] sm:$0xff] }
 0x4f8   : > { %v15116_v11 = vadd.f32 %v8594_v38, %v8349_v4  ;;  %v15132_v4 = vpop.f32.mrf.mxu0 }
 0x4f9   : > { %v9062_v45 = vsel %vm12014_vm2, %v9057_v46, %v9061_v53 }
 0x4fa   : > { %8321 = vmatmul.bf16.gmra.mxu2 %v14871_v59  ;;  %v8731_v59 = vld [vmem:[#allocation3 + $0xc0] sm:$0xf] }
 0x4fb   : > { %8636 = vmatmul.bf16.gmra.mxu3 %v11424_v49  ;;  %v9074_v35 = vshrl.u32 %v8731_v59, 16  ;;  %v9077_v32 = vshll.u32 %v8731_v59, 16  ;;  %v9164_v49 = vunpack.c.l.b16 %v9062_v45  ;;  %v9091_v59 = vrot.slane %v9090_v58, 4 }
 0x4fc   : > { %v7883_v21 = vpop.f32.mrf.mxu1 }
 0x4fd   : > { %9318 = vmatmul.bf16.gmra.mxu0 %v9182_v39  ;;  %v15123_v9 = vadd.f32 %v7883_v21, %v7253_v26  ;;  %v9183_v14 = vpack.c.b16 %v9165_v40, %v9164_v49  ;;  %v9076_v39 = vrot.slane %v9074_v35, 4  ;;  %v9079_v26 = vrot.slane %v9077_v32, 5  ;;  %v15727_v35 = vld [vmem:[#allocation46_spill] sm:$0xff]  ;;  %v8734_v32 = vld [vmem:[#allocation3 + $0xcc] sm:$0xf]  ;;  %v11426_v49 = vld [vmem:[#allocation3 + $0xc0] sm:$0xff] }
 0x4fe   : > { %v7255_v21 = vadd.f32 %v15724_v23, %v15723_v33  ;;  %v9096_v18 = vsel %vm12014_vm2, %v9091_v59, %v9095_v16  ;;  %v15729_v59 = vld [vmem:[#allocation21_spill] sm:$0xff] }
 0x4ff   : > { %v9080_v28 = vor.u32 %v9079_v26, %v9076_v39  ;;  %v9167_v22 = vunpack.c.l.b16 %v9096_v18  ;;  %v9101_v39 = vshll.u32 %v8734_v32, 16  ;;  %v9107_v26 = vshll.u32 %v15156_v13, 16 }
 0x500   : > { %v15145_v48 = vpop.f32.mrf.mxu0 }
 0x504   : > { %v7886_v57 = vpop.f32.mrf.mxu1 }
 0x505   : > { %v15134_v38 = vadd.f32 %v7886_v57, %v7254_v10  ;;  %v15726_v10 = vld [vmem:[#allocation24_spill] sm:$0xff] }
 0x506   : > { %v7256_v46 = vadd.f32 %v15726_v10, %v15725_v12 }
 0x507   : > { %9694 = vmatmul.bf16.gmra.mxu1 %v15722_v3  ;;  %v15158_v3 = vld [vmem:[#allocation3 + $0xd4] sm:$0x1] }
 0x508   : > { %v9117_v33 = vshll.u32 %v15158_v3, 16 }
 0x50a   : > { %8326 = vmatmul.bf16.gmra.mxu2 %v14949_v52  ;;  %v9081_v52 = vrot.slane %v9080_v28, 4  ;;  %v15728_v28 = vld [vmem:[#allocation59_spill] sm:$0xff] }
 0x50b   : > { %8641 = vmatmul.bf16.gmra.mxu3 %v11425_v44  ;;  %v15160_v44 = vpop.f32.mrf.mxu0  ;;  %v7257_v16 = vadd.f32 %v15729_v59, %v15728_v28  ;;  %v15734_v59 = vld [vmem:[#allocation30_spill] sm:$0xff] }
 0x50c   : > { %v7888_v53 = vpop.f32.mrf.mxu1  ;;  %v9086_v57 = vsel %vm12014_vm2, %v9081_v52, %v9085_v29  ;;  %v9111_v29 = vshrl.u32 %v15156_v13, 16 }
 0x50d   : > { %9323 = vmatmul.bf16.gmra.mxu0 %v9183_v14  ;;  %v15143_v47 = vadd.f32 %v7888_v53, %v7255_v21  ;;  %v9166_v40 = vunpack.c.l.b16 %v9086_v57  ;;  %v9098_v14 = vshrl.u32 %v8734_v32, 16  ;;  %v9103_v21 = vrot.slane %v9101_v39, 5  ;;  %v15731_v32 = vld [vmem:[#allocation28_spill] sm:$0xff] }
 0x50e   : > { %v9109_v53 = vrot.slane %v9107_v26, 5  ;;  %v9113_v51 = vrot.slane %v9111_v29, 4 }
 0x50f   : > { %v9184_v58 = vpack.c.b16 %v9167_v22, %v9166_v40  ;;  %v9100_v23 = vrot.slane %v9098_v14, 4  ;;  %v15730_v40 = vld [vmem:[#allocation25_spill] sm:$0xff] }
 0x510   : > { %v9114_v12 = vor.u32 %v9113_v51, %v9109_v53 }
 0x511   : > { %v9104_v18 = vor.u32 %v9103_v21, %v9100_v23  ;;  %v15733_v21 = vld [vmem:[#allocation26_spill] sm:$0xff] }
 0x512   : > { %v7259_v30 = vadd.f32 %v14824_v15, %v15733_v21  ;;  %v15737_v15 = vld [vmem:[#allocation17_spill] sm:$0xff] }
 0x514   : > { %v7891_v61 = vpop.f32.mrf.mxu1 }
 0x515   : > { %v15153_v45 = vadd.f32 %v7891_v61, %v7256_v46  ;;  %v9119_v46 = vrot.slane %v9117_v33, 5  ;;  %v9105_v61 = vrot.slane %v9104_v18, 4  ;;  %v15732_v33 = vld [vmem:[#allocation50_spill] sm:$0xff] }
 0x517   : > { %9699 = vmatmul.bf16.gmra.mxu1 %v15727_v35  ;;  %v9110_v57 = vsel %vm12014_vm2, %v9105_v61, %v9109_v53  ;;  %v15174_v35 = vpop.f32.mrf.mxu0 }
 0x518   : > { %v9168_v39 = vunpack.c.l.b16 %v9110_v57  ;;  %v7262_v57 = vadd.f32 %v15737_v15, %v14826_v6  ;;  %v15741_v6 = vld [vmem:[#allocation23_spill] sm:$0xff]  ;;  %v9340_v15 = vadd.f32 %v15102_v41, %v15002_v8  ;;  %v9341_v8 = vadd.f32 %v15119_v17, %v15025_v63 }
 0x519   : > { %v9342_v63 = vadd.f32 %v15132_v4, %v15056_v62  ;;  %v11518_v4 = vld [vmem:[%s11981_s13 + $0x10] sm:$0xff]  }
 0x51a   : > { %8331 = vmatmul.bf16.gmra.mxu2 %v15014_v56  ;;  %v9115_v56 = vrot.slane %v9114_v12, 4  ;;  %v15735_v12 = vld [vmem:[#allocation53_spill] sm:$0xff] }
 0x51b   : > { %8646 = vmatmul.bf16.gmra.mxu3 %v11426_v49  ;;  %v7258_v49 = vadd.f32 %v15731_v32, %v15730_v40  ;;  %v15738_v32 = vld [vmem:[#allocation56_spill] sm:$0xff] }
 0x51c   : > { %v7893_v52 = vpop.f32.mrf.mxu1  ;;  %v9120_v22 = vsel %vm12014_vm2, %v9115_v56, %v9119_v46  ;;  %v15736_v46 = vld [vmem:[#allocation29_spill] sm:$0xff] }
 0x51d   : > { %9328 = vmatmul.bf16.gmra.mxu0 %v9184_v58  ;;  %v15168_v10 = vadd.f32 %v7893_v52, %v7257_v16  ;;  %v9169_v26 = vunpack.c.l.b16 %v9120_v22  ;;  %v11427_v58 = vld [vmem:[#allocation3 + $0xcc] sm:$0xff]  ;;  %v7260_v16 = vadd.f32 %v14856_v50, %v15734_v59  ;;  %v15220_v59 = vld [vmem:[%s15516_s5] ss:$0 sm:$0xff] }
 0x51e   : > { %v15739_v50 = vld [vmem:[#allocation33_spill] sm:$0xff] }
 0x51f   : > { %v9185_v23 = vpack.c.b16 %v9169_v26, %v9168_v39  ;;  %v15184_v53 = vpop.f32.mrf.mxu0  ;;  %v15740_v26 = vld [vmem:[#allocation32_spill] sm:$0xff] }
 0x524   : > { %v7896_v14 = vpop.f32.mrf.mxu1 }
 0x525   : > { %v15178_v29 = vadd.f32 %v7896_v14, %v7258_v49  ;;  %v7263_v49 = vadd.f32 %v15000_v55, %v15739_v50  ;;  %v9339_v55 = vadd.f32 %v15088_v2, %v14969_v7  ;;  %v15232_v2 = vpop.f32.mrf.mxu2 }
 0x527   : > { %9704 = vmatmul.bf16.gmra.mxu1 %v15732_v33 }
 0x52a   : > { %8336 = vmatmul.bf16.gmra.mxu2 %v15063_v0  ;;  %v7261_v0 = vadd.f32 %v14899_v54, %v15736_v46  ;;  %v7264_v54 = vadd.f32 %v15032_v19, %v15740_v26 }
 0x52b   : > { %8651 = vmatmul.bf16.gmra.mxu3 %v11427_v58 }
 0x52c   : > { %v7898_v51 = vpop.f32.mrf.mxu1 }
 0x52d   : > { %9333 = vmatmul.bf16.gmra.mxu0 %v9185_v23  ;;  %v15186_v28 = vadd.f32 %v7898_v51, %v7259_v30  ;;  %v15742_v23 = vld [vmem:[#allocation16_spill] sm:$0xff]  ;;  %v15247_v41 = vpop.f32.mrf.mxu2 }
 0x52e   : > { %v7265_v21 = vadd.f32 %v15065_v25, %v15742_v23  ;;  %v11517_v23 = vld [vmem:[%s11981_s13 + $0x8] sm:$0xff]  }
 0x534   : > { %v7901_v52 = vpop.f32.mrf.mxu1 }
 0x535   : > { %v15190_v18 = vadd.f32 %v7901_v52, %v7260_v16  ;;  %v11454_v16 = vld [vmem:[%s11981_s13] sm:$0xff]  }
 0x536   : > { %v11455_v46 = vunpack.c.l.bf16 %v11454_v16 }
 0x537   : > { %9709 = vmatmul.bf16.gmra.mxu1 %v15735_v12  ;;  %v15226_v12 = vld [vmem:[%s15517_s6] ss:$0 sm:$0xff] }
 0x53c   : > { %v7903_v61 = vpop.f32.mrf.mxu1 }
 0x53d   : > { %v15195_v56 = vadd.f32 %v7903_v61, %v7261_v0  ;;  %v15743_v0 = vld [vmem:[#allocation18_spill] sm:$0xff] }
 0x544   : > { %v7906_v22 = vpop.f32.mrf.mxu1 }
 0x545   : > { %v15199_v40 = vadd.f32 %v7906_v22, %v7262_v57 }
 0x547   : > { %9714 = vmatmul.bf16.gmra.mxu1 %v15738_v32 }
 0x54c   : > { %v7908_v14 = vpop.f32.mrf.mxu1 }
 0x54d   : > { %v15204_v39 = vadd.f32 %v7908_v14, %v7263_v49  ;;  %v11456_v49 = vunpack.c.h.bf16 %v11454_v16  ;;  %v15240_v14 = vpop.f32.mrf.mxu3  ;;  %v15744_v16 = vld [vmem:[#allocation27_spill] sm:$0xff] }
 0x554   : > { %v7911_v58 = vpop.f32.mrf.mxu1 }
 0x555   : > { %v15208_v33 = vadd.f32 %v7911_v58, %v7264_v54  ;;  %v15243_v54 = vpop.f32.mrf.mxu0 }
 0x557   : > { %9719 = vmatmul.bf16.gmra.mxu1 %v15741_v6 }
 0x55c   : > { %v7913_v30 = vpop.f32.mrf.mxu1 }
 0x55d   : > { %v15213_v51 = vadd.f32 %v7913_v30, %v7265_v21 }
 0x564   : > { %v9685_v19 = vpop.f32.mrf.mxu1 }
 0x565   : > { %v9765_v52 = vadd.f32 %v9685_v19, %v9339_v55  ;;  %v11459_v19 = vunpack.c.l.bf16 %v11517_v23 }
 0x567   : > { %v9801_v25 = vmul.f32 %v15220_v59, %v9765_v52  ;;  %9724 = vmatmul.bf16.gmra.mxu1 %v15743_v0  ;;  %v15258_v0 = vpop.f32.mrf.mxu0 }
 0x569   : > { %v9837_v7 = vadd.f32 %v15226_v12, %v9801_v25  ;;  %v15254_v25 = vpop.f32.mrf.mxu3 }
 0x56b   : > { %v9933_v61 = vadd.f32 %v11455_v46, %v9837_v7 }
 0x56c   : > { %v9687_v57 = vpop.f32.mrf.mxu1 }
 0x56d   : > { %v9965_v22 = vmax.f32 %v9933_v61, 0.0  ;;  %v9766_v32 = vadd.f32 %v9687_v57, %v9340_v15  ;;  %v15260_v15 = vpop.f32.mrf.mxu2 }
 0x56f   : > { %9997 = vst [vmem:[%s15236_s29] sm:$0xff] %v9965_v22  ;;  %v9802_v50 = vmul.f32 %v15220_v59, %v9766_v32  ;;  %v11460_v22 = vunpack.c.h.bf16 %v11517_v23  ;;  %v15745_v23 = vld [vmem:[#allocation31_spill] sm:$0xff] }
 0x571   : > { %v9838_v26 = vadd.f32 %v15226_v12, %v9802_v50 }
 0x573   : > { %v9934_v58 = vadd.f32 %v11456_v49, %v9838_v26  ;;  %v9343_v49 = vadd.f32 %v15145_v48, %v15075_v5  ;;  %v15267_v26 = vpop.f32.mrf.mxu3  ;;  %v9344_v48 = vadd.f32 %v15160_v44, %v15091_v36  ;;  %v9345_v36 = vadd.f32 %v15174_v35, %v15100_v60 }
 0x574   : > { %v9690_v6 = vpop.f32.mrf.mxu1  ;;  %v9346_v35 = vadd.f32 %v15184_v53, %v15116_v11 }
 0x575   : > { %v9966_v21 = vmax.f32 %v9934_v58, 0.0  ;;  %v9767_v30 = vadd.f32 %v9690_v6, %v9341_v8  ;;  %v15270_v6 = vpop.f32.mrf.mxu0 }
 0x577   : > { %9998 = vst [vmem:[%s15236_s29 + $0x8] sm:$0xff] %v9966_v21  ;;  %v9803_v55 = vmul.f32 %v15220_v59, %v9767_v30  ;;  %9729 = vmatmul.bf16.gmra.mxu1 %v15744_v16  ;;  %v11463_v30 = vunpack.c.l.bf16 %v11518_v4 }
 0x579   : > { %v9839_v52 = vadd.f32 %v15226_v12, %v9803_v55  ;;  %v15275_v55 = vpop.f32.mrf.mxu2 }
 0x57b   : > { %v9935_v46 = vadd.f32 %v11459_v19, %v9839_v52 }
 0x57c   : > { %v9692_v17 = vpop.f32.mrf.mxu1 }
 0x57d   : > { %v9967_v7 = vmax.f32 %v9935_v46, 0.0  ;;  %v9768_v61 = vadd.f32 %v9692_v17, %v9342_v63  ;;  %v15280_v63 = vpop.f32.mrf.mxu3 }
 0x57f   : > { %9999 = vst [vmem:[%s15236_s29 + $0x10] sm:$0xff] %v9967_v7  ;;  %v9804_v57 = vmul.f32 %v15220_v59, %v9768_v61  ;;  %v11464_v7 = vunpack.c.h.bf16 %v11518_v4  ;;  %v15284_v61 = vpop.f32.mrf.mxu0  ;;  %v15746_v4 = vld [vmem:[#allocation20_spill] sm:$0xff] }
 0x581   : > { %v9840_v32 = vadd.f32 %v15226_v12, %v9804_v57 }
 0x583   : > { %v9936_v50 = vadd.f32 %v11460_v22, %v9840_v32  ;;  %v15287_v22 = vpop.f32.mrf.mxu2 }
 0x584   : > { %v9695_v62 = vpop.f32.mrf.mxu1 }
 0x585   : > { %v9968_v58 = vmax.f32 %v9936_v50, 0.0  ;;  %v9769_v8 = vadd.f32 %v9695_v62, %v9343_v49  ;;  %v11519_v50 = vld [vmem:[%s11981_s13 + $0x18] sm:$0xff]  }
 0x587   : > { %10000 = vst [vmem:[%s15236_s29 + $0x18] sm:$0xff] %v9968_v58  ;;  %v9805_v21 = vmul.f32 %v15220_v59, %v9769_v8  ;;  %9734 = vmatmul.bf16.gmra.mxu1 %v15745_v23  ;;  %v11467_v8 = vunpack.c.l.bf16 %v11519_v50  ;;  %v15747_v23 = vld [vmem:[#allocation14_spill] sm:$0xff] }
 0x589   : > { %v9841_v19 = vadd.f32 %v15226_v12, %v9805_v21  ;;  %v15295_v21 = vpop.f32.mrf.mxu3 }
 0x58b   : > { %v9937_v5 = vadd.f32 %v11463_v30, %v9841_v19  ;;  %v8350_v19 = vadd.f32 %v15232_v2, %v15747_v23 }
 0x58c   : > { %v9697_v16 = vpop.f32.mrf.mxu1 }
 0x58d   : > { %v9969_v52 = vmax.f32 %v9937_v5, 0.0  ;;  %v9770_v46 = vadd.f32 %v9697_v16, %v9344_v48  ;;  %v15300_v5 = vpop.f32.mrf.mxu0  ;;  %v15304_v48 = vpop.f32.mrf.mxu2 }
 0x58f   : > { %10001 = vst [vmem:[%s15236_s29 + $0x20] sm:$0xff] %v9969_v52  ;;  %v9806_v17 = vmul.f32 %v15220_v59, %v9770_v46 }
 0x591   : > { %v9842_v57 = vadd.f32 %v15226_v12, %v9806_v17  ;;  %v8665_v17 = vadd.f32 %v15240_v14, %v8350_v19  ;;  %v15749_v19 = vld [vmem:[#allocation19_spill] sm:$0xff] }
 0x593   : > { %v9938_v32 = vadd.f32 %v11464_v7, %v9842_v57  ;;  %v11468_v57 = vunpack.c.h.bf16 %v11519_v50  ;;  %v9347_v53 = vadd.f32 %v15243_v54, %v8665_v17  ;;  %v15750_v54 = vld [vmem:[#allocation15_spill] sm:$0xff] }
 0x594   : > { %v9700_v44 = vpop.f32.mrf.mxu1 }
 0x595   : > { %v9970_v49 = vmax.f32 %v9938_v32, 0.0  ;;  %v9771_v62 = vadd.f32 %v9700_v44, %v9345_v36  ;;  %v15310_v32 = vpop.f32.mrf.mxu3  ;;  %v15748_v36 = vld [vmem:[#allocation34_spill] sm:$0xff] }
 0x596   : > { %v8351_v44 = vadd.f32 %v15247_v41, %v15748_v36 }
 0x597   : > { %10002 = vst [vmem:[%s15236_s29 + $0x28] sm:$0xff] %v9970_v49  ;;  %v9807_v58 = vmul.f32 %v15220_v59, %v9771_v62  ;;  %9739 = vmatmul.bf16.gmra.mxu1 %v15746_v4  ;;  %v11520_v62 = vld [vmem:[%s11981_s13 + $0x20] sm:$0xff]   ;;  %v15318_v4 = vpop.f32.mrf.mxu2 }
 0x598   : > { %v8666_v50 = vadd.f32 %v15254_v25, %v8351_v44  ;;  %v11471_v23 = vunpack.c.l.bf16 %v11520_v62  ;;  %v11472_v36 = vunpack.c.h.bf16 %v11520_v62 }
 0x599   : > { %v9843_v30 = vadd.f32 %v15226_v12, %v9807_v58  ;;  %v15316_v58 = vpop.f32.mrf.mxu0 }
 0x59b   : > { %v9939_v60 = vadd.f32 %v11467_v8, %v9843_v30 }
 0x59c   : > { %v9702_v16 = vpop.f32.mrf.mxu1 }
 0x59d   : > { %v9971_v52 = vmax.f32 %v9939_v60, 0.0  ;;  %v9772_v46 = vadd.f32 %v9702_v16, %v9346_v35  ;;  %v8352_v60 = vadd.f32 %v15260_v15, %v15750_v54  ;;  %v9348_v16 = vadd.f32 %v15258_v0, %v8666_v50  ;;  %v15751_v0 = vld [vmem:[#allocation35_spill] sm:$0xff]  ;;  %v15752_v54 = vld [vmem:[#allocation37_spill] sm:$0xff] }
 0x59f   : > { %10003 = vst [vmem:[%s15236_s29 + $0x30] sm:$0xff] %v9971_v52  ;;  %v9808_v7 = vmul.f32 %v15220_v59, %v9772_v46  ;;  %v15328_v52 = vpop.f32.mrf.mxu3  ;;  %v15335_v44 = vpop.f32.mrf.mxu2 }
 0x5a0   : > { %v8357_v34 = vadd.f32 %v15335_v44, %v15071_v24 }
 0x5a1   : > { %v9844_v2 = vadd.f32 %v15226_v12, %v9808_v7  ;;  %v8667_v7 = vadd.f32 %v15267_v26, %v8352_v60  ;;  %v8354_v60 = vadd.f32 %v15287_v22, %v15752_v54  ;;  %v8355_v22 = vadd.f32 %v15304_v48, %v15020_v43 }
 0x5a3   : > { %v9940_v11 = vadd.f32 %v11468_v57, %v9844_v2  ;;  %v15331_v57 = vpop.f32.mrf.mxu0 }
 0x5a4   : > { %v9705_v49 = vpop.f32.mrf.mxu1 }
 0x5a5   : > { %v9972_v14 = vmax.f32 %v9940_v11, 0.0  ;;  %v9773_v8 = vadd.f32 %v9705_v49, %v9347_v53  ;;  %v8353_v11 = vadd.f32 %v15275_v55, %v15751_v0  ;;  %v9349_v49 = vadd.f32 %v15270_v6, %v8667_v7 }
 0x5a7   : > { %10004 = vst [vmem:[%s15236_s29 + $0x38] sm:$0xff] %v9972_v14  ;;  %v9809_v30 = vmul.f32 %v15220_v59, %v9773_v8  ;;  %9744 = vmatmul.bf16.gmra.mxu1 %v15749_v19  ;;  %v11521_v8 = vld [vmem:[%s11981_s13 + $0x28] sm:$0xff]   ;;  %v15351_v6 = vpop.f32.mrf.mxu2 }
 0x5a8   : > { %v11475_v19 = vunpack.c.l.bf16 %v11521_v8  ;;  %v11476_v7 = vunpack.c.h.bf16 %v11521_v8 }
 0x5a9   : > { %v9845_v41 = vadd.f32 %v15226_v12, %v9809_v30  ;;  %v15342_v30 = vpop.f32.mrf.mxu3 }
 0x5ab   : > { %v9941_v35 = vadd.f32 %v11471_v23, %v9845_v41  ;;  %v8668_v23 = vadd.f32 %v15280_v63, %v8353_v11  ;;  %v15348_v41 = vpop.f32.mrf.mxu0 }
 0x5ac   : > { %v9707_v46 = vpop.f32.mrf.mxu1 }
 0x5ad   : > { %v9973_v17 = vmax.f32 %v9941_v35, 0.0  ;;  %v9774_v25 = vadd.f32 %v9707_v46, %v9348_v16  ;;  %v9350_v16 = vadd.f32 %v15284_v61, %v8668_v23 }
 0x5af   : > { %10005 = vst [vmem:[%s15236_s29 + $0x40] sm:$0xff] %v9973_v17  ;;  %v9810_v2 = vmul.f32 %v15220_v59, %v9774_v25  ;;  %v8669_v25 = vadd.f32 %v15295_v21, %v8354_v60  ;;  %v15367_v11 = vpop.f32.mrf.mxu2 }
 0x5b1   : > { %v9846_v15 = vadd.f32 %v15226_v12, %v9810_v2  ;;  %v15359_v2 = vpop.f32.mrf.mxu3  ;;  %v9351_v0 = vadd.f32 %v15300_v5, %v8669_v25 }
 0x5b3   : > { %v9942_v53 = vadd.f32 %v11472_v36, %v9846_v15  ;;  %v15364_v15 = vpop.f32.mrf.mxu0 }
 0x5b4   : > { %v9710_v14 = vpop.f32.mrf.mxu1 }
 0x5b5   : > { %v9974_v26 = vmax.f32 %v9942_v53, 0.0  ;;  %v9775_v50 = vadd.f32 %v9710_v14, %v9349_v49  ;;  %v11522_v53 = vld [vmem:[%s11981_s13 + $0x30] sm:$0xff]   ;;  %v9542_v49 = vrot.slane %v15156_v13, 5  ;;  %v8356_v13 = vadd.f32 %v15318_v4, %v15048_v31 }
 0x5b6   : > { %v11479_v43 = vunpack.c.l.bf16 %v11522_v53  ;;  %v11480_v4 = vunpack.c.h.bf16 %v11522_v53 }
 0x5b7   : > { %10006 = vst [vmem:[%s15236_s29 + $0x48] sm:$0xff] %v9974_v26  ;;  %v9811_v62 = vmul.f32 %v15220_v59, %v9775_v50  ;;  %9749 = vmatmul.bf16.gmra.mxu1 %v15018_v42  ;;  %v9386_v26 = vld [vmem:[#allocation3 + $0xcc] sm:$0xe]  ;;  %v8670_v50 = vadd.f32 %v15310_v32, %v8355_v22  ;;  %v9544_v5 = vrot.slane %v9542_v49, 4 }
 0x5b8   : > { %v11173_v48 = vrot.slane %v9386_v26, 9 }
 0x5b9   : > { %v9847_v55 = vadd.f32 %v15226_v12, %v9811_v62  ;;  %v9545_v62 = vrot.slane %v15158_v3, 5  ;;  %v9352_v32 = vadd.f32 %v15316_v58, %v8670_v50 }
 0x5bb   : > { %v9943_v35 = vadd.f32 %v11475_v19, %v9847_v55  ;;  %v8619_v55 = vpop.f32.mrf.mxu3 }
 0x5bc   : > { %v9712_v63 = vpop.f32.mrf.mxu1 }
 0x5bd   : > { %v9975_v46 = vmax.f32 %v9943_v35, 0.0  ;;  %v9776_v17 = vadd.f32 %v9712_v63, %v9350_v16  ;;  %v9543_v35 = vsel %vm12391_vm13, %v11173_v48, %v9542_v49  ;;  %v9301_v16 = vpop.f32.mrf.mxu0 }
 0x5be   : > { %v9594_v58 = vunpack.c.l.b16 %v9543_v35 }
 0x5bf   : > { %10007 = vst [vmem:[%s15236_s29 + $0x50] sm:$0xff] %v9975_v46  ;;  %v9812_v42 = vmul.f32 %v15220_v59, %v9776_v17  ;;  %v8671_v46 = vadd.f32 %v15328_v52, %v8356_v13  ;;  %v8307_v17 = vpop.f32.mrf.mxu2  ;;  %v11523_v52 = vld [vmem:[%s11981_s13 + $0x38] sm:$0xff]  }
 0x5c0   : > { %v11483_v26 = vunpack.c.l.bf16 %v11523_v52  ;;  %v11484_v13 = vunpack.c.h.bf16 %v11523_v52 }
 0x5c1   : > { %v9848_v36 = vadd.f32 %v15226_v12, %v9812_v42 }
 0x5c3   : > { %v9944_v61 = vadd.f32 %v11476_v7, %v9848_v36  ;;  %v9353_v36 = vadd.f32 %v15331_v57, %v8671_v46  ;;  %v8358_v57 = vadd.f32 %v15351_v6, %v15083_v27  ;;  %v8359_v27 = vadd.f32 %v15367_v11, %v15096_v1 }
 0x5c4   : > { %v9715_v21 = vpop.f32.mrf.mxu1 }
 0x5c5   : > { %v9976_v14 = vmax.f32 %v9944_v61, 0.0  ;;  %v9777_v8 = vadd.f32 %v9715_v21, %v9351_v0  ;;  %v8622_v61 = vpop.f32.mrf.mxu3  ;;  %v9304_v53 = vpop.f32.mrf.mxu0 }
 0x5c7   : > { %10008 = vst [vmem:[%s15236_s29 + $0x58] sm:$0xff] %v9976_v14  ;;  %v9813_v23 = vmul.f32 %v15220_v59, %v9777_v8  ;;  %9754 = vmatmul.bf16.gmra.mxu1 %v15069_v20  ;;  %v9546_v20 = vsel %vm12391_vm13, %v9544_v5, %v9545_v62  ;;  %v8672_v14 = vadd.f32 %v15342_v30, %v8357_v34  ;;  %v8309_v50 = vpop.f32.mrf.mxu2 }
 0x5c8   : > { %v9595_v25 = vunpack.c.l.b16 %v9546_v20  ;;  %v8673_v62 = vadd.f32 %v15359_v2, %v8358_v57  ;;  %v11524_v20 = vld [vmem:[%s11981_s13 + $0x40] sm:$0xff]   ;;  %v8674_v2 = vadd.f32 %v8619_v55, %v8359_v27 }
 0x5c9   : > { %v9849_v19 = vadd.f32 %v15226_v12, %v9813_v23  ;;  %v9354_v23 = vadd.f32 %v15348_v41, %v8672_v14 }
 0x5ca   : > { %v9611_v22 = vpack.c.b16 %v9595_v25, %v9594_v58  ;;  %v9355_v6 = vadd.f32 %v15364_v15, %v8673_v62  ;;  %v8360_v25 = vadd.f32 %v8307_v17, %v15110_v37  ;;  %v9356_v11 = vadd.f32 %v9301_v16, %v8674_v2 }
 0x5cb   : > { %v9945_v54 = vadd.f32 %v11479_v43, %v9849_v19 }
 0x5cc   : > { %v9717_v60 = vpop.f32.mrf.mxu1 }
 0x5cd   : > { %v9977_v63 = vmax.f32 %v9945_v54, 0.0  ;;  %v9778_v3 = vadd.f32 %v9717_v60, %v9352_v32  ;;  %v8624_v5 = vpop.f32.mrf.mxu3  ;;  %v9306_v54 = vpop.f32.mrf.mxu0 }
 0x5cf   : > { %10009 = vst [vmem:[%s15236_s29 + $0x60] sm:$0xff] %v9977_v63  ;;  %v9814_v31 = vmul.f32 %v15220_v59, %v9778_v3  ;;  %v8312_v60 = vpop.f32.mrf.mxu2 }
 0x5d1   : > { %v9850_v42 = vadd.f32 %v15226_v12, %v9814_v31  ;;  %v11487_v31 = vunpack.c.l.bf16 %v11524_v20 }
 0x5d3   : > { %v9946_v7 = vadd.f32 %v11480_v4, %v9850_v42 }
 0x5d4   : > { %v9720_v0 = vpop.f32.mrf.mxu1 }
 0x5d5   : > { %v9978_v21 = vmax.f32 %v9946_v7, 0.0  ;;  %v9779_v49 = vadd.f32 %v9720_v0, %v9353_v36  ;;  %v8627_v4 = vpop.f32.mrf.mxu3  ;;  %v9309_v42 = vpop.f32.mrf.mxu0  ;;  %v11488_v0 = vunpack.c.h.bf16 %v11524_v20  ;;  %v11526_v20 = vld [vmem:[%s11981_s13 + $0x50] sm:$0xff]  }
 0x5d7   : > { %10010 = vst [vmem:[%s15236_s29 + $0x68] sm:$0xff] %v9978_v21  ;;  %v9815_v8 = vmul.f32 %v15220_v59, %v9779_v49  ;;  %9759 = vmatmul.bf16.gmra.mxu1 %v9611_v22  ;;  %v8314_v15 = vpop.f32.mrf.mxu2  ;;  %v8675_v22 = vadd.f32 %v8622_v61, %v8360_v25  ;;  %v8361_v49 = vadd.f32 %v8309_v50, %v15123_v9 }
 0x5d9   : > { %v9851_v24 = vadd.f32 %v15226_v12, %v9815_v8  ;;  %v9357_v17 = vadd.f32 %v9304_v53, %v8675_v22  ;;  %v11525_v8 = vld [vmem:[%s11981_s13 + $0x48] sm:$0xff]   ;;  %v8676_v61 = vadd.f32 %v8624_v5, %v8361_v49 }
 0x5da   : > { %v11492_v27 = vunpack.c.h.bf16 %v11525_v8 }
 0x5db   : > { %v9947_v44 = vadd.f32 %v11483_v26, %v9851_v24  ;;  %v9358_v9 = vadd.f32 %v9306_v54, %v8676_v61 }
 0x5dc   : > { %v9722_v43 = vpop.f32.mrf.mxu1 }
 0x5dd   : > { %v9979_v48 = vmax.f32 %v9947_v44, 0.0  ;;  %v9780_v30 = vadd.f32 %v9722_v43, %v9354_v23  ;;  %v8629_v21 = vpop.f32.mrf.mxu3  ;;  %v9311_v16 = vpop.f32.mrf.mxu0  ;;  %v11491_v23 = vunpack.c.l.bf16 %v11525_v8  ;;  %v11527_v8 = vld [vmem:[%s11981_s13 + $0x58] sm:$0xff]  }
 0x5de   : > { %v11499_v61 = vunpack.c.l.bf16 %v11527_v8 }
 0x5df   : > { %10011 = vst [vmem:[%s15236_s29 + $0x70] sm:$0xff] %v9979_v48  ;;  %v9816_v19 = vmul.f32 %v15220_v59, %v9780_v30  ;;  %v8317_v57 = vpop.f32.mrf.mxu2  ;;  %v8362_v48 = vadd.f32 %v8312_v60, %v15134_v38 }
 0x5e1   : > { %v9852_v32 = vadd.f32 %v15226_v12, %v9816_v19 }
 0x5e3   : > { %v9948_v41 = vadd.f32 %v11484_v13, %v9852_v32  ;;  %v8677_v13 = vadd.f32 %v8627_v4, %v8362_v48  ;;  %v11495_v4 = vunpack.c.l.bf16 %v11526_v20 }
 0x5e4   : > { %v9725_v35 = vpop.f32.mrf.mxu1 }
 0x5e5   : > { %v9980_v63 = vmax.f32 %v9948_v41, 0.0  ;;  %v9781_v3 = vadd.f32 %v9725_v35, %v9355_v6  ;;  %v8632_v53 = vpop.f32.mrf.mxu3  ;;  %v9314_v32 = vpop.f32.mrf.mxu0  ;;  %v8363_v35 = vadd.f32 %v8314_v15, %v15143_v47  ;;  %v9359_v60 = vadd.f32 %v9309_v42, %v8677_v13 }
 0x5e7   : > { %10012 = vst [vmem:[%s15236_s29 + $0x78] sm:$0xff] %v9980_v63  ;;  %v9817_v46 = vmul.f32 %v15220_v59, %v9781_v3  ;;  %v8319_v41 = vpop.f32.mrf.mxu2 }
 0x5e9   : > { %v9853_v58 = vadd.f32 %v15226_v12, %v9817_v46  ;;  %v8678_v46 = vadd.f32 %v8629_v21, %v8363_v35  ;;  %v8365_v21 = vadd.f32 %v8319_v41, %v15168_v10 }
 0x5eb   : > { %v9949_v1 = vadd.f32 %v11487_v31, %v9853_v58  ;;  %v9360_v15 = vadd.f32 %v9311_v16, %v8678_v46 }
 0x5ec   : > { %v9727_v34 = vpop.f32.mrf.mxu1 }
 0x5ed   : > { %v9981_v7 = vmax.f32 %v9949_v1, 0.0  ;;  %v9782_v36 = vadd.f32 %v9727_v34, %v9356_v11  ;;  %v8634_v2 = vpop.f32.mrf.mxu3  ;;  %v9316_v58 = vpop.f32.mrf.mxu0  ;;  %v8364_v11 = vadd.f32 %v8317_v57, %v15153_v45 }
 0x5ef   : > { %10013 = vst [vmem:[%s15236_s29 + $0x80] sm:$0xff] %v9981_v7  ;;  %v9818_v55 = vmul.f32 %v15220_v59, %v9782_v36  ;;  %v8322_v1 = vpop.f32.mrf.mxu2  ;;  %v8679_v36 = vadd.f32 %v8632_v53, %v8364_v11 }
 0x5f1   : > { %v9854_v52 = vadd.f32 %v15226_v12, %v9818_v55  ;;  %v11496_v55 = vunpack.c.h.bf16 %v11526_v20  ;;  %v9361_v45 = vadd.f32 %v9314_v32, %v8679_v36  ;;  %v11500_v32 = vunpack.c.h.bf16 %v11527_v8 }
 0x5f3   : > { %v9950_v37 = vadd.f32 %v11488_v0, %v9854_v52 }
 0x5f4   : > { %v9730_v14 = vpop.f32.mrf.mxu1 }
 0x5f5   : > { %v9982_v26 = vmax.f32 %v9950_v37, 0.0  ;;  %v9783_v24 = vadd.f32 %v9730_v14, %v9357_v17  ;;  %v8637_v0 = vpop.f32.mrf.mxu3  ;;  %v9319_v49 = vpop.f32.mrf.mxu0 }
 0x5f7   : > { %10014 = vst [vmem:[%s15236_s29 + $0x88] sm:$0xff] %v9982_v26  ;;  %v9819_v44 = vmul.f32 %v15220_v59, %v9783_v24  ;;  %v8324_v17 = vpop.f32.mrf.mxu2  ;;  %v8680_v24 = vadd.f32 %v8634_v2, %v8365_v21  ;;  %v11529_v21 = vld [vmem:[%s11981_s13 + $0x68] sm:$0xff]  }
 0x5f9   : > { %v9855_v43 = vadd.f32 %v15226_v12, %v9819_v44  ;;  %v9362_v48 = vadd.f32 %v9316_v58, %v8680_v24 }
 0x5fb   : > { %v9951_v30 = vadd.f32 %v11491_v23, %v9855_v43  ;;  %v8366_v43 = vadd.f32 %v8322_v1, %v15178_v29 }
 0x5fc   : > { %v9732_v50 = vpop.f32.mrf.mxu1 }
 0x5fd   : > { %v9983_v62 = vmax.f32 %v9951_v30, 0.0  ;;  %v9784_v19 = vadd.f32 %v9732_v50, %v9358_v9  ;;  %v8639_v23 = vpop.f32.mrf.mxu3  ;;  %v9321_v9 = vpop.f32.mrf.mxu0 }
 0x5ff   : > { %10015 = vst [vmem:[%s15236_s29 + $0x90] sm:$0xff] %v9983_v62  ;;  %v9820_v5 = vmul.f32 %v15220_v59, %v9784_v19  ;;  %v8327_v62 = vpop.f32.mrf.mxu2  ;;  %v8681_v19 = vadd.f32 %v8637_v0, %v8366_v43 }
 0x601   : > { %v9856_v6 = vadd.f32 %v15226_v12, %v9820_v5  ;;  %v9363_v29 = vadd.f32 %v9319_v49, %v8681_v19 }
 0x603   : > { %v9952_v38 = vadd.f32 %v11492_v27, %v9856_v6  ;;  %v8367_v27 = vadd.f32 %v8324_v17, %v15186_v28 }
 0x604   : > { %v9735_v54 = vpop.f32.mrf.mxu1 }
 0x605   : > { %v9984_v63 = vmax.f32 %v9952_v38, 0.0  ;;  %v9785_v3 = vadd.f32 %v9735_v54, %v9359_v60  ;;  %v8642_v6 = vpop.f32.mrf.mxu3  ;;  %v11528_v38 = vld [vmem:[%s11981_s13 + $0x60] sm:$0xff]   ;;  %v8682_v20 = vadd.f32 %v8639_v23, %v8367_v27 }
 0x606   : > { %v11503_v2 = vunpack.c.l.bf16 %v11528_v38 }
 0x607   : > { %10016 = vst [vmem:[%s15236_s29 + $0x98] sm:$0xff] %v9984_v63  ;;  %v9821_v31 = vmul.f32 %v15220_v59, %v9785_v3  ;;  %v9324_v63 = vpop.f32.mrf.mxu0  ;;  %v8329_v46 = vpop.f32.mrf.mxu2  ;;  %v9364_v58 = vadd.f32 %v9321_v9, %v8682_v20 }
 0x609   : > { %v9857_v25 = vadd.f32 %v15226_v12, %v9821_v31 }
 0x60b   : > { %v9953_v47 = vadd.f32 %v11495_v4, %v9857_v25  ;;  %v8368_v4 = vadd.f32 %v8327_v62, %v15190_v18 }
 0x60c   : > { %v9737_v42 = vpop.f32.mrf.mxu1 }
 0x60d   : > { %v9985_v34 = vmax.f32 %v9953_v47, 0.0  ;;  %v9786_v7 = vadd.f32 %v9737_v42, %v9360_v15  ;;  %v8644_v47 = vpop.f32.mrf.mxu3  ;;  %v8683_v15 = vadd.f32 %v8642_v6, %v8368_v4 }
 0x60f   : > { %10017 = vst [vmem:[%s15236_s29 + $0xa0] sm:$0xff] %v9985_v34  ;;  %v9822_v22 = vmul.f32 %v15220_v59, %v9786_v7  ;;  %v11504_v34 = vunpack.c.h.bf16 %v11528_v38  ;;  %v9326_v7 = vpop.f32.mrf.mxu0  ;;  %v9365_v0 = vadd.f32 %v9324_v63, %v8683_v15 }
 0x611   : > { %v9858_v52 = vadd.f32 %v15226_v12, %v9822_v22  ;;  %v8332_v22 = vpop.f32.mrf.mxu2 }
 0x612   : > { %v8370_v24 = vadd.f32 %v8332_v22, %v15199_v40 }
 0x613   : > { %v9954_v37 = vadd.f32 %v11496_v55, %v9858_v52  ;;  %v8369_v55 = vadd.f32 %v8329_v46, %v15195_v56 }
 0x614   : > { %v9740_v14 = vpop.f32.mrf.mxu1 }
 0x615   : > { %v9986_v16 = vmax.f32 %v9954_v37, 0.0  ;;  %v9787_v26 = vadd.f32 %v9740_v14, %v9361_v45  ;;  %v8684_v45 = vadd.f32 %v8644_v47, %v8369_v55  ;;  %v11507_v14 = vunpack.c.l.bf16 %v11529_v21  ;;  %v8647_v8 = vpop.f32.mrf.mxu3 }
 0x617   : > { %10018 = vst [vmem:[%s15236_s29 + $0xa8] sm:$0xff] %v9986_v16  ;;  %v9823_v57 = vmul.f32 %v15220_v59, %v9787_v26  ;;  %v9329_v26 = vpop.f32.mrf.mxu0  ;;  %v9366_v56 = vadd.f32 %v9326_v7, %v8684_v45 }
 0x619   : > { %v9859_v44 = vadd.f32 %v15226_v12, %v9823_v57 }
 0x61b   : > { %v9955_v10 = vadd.f32 %v11499_v61, %v9859_v44  ;;  %v8334_v61 = vpop.f32.mrf.mxu2 }
 0x61c   : > { %v9742_v30 = vpop.f32.mrf.mxu1 }
 0x61d   : > { %v9987_v53 = vmax.f32 %v9955_v10, 0.0  ;;  %v9788_v50 = vadd.f32 %v9742_v30, %v9362_v48  ;;  %v8685_v10 = vadd.f32 %v8647_v8, %v8370_v24  ;;  %v11508_v30 = vunpack.c.h.bf16 %v11529_v21 }
 0x61f   : > { %10019 = vst [vmem:[%s15236_s29 + $0xb0] sm:$0xff] %v9987_v53  ;;  %v9824_v13 = vmul.f32 %v15220_v59, %v9788_v50  ;;  %v8649_v53 = vpop.f32.mrf.mxu3  ;;  %v8371_v50 = vadd.f32 %v8334_v61, %v15204_v39  ;;  %v9367_v40 = vadd.f32 %v9329_v26, %v8685_v10  ;;  %v9331_v27 = vpop.f32.mrf.mxu0 }
 0x621   : > { %v9860_v5 = vadd.f32 %v15226_v12, %v9824_v13  ;;  %v11530_v13 = vld [vmem:[%s11981_s13 + $0x70] sm:$0xff]  }
 0x623   : > { %v9956_v41 = vadd.f32 %v11500_v32, %v9860_v5 }
 0x624   : > { %v9745_v35 = vpop.f32.mrf.mxu1 }
 0x625   : > { %v9988_v60 = vmax.f32 %v9956_v41, 0.0  ;;  %v9789_v54 = vadd.f32 %v9745_v35, %v9363_v29  ;;  %v8337_v41 = vpop.f32.mrf.mxu2  ;;  %v8686_v29 = vadd.f32 %v8649_v53, %v8371_v50  ;;  %v11511_v35 = vunpack.c.l.bf16 %v11530_v13 }
 0x627   : > { %10020 = vst [vmem:[%s15236_s29 + $0xb8] sm:$0xff] %v9988_v60  ;;  %v9825_v3 = vmul.f32 %v15220_v59, %v9789_v54  ;;  %v8652_v60 = vpop.f32.mrf.mxu3  ;;  %v8372_v54 = vadd.f32 %v8337_v41, %v15208_v33  ;;  %v9368_v20 = vadd.f32 %v9331_v27, %v8686_v29  ;;  %v9334_v46 = vpop.f32.mrf.mxu0 }
 0x629   : > { %v9861_v31 = vadd.f32 %v15226_v12, %v9825_v3 }
 0x62b   : > { %v9957_v28 = vadd.f32 %v11503_v2, %v9861_v31  ;;  %v8687_v31 = vadd.f32 %v8652_v60, %v8372_v54 }
 0x62c   : > { %v9747_v25 = vpop.f32.mrf.mxu1 }
 0x62d   : > { %v9989_v1 = vmax.f32 %v9957_v28, 0.0  ;;  %v9790_v11 = vadd.f32 %v9747_v25, %v9364_v58  ;;  %v11512_v28 = vunpack.c.h.bf16 %v11530_v13  ;;  %v8339_v58 = vpop.f32.mrf.mxu2 }
 0x62e   : > { %v8373_v33 = vadd.f32 %v8339_v58, %v15213_v51 }
 0x62f   : > { %10021 = vst [vmem:[%s15236_s29 + $0xc0] sm:$0xff] %v9989_v1  ;;  %v9826_v42 = vmul.f32 %v15220_v59, %v9790_v11  ;;  %v9369_v1 = vadd.f32 %v9334_v46, %v8687_v31  ;;  %v8654_v47 = vpop.f32.mrf.mxu3 }
 0x631   : > { %v9862_v36 = vadd.f32 %v15226_v12, %v9826_v42  ;;  %v11531_v42 = vld [vmem:[%s11981_s13 + $0x78] sm:$0xff]  }
 0x632   : > { %v11515_v55 = vunpack.c.l.bf16 %v11531_v42 }
 0x633   : > { %v9958_v18 = vadd.f32 %v11504_v34, %v9862_v36  ;;  %v8688_v36 = vadd.f32 %v8654_v47, %v8373_v33 }
 0x634   : > { %v9750_v52 = vpop.f32.mrf.mxu1 }
 0x635   : > { %v9990_v49 = vmax.f32 %v9958_v18, 0.0  ;;  %v9791_v37 = vadd.f32 %v9750_v52, %v9365_v0  ;;  %v9336_v18 = vpop.f32.mrf.mxu0 }
 0x636   : > { %v9370_v52 = vadd.f32 %v9336_v18, %v8688_v36 }
 0x637   : > { %10022 = vst [vmem:[%s15236_s29 + $0xc8] sm:$0xff] %v9990_v49  ;;  %v9827_v17 = vmul.f32 %v15220_v59, %v9791_v37 }
 0x639   : > { %v9863_v16 = vadd.f32 %v15226_v12, %v9827_v17  ;;  %v11516_v17 = vunpack.c.h.bf16 %v11531_v42 }
 0x63b   : > { %v9959_v57 = vadd.f32 %v11507_v14, %v9863_v16 }
 0x63c   : > { %v9752_v44 = vpop.f32.mrf.mxu1 }
 0x63d   : > { %v9991_v23 = vmax.f32 %v9959_v57, 0.0  ;;  %v9792_v43 = vadd.f32 %v9752_v44, %v9366_v56 }
 0x63f   : > { %10023 = vst [vmem:[%s15236_s29 + $0xd0] sm:$0xff] %v9991_v23  ;;  %v9828_v48 = vmul.f32 %v15220_v59, %v9792_v43 }
 0x641   : > { %v9864_v9 = vadd.f32 %v15226_v12, %v9828_v48 }
 0x643   : > { %v9960_v62 = vadd.f32 %v11508_v30, %v9864_v9 }
 0x644   : > { %v9755_v19 = vpop.f32.mrf.mxu1 }
 0x645   : > { %v9992_v32 = vmax.f32 %v9960_v62, 0.0  ;;  %v9793_v5 = vadd.f32 %v9755_v19, %v9367_v40 }
 0x647   : > { %10024 = vst [vmem:[%s15236_s29 + $0xd8] sm:$0xff] %v9992_v32  ;;  %v9829_v6 = vmul.f32 %v15220_v59, %v9793_v5 }
 0x649   : > { %v9865_v38 = vadd.f32 %v15226_v12, %v9829_v6 }
 0x64b   : > { %v9961_v39 = vadd.f32 %v11511_v35, %v9865_v38 }
 0x64c   : > { %v9757_v63 = vpop.f32.mrf.mxu1 }
 0x64d   : > { %v9993_v3 = vmax.f32 %v9961_v39, 0.0  ;;  %v9794_v2 = vadd.f32 %v9757_v63, %v9368_v20 }
 0x64f   : > { %10025 = vst [vmem:[%s15236_s29 + $0xe0] sm:$0xff] %v9993_v3  ;;  %v9830_v4 = vmul.f32 %v15220_v59, %v9794_v2 }
 0x651   : > { %v9866_v25 = vadd.f32 %v15226_v12, %v9830_v4 }
 0x653   : > { %v9962_v11 = vadd.f32 %v11512_v28, %v9866_v25 }
 0x654   : > { %v9760_v15 = vpop.f32.mrf.mxu1 }
 0x655   : > { %v9994_v34 = vmax.f32 %v9962_v11, 0.0  ;;  %v9795_v7 = vadd.f32 %v9760_v15, %v9369_v1 }
 0x657   : > { %10026 = vst [vmem:[%s15236_s29 + $0xe8] sm:$0xff] %v9994_v34  ;;  %v9831_v22 = vmul.f32 %v15220_v59, %v9795_v7 }
 0x659   : > { %v9867_v0 = vadd.f32 %v15226_v12, %v9831_v22 }
 0x65b   : > { %v9963_v21 = vadd.f32 %v11515_v55, %v9867_v0 }
 0x65c   : > { %v9762_v51 = vpop.f32.mrf.mxu1 }
 0x65d   : > { %v9995_v49 = vmax.f32 %v9963_v21, 0.0  ;;  %v9796_v37 = vadd.f32 %v9762_v51, %v9370_v52 }
 0x65f   : > { %10027 = vst [vmem:[%s15236_s29 + $0xf0] sm:$0xff] %v9995_v49  ;;  %v9832_v45 = vmul.f32 %v15220_v59, %v9796_v37 }
 0x661   : > { %v9868_v14 = vadd.f32 %v15226_v12, %v9832_v45 }
 0x663   : > { %v9964_v8 = vadd.f32 %v11516_v17, %v9868_v14 }
 0x665   : > { %v9996_v16 = vmax.f32 %v9964_v8, 0.0 }
 0x667   : > { %10028 = vst [vmem:[%s15236_s29 + $0xf8] sm:$0xff] %v9996_v16 }
 0x668   : > { %11780 = shalt.err (!%p11777_p10)
}
 0x669   : > { %s11830_s14 = smov 128   ;;  %s11831_s29 = smov 8  }
 0x66a   : > { %11558 = dma.vmem_to_hbm [thread:$0]  (%p11944_p3), %s10043_s17, 4096, %s10045_s11, %s10030_s28, %s11830_s14, %s11830_s14, %s11831_s29  }
 0x66b PF: > { %s10059_s23 = sand.u32 1, %s11811_s24   ;;  %p15753_p12 = scmp.ge.s32.totalorder %s11823_s27, 2 }
 0x66c   : > { %s10060_s13 = scalar_lea.sflag [#allocation6], %s10059_s23 }
 0x66d   : > { %p11572_p13 = pnand %p15753_p12, %p11907_p6 }
 0x66f   : > { %p11573_p0 = pneg %p11572_p13 }
 0x671   : > { %11806 = dma.done.wait (%p11573_p0), %s10060_s13, 4096  }
 0x672   : > { %11808 = vsyncadd (%p11573_p0), %s10060_s13, 4294963200  ;;  %p21_p5 = scmp.ge.s32.totalorder %s11934_s22, 4   ;;  %s15754_s24 = smov %s11815_s25 }
 0x673   : > { %s15755_s25 = smov %s11819_s26  ;;  %s15756_s26 = smov %s11950_s10 }
 0x674   : > { %s15757_s27 = smov %s11934_s22  ;;  %23 = sbr.rel (!%p21_p5) target bundleno = 8 (0x8), region = 121 }
 0x679   :  { %10066 = vsyncpa [#allocation5], 1 }
 0x67a   :  { %10068 = vsyncpa [#allocation5 + $0x1], 1 }
 0x67b   :  { %10069 = vsyncpa [#allocation8], 1 }
 0x67c   :  { %10070 = vsyncpa [#allocation6], 1 }
 0x67d   :  { %10072 = vsyncpa [#allocation6 + $0x1], 1 }

</bundles_post_ra>
